<compile_context>
chip_gen: v5e
topology: v5e:2x2
jax: 0.10.0
libtpu: 0.0.40
codegen_flags: <defaults>
</compile_context>

<pallas_src>
import functools

import jax
import jax.numpy as jnp
from jax.experimental import pallas as pl
from jax.experimental.pallas import tpu as pltpu


LANE = 128                 # all channel dims padded to the TPU lane width
W_ALIGN = 16               # bf16 sublane tile: (rows,W,C)<->(rows*W,C) reshape is free
ACT_DTYPE = jnp.bfloat16   # activation / weight storage dtype (f32 accumulation)
STEM_CIN_PAD = 32          # image channels 3 -> 32 so 2x2 space-to-depth -> 128 lanes
ROW_TILE_ROWS = 256        # target matmul M rows per grid step (<= 32 f32 result vregs)
NEG_PAD = -1.0e30          # finite "-inf" for maxpool padding (garbage stays finite)
VMEM_LIMIT = 32 * 1024 * 1024


def _round_up(x, m):
    return (x + m - 1) // m * m


def _cdiv(a, b):
    return -(-a // b)


def _pick_hc(ho, wop, target=ROW_TILE_ROWS):
    """Largest divisor of `ho` with hc*wop <= target rows of matmul M.
    Falls back to hc=1 (correct, small-M perf cliff) if no divisor fits."""
    hc = 1
    for d in range(1, ho + 1):
        if ho % d == 0 and d * wop <= target:
            hc = d
    return hc


# ---------------------------------------------------------------------------
# Pallas kernels
# ---------------------------------------------------------------------------

def _conv_kernel(*refs, offs, relu, has_res):
    """One output-row tile of fused conv + folded BN (+residual) (+ReLU).

    Grid = (image, row_tile).  Refs (batch dim squeezed by the BlockSpecs):
      x_ref     : (Hs, Ws, Cf)        bf16  whole padded (s2d) input, resident per image
      w_ref     : (T*Cf, Cout_p)      bf16  tap-concatenated weight matrix
      scale_ref : (1, Cout_p)         f32   folded BN scale
      shift_ref : (1, Cout_p)         f32   folded BN shift
      res_ref   : (hc, Wo_p, Cout_p)  bf16  optional residual row tile
      o_ref     : (hc, Wo_p, Cout_p)  bf16  output row tile
      col_ref   : (hc*Wo_p, T*Cf)     bf16  VMEM im2col scratch
    """
    if has_res:
        x_ref, w_ref, scale_ref, shift_ref, res_ref, o_ref, col_ref = refs
    else:
        x_ref, w_ref, scale_ref, shift_ref, o_ref, col_ref = refs
        res_ref = None

    hc, wop, cop = o_ref.shape
    cf = x_ref.shape[-1]
    m = hc * wop
    r0 = pl.multiple_of(pl.program_id(1) * hc, hc)

    # im2col into VMEM: T lane-dense (m, cf) slabs -> a single K = T*cf matmul.
    for t, (di, dj) in enumerate(offs):
        xt = x_ref[pl.ds(r0 + di, hc), dj:dj + wop, :]
        col_ref[:, t * cf:(t + 1) * cf] = xt.reshape(m, cf)

    y = jnp.dot(col_ref[...], w_ref[...], preferred_element_type=jnp.float32)
    y = y * scale_ref[...] + shift_ref[...]
    if res_ref is not None:
        y = y + res_ref[...].reshape(m, cop).astype(jnp.float32)
    if relu:
        y = jnp.maximum(y, 0.0)
    o_ref[...] = y.reshape(hc, wop, cop).astype(o_ref.dtype)


def _maxpool_kernel(x_ref, o_ref, *, offs):
    """MaxPool over kernel taps; x_ref is the space-to-depth'd padded input
    (Hs, Ws, s*s*C); each tap reads a lane-aligned channel slot."""
    ho, wop, c = o_ref.shape
    r = None
    for (di, dj, c0) in offs:
        v = x_ref[di:di + ho, dj:dj + wop, c0:c0 + c]
        r = v if r is None else jnp.maximum(r, v)
    o_ref[...] = r


def _pool_kernel(x_ref, fc_ref, att_ref, *, att_size, w_true):
    """Per-image global mean + adaptive average pool (PyTorch bin semantics)."""
    x = x_ref[:, :w_true, :].astype(jnp.float32)          # (H, true W, C)
    h, w, _ = x.shape
    fc_ref[...] = jnp.mean(x, axis=(0, 1))[None, :]
    rows = []
    for i in range(att_size):
        h0 = (i * h) // att_size
        h1 = _cdiv((i + 1) * h, att_size)
        cols = []
        for j in range(att_size):
            w0 = (j * w) // att_size
            w1 = _cdiv((j + 1) * w, att_size)
            cols.append(jnp.mean(x[h0:h1, w0:w1, :], axis=(0, 1), keepdims=True))
        rows.append(jnp.concatenate(cols, axis=1))
    att_ref[...] = jnp.concatenate(rows, axis=0)           # one lane-dense store


# ---------------------------------------------------------------------------
# Wrappers (layout glue in plain JAX, compute in Pallas)
# ---------------------------------------------------------------------------

def _space_to_depth(x, s):
    """(N, H, W, C) -> (N, H//s, W//s, s*s*C); stride-s conv becomes stride-1."""
    if s == 1:
        return x
    n, h, w, c = x.shape
    x = x.reshape(n, h // s, s, w // s, s, c)
    x = jnp.transpose(x, (0, 1, 3, 2, 4, 5))
    return x.reshape(n, h // s, w // s, s * s * c)


def conv_bn(x, w_true, packed, relu=True, residual=None):
    """Conv2d(bias=False) + eval-mode BN (+residual) (+ReLU) on padded NHWC.
    Returns (out, true_output_width); stored width is 16-aligned and columns
    beyond the true width are don't-care (finite) values."""
    k, s, p = packed["k"], packed["s"], packed["pad"]
    n, h, _, cin_p = x.shape
    assert cin_p == packed["cin_pad"]

    ho = (h + 2 * p - k) // s + 1
    wo = (w_true + 2 * p - k) // s + 1
    wop = _round_up(wo, W_ALIGN)
    dk = _cdiv(k, s)                               # taps per spatial axis after s2d
    hs_need = ho + dk - 1
    ws_need = wop + dk - 1
    hp = max(_round_up(h + 2 * p, s), hs_need * s)
    wp = max(_round_up(w_true + 2 * p, s), ws_need * s)

    # TODO(synk): keep a persistent pre-padded layout across layers instead of
    #             slicing/re-padding the whole activation in XLA every conv.
    xs = x[:, :, :w_true, :]
    xs = jnp.pad(xs, ((0, 0), (p, hp - h - p), (p, wp - w_true - p), (0, 0)))
    xs = _space_to_depth(xs.astype(ACT_DTYPE), s)
    _, hs, ws, cf = xs.shape

    cop = packed["cout_pad"]
    tk = packed["w"].shape[0]                      # T * cf
    assert tk == len(packed["offs"]) * cf
    hc = _pick_hc(ho, wop)
    nrt = ho // hc

    in_specs = [
        pl.BlockSpec((None, hs, ws, cf), lambda i, r: (i, 0, 0, 0)),   # resident per image
        pl.BlockSpec((tk, cop), lambda i, r: (0, 0)),
        pl.BlockSpec((1, cop), lambda i, r: (0, 0)),
        pl.BlockSpec((1, cop), lambda i, r: (0, 0)),
    ]
    args = [xs, packed["w"], packed["scale"], packed["shift"]]

    if residual is not None:
        res = residual[:, :ho, :, :]
        if res.shape[2] < wop:
            res = jnp.pad(res, ((0, 0), (0, 0), (0, wop - res.shape[2]), (0, 0)))
        else:
            res = res[:, :, :wop, :]
        res = res.astype(ACT_DTYPE)
        in_specs.append(pl.BlockSpec((None, hc, wop, cop),
                                     lambda i, r: (i, r, 0, 0)))
        args.append(res)

    kernel = functools.partial(_conv_kernel, offs=packed["offs"], relu=relu,
                               has_res=residual is not None)
    out = pl.pallas_call(
        kernel,
        out_shape=jax.ShapeDtypeStruct((n, ho, wop, cop), ACT_DTYPE),
        grid=(n, nrt),
        in_specs=in_specs,
        out_specs=pl.BlockSpec((None, hc, wop, cop), lambda i, r: (i, r, 0, 0)),
        scratch_shapes=[pltpu.VMEM((hc * wop, tk), ACT_DTYPE)],
        compiler_params=pltpu.CompilerParams(
            dimension_semantics=("parallel", "arbitrary"),
            vmem_limit_bytes=VMEM_LIMIT,
        ),
    )(*args)
    return out, wo


def maxpool_3x3_s2(x, w_true):
    """MaxPool2d(kernel=3, stride=2, padding=1) on padded NHWC bf16.
    Output width is 16-aligned; don't-care columns hold NEG_PAD (finite)."""
    k, s, p = 3, 2, 1
    n, h, _, c = x.shape
    ho = (h + 2 * p - k) // s + 1
    wo = (w_true + 2 * p - k) // s + 1
    wop = _round_up(wo, W_ALIGN)
    dk = _cdiv(k, s)
    hp = max(_round_up(h + 2 * p, s), (ho + dk - 1) * s)
    wp = max(_round_up(w_true + 2 * p, s), (wop + dk - 1) * s)

    xs = x[:, :, :w_true, :]
    xs = jnp.pad(xs, ((0, 0), (p, hp - h - p), (p, wp - w_true - p), (0, 0)),
                 constant_values=NEG_PAD)      # post-ReLU input: any value < 0 works
    xs = _space_to_depth(xs, s)
    _, hs, ws, cf = xs.shape

    offs = [(ki // s, kj // s, ((ki % s) * s + (kj % s)) * c)
            for ki in range(k) for kj in range(k)]

    out = pl.pallas_call(
        functools.partial(_maxpool_kernel, offs=offs),
        out_shape=jax.ShapeDtypeStruct((n, ho, wop, c), x.dtype),
        grid=(n,),
        in_specs=[pl.BlockSpec((None, hs, ws, cf), lambda i: (i, 0, 0, 0))],
        out_specs=pl.BlockSpec((None, ho, wop, c), lambda i: (i, 0, 0, 0)),
        compiler_params=pltpu.CompilerParams(
            dimension_semantics=("parallel",),
            vmem_limit_bytes=VMEM_LIMIT,
        ),
    )(xs)
    return out, wo


def global_pools(x, w_true, c_true, att_size):
    """fc = mean over H, true W ; att = adaptive_avg_pool2d(., att) in NHWC."""
    n, h, wop, cop = x.shape
    fc, att = pl.pallas_call(
        functools.partial(_pool_kernel, att_size=att_size, w_true=w_true),
        out_shape=(jax.ShapeDtypeStruct((n, 1, cop), jnp.float32),
                   jax.ShapeDtypeStruct((n, att_size, att_size, cop), jnp.float32)),
        grid=(n,),
        in_specs=[pl.BlockSpec((None, h, wop, cop), lambda i: (i, 0, 0, 0))],
        out_specs=(pl.BlockSpec((None, 1, cop), lambda i: (i, 0, 0)),
                   pl.BlockSpec((None, att_size, att_size, cop),
                                lambda i: (i, 0, 0, 0))),
        compiler_params=pltpu.CompilerParams(
            dimension_semantics=("parallel",),
            vmem_limit_bytes=VMEM_LIMIT,
        ),
    )(x)
    return fc[:, 0, :c_true], att[:, :, :, :c_true]


# ---------------------------------------------------------------------------
# Parameter packing: fold BN, pad channels to 128, regroup taps for stride,
# concatenate taps along the contraction (K) dimension.
# ---------------------------------------------------------------------------

def _pack_conv(p, stride, pad, cin_pad, eps=1e-5):
    w = p["w"]                                    # (Cout, Cin, k, k) torch layout
    cout, cin, k, _ = w.shape
    s = stride
    dk = _cdiv(k, s)
    cf = s * s * cin_pad
    cout_pad = max(LANE, _round_up(cout, LANE))

    wt = jnp.transpose(w, (2, 3, 1, 0))           # (k, k, Cin, Cout)
    wg = jnp.zeros((dk * dk, cf, cout_pad), jnp.float32)
    offs = []
    t = 0
    for di in range(dk):
        for dj in range(dk):
            offs.append((di, dj))
            for pi in range(s):
                for pj in range(s):
                    ki, kj = di * s + pi, dj * s + pj
                    if ki < k and kj < k:
                        c0 = (pi * s + pj) * cin_pad
                        wg = wg.at[t, c0:c0 + cin, :cout].set(wt[ki, kj])
            t += 1

    scale = p["gamma"] / jnp.sqrt(p["var"] + p.get("eps", eps))
    shift = p["beta"] - p["mean"] * scale
    scale_p = jnp.zeros((1, cout_pad), jnp.float32).at[0, :cout].set(scale)
    shift_p = jnp.zeros((1, cout_pad), jnp.float32).at[0, :cout].set(shift)

    # Tap-concatenated weight matrix: rows [t*cf, (t+1)*cf) belong to tap t.
    w_cat = wg.reshape(dk * dk * cf, cout_pad).astype(ACT_DTYPE)
    return dict(w=w_cat, scale=scale_p, shift=shift_p,
                offs=offs, k=k, s=s, pad=pad,
                cin_pad=cin_pad, cout_pad=cout_pad, cout=cout)


def pack_params(params):
    packed = {"stem": _pack_conv(params["stem"], stride=2, pad=3,
                                 cin_pad=STEM_CIN_PAD)}
    prev_cp = packed["stem"]["cout_pad"]
    layers = []
    for blk, s in params["layers"]:
        pb = {"conv1": _pack_conv(blk["conv1"], stride=s, pad=1, cin_pad=prev_cp)}
        pb["conv2"] = _pack_conv(blk["conv2"], stride=1, pad=1,
                                 cin_pad=pb["conv1"]["cout_pad"])
        if "down" in blk:
            pb["down"] = _pack_conv(blk["down"], stride=s, pad=0, cin_pad=prev_cp)
        prev_cp = pb["conv2"]["cout_pad"]
        layers.append(pb)
    packed["layers"] = layers
    return packed


# ---------------------------------------------------------------------------
# Forward pass (mirrors myResnet.forward)
# ---------------------------------------------------------------------------

def my_resnet_forward(img_nchw, packed, att_size=2):
    x = jnp.transpose(img_nchw.astype(jnp.float32), (0, 2, 3, 1))    # NCHW -> NHWC
    n, h, wd, c = x.shape
    cin_pad = packed["stem"]["cin_pad"]
    x = jnp.pad(x, ((0, 0), (0, 0), (0, 0), (0, cin_pad - c))).astype(ACT_DTYPE)

    x, w_true = conv_bn(x, wd, packed["stem"], relu=True)            # conv1+bn1+relu
    x, w_true = maxpool_3x3_s2(x, w_true)                            # maxpool

    for pb in packed["layers"]:                                      # layer1..layer4
        identity = x
        out, out_w = conv_bn(x, w_true, pb["conv1"], relu=True)
        if "down" in pb:
            identity, _ = conv_bn(x, w_true, pb["down"], relu=False)
        x, w_true = conv_bn(out, out_w, pb["conv2"], relu=True, residual=identity)

    c_true = packed["layers"][-1]["conv2"]["cout"]
    fc, att = global_pools(x, w_true, c_true, att_size)
    # fc == x.mean(3).mean(2); att == adaptive_avg_pool2d(x, att).permute(0,2,3,1)
    return fc, att


# ---------------------------------------------------------------------------
# Deterministic synthetic parameters (tiny BasicBlock ResNet, eval-mode BN)
# ---------------------------------------------------------------------------

def _conv_bn_init(key, cout, cin, kh, kw):
    kw_, kg, kb, km, kv = jax.random.split(key, 5)
    fan_in = jnp.float32(cin * kh * kw)
    return dict(
        w=jax.random.normal(kw_, (cout, cin, kh, kw), jnp.float32) / jnp.sqrt(fan_in),
        gamma=jax.random.uniform(kg, (cout,), jnp.float32, 0.5, 1.5),
        beta=0.1 * jax.random.normal(kb, (cout,), jnp.float32),
        mean=0.1 * jax.random.normal(km, (cout,), jnp.float32),
        var=jax.random.uniform(kv, (cout,), jnp.float32, 0.5, 1.5),
    )


def init_params(key, stem_c=8, widths=(8, 16, 32, 64), strides=(1, 2, 2, 2)):
    keys = jax.random.split(key, 16)
    params = {"stem": _conv_bn_init(keys[0], stem_c, 3, 7, 7)}
    layers = []
    cin, ki = stem_c, 1
    for cout, s in zip(widths, strides):
        blk = {"conv1": _conv_bn_init(keys[ki], cout, cin, 3, 3),
               "conv2": _conv_bn_init(keys[ki + 1], cout, cout, 3, 3)}
        ki += 2
        if s != 1 or cin != cout:
            blk["down"] = _conv_bn_init(keys[ki], cout, cin, 1, 1)
            ki += 1
        layers.append((blk, s))
        cin = cout
    params["layers"] = layers
    return params


# ---------------------------------------------------------------------------

if __name__ == "__main__":
    key = jax.random.PRNGKey(0)
    kimg, kparams = jax.random.split(key)

    # 96x96 image: stem /2, maxpool /2, layer2-4 /2 each -> final 3x3x64 map.
    img = jax.random.normal(kimg, (2, 3, 96, 96), dtype=jnp.float32)
    params = init_params(kparams)
    packed = pack_params(params)

    fc, att = my_resnet_forward(img, packed, att_size=2)
    jax.block_until_ready((fc, att))

    assert fc.shape == (2, 64), fc.shape
    assert att.shape == (2, 2, 2, 64), att.shape
    assert bool(jnp.isfinite(fc).all()) and bool(jnp.isfinite(att).all())
    print("KERNEL_OK")
</pallas_src>

<mosaic_0001>
module attributes {stable_mosaic.version = 11 : i64} {
  func.func @_conv_kernel(%arg0: i32, %arg1: i32, %arg2: memref<1x51x51x128xbf16, #tpu.memory_space<vmem>>, %arg3: memref<2048x128xbf16, #tpu.memory_space<vmem>>, %arg4: memref<1x128xf32, #tpu.memory_space<vmem>>, %arg5: memref<1x128xf32, #tpu.memory_space<vmem>>, %arg6: memref<1x4x48x128xbf16, #tpu.memory_space<vmem>>, %arg7: memref<192x2048xbf16, #tpu.memory_space<vmem>>) attributes {dimension_semantics = [#tpu.dimension_semantics<parallel>, #tpu.dimension_semantics<arbitrary>], iteration_bounds = array<i64: 2, 12>, scalar_prefetch = 0 : i64, scratch_operands = 1 : i64, tpu.core_type = #tpu.core_type<tc>, window_params = [{transform_indices = @transform_0, window_bounds = array<i64: 1, 51, 51, 128>}, {pipeline_mode = #tpu.pipeline_mode<synchronous>, transform_indices = @transform_1, window_bounds = array<i64: 2048, 128>}, {pipeline_mode = #tpu.pipeline_mode<synchronous>, transform_indices = @transform_2, window_bounds = array<i64: 1, 128>}, {pipeline_mode = #tpu.pipeline_mode<synchronous>, transform_indices = @transform_3, window_bounds = array<i64: 1, 128>}, {transform_indices = @transform_4, window_bounds = array<i64: 1, 4, 48, 128>}]} {
    %c4_i32 = arith.constant 4 : i32
    %0 = arith.muli %arg1, %c4_i32 : i32
    %1 = tpu.assume_multiple %0, 4 : i32
    %c0_i32 = arith.constant 0 : i32
    %2 = arith.addi %1, %c0_i32 : i32
    %c0 = arith.constant 0 : index
    %3 = arith.index_cast %2 : i32 to index
    %c0_0 = arith.constant 0 : index
    %c0_1 = arith.constant 0 : index
    %4 = vector.load %arg2[%c0, %3, %c0_0, %c0_1] : memref<1x51x51x128xbf16, #tpu.memory_space<vmem>>, vector<1x4x48x128xbf16>
    %5 = vector.shape_cast %4 : vector<1x4x48x128xbf16> to vector<4x48x128xbf16>
    %6 = vector.shape_cast %5 : vector<4x48x128xbf16> to vector<192x128xbf16>
    %c0_2 = arith.constant 0 : index
    %c0_3 = arith.constant 0 : index
    %7 = vector.load %arg7[%c0_2, %c0_3] : memref<192x2048xbf16, #tpu.memory_space<vmem>>, vector<192x128xbf16>
    tpu.vector_store %arg7[%c0_2, %c0_3], %6 {strides = array<i32>} : memref<192x2048xbf16, #tpu.memory_space<vmem>>, vector<192x128xbf16>,
    %c0_i32_4 = arith.constant 0 : i32
    %8 = arith.addi %1, %c0_i32_4 : i32
    %c0_5 = arith.constant 0 : index
    %9 = arith.index_cast %8 : i32 to index
    %c1 = arith.constant 1 : index
    %c0_6 = arith.constant 0 : index
    %10 = vector.load %arg2[%c0_5, %9, %c1, %c0_6] : memref<1x51x51x128xbf16, #tpu.memory_space<vmem>>, vector<1x4x48x128xbf16>
    %11 = vector.shape_cast %10 : vector<1x4x48x128xbf16> to vector<4x48x128xbf16>
    %12 = vector.shape_cast %11 : vector<4x48x128xbf16> to vector<192x128xbf16>
    %c0_7 = arith.constant 0 : index
    %c128 = arith.constant 128 : index
    %13 = vector.load %arg7[%c0_7, %c128] : memref<192x2048xbf16, #tpu.memory_space<vmem>>, vector<192x128xbf16>
    tpu.vector_store %arg7[%c0_7, %c128], %12 {strides = array<i32>} : memref<192x2048xbf16, #tpu.memory_space<vmem>>, vector<192x128xbf16>,
    %c0_i32_8 = arith.constant 0 : i32
    %14 = arith.addi %1, %c0_i32_8 : i32
    %c0_9 = arith.constant 0 : index
    %15 = arith.index_cast %14 : i32 to index
    %c2 = arith.constant 2 : index
    %c0_10 = arith.constant 0 : index
    %16 = vector.load %arg2[%c0_9, %15, %c2, %c0_10] : memref<1x51x51x128xbf16, #tpu.memory_space<vmem>>, vector<1x4x48x128xbf16>
    %17 = vector.shape_cast %16 : vector<1x4x48x128xbf16> to vector<4x48x128xbf16>
    %18 = vector.shape_cast %17 : vector<4x48x128xbf16> to vector<192x128xbf16>
    %c0_11 = arith.constant 0 : index
    %c256 = arith.constant 256 : index
    %19 = vector.load %arg7[%c0_11, %c256] : memref<192x2048xbf16, #tpu.memory_space<vmem>>, vector<192x128xbf16>
    tpu.vector_store %arg7[%c0_11, %c256], %18 {strides = array<i32>} : memref<192x2048xbf16, #tpu.memory_space<vmem>>, vector<192x128xbf16>,
    %c0_i32_12 = arith.constant 0 : i32
    %20 = arith.addi %1, %c0_i32_12 : i32
    %c0_13 = arith.constant 0 : index
    %21 = arith.index_cast %20 : i32 to index
    %c3 = arith.constant 3 : index
    %c0_14 = arith.constant 0 : index
    %22 = vector.load %arg2[%c0_13, %21, %c3, %c0_14] : memref<1x51x51x128xbf16, #tpu.memory_space<vmem>>, vector<1x4x48x128xbf16>
    %23 = vector.shape_cast %22 : vector<1x4x48x128xbf16> to vector<4x48x128xbf16>
    %24 = vector.shape_cast %23 : vector<4x48x128xbf16> to vector<192x128xbf16>
    %c0_15 = arith.constant 0 : index
    %c384 = arith.constant 384 : index
    %25 = vector.load %arg7[%c0_15, %c384] : memref<192x2048xbf16, #tpu.memory_space<vmem>>, vector<192x128xbf16>
    tpu.vector_store %arg7[%c0_15, %c384], %24 {strides = array<i32>} : memref<192x2048xbf16, #tpu.memory_space<vmem>>, vector<192x128xbf16>,
    %c1_i32 = arith.constant 1 : i32
    %26 = arith.addi %1, %c1_i32 : i32
    %c0_16 = arith.constant 0 : index
    %27 = arith.index_cast %26 : i32 to index
    %c0_17 = arith.constant 0 : index
    %c0_18 = arith.constant 0 : index
    %28 = vector.load %arg2[%c0_16, %27, %c0_17, %c0_18] : memref<1x51x51x128xbf16, #tpu.memory_space<vmem>>, vector<1x4x48x128xbf16>
    %29 = vector.shape_cast %28 : vector<1x4x48x128xbf16> to vector<4x48x128xbf16>
    %30 = vector.shape_cast %29 : vector<4x48x128xbf16> to vector<192x128xbf16>
    %c0_19 = arith.constant 0 : index
    %c512 = arith.constant 512 : index
    %31 = vector.load %arg7[%c0_19, %c512] : memref<192x2048xbf16, #tpu.memory_space<vmem>>, vector<192x128xbf16>
    tpu.vector_store %arg7[%c0_19, %c512], %30 {strides = array<i32>} : memref<192x2048xbf16, #tpu.memory_space<vmem>>, vector<192x128xbf16>,
    %c1_i32_20 = arith.constant 1 : i32
    %32 = arith.addi %1, %c1_i32_20 : i32
    %c0_21 = arith.constant 0 : index
    %33 = arith.index_cast %32 : i32 to index
    %c1_22 = arith.constant 1 : index
    %c0_23 = arith.constant 0 : index
    %34 = vector.load %arg2[%c0_21, %33, %c1_22, %c0_23] : memref<1x51x51x128xbf16, #tpu.memory_space<vmem>>, vector<1x4x48x128xbf16>
    %35 = vector.shape_cast %34 : vector<1x4x48x128xbf16> to vector<4x48x128xbf16>
    %36 = vector.shape_cast %35 : vector<4x48x128xbf16> to vector<192x128xbf16>
    %c0_24 = arith.constant 0 : index
    %c640 = arith.constant 640 : index
    %37 = vector.load %arg7[%c0_24, %c640] : memref<192x2048xbf16, #tpu.memory_space<vmem>>, vector<192x128xbf16>
    tpu.vector_store %arg7[%c0_24, %c640], %36 {strides = array<i32>} : memref<192x2048xbf16, #tpu.memory_space<vmem>>, vector<192x128xbf16>,
    %c1_i32_25 = arith.constant 1 : i32
    %38 = arith.addi %1, %c1_i32_25 : i32
    %c0_26 = arith.constant 0 : index
    %39 = arith.index_cast %38 : i32 to index
    %c2_27 = arith.constant 2 : index
    %c0_28 = arith.constant 0 : index
    %40 = vector.load %arg2[%c0_26, %39, %c2_27, %c0_28] : memref<1x51x51x128xbf16, #tpu.memory_space<vmem>>, vector<1x4x48x128xbf16>
    %41 = vector.shape_cast %40 : vector<1x4x48x128xbf16> to vector<4x48x128xbf16>
    %42 = vector.shape_cast %41 : vector<4x48x128xbf16> to vector<192x128xbf16>
    %c0_29 = arith.constant 0 : index
    %c768 = arith.constant 768 : index
    %43 = vector.load %arg7[%c0_29, %c768] : memref<192x2048xbf16, #tpu.memory_space<vmem>>, vector<192x128xbf16>
    tpu.vector_store %arg7[%c0_29, %c768], %42 {strides = array<i32>} : memref<192x2048xbf16, #tpu.memory_space<vmem>>, vector<192x128xbf16>,
    %c1_i32_30 = arith.constant 1 : i32
    %44 = arith.addi %1, %c1_i32_30 : i32
    %c0_31 = arith.constant 0 : index
    %45 = arith.index_cast %44 : i32 to index
    %c3_32 = arith.constant 3 : index
    %c0_33 = arith.constant 0 : index
    %46 = vector.load %arg2[%c0_31, %45, %c3_32, %c0_33] : memref<1x51x51x128xbf16, #tpu.memory_space<vmem>>, vector<1x4x48x128xbf16>
    %47 = vector.shape_cast %46 : vector<1x4x48x128xbf16> to vector<4x48x128xbf16>
    %48 = vector.shape_cast %47 : vector<4x48x128xbf16> to vector<192x128xbf16>
    %c0_34 = arith.constant 0 : index
    %c896 = arith.constant 896 : index
    %49 = vector.load %arg7[%c0_34, %c896] : memref<192x2048xbf16, #tpu.memory_space<vmem>>, vector<192x128xbf16>
    tpu.vector_store %arg7[%c0_34, %c896], %48 {strides = array<i32>} : memref<192x2048xbf16, #tpu.memory_space<vmem>>, vector<192x128xbf16>,
    %c2_i32 = arith.constant 2 : i32
    %50 = arith.addi %1, %c2_i32 : i32
    %c0_35 = arith.constant 0 : index
    %51 = arith.index_cast %50 : i32 to index
    %c0_36 = arith.constant 0 : index
    %c0_37 = arith.constant 0 : index
    %52 = vector.load %arg2[%c0_35, %51, %c0_36, %c0_37] : memref<1x51x51x128xbf16, #tpu.memory_space<vmem>>, vector<1x4x48x128xbf16>
    %53 = vector.shape_cast %52 : vector<1x4x48x128xbf16> to vector<4x48x128xbf16>
    %54 = vector.shape_cast %53 : vector<4x48x128xbf16> to vector<192x128xbf16>
    %c0_38 = arith.constant 0 : index
    %c1024 = arith.constant 1024 : index
    %55 = vector.load %arg7[%c0_38, %c1024] : memref<192x2048xbf16, #tpu.memory_space<vmem>>, vector<192x128xbf16>
    tpu.vector_store %arg7[%c0_38, %c1024], %54 {strides = array<i32>} : memref<192x2048xbf16, #tpu.memory_space<vmem>>, vector<192x128xbf16>,
    %c2_i32_39 = arith.constant 2 : i32
    %56 = arith.addi %1, %c2_i32_39 : i32
    %c0_40 = arith.constant 0 : index
    %57 = arith.index_cast %56 : i32 to index
    %c1_41 = arith.constant 1 : index
    %c0_42 = arith.constant 0 : index
    %58 = vector.load %arg2[%c0_40, %57, %c1_41, %c0_42] : memref<1x51x51x128xbf16, #tpu.memory_space<vmem>>, vector<1x4x48x128xbf16>
    %59 = vector.shape_cast %58 : vector<1x4x48x128xbf16> to vector<4x48x128xbf16>
    %60 = vector.shape_cast %59 : vector<4x48x128xbf16> to vector<192x128xbf16>
    %c0_43 = arith.constant 0 : index
    %c1152 = arith.constant 1152 : index
    %61 = vector.load %arg7[%c0_43, %c1152] : memref<192x2048xbf16, #tpu.memory_space<vmem>>, vector<192x128xbf16>
    tpu.vector_store %arg7[%c0_43, %c1152], %60 {strides = array<i32>} : memref<192x2048xbf16, #tpu.memory_space<vmem>>, vector<192x128xbf16>,
    %c2_i32_44 = arith.constant 2 : i32
    %62 = arith.addi %1, %c2_i32_44 : i32
    %c0_45 = arith.constant 0 : index
    %63 = arith.index_cast %62 : i32 to index
    %c2_46 = arith.constant 2 : index
    %c0_47 = arith.constant 0 : index
    %64 = vector.load %arg2[%c0_45, %63, %c2_46, %c0_47] : memref<1x51x51x128xbf16, #tpu.memory_space<vmem>>, vector<1x4x48x128xbf16>
    %65 = vector.shape_cast %64 : vector<1x4x48x128xbf16> to vector<4x48x128xbf16>
    %66 = vector.shape_cast %65 : vector<4x48x128xbf16> to vector<192x128xbf16>
    %c0_48 = arith.constant 0 : index
    %c1280 = arith.constant 1280 : index
    %67 = vector.load %arg7[%c0_48, %c1280] : memref<192x2048xbf16, #tpu.memory_space<vmem>>, vector<192x128xbf16>
    tpu.vector_store %arg7[%c0_48, %c1280], %66 {strides = array<i32>} : memref<192x2048xbf16, #tpu.memory_space<vmem>>, vector<192x128xbf16>,
    %c2_i32_49 = arith.constant 2 : i32
    %68 = arith.addi %1, %c2_i32_49 : i32
    %c0_50 = arith.constant 0 : index
    %69 = arith.index_cast %68 : i32 to index
    %c3_51 = arith.constant 3 : index
    %c0_52 = arith.constant 0 : index
    %70 = vector.load %arg2[%c0_50, %69, %c3_51, %c0_52] : memref<1x51x51x128xbf16, #tpu.memory_space<vmem>>, vector<1x4x48x128xbf16>
    %71 = vector.shape_cast %70 : vector<1x4x48x128xbf16> to vector<4x48x128xbf16>
    %72 = vector.shape_cast %71 : vector<4x48x128xbf16> to vector<192x128xbf16>
    %c0_53 = arith.constant 0 : index
    %c1408 = arith.constant 1408 : index
    %73 = vector.load %arg7[%c0_53, %c1408] : memref<192x2048xbf16, #tpu.memory_space<vmem>>, vector<192x128xbf16>
    tpu.vector_store %arg7[%c0_53, %c1408], %72 {strides = array<i32>} : memref<192x2048xbf16, #tpu.memory_space<vmem>>, vector<192x128xbf16>,
    %c3_i32 = arith.constant 3 : i32
    %74 = arith.addi %1, %c3_i32 : i32
    %c0_54 = arith.constant 0 : index
    %75 = arith.index_cast %74 : i32 to index
    %c0_55 = arith.constant 0 : index
    %c0_56 = arith.constant 0 : index
    %76 = vector.load %arg2[%c0_54, %75, %c0_55, %c0_56] : memref<1x51x51x128xbf16, #tpu.memory_space<vmem>>, vector<1x4x48x128xbf16>
    %77 = vector.shape_cast %76 : vector<1x4x48x128xbf16> to vector<4x48x128xbf16>
    %78 = vector.shape_cast %77 : vector<4x48x128xbf16> to vector<192x128xbf16>
    %c0_57 = arith.constant 0 : index
    %c1536 = arith.constant 1536 : index
    %79 = vector.load %arg7[%c0_57, %c1536] : memref<192x2048xbf16, #tpu.memory_space<vmem>>, vector<192x128xbf16>
    tpu.vector_store %arg7[%c0_57, %c1536], %78 {strides = array<i32>} : memref<192x2048xbf16, #tpu.memory_space<vmem>>, vector<192x128xbf16>,
    %c3_i32_58 = arith.constant 3 : i32
    %80 = arith.addi %1, %c3_i32_58 : i32
    %c0_59 = arith.constant 0 : index
    %81 = arith.index_cast %80 : i32 to index
    %c1_60 = arith.constant 1 : index
    %c0_61 = arith.constant 0 : index
    %82 = vector.load %arg2[%c0_59, %81, %c1_60, %c0_61] : memref<1x51x51x128xbf16, #tpu.memory_space<vmem>>, vector<1x4x48x128xbf16>
    %83 = vector.shape_cast %82 : vector<1x4x48x128xbf16> to vector<4x48x128xbf16>
    %84 = vector.shape_cast %83 : vector<4x48x128xbf16> to vector<192x128xbf16>
    %c0_62 = arith.constant 0 : index
    %c1664 = arith.constant 1664 : index
    %85 = vector.load %arg7[%c0_62, %c1664] : memref<192x2048xbf16, #tpu.memory_space<vmem>>, vector<192x128xbf16>
    tpu.vector_store %arg7[%c0_62, %c1664], %84 {strides = array<i32>} : memref<192x2048xbf16, #tpu.memory_space<vmem>>, vector<192x128xbf16>,
    %c3_i32_63 = arith.constant 3 : i32
    %86 = arith.addi %1, %c3_i32_63 : i32
    %c0_64 = arith.constant 0 : index
    %87 = arith.index_cast %86 : i32 to index
    %c2_65 = arith.constant 2 : index
    %c0_66 = arith.constant 0 : index
    %88 = vector.load %arg2[%c0_64, %87, %c2_65, %c0_66] : memref<1x51x51x128xbf16, #tpu.memory_space<vmem>>, vector<1x4x48x128xbf16>
    %89 = vector.shape_cast %88 : vector<1x4x48x128xbf16> to vector<4x48x128xbf16>
    %90 = vector.shape_cast %89 : vector<4x48x128xbf16> to vector<192x128xbf16>
    %c0_67 = arith.constant 0 : index
    %c1792 = arith.constant 1792 : index
    %91 = vector.load %arg7[%c0_67, %c1792] : memref<192x2048xbf16, #tpu.memory_space<vmem>>, vector<192x128xbf16>
    tpu.vector_store %arg7[%c0_67, %c1792], %90 {strides = array<i32>} : memref<192x2048xbf16, #tpu.memory_space<vmem>>, vector<192x128xbf16>,
    %c3_i32_68 = arith.constant 3 : i32
    %92 = arith.addi %1, %c3_i32_68 : i32
    %c0_69 = arith.constant 0 : index
    %93 = arith.index_cast %92 : i32 to index
    %c3_70 = arith.constant 3 : index
    %c0_71 = arith.constant 0 : index
    %94 = vector.load %arg2[%c0_69, %93, %c3_70, %c0_71] : memref<1x51x51x128xbf16, #tpu.memory_space<vmem>>, vector<1x4x48x128xbf16>
    %95 = vector.shape_cast %94 : vector<1x4x48x128xbf16> to vector<4x48x128xbf16>
    %96 = vector.shape_cast %95 : vector<4x48x128xbf16> to vector<192x128xbf16>
    %c0_72 = arith.constant 0 : index
    %c1920 = arith.constant 1920 : index
    %97 = vector.load %arg7[%c0_72, %c1920] : memref<192x2048xbf16, #tpu.memory_space<vmem>>, vector<192x128xbf16>
    tpu.vector_store %arg7[%c0_72, %c1920], %96 {strides = array<i32>} : memref<192x2048xbf16, #tpu.memory_space<vmem>>, vector<192x128xbf16>,
    %c0_73 = arith.constant 0 : index
    %c0_74 = arith.constant 0 : index
    %98 = vector.load %arg7[%c0_73, %c0_74] : memref<192x2048xbf16, #tpu.memory_space<vmem>>, vector<192x2048xbf16>
    %c0_75 = arith.constant 0 : index
    %c0_76 = arith.constant 0 : index
    %99 = vector.load %arg3[%c0_75, %c0_76] : memref<2048x128xbf16, #tpu.memory_space<vmem>>, vector<2048x128xbf16>
    %cst = arith.constant dense<0.000000e+00> : vector<192x128xf32>
    %100 = tpu.matmul %98, %99, %cst {dimension_numbers = #tpu.dot_dimension_numbers<[1], [0], [0], [1], [0, 0, 1, 1], [], []>} : vector<192x2048xbf16>, vector<2048x128xbf16>, vector<192x128xf32> -> vector<192x128xf32>
    %c0_77 = arith.constant 0 : index
    %c0_78 = arith.constant 0 : index
    %101 = vector.load %arg4[%c0_77, %c0_78] : memref<1x128xf32, #tpu.memory_space<vmem>>, vector<1x128xf32>
    %102 = vector.broadcast %101 : vector<1x128xf32> to vector<192x128xf32>
    %103 = arith.mulf %100, %102 : vector<192x128xf32>
    %c0_79 = arith.constant 0 : index
    %c0_80 = arith.constant 0 : index
    %104 = vector.load %arg5[%c0_79, %c0_80] : memref<1x128xf32, #tpu.memory_space<vmem>>, vector<1x128xf32>
    %105 = vector.broadcast %104 : vector<1x128xf32> to vector<192x128xf32>
    %106 = arith.addf %103, %105 : vector<192x128xf32>
    %cst_81 = arith.constant 0.000000e+00 : f32
    %107 = vector.broadcast %cst_81 : f32 to vector<192x128xf32>
    %108 = arith.maximumf %106, %107 : vector<192x128xf32>
    %109 = vector.shape_cast %108 : vector<192x128xf32> to vector<4x48x128xf32>
    %110 = arith.truncf %109 : vector<4x48x128xf32> to vector<4x48x128xbf16>
    %c0_82 = arith.constant 0 : index
    %c0_83 = arith.constant 0 : index
    %c0_84 = arith.constant 0 : index
    %c0_85 = arith.constant 0 : index
    %111 = vector.load %arg6[%c0_82, %c0_83, %c0_84, %c0_85] : memref<1x4x48x128xbf16, #tpu.memory_space<vmem>>, vector<1x4x48x128xbf16>
    %112 = vector.shape_cast %111 : vector<1x4x48x128xbf16> to vector<4x48x128xbf16>
    %113 = vector.shape_cast %110 : vector<4x48x128xbf16> to vector<1x4x48x128xbf16>
    tpu.vector_store %arg6[%c0_82, %c0_83, %c0_84, %c0_85], %113 {strides = array<i32>} : memref<1x4x48x128xbf16, #tpu.memory_space<vmem>>, vector<1x4x48x128xbf16>,
    return
  }
  func.func @transform_0(%arg0: i32, %arg1: i32) -> (i32, i32, i32, i32) {
    %c0_i32 = arith.constant 0 : i32
    %c0_i32_0 = arith.constant 0 : i32
    %c0_i32_1 = arith.constant 0 : i32
    %c0_i32_2 = arith.constant 0 : i32
    return %arg0, %c0_i32, %c0_i32_0, %c0_i32_1 : i32, i32, i32, i32
  }
  func.func @transform_1(%arg0: i32, %arg1: i32) -> (i32, i32) {
    %c0_i32 = arith.constant 0 : i32
    %c0_i32_0 = arith.constant 0 : i32
    %c0_i32_1 = arith.constant 0 : i32
    return %c0_i32, %c0_i32_0 : i32, i32
  }
  func.func @transform_2(%arg0: i32, %arg1: i32) -> (i32, i32) {
    %c0_i32 = arith.constant 0 : i32
    %c0_i32_0 = arith.constant 0 : i32
    %c0_i32_1 = arith.constant 0 : i32
    return %c0_i32, %c0_i32_0 : i32, i32
  }
  func.func @transform_3(%arg0: i32, %arg1: i32) -> (i32, i32) {
    %c0_i32 = arith.constant 0 : i32
    %c0_i32_0 = arith.constant 0 : i32
    %c0_i32_1 = arith.constant 0 : i32
    return %c0_i32, %c0_i32_0 : i32, i32
  }
  func.func @transform_4(%arg0: i32, %arg1: i32) -> (i32, i32, i32, i32) {
    %c0_i32 = arith.constant 0 : i32
    %c0_i32_0 = arith.constant 0 : i32
    %c0_i32_1 = arith.constant 0 : i32
    return %arg0, %arg1, %c0_i32, %c0_i32_0 : i32, i32, i32, i32
  }
}

</mosaic_0001>

<bundles_post_ra>
// kernel: tpu_custom_call.1
= control target key start
LH: loop header
LB: loop body
LE: loop exit
PB: predicated region body
PF: predicated region fallthrough
CT: control target
= control target key end

     0   :  { %9 = vsyncpa [#allocation4], 0  ;;  %s12164_s0 = inlined_call_operand.vmem [shape: bf16[2,51,51,128], index: 0, kind: input, shape index: {}]   ;;  %s12165_s1 = inlined_call_operand.vmem [shape: bf16[2048,128], index: 1, kind: input, shape index: {}]   ;;  %s12166_s2 = inlined_call_operand.vmem [shape: f32[1,128], index: 2, kind: input, shape index: {}]   ;;  %s12167_s3 = inlined_call_operand.vmem [shape: f32[1,128], index: 3, kind: input, shape index: {}]   ;;  %s12168_s4 = inlined_call_operand.hbm [shape: bf16[2,48,48,128], index: 4, kind: output, shape index: {}]  }
   0x1   :  { %11 = vsyncpa [#allocation4 + $0x1], 0  ;;  %s9619_s15 = smov 0   ;;  %s9621_s16 = smov 0  }
   0x2   :  { %s9623_s17 = smov 0   ;;  %s9625_s18 = smov 0  }
   0x3   :  { %s9627_s19 = smov 0   ;;  %s9629_s20 = smov 0  }
   0x4   :  { %s9631_s21 = smov 0   ;;  %s9633_s22 = smov 0  }
   0x5 LB: > { %s7385_s23 = sadd.s32 4294967295, %s9590_s22   ;;  %s7386_s24 = sadd.s32 4294967294, %s9590_s22   ;;  %s9590_s22 = sphi %s9633_s22, %s17_s22   ;;  %s9586_s21 = sphi %s9631_s21, %s12186_s21   ;;  %s9582_s20 = sphi %s9629_s20, %s12185_s20   ;;  %s9578_s19 = sphi %s9627_s19, %s12184_s19   ;;  %s9574_s18 = sphi %s9625_s18, %s12183_s18   ;;  %s9570_s17 = sphi %s9623_s17, %s12182_s17   ;;  %s9566_s16 = sphi %s9621_s16, %s12181_s16   ;;  %s9562_s15 = sphi %s9619_s15, %s12180_s15  }
   0x6   : > { %s26_s25 = sadd.s32 1, %s9582_s20  ;;  %s29_s26 = sadd.s32 1, %s9586_s21 }
   0x7   : > { %p27_p0 = scmp.ge.s32.totalorder %s26_s25, 12  ;;  %p137_p1 = scmp.ne.s32.totalorder %s9570_s17, %s9566_s16 }
   0x8   : > { %p138_p2 = scmp.eq.s32.totalorder %s7385_s23, 23  ;;  %p143_p5 = scmp.ne.s32.totalorder %s9566_s16, %s9562_s15 }
   0x9   : > { %s12188_s25 = smov (%p27_p0, %s26_s25), 0  ;;  %s12190_s26 = smov (!%p27_p0, %s29_s26), %s9586_s21 }
   0xa   : > { %s123_s27 = ssub.s32 %s9582_s20, %s12188_s25  ;;  %p9670_p3 = por %p138_p2, %p137_p1 }
   0xb   : > { %p31_p4 = scmp.ge.s32.totalorder %s12190_s26, 2  ;;  %p144_p6 = scmp.eq.s32.totalorder %s7386_s24, 23 }
   0xc   : > { %p7389_p7 = scmp.ge.s32.totalorder %s9590_s22, 1  ;;  %p179_p9 = scmp.lt.s32.totalorder %s9590_s22, 25 }
   0xd   : > { %s12192_s26 = smov (%p31_p4, %s12190_s26), 0  ;;  %p9679_p8 = por %p144_p6, %p143_p5 }
   0xe   : > { %12171 = sst [smem:[#allocation6_spill]] %s12192_s26  ;;  %s122_s30 = ssub.s32 %s9586_s21, %s12192_s26 }
   0xf   : > { %s127_s5 = sadd.s32 1, %s9570_s17  ;;  %s124_s6 = sor.u32 %s123_s27, %s122_s30 }
  0x10   : > { %p180_p10 = pnand %p7389_p7, %p179_p9  ;;  %p125_p11 = scmp.eq.s32.totalorder %s124_s6, 0 }
  0x11   : > { %p205_p12 = scmp.lt.s32.totalorder (!%p180_p10), %s9578_s19, 1  ;;  %s9025_s12 = smul.u32 (!%p180_p10), 112, %s9574_s18 }
  0x12   : > { %s9688_s7 = scalar_select %p125_p11, %s9570_s17, %s127_s5  }
  0x13   : > { %183 = sbr.rel (%p180_p10) target bundleno = 967 (0x3c7), region = 36  ;;  %s202_s23 = sand.u32 (!%p180_p10), 1, %s9566_s16  }
  0x14   : > { %s9420_s27 = smul.u32 (!%p180_p10), 288, %s9578_s19  ;;  %s7277_s10 = scalar_lea.sflag (!%p180_p10), [#allocation4], %s202_s23 }
  0x18   : > { %v9225_v0 = vld [vmem:[%s12165_s1 + $0x38] sm:$0xff]  ;;  %v9224_v4 = vld [vmem:[%s12165_s1 + $0x30] sm:$0xff]  ;;  %s206_s6 = scalar_select %p205_p12, %s9578_s19, 1  ;;  %v9223_v8 = vld [vmem:[%s12165_s1 + $0x28] sm:$0xff]  ;;  %vm291_vm0 = vsmask.f32 3328 }
  0x19   : > { %v9233_v1 = vld [vmem:[%s12165_s1 + $0x78] sm:$0xff]  ;;  %6044 = vmatpush.bf16.msra.mxu0 %v9225_v0  ;;  %v9232_v5 = vld [vmem:[%s12165_s1 + $0x70] sm:$0xff]  ;;  %v9231_v9 = vld [vmem:[%s12165_s1 + $0x68] sm:$0xff]  ;;  %vm654_vm1 = vcmask 1042432   ;;  %vm655_vm2 = vcmask 1046532  }
  0x1a   : > { %v9241_v2 = vld [vmem:[%s12165_s1 + $0xb8] sm:$0xff]  ;;  %6113 = vmatpush.bf16.msra.mxu1 %v9233_v1  ;;  %v9240_v6 = vld [vmem:[%s12165_s1 + $0xb0] sm:$0xff]  ;;  %s9418_s13 = smul.u32 1428, %s206_s6  ;;  %v9239_v10 = vld [vmem:[%s12165_s1 + $0xa8] sm:$0xff]  ;;  %vm292_vm3 = vsmask.f32 7440 }
  0x1b   : > { %v9249_v3 = vld [vmem:[%s12165_s1 + $0xf8] sm:$0xff]  ;;  %6182 = vmatpush.bf16.msra.mxu2 %v9241_v2  ;;  %v9248_v7 = vld [vmem:[%s12165_s1 + $0xf0] sm:$0xff]  ;;  %v9247_v11 = vld [vmem:[%s12165_s1 + $0xe8] sm:$0xff]  ;;  %vm809_vm4 = vsmask.f32 2304 }
  0x1c   : > { %6251 = vmatpush.bf16.msra.mxu3 %v9249_v3  ;;  %s209_s8 = scalar_lea.vmem %s12164_s0, %s9418_s13  ;;  %v9222_v12 = vld [vmem:[%s12165_s1 + $0x20] sm:$0xff]  ;;  %v9221_v19 = vld [vmem:[%s12165_s1 + $0x18] sm:$0xff]  ;;  %vm810_vm5 = vsmask.f32 6416  ;;  %vm9774_vm6 = vmor %vm654_vm1, %vm655_vm2  ;;  %s9417_s13 = smul.u32 96, %s202_s23 }
  0x1d   : > { %6045 = vmatpush.bf16.msra.mxu0 %v9224_v4  ;;  %s9732_s14 = scalar_lea.vmem %s209_s8, %s9025_s12  ;;  %v9230_v13 = vld [vmem:[%s12165_s1 + $0x60] sm:$0xff]  ;;  %v9229_v20 = vld [vmem:[%s12165_s1 + $0x58] sm:$0xff]  ;;  %v9220_v45 = vld [vmem:[%s12165_s1 + $0x10] sm:$0xff]  ;;  %s9419_s12 = smul.u32 24, %s9574_s18 }
  0x1e   : > { %6114 = vmatpush.bf16.msra.mxu1 %v9232_v5  ;;  %v9238_v14 = vld [vmem:[%s12165_s1 + $0xa0] sm:$0xff]  ;;  %v9757_v22 = vld [vmem:[%s9732_s14 + $0x8] sm:$0xf]  ;;  %v9237_v23 = vld [vmem:[%s12165_s1 + $0x98] sm:$0xff]  ;;  %s12040_s24 = scalar_lea.vmem [#allocation3], %s9417_s13 }
  0x1f   : > { %6183 = vmatpush.bf16.msra.mxu2 %v9240_v6  ;;  %v9246_v15 = vld [vmem:[%s12165_s1 + $0xe0] sm:$0xff]  ;;  %v9245_v24 = vld [vmem:[%s12165_s1 + $0xd8] sm:$0xff]  ;;  %v314_v30 = vshll.u32 %v9757_v22, 16  ;;  %v318_v31 = vshrl.u32 %v9757_v22, 16  ;;  %v9770_v33 = vld [vmem:[%s9732_s14 + $0x8] sm:$0xf]  ;;  %s7289_s26 = sadd.s32 %s9420_s27, %s9419_s12 }
  0x20   : > { %6252 = vmatpush.bf16.msra.mxu3 %v9248_v7  ;;  %v215_v16 = vld [vmem:[%s9732_s14] sm:$0xf]  ;;  %v216_v17 = vld [vmem:[%s9732_s14 + $0x4] sm:$0xf]  ;;  %v662_v43 = vrot.slane %v9770_v33, 5  ;;  %v9228_v46 = vld [vmem:[%s12165_s1 + $0x50] sm:$0xff] }
  0x21   : > { %6046 = vmatpush.bf16.msra.mxu0 %v9223_v8  ;;  %239 = vst [vmem:[#allocation2] sm:$0xf] %v215_v16  ;;  %v263_v18 = vld [vmem:[%s9732_s14] sm:$0xf]  ;;  %v264_v21 = vld [vmem:[%s9732_s14 + $0x4] sm:$0xf]  ;;  %vm9797_vm7 = vmor %vm291_vm0, %vm292_vm3 }
  0x22   : > { %6115 = vmatpush.bf16.msra.mxu1 %v9231_v9  ;;  %240 = vst [vmem:[#allocation2 + $0x40] sm:$0xf] %v216_v17  ;;  %v295_v25 = vshrl.u32 %v263_v18, 16  ;;  %v298_v26 = vshll.u32 %v263_v18, 16  ;;  %v304_v27 = vshll.u32 %v264_v21, 16  ;;  %v308_v28 = vshrl.u32 %v264_v21, 16  ;;  %vm9830_vm8 = vmor %vm809_vm4, %vm810_vm5 }
  0x23   : > { %6184 = vmatpush.bf16.msra.mxu2 %v9239_v10  ;;  %v598_v29 = vld [vmem:[%s9732_s14] sm:$0xe]  ;;  %v599_v32 = vld [vmem:[%s9732_s14 + $0x4] sm:$0xf]  ;;  %v9779_v40 = vrot.slane %v314_v30, 5  ;;  %v9236_v51 = vld [vmem:[%s12165_s1 + $0x90] sm:$0xff] }
  0x24   : > { %6253 = vmatpush.bf16.msra.mxu3 %v9247_v11  ;;  %v297_v34 = vrot.slane %v295_v25, 4  ;;  %v300_v35 = vrot.slane %v298_v26, 5  ;;  %v306_v36 = vrot.slane %v304_v27, 5  ;;  %v310_v37 = vrot.slane %v308_v28, 4  ;;  %v781_v39 = vld [vmem:[%s9732_s14] sm:$0xe] }
  0x25   : > { %6047 = vmatpush.bf16.msra.mxu0 %v9222_v12  ;;  %v7394_v41 = vrot.slane %v598_v29, 9  ;;  %v659_v42 = vrot.slane %v599_v32, 5  ;;  %v782_v44 = vld [vmem:[%s9732_s14 + $0x4] sm:$0xf]  ;;  %v813_v49 = vshrl.u32 %v781_v39, 16  ;;  %v816_v50 = vshll.u32 %v781_v39, 16 }
  0x26   : > { %6116 = vmatpush.bf16.msra.mxu1 %v9230_v13  ;;  %v301_v47 = vor.u32 %v300_v35, %v297_v34  ;;  %v311_v48 = vor.u32 %v310_v37, %v306_v36  ;;  %v9244_v52 = vld [vmem:[%s12165_s1 + $0xd0] sm:$0xff]  ;;  %v822_v56 = vshrl.u32 %v782_v44, 16  ;;  %v825_v57 = vshll.u32 %v782_v44, 16  ;;  %v783_v60 = vld [vmem:[%s9732_s14 + $0x8] sm:$0xf]  ;;  %v9234_v22 = vld [vmem:[%s12165_s1 + $0x80] sm:$0xff] }
  0x27   : > { %6185 = vmatpush.bf16.msra.mxu2 %v9238_v14  ;;  %v660_v54 = vsel %vm9774_vm6, %v7394_v41, %v659_v42  ;;  %v661_v55 = vrot.slane %v659_v42, 4  ;;  %v9219_v61 = vld [vmem:[%s12165_s1 + $0x8] sm:$0xff]  ;;  %v815_v0 = vrot.slane %v813_v49, 5  ;;  %v818_v1 = vrot.slane %v816_v50, 6  ;;  %v9835_v16 = vld [vmem:[%s9732_s14 + $0x10] sm:$0xf] }
  0x28   : > { %6254 = vmatpush.bf16.msra.mxu3 %v9246_v15  ;;  %v302_v58 = vrot.slane %v301_v47, 4  ;;  %v312_v59 = vrot.slane %v311_v48, 4  ;;  %757 = vst [vmem:[#allocation2 + $0x8] sm:$0xf] %v660_v54  ;;  %v9227_v62 = vld [vmem:[%s12165_s1 + $0x48] sm:$0xff]  ;;  %v824_v7 = vrot.slane %v822_v56, 5 }
  0x29   : > { %6048 = vmatpush.bf16.msra.mxu0 %v9221_v19  ;;  %v663_v63 = vsel %vm9774_vm6, %v661_v55, %v662_v43  ;;  %v217_v2 = vld [vmem:[%s9732_s14 + $0x8] sm:$0xf]  ;;  %v827_v8 = vrot.slane %v825_v57, 6  ;;  %v218_v9 = vld [vmem:[%s9732_s14 + $0xc] sm:$0xf]  ;;  %v819_v10 = vor.u32 %v818_v1, %v815_v0  ;;  %v832_v11 = vshrl.u32 %v783_v60, 16 }
  0x2a   : > { %6117 = vmatpush.bf16.msra.mxu1 %v9229_v20  ;;  %v9235_v3 = vld [vmem:[%s12165_s1 + $0x88] sm:$0xff]  ;;  %v307_v5 = vsel %vm9797_vm7, %v302_v58, %v306_v36  ;;  %v317_v6 = vsel %vm9797_vm7, %v312_v59, %v9779_v40  ;;  %758 = vst [vmem:[#allocation2 + $0x48] sm:$0xf] %v663_v63  ;;  %v835_v12 = vshll.u32 %v783_v60, 16  ;;  %v320_v17 = vrot.slane %v318_v31, 4  ;;  %v9218_v19 = vld [vmem:[%s12165_s1] sm:$0xff] }
  0x2b   : > { %6186 = vmatpush.bf16.msra.mxu2 %v9237_v23  ;;  %v9243_v4 = vld [vmem:[%s12165_s1 + $0xc8] sm:$0xff]  ;;  %574 = vst [vmem:[#allocation2 + $0x4] sm:$0xf] %v307_v5  ;;  %v828_v15 = vor.u32 %v827_v8, %v824_v7  ;;  %v9226_v20 = vld [vmem:[%s12165_s1 + $0x40] sm:$0xff]  ;;  %v834_v25 = vrot.slane %v832_v11, 5  ;;  %v334_v32 = vshll.u32 %v9835_v16, 16 }
  0x2c   : > { %6255 = vmatpush.bf16.msra.mxu3 %v9245_v24  ;;  %v266_v13 = vld [vmem:[%s9732_s14 + $0xc] sm:$0xf]  ;;  %575 = vst [vmem:[#allocation2 + $0x44] sm:$0xf] %v317_v6  ;;  %v9845_v21 = vld [vmem:[#allocation2] sm:$0xf]  ;;  %v321_v30 = vor.u32 %v320_v17, %v9779_v40 }
  0x2d   : > { %6049 = vmatpush.bf16.msra.mxu0 %v9220_v45  ;;  %v324_v18 = vshll.u32 %v266_v13, 16  ;;  %v9847_v23 = vld [vmem:[#allocation2 + $0x3c] sm:$0xf0]  ;;  %v820_v24 = vrot.slane %v819_v10, 4  ;;  %v837_v26 = vrot.slane %v835_v12, 6  ;;  %v328_v27 = vshrl.u32 %v266_v13, 16 }
  0x2e   : > { %6118 = vmatpush.bf16.msra.mxu1 %v9228_v46  ;;  %241 = vst [vmem:[#allocation2 + $0x80] sm:$0xf] %v217_v2  ;;  %v9242_v28 = vld [vmem:[%s12165_s1 + $0xc0] sm:$0xff]  ;;  %v830_v29 = vrot.slane %v828_v15, 4  ;;  %v9273_v37 = vld [vmem:[%s12165_s1 + $0x1b8] sm:$0xff]  ;;  %v322_v42 = vrot.slane %v321_v30, 4  ;;  %v7743_v54 = vor.u32 %v9847_v23, %v9845_v21 }
  0x2f   : > { %6187 = vmatpush.bf16.msra.mxu2 %v9236_v51  ;;  %242 = vst [vmem:[#allocation2 + $0xc0] sm:$0xf] %v218_v9  ;;  %v326_v31 = vrot.slane %v324_v18, 5  ;;  %v7750_v34 = vld [vmem:[#allocation2 + $0x8] sm:$0xf]  ;;  %v829_v35 = vsel %vm9830_vm8, %v820_v24, %v828_v15  ;;  %v9859_v36 = vor.u32 %v837_v26, %v834_v25  ;;  %v9257_v39 = vld [vmem:[%s12165_s1 + $0x138] sm:$0xff] }
  0x30   : > { %6256 = vmatpush.bf16.msra.mxu3 %v9244_v52  ;;  %v330_v40 = vrot.slane %v328_v27, 4  ;;  %v601_v41 = vld [vmem:[%s9732_s14 + $0xc] sm:$0xf]  ;;  %1108 = vst [vmem:[#allocation2 + $0xc] sm:$0xf] %v829_v35  ;;  %v9868_v44 = vrot.slane %v334_v32, 5 }
  0x31   : > { %6050 = vmatpush.bf16.msra.mxu0 %v9219_v61  ;;  %v9871_v45 = vld [vmem:[%s9732_s14 + $0x10] sm:$0xf]  ;;  %v9035_v46 = vld [vmem:[#allocation2 + $0x44] sm:$0xf0]  ;;  %v839_v47 = vsel %vm9830_vm8, %v830_v29, %v9859_v36  ;;  %v9281_v48 = vld [vmem:[%s12165_s1 + $0x1f8] sm:$0xff]  ;;  %v664_v50 = vrot.slane %v662_v43, 4  ;;  %v327_v56 = vsel %vm9797_vm7, %v322_v42, %v326_v31 }
  0x32   : > { %6119 = vmatpush.bf16.msra.mxu1 %v9227_v62  ;;  %v331_v49 = vor.u32 %v330_v40, %v326_v31  ;;  %v665_v51 = vrot.slane %v601_v41, 5  ;;  %v784_v52 = vld [vmem:[%s9732_s14 + $0xc] sm:$0xf]  ;;  %v9026_v55 = vld [vmem:[#allocation2 + $0x4] sm:$0xf]  ;;  %v338_v57 = vshrl.u32 %v9835_v16, 16  ;;  %v7751_v33 = vor.u32 %v9035_v46, %v7750_v34 }
  0x33   : > { %6188 = vmatpush.bf16.msra.mxu2 %v9235_v3  ;;  %1109 = vst [vmem:[#allocation2 + $0x4c] sm:$0xf] %v839_v47  ;;  %v668_v58 = vrot.slane %v9871_v45, 5  ;;  %v7744_v59 = vld [vmem:[#allocation2 + $0x40] sm:$0xf0]  ;;  %v9265_v63 = vld [vmem:[%s12165_s1 + $0x178] sm:$0xff] }
  0x34   : > { %6257 = vmatpush.bf16.msra.mxu3 %v9243_v4  ;;  %v332_v43 = vrot.slane %v331_v49, 4  ;;  %576 = vst [vmem:[#allocation2 + $0x84] sm:$0xf] %v327_v56  ;;  %v666_v60 = vsel %vm9774_vm6, %v664_v50, %v665_v51  ;;  %v667_v61 = vrot.slane %v665_v51, 4  ;;  %v7747_v62 = vor.u32 %v9026_v55, %v7744_v59  ;;  %v785_v0 = vld [vmem:[%s9732_s14 + $0x10] sm:$0xf] }
  0x35   : > { %6051 = vmatpush.bf16.msra.mxu0 %v9218_v19  ;;  %759 = vst [vmem:[#allocation2 + $0x88] sm:$0xf] %v666_v60  ;;  %v840_v1 = vrot.slane %v9859_v36, 4  ;;  %v842_v4 = vshrl.u32 %v784_v52, 16  ;;  %v845_v5 = vshll.u32 %v784_v52, 16  ;;  %v9272_v6 = vld [vmem:[%s12165_s1 + $0x1b0] sm:$0xff] }
  0x36   : > { %6120 = vmatpush.bf16.msra.mxu1 %v9226_v20  ;;  %v337_v2 = vsel %vm9797_vm7, %v332_v43, %v9868_v44  ;;  %v669_v3 = vsel %vm9774_vm6, %v667_v61, %v668_v58  ;;  %v9256_v7 = vld [vmem:[%s12165_s1 + $0x130] sm:$0xff]  ;;  %v852_v9 = vshrl.u32 %v785_v0, 16  ;;  %v855_v10 = vshll.u32 %v785_v0, 16  ;;  %v7806_v27 = vld [vmem:[#allocation2 + $0x80] sm:$0xf]  ;;  %s9022_s30 = sshll.u32 %s7289_s26, 2 }
  0x37   : > { %6189 = vmatpush.bf16.msra.mxu2 %v9234_v22  ;;  %v9280_v8 = vld [vmem:[%s12165_s1 + $0x1f0] sm:$0xff]  ;;  %577 = vst [vmem:[#allocation2 + $0xc4] sm:$0xf] %v337_v2  ;;  %v340_v12 = vrot.slane %v338_v57, 4  ;;  %v9027_v13 = vld [vmem:[#allocation2 + $0xc] sm:$0xf]  ;;  %s7291_s5 = scalar_lea.hbm %s12168_s4, %s9022_s30 }
  0x38   : > { %6258 = vmatpush.bf16.msra.mxu3 %v9242_v28  ;;  %6052 = vmatmul.bf16.vlgmr.msra.gmra.mxu0 %v7743_v54  ;;  %v9264_v11 = vld [vmem:[%s12165_s1 + $0x170] sm:$0xff]  ;;  %760 = vst [vmem:[#allocation2 + $0xc8] sm:$0xf] %v669_v3  ;;  %v844_v15 = vrot.slane %v842_v4, 5  ;;  %v847_v16 = vrot.slane %v845_v5, 6  ;;  %v854_v17 = vrot.slane %v852_v9, 5 }
  0x39   : > { %6320 = vmatpush.bf16.msrb.mxu0 %v9257_v39  ;;  %6121 = vmatmul.bf16.vlgmr.msra.gmra.mxu1 %v7747_v62  ;;  %v857_v18 = vrot.slane %v855_v10, 6  ;;  %v219_v19 = vld [vmem:[%s9732_s14 + $0x10] sm:$0xf]  ;;  %v220_v20 = vld [vmem:[%s9732_s14 + $0x14] sm:$0xf]  ;;  %v341_v21 = vor.u32 %v340_v12, %v9868_v44  ;;  %v670_v46 = vrot.slane %v668_v58, 4 }
  0x3a   : > { %6190 = vmatmul.bf16.vlgmr.msra.gmra.mxu2 %v7751_v33  ;;  %6389 = vmatpush.bf16.msrb.mxu1 %v9265_v63  ;;  %v7752_v23 = vld [vmem:[#allocation2 + $0x48] sm:$0xf0]  ;;  %v848_v24 = vor.u32 %v847_v16, %v844_v15  ;;  %243 = vst [vmem:[#allocation2 + $0x100] sm:$0xf] %v219_v19  ;;  %v268_v25 = vld [vmem:[%s9732_s14 + $0x14] sm:$0xf] }
  0x3b   : > { %6458 = vmatpush.bf16.msrb.mxu2 %v9273_v37  ;;  %v7755_v26 = vor.u32 %v9027_v13, %v7752_v23  ;;  %v9050_v22 = vld [vmem:[#allocation2 + $0xbc] sm:$0xf0]  ;;  %v9918_v28 = vor.u32 %v857_v18, %v854_v17  ;;  %244 = vst [vmem:[#allocation2 + $0x140] sm:$0xf] %v220_v20  ;;  %v269_v29 = vld [vmem:[%s9732_s14 + $0x18] sm:$0x1] }
  0x3c   : > { %6527 = vmatpush.bf16.msrb.mxu3 %v9281_v48  ;;  %v9042_v30 = vld [vmem:[#allocation2 + $0x84] sm:$0xf]  ;;  %v849_v31 = vsel %vm9830_vm8, %v840_v1, %v848_v24  ;;  %v850_v32 = vrot.slane %v848_v24, 4  ;;  %v342_v34 = vrot.slane %v341_v21, 4  ;;  %v344_v35 = vshll.u32 %v268_v25, 16  ;;  %s7292_s8 = sshll.u32 %s12040_s24, 4  ;;  %s7293_s8 = int_to_ptr.vmem [resolvable:$true] %s7292_s8 }
  0x3d   : > { %6321 = vmatpush.bf16.msrb.mxu0 %v9256_v7  ;;  %6259 = vmatmul.bf16.vlgmr.msra.gmra.mxu3 %v7755_v26  ;;  %1110 = vst [vmem:[#allocation2 + $0x8c] sm:$0xf] %v849_v31  ;;  %v348_v36 = vshrl.u32 %v268_v25, 16  ;;  %v354_v37 = vshll.u32 %v269_v29, 16  ;;  %v603_v39 = vld [vmem:[%s9732_s14 + $0x14] sm:$0xf]  ;;  %v7807_v49 = vor.u32 %v9050_v22, %v7806_v27 }
  0x3e   : > { %6390 = vmatpush.bf16.msrb.mxu1 %v9264_v11  ;;  %v7808_v40 = vld [vmem:[#allocation2 + $0xc0] sm:$0xf0]  ;;  %v859_v41 = vsel %vm9830_vm8, %v850_v32, %v9918_v28  ;;  %v346_v42 = vrot.slane %v344_v35, 5  ;;  %v604_v44 = vld [vmem:[%s9732_s14 + $0x18] sm:$0x1]  ;;  %v671_v51 = vrot.slane %v603_v39, 5 }
  0x3f   : > { %6459 = vmatpush.bf16.msrb.mxu2 %v9272_v6  ;;  %v7814_v47 = vld [vmem:[#allocation2 + $0x88] sm:$0xf]  ;;  %1111 = vst [vmem:[#allocation2 + $0xcc] sm:$0xf] %v859_v41  ;;  %v350_v48 = vrot.slane %v348_v36, 4  ;;  %v674_v52 = vrot.slane %v604_v44, 5  ;;  %v7811_v56 = vor.u32 %v9042_v30, %v7808_v40 }
  0x40   : > { %6528 = vmatpush.bf16.msrb.mxu3 %v9280_v8  ;;  %v347_v50 = vsel %vm9797_vm7, %v342_v34, %v346_v42  ;;  %v786_v54 = vld [vmem:[%s9732_s14 + $0x14] sm:$0xf]  ;;  %v787_v55 = vld [vmem:[%s9732_s14 + $0x18] sm:$0x3]  ;;  %v9051_v57 = vld [vmem:[#allocation2 + $0xc4] sm:$0xf0]  ;;  %v672_v45 = vsel %vm9774_vm6, %v670_v46, %v671_v51 }
  0x41   : > { %v351_v59 = vor.u32 %v350_v48, %v346_v42  ;;  %v356_v33 = vrot.slane %v354_v37, 5  ;;  %578 = vst [vmem:[#allocation2 + $0x104] sm:$0xf] %v347_v50  ;;  %v862_v43 = vshrl.u32 %v786_v54, 16  ;;  %v673_v58 = vrot.slane %v671_v51, 4  ;;  %v9271_v44 = vld [vmem:[%s12165_s1 + $0x1a8] sm:$0xff] }
  0x42   : > { %v865_v60 = vshll.u32 %v786_v54, 16  ;;  %v872_v61 = vshrl.u32 %v787_v55, 16  ;;  %761 = vst [vmem:[#allocation2 + $0x108] sm:$0xf] %v672_v45  ;;  %v860_v63 = vrot.slane %v9918_v28, 4  ;;  %v875_v1 = vshll.u32 %v787_v55, 16 }
  0x43   : > { %v352_v62 = vrot.slane %v351_v59, 4  ;;  %v864_v0 = vrot.slane %v862_v43, 5  ;;  %v7815_v2 = vor.u32 %v9051_v57, %v7814_v47  ;;  %v675_v4 = vsel %vm9774_vm6, %v673_v58, %v674_v52  ;;  %v221_v7 = vld [vmem:[%s9732_s14 + $0x1c] sm:$0xf]  ;;  %v222_v10 = vld [vmem:[%s9732_s14 + $0x20] sm:$0xf]  ;;  %6460 = vmatpush.bf16.msrb.mxu2 %v9271_v44 }
  0x44   : > { %v9043_v3 = vld [vmem:[#allocation2 + $0x8c] sm:$0xf]  ;;  %v867_v5 = vrot.slane %v865_v60, 6  ;;  %v874_v6 = vrot.slane %v872_v61, 5  ;;  %762 = vst [vmem:[#allocation2 + $0x148] sm:$0xf] %v675_v4 }
  0x45   : > { %v357_v8 = vsel %vm9797_vm7, %v352_v62, %v356_v33  ;;  %v877_v9 = vrot.slane %v875_v1, 6  ;;  %v270_v13 = vld [vmem:[%s9732_s14 + $0x1c] sm:$0xf]  ;;  %245 = vst [vmem:[#allocation2 + $0x180] sm:$0xf] %v221_v7  ;;  %v9255_v45 = vld [vmem:[%s12165_s1 + $0x128] sm:$0xff] }
  0x46   : > { %v7816_v11 = vld [vmem:[#allocation2 + $0xc8] sm:$0xf0]  ;;  %579 = vst [vmem:[#allocation2 + $0x144] sm:$0xf] %v357_v8  ;;  %v868_v12 = vor.u32 %v867_v5, %v864_v0  ;;  %v271_v16 = vld [vmem:[%s9732_s14 + $0x20] sm:$0xf]  ;;  %6322 = vmatpush.bf16.msrb.mxu0 %v9255_v45 }
  0x47   : > { %v878_v15 = vor.u32 %v877_v9, %v874_v6  ;;  %v9946_v17 = vld [vmem:[%s9732_s14 + $0x24] sm:$0xf]  ;;  %v7819_v18 = vor.u32 %v9043_v3, %v7816_v11  ;;  %246 = vst [vmem:[#allocation2 + $0x1c0] sm:$0xf] %v222_v10  ;;  %v359_v21 = vshrl.u32 %v270_v13, 16  ;;  %v362_v23 = vshll.u32 %v270_v13, 16 }
  0x48   : > { %6057 = vmatmul.bf16.gmra.mxu0 %v7807_v49  ;;  %v869_v19 = vsel %vm9830_vm8, %v860_v63, %v868_v12  ;;  %v870_v20 = vrot.slane %v868_v12, 4  ;;  %v368_v24 = vshll.u32 %v271_v16, 16  ;;  %v372_v25 = vshrl.u32 %v271_v16, 16  ;;  %v605_v28 = vld [vmem:[%s9732_s14 + $0x1c] sm:$0xe]  ;;  %v9279_v58 = vld [vmem:[%s12165_s1 + $0x1e8] sm:$0xff] }
  0x49   : > { %6126 = vmatmul.bf16.gmra.mxu1 %v7811_v56  ;;  %1112 = vst [vmem:[#allocation2 + $0x10c] sm:$0xf] %v869_v19  ;;  %v378_v26 = vshll.u32 %v9946_v17, 16  ;;  %v361_v22 = vrot.slane %v359_v21, 4  ;;  %v364_v29 = vrot.slane %v362_v23, 5  ;;  %v7395_v41 = vrot.slane %v605_v28, 9  ;;  %6529 = vmatpush.bf16.msrb.mxu3 %v9279_v58 }
  0x4a   : > { %6195 = vmatmul.bf16.gmra.mxu2 %v7815_v2  ;;  %v879_v27 = vsel %vm9830_vm8, %v870_v20, %v878_v15  ;;  %v370_v30 = vrot.slane %v368_v24, 5  ;;  %v374_v31 = vrot.slane %v372_v25, 4  ;;  %v606_v32 = vld [vmem:[%s9732_s14 + $0x20] sm:$0xf]  ;;  %v9956_v34 = vld [vmem:[%s9732_s14 + $0x24] sm:$0xf] }
  0x4b   : > { %1113 = vst [vmem:[#allocation2 + $0x14c] sm:$0xf] %v879_v27  ;;  %v7870_v35 = vld [vmem:[#allocation2 + $0x100] sm:$0xf]  ;;  %v365_v37 = vor.u32 %v364_v29, %v361_v22  ;;  %v9958_v40 = vrot.slane %v378_v26, 5  ;;  %v382_v47 = vshrl.u32 %v9946_v17, 16 }
  0x4c   : > { %v9066_v36 = vld [vmem:[#allocation2 + $0x13c] sm:$0xf0]  ;;  %v375_v39 = vor.u32 %v374_v31, %v370_v30  ;;  %v788_v42 = vld [vmem:[%s9732_s14 + $0x1c] sm:$0xe]  ;;  %v9058_v46 = vld [vmem:[#allocation2 + $0x104] sm:$0xf] }
  0x4d   : > { %6264 = vmatmul.bf16.gmra.mxu3 %v7819_v18  ;;  %v678_v48 = vrot.slane %v606_v32, 5  ;;  %v681_v49 = vrot.slane %v9956_v34, 5  ;;  %v789_v50 = vld [vmem:[%s9732_s14 + $0x20] sm:$0xf]  ;;  %v7872_v51 = vld [vmem:[#allocation2 + $0x140] sm:$0xf0]  ;;  %v7871_v1 = vor.u32 %v9066_v36, %v7870_v35 }
  0x4e   : > { %v7878_v52 = vld [vmem:[#allocation2 + $0x108] sm:$0xf]  ;;  %v366_v55 = vrot.slane %v365_v37, 4  ;;  %v376_v56 = vrot.slane %v375_v39, 4  ;;  %v790_v33 = vld [vmem:[%s9732_s14 + $0x24] sm:$0xf]  ;;  %v7875_v5 = vor.u32 %v9058_v46, %v7872_v51 }
  0x4f   : > { %v9067_v54 = vld [vmem:[#allocation2 + $0x144] sm:$0xf0]  ;;  %v679_v57 = vsel %vm9774_vm6, %v7395_v41, %v678_v48  ;;  %v680_v59 = vrot.slane %v678_v48, 4  ;;  %v881_v43 = vshrl.u32 %v788_v42, 16  ;;  %v884_v62 = vshll.u32 %v788_v42, 16  ;;  %v9254_v34 = vld [vmem:[%s12165_s1 + $0x120] sm:$0xff] }
  0x50   : > { %v371_v60 = vsel %vm9797_vm7, %v366_v55, %v370_v30  ;;  %v381_v61 = vsel %vm9797_vm7, %v376_v56, %v9958_v40  ;;  %763 = vst [vmem:[#allocation2 + $0x188] sm:$0xf] %v679_v57  ;;  %v890_v63 = vshrl.u32 %v789_v50, 16  ;;  %v9263_v0 = vld [vmem:[%s12165_s1 + $0x168] sm:$0xff]  ;;  %v893_v4 = vshll.u32 %v789_v50, 16  ;;  %6323 = vmatpush.bf16.msrb.mxu0 %v9254_v34  ;;  %s7294_s9 = sshll.u32 %s7291_s5, 4  ;;  %s7295_s9 = int_to_ptr.hbm [resolvable:$true] %s7294_s9 }
  0x51   : > { %580 = vst [vmem:[#allocation2 + $0x184] sm:$0xf] %v371_v60  ;;  %v682_v2 = vsel %vm9774_vm6, %v680_v59, %v681_v49  ;;  %v883_v3 = vrot.slane %v881_v43, 5  ;;  %v9059_v6 = vld [vmem:[#allocation2 + $0x10c] sm:$0xf]  ;;  %v886_v8 = vrot.slane %v884_v62, 6  ;;  %6391 = vmatpush.bf16.msrb.mxu1 %v9263_v0  ;;  %v7879_v11 = vor.u32 %v9067_v54, %v7878_v52 }
  0x52   : > { %v7880_v7 = vld [vmem:[#allocation2 + $0x148] sm:$0xf0]  ;;  %581 = vst [vmem:[#allocation2 + $0x1c4] sm:$0xf] %v381_v61  ;;  %v892_v9 = vrot.slane %v890_v63, 5  ;;  %v900_v10 = vshrl.u32 %v790_v33, 16 }
  0x53   : > { %764 = vst [vmem:[#allocation2 + $0x1c8] sm:$0xf] %v682_v2  ;;  %v895_v12 = vrot.slane %v893_v4, 6  ;;  %v903_v13 = vshll.u32 %v790_v33, 16  ;;  %v223_v15 = vld [vmem:[%s9732_s14 + $0x24] sm:$0xf]  ;;  %v887_v16 = vor.u32 %v886_v8, %v883_v3  ;;  %v7883_v28 = vor.u32 %v9059_v6, %v7880_v7 }
  0x54   : > { %v902_v17 = vrot.slane %v900_v10, 5  ;;  %v224_v18 = vld [vmem:[%s9732_s14 + $0x28] sm:$0xf]  ;;  %247 = vst [vmem:[#allocation2 + $0x200] sm:$0xf] %v223_v15  ;;  %v384_v19 = vrot.slane %v382_v47, 4 }
  0x55   : > { %v896_v20 = vor.u32 %v895_v12, %v892_v9  ;;  %v905_v21 = vrot.slane %v903_v13, 6  ;;  %248 = vst [vmem:[#allocation2 + $0x240] sm:$0xf] %v224_v18  ;;  %v273_v23 = vld [vmem:[%s9732_s14 + $0x28] sm:$0xf]  ;;  %v888_v24 = vrot.slane %v887_v16, 4 }
  0x56   : > { %v274_v25 = vld [vmem:[%s9732_s14 + $0x2c] sm:$0xf]  ;;  %v385_v26 = vor.u32 %v384_v19, %v9958_v40  ;;  %v388_v27 = vshll.u32 %v273_v23, 16  ;;  %v392_v22 = vshrl.u32 %v273_v23, 16  ;;  %v608_v46 = vld [vmem:[%s9732_s14 + $0x28] sm:$0xf] }
  0x57   : > { %v898_v29 = vrot.slane %v896_v20, 4  ;;  %v9993_v30 = vor.u32 %v905_v21, %v902_v17  ;;  %v398_v31 = vshll.u32 %v274_v25, 16  ;;  %v897_v32 = vsel %vm9830_vm8, %v888_v24, %v896_v20  ;;  %v609_v48 = vld [vmem:[%s9732_s14 + $0x2c] sm:$0xf]  ;;  %v9270_v54 = vld [vmem:[%s12165_s1 + $0x1a0] sm:$0xff]  ;;  %s9510_s6 = sshra.s32 %s7295_s9, 4  ;;  %s9511_s6 = int_to_ptr.hbm [resolvable:$true] %s9510_s6 }
  0x58   : > { %6062 = vmatmul.bf16.gmra.mxu0 %v7871_v1  ;;  %v386_v35 = vrot.slane %v385_v26, 4  ;;  %v390_v36 = vrot.slane %v388_v27, 5  ;;  %v394_v37 = vrot.slane %v392_v22, 4  ;;  %1114 = vst [vmem:[#allocation2 + $0x18c] sm:$0xf] %v897_v32  ;;  %v402_v40 = vshrl.u32 %v274_v25, 16  ;;  %6461 = vmatpush.bf16.msrb.mxu2 %v9270_v54  ;;  %p9517_p2 = scmp.lt.s32.totalorder %s9511_s6, %s12168_s4 }
  0x59   : > { %6131 = vmatmul.bf16.gmra.mxu1 %v7875_v5  ;;  %v907_v39 = vsel %vm9830_vm8, %v898_v29, %v9993_v30  ;;  %v400_v44 = vrot.slane %v398_v31, 5  ;;  %v683_v47 = vrot.slane %v681_v49, 4  ;;  %v684_v51 = vrot.slane %v608_v46, 5  ;;  %v7934_v55 = vld [vmem:[#allocation2 + $0x180] sm:$0xf]  ;;  %s9516_s12 = scalar_lea.hbm %s12168_s4, 2304 }
  0x5a   : > { %6200 = vmatmul.bf16.gmra.mxu2 %v7879_v11  ;;  %1115 = vst [vmem:[#allocation2 + $0x1cc] sm:$0xf] %v907_v39  ;;  %v391_v41 = vsel %vm9797_vm7, %v386_v35, %v390_v36  ;;  %v395_v42 = vor.u32 %v394_v37, %v390_v36  ;;  %v687_v52 = vrot.slane %v609_v48, 5  ;;  %v9082_v56 = vld [vmem:[#allocation2 + $0x1bc] sm:$0xf0]  ;;  %v404_v49 = vrot.slane %v402_v40, 4 }
  0x5b   : > { %582 = vst [vmem:[#allocation2 + $0x204] sm:$0xf] %v391_v41  ;;  %v9074_v57 = vld [vmem:[#allocation2 + $0x184] sm:$0xf]  ;;  %v791_v33 = vld [vmem:[%s9732_s14 + $0x28] sm:$0xf]  ;;  %v685_v61 = vsel %vm9774_vm6, %v683_v47, %v684_v51  ;;  %v7935_v12 = vor.u32 %v9082_v56, %v7934_v55 }
  0x5c   : > { %v396_v50 = vrot.slane %v395_v42, 4  ;;  %v7936_v59 = vld [vmem:[#allocation2 + $0x1c0] sm:$0xf0]  ;;  %v792_v43 = vld [vmem:[%s9732_s14 + $0x2c] sm:$0xf]  ;;  %v686_v62 = vrot.slane %v684_v51, 4  ;;  %v405_v5 = vor.u32 %v404_v49, %v400_v44 }
  0x5d   : > { %6269 = vmatmul.bf16.gmra.mxu3 %v7883_v28  ;;  %v7942_v45 = vld [vmem:[#allocation2 + $0x188] sm:$0xf]  ;;  %v910_v63 = vshrl.u32 %v791_v33, 16  ;;  %v9278_v0 = vld [vmem:[%s12165_s1 + $0x1e0] sm:$0xff]  ;;  %v913_v2 = vshll.u32 %v791_v33, 16  ;;  %v920_v3 = vshrl.u32 %v792_v43, 16  ;;  %v7939_v13 = vor.u32 %v9074_v57, %v7936_v59 }
  0x5e   : > { %v9083_v58 = vld [vmem:[#allocation2 + $0x1c4] sm:$0xf0]  ;;  %v401_v60 = vsel %vm9797_vm7, %v396_v50, %v400_v44  ;;  %v9262_v1 = vld [vmem:[%s12165_s1 + $0x160] sm:$0xff]  ;;  %v923_v4 = vshll.u32 %v792_v43, 16  ;;  %v688_v6 = vsel %vm9774_vm6, %v686_v62, %v687_v52  ;;  %765 = vst [vmem:[#allocation2 + $0x208] sm:$0xf] %v685_v61  ;;  %6530 = vmatpush.bf16.msrb.mxu3 %v9278_v0 }
  0x5f   : > { %583 = vst [vmem:[#allocation2 + $0x244] sm:$0xf] %v401_v60  ;;  %v912_v7 = vrot.slane %v910_v63, 5  ;;  %6392 = vmatpush.bf16.msrb.mxu1 %v9262_v1  ;;  %v225_v8 = vld [vmem:[%s9732_s14 + $0x2c] sm:$0xf]  ;;  %v908_v9 = vrot.slane %v9993_v30, 4  ;;  %v7943_v20 = vor.u32 %v9083_v58, %v7942_v45 }
  0x60   : > { %766 = vst [vmem:[#allocation2 + $0x248] sm:$0xf] %v688_v6  ;;  %v915_v10 = vrot.slane %v913_v2, 6  ;;  %v922_v11 = vrot.slane %v920_v3, 5  ;;  %v9075_v15 = vld [vmem:[#allocation2 + $0x18c] sm:$0xf] }
  0x61   : > { %v7944_v16 = vld [vmem:[#allocation2 + $0x1c8] sm:$0xf0]  ;;  %v925_v17 = vrot.slane %v923_v4, 6  ;;  %v226_v18 = vld [vmem:[%s9732_s14 + $0x30] sm:$0xf]  ;;  %v406_v19 = vrot.slane %v405_v5, 4 }
  0x62   : > { %v916_v21 = vor.u32 %v915_v10, %v912_v7  ;;  %249 = vst [vmem:[#allocation2 + $0x280] sm:$0xf] %v225_v8  ;;  %v275_v23 = vld [vmem:[%s9732_s14 + $0x30] sm:$0xf]  ;;  %v276_v24 = vld [vmem:[%s9732_s14 + $0x34] sm:$0x1]  ;;  %v7947_v37 = vor.u32 %v9075_v15, %v7944_v16 }
  0x63   : > { %v926_v25 = vor.u32 %v925_v17, %v922_v11  ;;  %250 = vst [vmem:[#allocation2 + $0x2c0] sm:$0xf] %v226_v18  ;;  %v408_v26 = vshll.u32 %v275_v23, 16  ;;  %v412_v27 = vshrl.u32 %v275_v23, 16  ;;  %v418_v22 = vshll.u32 %v276_v24, 16 }
  0x64   : > { %v917_v28 = vsel %vm9830_vm8, %v908_v9, %v916_v21  ;;  %v918_v29 = vrot.slane %v916_v21, 4  ;;  %v610_v30 = vld [vmem:[%s9732_s14 + $0x30] sm:$0xf]  ;;  %v611_v31 = vld [vmem:[%s9732_s14 + $0x34] sm:$0x1]  ;;  %v689_v32 = vrot.slane %v687_v52, 4 }
  0x65   : > { %1116 = vst [vmem:[#allocation2 + $0x20c] sm:$0xf] %v917_v28  ;;  %v410_v35 = vrot.slane %v408_v26, 5  ;;  %v414_v36 = vrot.slane %v412_v27, 4  ;;  %v690_v40 = vrot.slane %v610_v30, 5  ;;  %v420_v46 = vrot.slane %v418_v22, 5 }
  0x66   : > { %v927_v39 = vsel %vm9830_vm8, %v918_v29, %v926_v25  ;;  %v793_v41 = vld [vmem:[%s9732_s14 + $0x30] sm:$0xf]  ;;  %v693_v47 = vrot.slane %v611_v31, 5  ;;  %v794_v51 = vld [vmem:[%s9732_s14 + $0x34] sm:$0x3]  ;;  %v928_v58 = vrot.slane %v926_v25, 4 }
  0x67   : > { %1117 = vst [vmem:[#allocation2 + $0x24c] sm:$0xf] %v927_v39  ;;  %v411_v42 = vsel %vm9797_vm7, %v406_v19, %v410_v35  ;;  %v415_v44 = vor.u32 %v414_v36, %v410_v35  ;;  %v691_v48 = vsel %vm9774_vm6, %v689_v32, %v690_v40  ;;  %v692_v50 = vrot.slane %v690_v40, 4  ;;  %v7998_v43 = vld [vmem:[#allocation2 + $0x200] sm:$0xf] }
  0x68   : > { %6067 = vmatmul.bf16.gmra.mxu0 %v7935_v12  ;;  %584 = vst [vmem:[#allocation2 + $0x284] sm:$0xf] %v411_v42  ;;  %v930_v52 = vshrl.u32 %v793_v41, 16  ;;  %v933_v55 = vshll.u32 %v793_v41, 16  ;;  %v940_v59 = vshrl.u32 %v794_v51, 16  ;;  %v943_v33 = vshll.u32 %v794_v51, 16 }
  0x69   : > { %6136 = vmatmul.bf16.gmra.mxu1 %v7939_v13  ;;  %v416_v54 = vrot.slane %v415_v44, 4  ;;  %767 = vst [vmem:[#allocation2 + $0x288] sm:$0xf] %v691_v48  ;;  %v694_v56 = vsel %vm9774_vm6, %v692_v50, %v693_v47  ;;  %v9098_v34 = vld [vmem:[#allocation2 + $0x23c] sm:$0xf0] }
  0x6a   : > { %6205 = vmatmul.bf16.gmra.mxu2 %v7943_v20  ;;  %v932_v57 = vrot.slane %v930_v52, 5  ;;  %v9090_v49 = vld [vmem:[#allocation2 + $0x204] sm:$0xf]  ;;  %768 = vst [vmem:[#allocation2 + $0x2c8] sm:$0xf] %v694_v56  ;;  %v935_v60 = vrot.slane %v933_v55, 6  ;;  %v7999_v12 = vor.u32 %v9098_v34, %v7998_v43 }
  0x6b   : > { %v421_v45 = vsel %vm9797_vm7, %v416_v54, %v420_v46  ;;  %v227_v61 = vld [vmem:[%s9732_s14 + $0x38] sm:$0xf]  ;;  %v8000_v62 = vld [vmem:[#allocation2 + $0x240] sm:$0xf0]  ;;  %v942_v63 = vrot.slane %v940_v59, 5  ;;  %v945_v0 = vrot.slane %v943_v33, 6 }
  0x6c   : > { %585 = vst [vmem:[#allocation2 + $0x2c4] sm:$0xf] %v421_v45  ;;  %v936_v1 = vor.u32 %v935_v60, %v932_v57  ;;  %v228_v2 = vld [vmem:[%s9732_s14 + $0x3c] sm:$0xf]  ;;  %v277_v3 = vld [vmem:[%s9732_s14 + $0x38] sm:$0xf]  ;;  %v8003_v13 = vor.u32 %v9090_v49, %v8000_v62 }
  0x6d   : > { %6274 = vmatmul.bf16.gmra.mxu3 %v7947_v37  ;;  %251 = vst [vmem:[#allocation2 + $0x300] sm:$0xf] %v227_v61  ;;  %v8006_v4 = vld [vmem:[#allocation2 + $0x208] sm:$0xf]  ;;  %v946_v5 = vor.u32 %v945_v0, %v942_v63  ;;  %v278_v6 = vld [vmem:[%s9732_s14 + $0x3c] sm:$0xf] }
  0x6e   : > { %252 = vst [vmem:[#allocation2 + $0x340] sm:$0xf] %v228_v2  ;;  %v9099_v7 = vld [vmem:[#allocation2 + $0x244] sm:$0xf0]  ;;  %v937_v8 = vsel %vm9830_vm8, %v928_v58, %v936_v1  ;;  %v938_v9 = vrot.slane %v936_v1, 4  ;;  %v423_v11 = vshrl.u32 %v277_v3, 16 }
  0x6f   : > { %v10054_v10 = vld [vmem:[%s9732_s14 + $0x40] sm:$0xf]  ;;  %1118 = vst [vmem:[#allocation2 + $0x28c] sm:$0xf] %v937_v8  ;;  %v426_v15 = vshll.u32 %v277_v3, 16  ;;  %v432_v16 = vshll.u32 %v278_v6, 16  ;;  %v8007_v23 = vor.u32 %v9099_v7, %v8006_v4 }
  0x70   : > { %v947_v17 = vsel %vm9830_vm8, %v938_v9, %v946_v5  ;;  %v425_v18 = vrot.slane %v423_v11, 4  ;;  %v436_v19 = vshrl.u32 %v278_v6, 16  ;;  %v442_v20 = vshll.u32 %v10054_v10, 16  ;;  %v612_v21 = vld [vmem:[%s9732_s14 + $0x38] sm:$0xe] }
  0x71   : > { %1119 = vst [vmem:[#allocation2 + $0x2cc] sm:$0xf] %v947_v17  ;;  %v428_v24 = vrot.slane %v426_v15, 5  ;;  %v434_v25 = vrot.slane %v432_v16, 5  ;;  %v9091_v26 = vld [vmem:[#allocation2 + $0x20c] sm:$0xf] }
  0x72   : > { %v438_v27 = vrot.slane %v436_v19, 4  ;;  %v613_v22 = vld [vmem:[%s9732_s14 + $0x3c] sm:$0xf]  ;;  %v8008_v28 = vld [vmem:[#allocation2 + $0x248] sm:$0xf0]  ;;  %v7396_v31 = vrot.slane %v612_v21, 9 }
  0x73   : > { %v429_v29 = vor.u32 %v428_v24, %v425_v18  ;;  %v10062_v30 = vld [vmem:[%s9732_s14 + $0x40] sm:$0xf]  ;;  %v697_v32 = vrot.slane %v613_v22, 5  ;;  %v10064_v36 = vrot.slane %v442_v20, 5  ;;  %v795_v39 = vld [vmem:[%s9732_s14 + $0x38] sm:$0xe]  ;;  %v8011_v47 = vor.u32 %v9091_v26, %v8008_v28 }
  0x74   : > { %v439_v35 = vor.u32 %v438_v27, %v434_v25  ;;  %v700_v37 = vrot.slane %v10062_v30, 5  ;;  %v446_v41 = vshrl.u32 %v10054_v10, 16  ;;  %v796_v46 = vld [vmem:[%s9732_s14 + $0x3c] sm:$0xf]  ;;  %v797_v50 = vld [vmem:[%s9732_s14 + $0x40] sm:$0xf] }
  0x75   : > { %v430_v40 = vrot.slane %v429_v29, 4  ;;  %v698_v42 = vsel %vm9774_vm6, %v7396_v31, %v697_v32  ;;  %v699_v44 = vrot.slane %v697_v32, 4  ;;  %v949_v51 = vshrl.u32 %v795_v39, 16  ;;  %v280_v43 = vld [vmem:[%s9732_s14 + $0x44] sm:$0xf]  ;;  %v9269_v61 = vld [vmem:[%s12165_s1 + $0x198] sm:$0xff] }
  0x76   : > { %v440_v48 = vrot.slane %v439_v35, 4  ;;  %769 = vst [vmem:[#allocation2 + $0x308] sm:$0xf] %v698_v42  ;;  %v952_v55 = vshll.u32 %v795_v39, 16  ;;  %v958_v56 = vshrl.u32 %v796_v46, 16  ;;  %v961_v33 = vshll.u32 %v796_v46, 16  ;;  %6462 = vmatpush.bf16.msrb.mxu2 %v9269_v61 }
  0x77   : > { %v435_v52 = vsel %vm9797_vm7, %v430_v40, %v434_v25  ;;  %v701_v54 = vsel %vm9774_vm6, %v699_v44, %v700_v37  ;;  %v951_v59 = vrot.slane %v949_v51, 5  ;;  %v968_v45 = vshrl.u32 %v797_v50, 16  ;;  %v9253_v62 = vld [vmem:[%s12165_s1 + $0x118] sm:$0xff]  ;;  %v8062_v63 = vld [vmem:[#allocation2 + $0x280] sm:$0xf] }
  0x78   : > { %6072 = vmatmul.bf16.gmra.mxu0 %v7999_v12  ;;  %v445_v57 = vsel %vm9797_vm7, %v440_v48, %v10064_v36  ;;  %586 = vst [vmem:[#allocation2 + $0x304] sm:$0xf] %v435_v52  ;;  %v954_v34 = vrot.slane %v952_v55, 6  ;;  %v960_v49 = vrot.slane %v958_v56, 5  ;;  %v963_v58 = vrot.slane %v961_v33, 6  ;;  %v9277_v4 = vld [vmem:[%s12165_s1 + $0x1d8] sm:$0xff] }
  0x79   : > { %6141 = vmatmul.bf16.gmra.mxu1 %v8003_v13  ;;  %587 = vst [vmem:[#allocation2 + $0x344] sm:$0xf] %v445_v57  ;;  %v971_v60 = vshll.u32 %v797_v50, 16  ;;  %v9114_v0 = vld [vmem:[#allocation2 + $0x2bc] sm:$0xf0]  ;;  %v970_v3 = vrot.slane %v968_v45, 5  ;;  %6324 = vmatpush.bf16.msrb.mxu0 %v9253_v62 }
  0x7a   : > { %6210 = vmatmul.bf16.gmra.mxu2 %v8007_v23  ;;  %770 = vst [vmem:[#allocation2 + $0x348] sm:$0xf] %v701_v54  ;;  %v9106_v1 = vld [vmem:[#allocation2 + $0x284] sm:$0xf]  ;;  %v955_v2 = vor.u32 %v954_v34, %v951_v59  ;;  %v9261_v5 = vld [vmem:[%s12165_s1 + $0x158] sm:$0xff]  ;;  %v448_v7 = vrot.slane %v446_v41, 4  ;;  %v964_v9 = vor.u32 %v963_v58, %v960_v49  ;;  %6531 = vmatpush.bf16.msrb.mxu3 %v9277_v4 }
  0x7b   : > { %v229_v6 = vld [vmem:[%s9732_s14 + $0x40] sm:$0xf]  ;;  %v8070_v8 = vld [vmem:[#allocation2 + $0x288] sm:$0xf]  ;;  %v973_v10 = vrot.slane %v971_v60, 6  ;;  %v452_v12 = vshll.u32 %v280_v43, 16  ;;  %6393 = vmatpush.bf16.msrb.mxu1 %v9261_v5  ;;  %v8063_v28 = vor.u32 %v9114_v0, %v8062_v63 }
  0x7c   : > { %v230_v11 = vld [vmem:[%s9732_s14 + $0x44] sm:$0xf]  ;;  %253 = vst [vmem:[#allocation2 + $0x380] sm:$0xf] %v229_v6  ;;  %v956_v15 = vrot.slane %v955_v2, 4  ;;  %v449_v16 = vor.u32 %v448_v7, %v10064_v36  ;;  %v456_v17 = vshrl.u32 %v280_v43, 16 }
  0x7d   : > { %6279 = vmatmul.bf16.gmra.mxu3 %v8011_v47  ;;  %v8064_v13 = vld [vmem:[#allocation2 + $0x2c0] sm:$0xf0]  ;;  %254 = vst [vmem:[#allocation2 + $0x3c0] sm:$0xf] %v230_v11  ;;  %v9115_v18 = vld [vmem:[#allocation2 + $0x2c4] sm:$0xf0]  ;;  %v10098_v20 = vor.u32 %v973_v10, %v970_v3 }
  0x7e   : > { %v966_v19 = vrot.slane %v964_v9, 4  ;;  %v281_v21 = vld [vmem:[%s9732_s14 + $0x48] sm:$0xf]  ;;  %v454_v23 = vrot.slane %v452_v12, 5  ;;  %v965_v24 = vsel %vm9830_vm8, %v956_v15, %v964_v9  ;;  %v450_v25 = vrot.slane %v449_v16, 4  ;;  %v9252_v9 = vld [vmem:[%s12165_s1 + $0x110] sm:$0xff] }
  0x7f   : > { %v458_v26 = vrot.slane %v456_v17, 4  ;;  %v462_v27 = vshll.u32 %v281_v21, 16  ;;  %v615_v22 = vld [vmem:[%s9732_s14 + $0x44] sm:$0xf]  ;;  %v8067_v29 = vor.u32 %v9106_v1, %v8064_v13  ;;  %1120 = vst [vmem:[#allocation2 + $0x30c] sm:$0xf] %v965_v24  ;;  %v8071_v35 = vor.u32 %v9115_v18, %v8070_v8  ;;  %6325 = vmatpush.bf16.msrb.mxu0 %v9252_v9 }
  0x80   : > { %v975_v31 = vsel %vm9830_vm8, %v966_v19, %v10098_v20  ;;  %v10108_v32 = vld [vmem:[%s9732_s14 + $0x48] sm:$0xf]  ;;  %v9107_v36 = vld [vmem:[#allocation2 + $0x28c] sm:$0xf]  ;;  %v455_v39 = vsel %vm9797_vm7, %v450_v25, %v454_v23  ;;  %v798_v42 = vld [vmem:[%s9732_s14 + $0x44] sm:$0xf] }
  0x81   : > { %1121 = vst [vmem:[#allocation2 + $0x34c] sm:$0xf] %v975_v31  ;;  %v459_v40 = vor.u32 %v458_v26, %v454_v23  ;;  %v10112_v41 = vrot.slane %v462_v27, 5  ;;  %v702_v44 = vrot.slane %v700_v37, 4  ;;  %v703_v46 = vrot.slane %v615_v22, 5  ;;  %v9268_v8 = vld [vmem:[%s12165_s1 + $0x190] sm:$0xff] }
  0x82   : > { %588 = vst [vmem:[#allocation2 + $0x384] sm:$0xf] %v455_v39  ;;  %v706_v47 = vrot.slane %v10108_v32, 5  ;;  %v8072_v48 = vld [vmem:[#allocation2 + $0x2c8] sm:$0xf0]  ;;  %v466_v52 = vshrl.u32 %v281_v21, 16  ;;  %6463 = vmatpush.bf16.msrb.mxu2 %v9268_v8 }
  0x83   : > { %v460_v50 = vrot.slane %v459_v40, 4  ;;  %v799_v51 = vld [vmem:[%s9732_s14 + $0x48] sm:$0xf]  ;;  %v704_v54 = vsel %vm9774_vm6, %v702_v44, %v703_v46  ;;  %v705_v55 = vrot.slane %v703_v46, 4  ;;  %v978_v56 = vshrl.u32 %v798_v42, 16  ;;  %v9276_v10 = vld [vmem:[%s12165_s1 + $0x1d0] sm:$0xff] }
  0x84   : > { %771 = vst [vmem:[#allocation2 + $0x388] sm:$0xf] %v704_v54  ;;  %v981_v37 = vshll.u32 %v798_v42, 16  ;;  %v988_v57 = vshrl.u32 %v799_v51, 16  ;;  %v8075_v59 = vor.u32 %v9107_v36, %v8072_v48  ;;  %v991_v34 = vshll.u32 %v799_v51, 16  ;;  %v9260_v17 = vld [vmem:[%s12165_s1 + $0x150] sm:$0xff]  ;;  %6532 = vmatpush.bf16.msrb.mxu3 %v9276_v10 }
  0x85   : > { %v465_v30 = vsel %vm9797_vm7, %v460_v50, %v10112_v41  ;;  %v707_v33 = vsel %vm9774_vm6, %v705_v55, %v706_v47  ;;  %v980_v43 = vrot.slane %v978_v56, 5  ;;  %v282_v49 = vld [vmem:[%s9732_s14 + $0x4c] sm:$0xf]  ;;  %v976_v45 = vrot.slane %v10098_v20, 4  ;;  %v8126_v3 = vld [vmem:[#allocation2 + $0x300] sm:$0xf]  ;;  %6394 = vmatpush.bf16.msrb.mxu1 %v9260_v17 }
  0x86   : > { %589 = vst [vmem:[#allocation2 + $0x3c4] sm:$0xf] %v465_v30  ;;  %v983_v58 = vrot.slane %v981_v37, 6  ;;  %v990_v60 = vrot.slane %v988_v57, 5  ;;  %v993_v61 = vrot.slane %v991_v34, 6  ;;  %v472_v62 = vshll.u32 %v282_v49, 16 }
  0x87   : > { %772 = vst [vmem:[#allocation2 + $0x3c8] sm:$0xf] %v707_v33  ;;  %v476_v63 = vshrl.u32 %v282_v49, 16  ;;  %v468_v1 = vrot.slane %v466_v52, 4  ;;  %v800_v2 = vld [vmem:[%s9732_s14 + $0x4c] sm:$0xf] }
  0x88   : > { %6077 = vmatmul.bf16.gmra.mxu0 %v8063_v28  ;;  %v984_v0 = vor.u32 %v983_v58, %v980_v43  ;;  %v9130_v4 = vld [vmem:[#allocation2 + $0x33c] sm:$0xf0]  ;;  %v9122_v5 = vld [vmem:[#allocation2 + $0x304] sm:$0xf]  ;;  %v10129_v7 = vor.u32 %v993_v61, %v990_v60  ;;  %v474_v11 = vrot.slane %v472_v62, 5  ;;  %v708_v28 = vrot.slane %v706_v47, 4 }
  0x89   : > { %6146 = vmatmul.bf16.gmra.mxu1 %v8067_v29  ;;  %v8128_v6 = vld [vmem:[#allocation2 + $0x340] sm:$0xf0]  ;;  %v478_v12 = vrot.slane %v476_v63, 4  ;;  %v8134_v13 = vld [vmem:[#allocation2 + $0x308] sm:$0xf]  ;;  %v469_v19 = vor.u32 %v468_v1, %v10112_v41  ;;  %v998_v29 = vshrl.u32 %v800_v2, 16 }
  0x8a   : > { %6215 = vmatmul.bf16.gmra.mxu2 %v8071_v35  ;;  %v985_v15 = vsel %vm9830_vm8, %v976_v45, %v984_v0  ;;  %v986_v16 = vrot.slane %v984_v0, 4  ;;  %v283_v18 = vld [vmem:[%s9732_s14 + $0x50] sm:$0x1]  ;;  %v617_v20 = vld [vmem:[%s9732_s14 + $0x4c] sm:$0xf]  ;;  %v8127_v35 = vor.u32 %v9130_v4, %v8126_v3  ;;  %v8131_v36 = vor.u32 %v9122_v5, %v8128_v6 }
  0x8b   : > { %v9131_v21 = vld [vmem:[#allocation2 + $0x344] sm:$0xf0]  ;;  %1122 = vst [vmem:[#allocation2 + $0x38c] sm:$0xf] %v985_v15  ;;  %v479_v23 = vor.u32 %v478_v12, %v474_v11  ;;  %v482_v24 = vshll.u32 %v283_v18, 16  ;;  %v709_v25 = vrot.slane %v617_v20, 5 }
  0x8c   : > { %v995_v26 = vsel %vm9830_vm8, %v986_v16, %v10129_v7  ;;  %v470_v27 = vrot.slane %v469_v19, 4  ;;  %v618_v22 = vld [vmem:[%s9732_s14 + $0x50] sm:$0x1]  ;;  %v231_v39 = vld [vmem:[%s9732_s14 + $0x48] sm:$0xf]  ;;  %v8135_v44 = vor.u32 %v9131_v21, %v8134_v13  ;;  %v1000_v52 = vrot.slane %v998_v29, 5 }
  0x8d   : > { %6284 = vmatmul.bf16.gmra.mxu3 %v8075_v59  ;;  %1123 = vst [vmem:[#allocation2 + $0x3cc] sm:$0xf] %v995_v26  ;;  %v480_v31 = vrot.slane %v479_v23, 4  ;;  %v484_v32 = vrot.slane %v482_v24, 5  ;;  %v232_v40 = vld [vmem:[%s9732_s14 + $0x4c] sm:$0xf]  ;;  %v710_v47 = vsel %vm9774_vm6, %v708_v28, %v709_v25 }
  0x8e   : > { %v475_v41 = vsel %vm9797_vm7, %v470_v27, %v474_v11  ;;  %v711_v42 = vrot.slane %v709_v25, 4  ;;  %255 = vst [vmem:[#allocation2 + $0x400] sm:$0xf] %v231_v39  ;;  %v712_v48 = vrot.slane %v618_v22, 5  ;;  %v801_v50 = vld [vmem:[%s9732_s14 + $0x50] sm:$0x3] }
  0x8f   : > { %v485_v46 = vsel %vm9797_vm7, %v480_v31, %v484_v32  ;;  %v9123_v51 = vld [vmem:[#allocation2 + $0x30c] sm:$0xf]  ;;  %256 = vst [vmem:[#allocation2 + $0x440] sm:$0xf] %v232_v40  ;;  %v1001_v54 = vshll.u32 %v800_v2, 16  ;;  %v1008_v55 = vshrl.u32 %v801_v50, 16 }
  0x90   : > { %v1011_v56 = vshll.u32 %v801_v50, 16  ;;  %v8136_v30 = vld [vmem:[#allocation2 + $0x348] sm:$0xf0]  ;;  %590 = vst [vmem:[#allocation2 + $0x404] sm:$0xf] %v475_v41  ;;  %v713_v37 = vsel %vm9774_vm6, %v711_v42, %v712_v48  ;;  %v996_v57 = vrot.slane %v10129_v7, 4 }
  0x91   : > { %591 = vst [vmem:[#allocation2 + $0x444] sm:$0xf] %v485_v46  ;;  %v1003_v59 = vrot.slane %v1001_v54, 6  ;;  %v1010_v33 = vrot.slane %v1008_v55, 5  ;;  %v8139_v49 = vor.u32 %v9123_v51, %v8136_v30  ;;  %v284_v58 = vld [vmem:[%s9732_s14 + $0x54] sm:$0xf] }
  0x92   : > { %773 = vst [vmem:[#allocation2 + $0x408] sm:$0xf] %v710_v47  ;;  %v1013_v43 = vrot.slane %v1011_v56, 6  ;;  %v285_v60 = vld [vmem:[%s9732_s14 + $0x58] sm:$0xf]  ;;  %v487_v63 = vshrl.u32 %v284_v58, 16 }
  0x93   : > { %774 = vst [vmem:[#allocation2 + $0x448] sm:$0xf] %v713_v37  ;;  %v1004_v34 = vor.u32 %v1003_v59, %v1000_v52  ;;  %v490_v0 = vshll.u32 %v284_v58, 16  ;;  %v496_v1 = vshll.u32 %v285_v60, 16  ;;  %v500_v2 = vshrl.u32 %v285_v60, 16 }
  0x94   : > { %v1014_v45 = vor.u32 %v1013_v43, %v1010_v33  ;;  %v489_v4 = vrot.slane %v487_v63, 4  ;;  %v8190_v6 = vld [vmem:[#allocation2 + $0x380] sm:$0xf]  ;;  %v10171_v8 = vld [vmem:[%s9732_s14 + $0x5c] sm:$0xf] }
  0x95   : > { %v1005_v61 = vsel %vm9830_vm8, %v996_v57, %v1004_v34  ;;  %v1006_v62 = vrot.slane %v1004_v34, 4  ;;  %v492_v5 = vrot.slane %v490_v0, 5  ;;  %v9146_v7 = vld [vmem:[#allocation2 + $0x3bc] sm:$0xf0]  ;;  %v9138_v9 = vld [vmem:[#allocation2 + $0x384] sm:$0xf] }
  0x96   : > { %1124 = vst [vmem:[#allocation2 + $0x40c] sm:$0xf] %v1005_v61  ;;  %v498_v11 = vrot.slane %v496_v1, 5  ;;  %v502_v12 = vrot.slane %v500_v2, 4  ;;  %v620_v13 = vld [vmem:[%s9732_s14 + $0x58] sm:$0xf]  ;;  %v8191_v32 = vor.u32 %v9146_v7, %v8190_v6 }
  0x97   : > { %v1015_v3 = vsel %vm9830_vm8, %v1006_v62, %v1014_v45  ;;  %v493_v10 = vor.u32 %v492_v5, %v489_v4  ;;  %v802_v15 = vld [vmem:[%s9732_s14 + $0x54] sm:$0xe]  ;;  %v8192_v16 = vld [vmem:[#allocation2 + $0x3c0] sm:$0xf0]  ;;  %v8198_v17 = vld [vmem:[#allocation2 + $0x388] sm:$0xf] }
  0x98   : > { %6082 = vmatmul.bf16.gmra.mxu0 %v8127_v35  ;;  %1125 = vst [vmem:[#allocation2 + $0x44c] sm:$0xf] %v1015_v3  ;;  %v506_v18 = vshll.u32 %v10171_v8, 16  ;;  %v619_v19 = vld [vmem:[%s9732_s14 + $0x54] sm:$0xe]  ;;  %v716_v20 = vrot.slane %v620_v13, 5  ;;  %v503_v24 = vor.u32 %v502_v12, %v498_v11  ;;  %v8195_v41 = vor.u32 %v9138_v9, %v8192_v16 }
  0x99   : > { %6151 = vmatmul.bf16.gmra.mxu1 %v8131_v36  ;;  %v9147_v21 = vld [vmem:[#allocation2 + $0x3c4] sm:$0xf0]  ;;  %v494_v23 = vrot.slane %v493_v10, 4  ;;  %v10178_v25 = vld [vmem:[%s9732_s14 + $0x5c] sm:$0xf]  ;;  %v7397_v26 = vrot.slane %v619_v19, 9 }
  0x9a   : > { %6220 = vmatmul.bf16.gmra.mxu2 %v8135_v44  ;;  %v10180_v27 = vrot.slane %v506_v18, 5  ;;  %v718_v22 = vrot.slane %v716_v20, 4  ;;  %v719_v28 = vrot.slane %v10178_v25, 5  ;;  %v803_v29 = vld [vmem:[%s9732_s14 + $0x58] sm:$0xf]  ;;  %v1017_v31 = vshrl.u32 %v802_v15, 16 }
  0x9b   : > { %v233_v35 = vld [vmem:[%s9732_s14 + $0x54] sm:$0xf]  ;;  %v234_v36 = vld [vmem:[%s9732_s14 + $0x58] sm:$0xf]  ;;  %v499_v39 = vsel %vm9797_vm7, %v494_v23, %v498_v11  ;;  %v804_v40 = vld [vmem:[%s9732_s14 + $0x5c] sm:$0xf]  ;;  %v8199_v47 = vor.u32 %v9147_v21, %v8198_v17  ;;  %v717_v50 = vsel %vm9774_vm6, %v7397_v26, %v716_v20 }
  0x9c   : > { %257 = vst [vmem:[#allocation2 + $0x480] sm:$0xf] %v233_v35  ;;  %v504_v42 = vrot.slane %v503_v24, 4  ;;  %v1019_v44 = vrot.slane %v1017_v31, 5  ;;  %v1020_v46 = vshll.u32 %v802_v15, 16  ;;  %v1026_v51 = vshrl.u32 %v803_v29, 16 }
  0x9d   : > { %6289 = vmatmul.bf16.gmra.mxu3 %v8139_v49  ;;  %v9139_v48 = vld [vmem:[#allocation2 + $0x38c] sm:$0xf]  ;;  %258 = vst [vmem:[#allocation2 + $0x4c0] sm:$0xf] %v234_v36  ;;  %v1029_v52 = vshll.u32 %v803_v29, 16  ;;  %v720_v56 = vsel %vm9774_vm6, %v718_v22, %v719_v28  ;;  %v1036_v37 = vshrl.u32 %v804_v40, 16 }
  0x9e   : > { %v8200_v54 = vld [vmem:[#allocation2 + $0x3c8] sm:$0xf0]  ;;  %v509_v55 = vsel %vm9797_vm7, %v504_v42, %v10180_v27  ;;  %592 = vst [vmem:[#allocation2 + $0x484] sm:$0xf] %v499_v39  ;;  %v1022_v30 = vrot.slane %v1020_v46, 6  ;;  %v1028_v57 = vrot.slane %v1026_v51, 5 }
  0x9f   : > { %593 = vst [vmem:[#allocation2 + $0x4c4] sm:$0xf] %v509_v55  ;;  %v1031_v59 = vrot.slane %v1029_v52, 6  ;;  %v1039_v33 = vshll.u32 %v804_v40, 16  ;;  %v1038_v34 = vrot.slane %v1036_v37, 5  ;;  %v8203_v58 = vor.u32 %v9139_v48, %v8200_v54  ;;  %v9267_v11 = vld [vmem:[%s12165_s1 + $0x188] sm:$0xff] }
  0xa0   : > { %775 = vst [vmem:[#allocation2 + $0x488] sm:$0xf] %v717_v50  ;;  %v1023_v43 = vor.u32 %v1022_v30, %v1019_v44  ;;  %v510_v60 = vshrl.u32 %v10171_v8, 16  ;;  %v287_v62 = vld [vmem:[%s9732_s14 + $0x60] sm:$0xf]  ;;  %v9251_v12 = vld [vmem:[%s12165_s1 + $0x108] sm:$0xff]  ;;  %6464 = vmatpush.bf16.msrb.mxu2 %v9267_v11 }
  0xa1   : > { %776 = vst [vmem:[#allocation2 + $0x4c8] sm:$0xf] %v720_v56  ;;  %v1032_v49 = vor.u32 %v1031_v59, %v1028_v57  ;;  %v1041_v45 = vrot.slane %v1039_v33, 6  ;;  %v805_v63 = vld [vmem:[%s9732_s14 + $0x60] sm:$0xf]  ;;  %v516_v2 = vshll.u32 %v287_v62, 16  ;;  %6326 = vmatpush.bf16.msrb.mxu0 %v9251_v12 }
  0xa2   : > { %v1024_v61 = vrot.slane %v1023_v43, 4  ;;  %v520_v3 = vshrl.u32 %v287_v62, 16  ;;  %v512_v6 = vrot.slane %v510_v60, 4  ;;  %v1046_v8 = vshrl.u32 %v805_v63, 16  ;;  %v8254_v9 = vld [vmem:[#allocation2 + $0x400] sm:$0xf] }
  0xa3   : > { %v1034_v0 = vrot.slane %v1032_v49, 4  ;;  %v10201_v1 = vor.u32 %v1041_v45, %v1038_v34  ;;  %v518_v7 = vrot.slane %v516_v2, 5  ;;  %v9162_v10 = vld [vmem:[#allocation2 + $0x43c] sm:$0xf0]  ;;  %v9154_v13 = vld [vmem:[#allocation2 + $0x404] sm:$0xf] }
  0xa4   : > { %v1033_v4 = vsel %vm9830_vm8, %v1024_v61, %v1032_v49  ;;  %v8256_v15 = vld [vmem:[#allocation2 + $0x440] sm:$0xf0]  ;;  %v8262_v16 = vld [vmem:[#allocation2 + $0x408] sm:$0xf]  ;;  %v513_v20 = vor.u32 %v512_v6, %v10180_v27  ;;  %v522_v21 = vrot.slane %v520_v3, 4  ;;  %v1049_v23 = vshll.u32 %v805_v63, 16 }
  0xa5   : > { %v1043_v5 = vsel %vm9830_vm8, %v1034_v0, %v10201_v1  ;;  %1126 = vst [vmem:[#allocation2 + $0x48c] sm:$0xf] %v1033_v4  ;;  %v9163_v17 = vld [vmem:[#allocation2 + $0x444] sm:$0xf0]  ;;  %v10218_v19 = vld [vmem:[%s9732_s14 + $0x64] sm:$0xf]  ;;  %v8255_v44 = vor.u32 %v9162_v10, %v8254_v9  ;;  %v8259_v50 = vor.u32 %v9154_v13, %v8256_v15 }
  0xa6   : > { %1127 = vst [vmem:[#allocation2 + $0x4cc] sm:$0xf] %v1043_v5  ;;  %v9275_v18 = vld [vmem:[%s12165_s1 + $0x1c8] sm:$0xff]  ;;  %v526_v24 = vshll.u32 %v10218_v19, 16  ;;  %v622_v26 = vld [vmem:[%s9732_s14 + $0x60] sm:$0xf]  ;;  %v523_v31 = vor.u32 %v522_v21, %v518_v7  ;;  %v8263_v51 = vor.u32 %v9163_v17, %v8262_v16 }
  0xa7   : > { %v806_v22 = vld [vmem:[%s9732_s14 + $0x64] sm:$0xf]  ;;  %6533 = vmatpush.bf16.msrb.mxu3 %v9275_v18  ;;  %v514_v29 = vrot.slane %v513_v20, 4  ;;  %v721_v35 = vrot.slane %v719_v28, 4  ;;  %v1048_v36 = vrot.slane %v1046_v8, 5  ;;  %v9259_v27 = vld [vmem:[%s12165_s1 + $0x148] sm:$0xff] }
  0xa8   : > { %6087 = vmatmul.bf16.gmra.mxu0 %v8191_v32  ;;  %v10225_v32 = vld [vmem:[%s9732_s14 + $0x64] sm:$0xf]  ;;  %v10232_v39 = vrot.slane %v526_v24, 5  ;;  %v722_v40 = vrot.slane %v622_v26, 5  ;;  %v1044_v42 = vrot.slane %v10201_v1, 4  ;;  %v524_v25 = vrot.slane %v523_v31, 4  ;;  %6395 = vmatpush.bf16.msrb.mxu1 %v9259_v27 }
  0xa9   : > { %6156 = vmatmul.bf16.gmra.mxu1 %v8195_v41  ;;  %v725_v41 = vrot.slane %v10225_v32, 5  ;;  %v235_v46 = vld [vmem:[%s9732_s14 + $0x5c] sm:$0xf]  ;;  %v519_v48 = vsel %vm9797_vm7, %v514_v29, %v518_v7  ;;  %v1051_v28 = vrot.slane %v1049_v23, 6  ;;  %v1056_v54 = vshrl.u32 %v806_v22, 16 }
  0xaa   : > { %6225 = vmatmul.bf16.gmra.mxu2 %v8199_v47  ;;  %v236_v47 = vld [vmem:[%s9732_s14 + $0x60] sm:$0xf]  ;;  %259 = vst [vmem:[#allocation2 + $0x500] sm:$0xf] %v235_v46  ;;  %v724_v52 = vrot.slane %v722_v40, 4  ;;  %v529_v30 = vsel %vm9797_vm7, %v524_v25, %v10232_v39  ;;  %v723_v37 = vsel %vm9774_vm6, %v721_v35, %v722_v40  ;;  %v1059_v59 = vshll.u32 %v806_v22, 16 }
  0xab   : > { %260 = vst [vmem:[#allocation2 + $0x540] sm:$0xf] %v236_v47  ;;  %v1052_v57 = vor.u32 %v1051_v28, %v1048_v36  ;;  %v9155_v43 = vld [vmem:[#allocation2 + $0x40c] sm:$0xf]  ;;  %v1058_v49 = vrot.slane %v1056_v54, 5  ;;  %v530_v0 = vshrl.u32 %v10218_v19, 16 }
  0xac   : > { %594 = vst [vmem:[#allocation2 + $0x504] sm:$0xf] %v519_v48  ;;  %v726_v34 = vsel %vm9774_vm6, %v724_v52, %v725_v41  ;;  %v8264_v45 = vld [vmem:[#allocation2 + $0x448] sm:$0xf0]  ;;  %v1061_v61 = vrot.slane %v1059_v59, 6  ;;  %v9250_v48 = vld [vmem:[%s12165_s1 + $0x100] sm:$0xff] }
  0xad   : > { %6294 = vmatmul.bf16.gmra.mxu3 %v8203_v58  ;;  %595 = vst [vmem:[#allocation2 + $0x544] sm:$0xf] %v529_v30  ;;  %v1053_v58 = vsel %vm9830_vm8, %v1044_v42, %v1052_v57  ;;  %v1054_v60 = vrot.slane %v1052_v57, 4  ;;  %v8267_v63 = vor.u32 %v9155_v43, %v8264_v45  ;;  %v289_v1 = vld [vmem:[%s9732_s14 + $0x68] sm:$0xf]  ;;  %v532_v10 = vrot.slane %v530_v0, 4  ;;  %6327 = vmatpush.bf16.msrb.mxu0 %v9250_v48 }
  0xae   : > { %777 = vst [vmem:[#allocation2 + $0x508] sm:$0xf] %v723_v37  ;;  %v10251_v62 = vor.u32 %v1061_v61, %v1058_v49  ;;  %v536_v3 = vshll.u32 %v289_v1, 16  ;;  %v540_v4 = vshrl.u32 %v289_v1, 16  ;;  %v807_v6 = vld [vmem:[%s9732_s14 + $0x68] sm:$0xf] }
  0xaf   : > { %778 = vst [vmem:[#allocation2 + $0x548] sm:$0xf] %v726_v34  ;;  %v8318_v13 = vld [vmem:[#allocation2 + $0x480] sm:$0xf]  ;;  %v9170_v16 = vld [vmem:[#allocation2 + $0x484] sm:$0xf]  ;;  %v533_v21 = vor.u32 %v532_v10, %v10232_v39 }
  0xb0   : > { %1128 = vst [vmem:[#allocation2 + $0x50c] sm:$0xf] %v1053_v58  ;;  %v1063_v2 = vsel %vm9830_vm8, %v1054_v60, %v10251_v62  ;;  %v538_v11 = vrot.slane %v536_v3, 5  ;;  %v9178_v15 = vld [vmem:[#allocation2 + $0x4bc] sm:$0xf0]  ;;  %v542_v19 = vrot.slane %v540_v4, 4 }
  0xb1   : > { %1129 = vst [vmem:[#allocation2 + $0x54c] sm:$0xf] %v1063_v2  ;;  %v8320_v17 = vld [vmem:[#allocation2 + $0x4c0] sm:$0xf0]  ;;  %v290_v18 = vld [vmem:[%s9732_s14 + $0x6c] sm:$0x1] }
  0xb2   : > { %v8326_v20 = vld [vmem:[#allocation2 + $0x488] sm:$0xf]  ;;  %v546_v23 = vshll.u32 %v290_v18, 16  ;;  %v1066_v26 = vshrl.u32 %v807_v6, 16  ;;  %v543_v29 = vor.u32 %v542_v19, %v538_v11  ;;  %v625_v31 = vld [vmem:[%s9732_s14 + $0x6c] sm:$0x1] }
  0xb3   : > { %v624_v24 = vld [vmem:[%s9732_s14 + $0x68] sm:$0xf]  ;;  %v534_v27 = vrot.slane %v533_v21, 4  ;;  %v727_v42 = vrot.slane %v725_v41, 4  ;;  %v1069_v46 = vshll.u32 %v807_v6, 16  ;;  %v9266_v39 = vld [vmem:[%s12165_s1 + $0x180] sm:$0xff]  ;;  %v8319_v41 = vor.u32 %v9178_v15, %v8318_v13 }
  0xb4   : > { %v9179_v22 = vld [vmem:[#allocation2 + $0x4c4] sm:$0xf0]  ;;  %v728_v35 = vrot.slane %v624_v24, 5  ;;  %v548_v40 = vrot.slane %v546_v23, 5  ;;  %v9274_v25 = vld [vmem:[%s12165_s1 + $0x1c0] sm:$0xff]  ;;  %v544_v28 = vrot.slane %v543_v29, 4  ;;  %6465 = vmatpush.bf16.msrb.mxu2 %v9266_v39 }
  0xb5   : > { %v6053_v55 = vpop.f32.mrf.mxu0  ;;  %v731_v32 = vrot.slane %v625_v31, 5  ;;  %v237_v52 = vld [vmem:[%s9732_s14 + $0x64] sm:$0xf]  ;;  %v238_v54 = vld [vmem:[%s9732_s14 + $0x68] sm:$0xf]  ;;  %v8327_v37 = vor.u32 %v9179_v22, %v8326_v20  ;;  %6534 = vmatpush.bf16.msrb.mxu3 %v9274_v25  ;;  %v1064_v49 = vrot.slane %v10251_v62, 4 }
  0xb6   : > { %v6122_v56 = vpop.f32.mrf.mxu1  ;;  %261 = vst [vmem:[#allocation2 + $0x580] sm:$0xf] %v237_v52  ;;  %v549_v57 = vsel %vm9797_vm7, %v544_v28, %v548_v40  ;;  %v729_v59 = vsel %vm9774_vm6, %v727_v42, %v728_v35  ;;  %v1071_v45 = vrot.slane %v1069_v46, 6  ;;  %v9171_v61 = vld [vmem:[#allocation2 + $0x48c] sm:$0xf] }
  0xb7   : > { %v6123_v33 = vadd.f32 %v6122_v56, %v6053_v55  ;;  %v539_v55 = vsel %vm9797_vm7, %v534_v27, %v538_v11  ;;  %v1068_v56 = vrot.slane %v1066_v26, 5  ;;  %262 = vst [vmem:[#allocation2 + $0x5c0] sm:$0xf] %v238_v54  ;;  %v8328_v1 = vld [vmem:[#allocation2 + $0x4c8] sm:$0xf0] }
  0xb8   : > { %6092 = vmatmul.bf16.gmra.mxu0 %v8255_v44  ;;  %v808_v44 = vld [vmem:[%s9732_s14 + $0x6c] sm:$0x3]  ;;  %596 = vst [vmem:[#allocation2 + $0x584] sm:$0xf] %v539_v55  ;;  %v7424_v11 = vld [vmem:[%s9732_s14 + $0x1c] sm:$0xf] }
  0xb9   : > { %6161 = vmatmul.bf16.gmra.mxu1 %v8259_v50  ;;  %v730_v50 = vrot.slane %v728_v35, 4  ;;  %v1076_v58 = vshrl.u32 %v808_v44, 16  ;;  %v1079_v0 = vshll.u32 %v808_v44, 16  ;;  %597 = vst [vmem:[#allocation2 + $0x5c4] sm:$0xf] %v549_v57  ;;  %v1072_v2 = vor.u32 %v1071_v45, %v1068_v56 }
  0xba   : > { %6230 = vmatmul.bf16.gmra.mxu2 %v8263_v51  ;;  %v8323_v51 = vor.u32 %v9170_v16, %v8320_v17  ;;  %779 = vst [vmem:[#allocation2 + $0x588] sm:$0xf] %v729_v59  ;;  %v1213_v13 = vshrl.u32 %v7424_v11, 16  ;;  %v1216_v15 = vshll.u32 %v7424_v11, 16  ;;  %v8382_v29 = vld [vmem:[#allocation2 + $0x500] sm:$0xf] }
  0xbb   : > { %v1078_v3 = vrot.slane %v1076_v58, 5  ;;  %v1081_v4 = vrot.slane %v1079_v0, 6  ;;  %v1074_v6 = vrot.slane %v1072_v2, 4  ;;  %v9194_v31 = vld [vmem:[#allocation2 + $0x53c] sm:$0xf0] }
  0xbc   : > { %v1215_v24 = vrot.slane %v1213_v13, 4  ;;  %v1218_v26 = vrot.slane %v1216_v15, 5  ;;  %v9186_v35 = vld [vmem:[#allocation2 + $0x504] sm:$0xf]  ;;  %v7484_v42 = vld [vmem:[%s9732_s14 + $0x1c] sm:$0xe] }
  0xbd   : > { %v6191_v5 = vpop.f32.mrf.mxu2  ;;  %v6055_v8 = vpop.f32.mrf.mxu0  ;;  %6299 = vmatmul.bf16.gmra.mxu3 %v8267_v63  ;;  %v732_v63 = vsel %vm9774_vm6, %v730_v50, %v731_v32  ;;  %v1082_v10 = vor.u32 %v1081_v4, %v1078_v3  ;;  %v8384_v44 = vld [vmem:[#allocation2 + $0x540] sm:$0xf0]  ;;  %v7453_v48 = vld [vmem:[%s9732_s14 + $0x20] sm:$0xf]  ;;  %v8390_v25 = vld [vmem:[#allocation2 + $0x508] sm:$0xf] }
  0xbe   : > { %v6192_v7 = vadd.f32 %v6191_v5, %v6123_v33  ;;  %v6124_v9 = vpop.f32.mrf.mxu1  ;;  %780 = vst [vmem:[#allocation2 + $0x5c8] sm:$0xf] %v732_v63  ;;  %v1073_v5 = vsel %vm9830_vm8, %v1064_v49, %v1072_v2  ;;  %v1219_v46 = vor.u32 %v1218_v26, %v1215_v24  ;;  %v7452_v50 = vld [vmem:[%s9732_s14 + $0x1c] sm:$0xe]  ;;  %v10307_v32 = vld [vmem:[%s9732_s14 + $0x24] sm:$0xf] }
  0xbf   : > { %v6125_v12 = vadd.f32 %v6124_v9, %v6055_v8  ;;  %v8331_v8 = vor.u32 %v9171_v61, %v8328_v1  ;;  %v9258_v9 = vld [vmem:[%s12165_s1 + $0x140] sm:$0xff]  ;;  %1130 = vst [vmem:[#allocation2 + $0x58c] sm:$0xf] %v1073_v5  ;;  %v1083_v17 = vsel %vm9830_vm8, %v1074_v6, %v1082_v10  ;;  %v7480_v55 = vrot.slane %v7452_v50, 9  ;;  %v7400_v49 = vld [vmem:[%s9732_s14 + $0x1c] sm:$0xf] }
  0xc0   : > { %v6260_v36 = vpop.f32.mrf.mxu3  ;;  %6396 = vmatpush.bf16.msrb.mxu1 %v9258_v9  ;;  %1131 = vst [vmem:[#allocation2 + $0x5cc] sm:$0xf] %v1083_v17  ;;  %v1220_v52 = vrot.slane %v1219_v46, 4  ;;  %v1725_v56 = vshrl.u32 %v7484_v42, 16  ;;  %v1574_v57 = vrot.slane %v7453_v48, 5  ;;  %v1577_v59 = vrot.slane %v10307_v32, 5 }
  0xc1   : > { %v10266_v47 = vadd.f32 %v6260_v36, %v6192_v7  ;;  %v10300_v36 = vld [vmem:[%s9732_s14 + $0x24] sm:$0xf]  ;;  %v7401_v45 = vld [vmem:[%s9732_s14 + $0x20] sm:$0xf]  ;;  %1160 = vst [vmem:[#allocation2 + $0x10] sm:$0xf] %v7400_v49 }
  0xc2   : > { %v1232_v39 = vshll.u32 %v10300_v36, 16  ;;  %v1575_v1 = vsel %vm9774_vm6, %v7480_v55, %v1574_v57  ;;  %v1576_v2 = vrot.slane %v1574_v57, 4  ;;  %v9187_v5 = vld [vmem:[#allocation2 + $0x50c] sm:$0xf]  ;;  %1161 = vst [vmem:[#allocation2 + $0x50] sm:$0xf] %v7401_v45 }
  0xc3   : > { %v1727_v6 = vrot.slane %v1725_v56, 5  ;;  %v8392_v11 = vld [vmem:[#allocation2 + $0x548] sm:$0xf0]  ;;  %1672 = vst [vmem:[#allocation2 + $0x18] sm:$0xf] %v1575_v1  ;;  %v9289_v57 = vld [vmem:[%s12165_s1 + $0x238] sm:$0xff] }
  0xc4   : > { %v10309_v54 = vrot.slane %v1232_v39, 5  ;;  %v8446_v55 = vld [vmem:[#allocation2 + $0x580] sm:$0xf]  ;;  %v9313_v49 = vld [vmem:[%s12165_s1 + $0x2f8] sm:$0xff]  ;;  %6596 = vmatpush.bf16.msra.mxu0 %v9289_v57 }
  0xc5   : > { %v6193_v30 = vpop.f32.mrf.mxu2  ;;  %v6058_v43 = vpop.f32.mrf.mxu0  ;;  %v9210_v56 = vld [vmem:[#allocation2 + $0x5bc] sm:$0xf0]  ;;  %6803 = vmatpush.bf16.msra.mxu3 %v9313_v49 }
  0xc6   : > { %v6194_v33 = vadd.f32 %v6193_v30, %v6125_v12  ;;  %v6127_v34 = vpop.f32.mrf.mxu1  ;;  %v7425_v12 = vld [vmem:[%s9732_s14 + $0x20] sm:$0xf] }
  0xc7   : > { %v6128_v60 = vadd.f32 %v6127_v34, %v6058_v43  ;;  %v1222_v18 = vshll.u32 %v7425_v12, 16  ;;  %v1226_v19 = vshrl.u32 %v7425_v12, 16  ;;  %v8383_v43 = vor.u32 %v9194_v31, %v8382_v29  ;;  %v7427_v31 = vld [vmem:[%s9732_s14 + $0x28] sm:$0xf] }
  0xc8   : > { %6097 = vmatmul.bf16.gmra.mxu0 %v8319_v41  ;;  %v6262_v62 = vpop.f32.mrf.mxu3  ;;  %v8387_v34 = vor.u32 %v9186_v35, %v8384_v44  ;;  %v1578_v12 = vsel %vm9774_vm6, %v1576_v2, %v1577_v59  ;;  %v1246_v39 = vshrl.u32 %v7427_v31, 16 }
  0xc9   : > { %6166 = vmatmul.bf16.gmra.mxu1 %v8323_v51  ;;  %v10290_v7 = vadd.f32 %v6262_v62, %v6194_v33  ;;  %v1224_v27 = vrot.slane %v1222_v18, 5  ;;  %v1228_v40 = vrot.slane %v1226_v19, 4  ;;  %v9195_v51 = vld [vmem:[#allocation2 + $0x544] sm:$0xf0]  ;;  %v7485_v33 = vld [vmem:[%s9732_s14 + $0x20] sm:$0xf] }
  0xca   : > { %6235 = vmatmul.bf16.gmra.mxu2 %v8327_v37  ;;  %v8391_v63 = vor.u32 %v9195_v51, %v8390_v25  ;;  %v1734_v9 = vshrl.u32 %v7485_v33, 16  ;;  %v1737_v13 = vshll.u32 %v7485_v33, 16  ;;  %1673 = vst [vmem:[#allocation2 + $0x58] sm:$0xf] %v1578_v12  ;;  %v10338_v51 = vld [vmem:[%s9732_s14 + $0x28] sm:$0xf] }
  0xcb   : > { %v1229_v28 = vor.u32 %v1228_v40, %v1224_v27  ;;  %v1225_v58 = vsel %vm9797_vm7, %v1220_v52, %v1224_v27  ;;  %v1236_v40 = vshrl.u32 %v10300_v36, 16  ;;  %v9202_v33 = vld [vmem:[#allocation2 + $0x584] sm:$0xf] }
  0xcc   : > { %1492 = vst [vmem:[#allocation2 + $0x14] sm:$0xf] %v1225_v58  ;;  %v1736_v17 = vrot.slane %v1734_v9, 5  ;;  %v1739_v19 = vrot.slane %v1737_v13, 6  ;;  %v7402_v12 = vld [vmem:[%s9732_s14 + $0x24] sm:$0xf] }
  0xcd   : > { %v6196_v16 = vpop.f32.mrf.mxu2  ;;  %v6060_v21 = vpop.f32.mrf.mxu0  ;;  %6304 = vmatmul.bf16.gmra.mxu3 %v8331_v8  ;;  %v1230_v37 = vrot.slane %v1229_v28, 4  ;;  %v1728_v8 = vshll.u32 %v7484_v42, 16  ;;  %v1242_v42 = vshll.u32 %v7427_v31, 16  ;;  %v7403_v13 = vld [vmem:[%s9732_s14 + $0x28] sm:$0xf] }
  0xce   : > { %v6197_v20 = vadd.f32 %v6196_v16, %v6128_v60  ;;  %v6129_v23 = vpop.f32.mrf.mxu1  ;;  %v7486_v60 = vld [vmem:[%s9732_s14 + $0x24] sm:$0xf]  ;;  %v1740_v29 = vor.u32 %v1739_v19, %v1736_v17  ;;  %1162 = vst [vmem:[#allocation2 + $0x90] sm:$0xf] %v7402_v12  ;;  %v7457_v12 = vld [vmem:[%s9732_s14 + $0x30] sm:$0xf] }
  0xcf   : > { %v6130_v22 = vadd.f32 %v6129_v23, %v6060_v21  ;;  %v1235_v0 = vsel %vm9797_vm7, %v1230_v37, %v10309_v54  ;;  %v1744_v15 = vshrl.u32 %v7486_v60, 16  ;;  %v1730_v16 = vrot.slane %v1728_v8, 6  ;;  %v9305_v37 = vld [vmem:[%s12165_s1 + $0x2b8] sm:$0xff]  ;;  %1163 = vst [vmem:[#allocation2 + $0xd0] sm:$0xf] %v7403_v13 }
  0xd0   : > { %v6265_v41 = vpop.f32.mrf.mxu3  ;;  %1493 = vst [vmem:[#allocation2 + $0x54] sm:$0xf] %v1235_v0  ;;  %v1747_v18 = vshll.u32 %v7486_v60, 16  ;;  %v1742_v46 = vrot.slane %v1740_v29, 4  ;;  %v1244_v58 = vrot.slane %v1242_v42, 5  ;;  %6734 = vmatpush.bf16.msra.mxu2 %v9305_v37  ;;  %v1754_v0 = vshrl.u32 %v10338_v51, 16 }
  0xd1   : > { %v10311_v30 = vadd.f32 %v6265_v41, %v6197_v20  ;;  %v1746_v20 = vrot.slane %v1744_v15, 5  ;;  %v1731_v23 = vor.u32 %v1730_v16, %v1727_v6  ;;  %v1238_v41 = vrot.slane %v1236_v40, 4  ;;  %v9211_v60 = vld [vmem:[#allocation2 + $0x5c4] sm:$0xf0]  ;;  %v8456_v42 = vld [vmem:[#allocation2 + $0x5c8] sm:$0xf0] }
  0xd2   : > { %v1749_v24 = vrot.slane %v1747_v18, 6  ;;  %v1579_v8 = vrot.slane %v1577_v59, 4  ;;  %v1756_v31 = vrot.slane %v1754_v0, 5  ;;  %v7429_v37 = vld [vmem:[%s9732_s14 + $0x30] sm:$0xf] }
  0xd3   : > { %v1732_v35 = vrot.slane %v1731_v23, 4  ;;  %v1239_v45 = vor.u32 %v1238_v41, %v10309_v54  ;;  %v1266_v49 = vshrl.u32 %v7429_v37, 16  ;;  %v9037_v13 = vld [vmem:[#allocation2 + $0x54] sm:$0xf0] }
  0xd4   : > { %v10332_v27 = vor.u32 %v1749_v24, %v1746_v20 }
  0xd5   : > { %v6198_v61 = vpop.f32.mrf.mxu2  ;;  %v6063_v4 = vpop.f32.mrf.mxu0  ;;  %v1741_v50 = vsel %vm9830_vm8, %v1732_v35, %v1740_v29  ;;  %v1240_v2 = vrot.slane %v1239_v45, 4  ;;  %v1757_v35 = vshll.u32 %v10338_v51, 16 }
  0xd6   : > { %v6199_v3 = vadd.f32 %v6198_v61, %v6130_v22  ;;  %v6132_v62 = vpop.f32.mrf.mxu1  ;;  %v8395_v22 = vor.u32 %v9187_v5, %v8392_v11  ;;  %v1751_v36 = vsel %vm9830_vm8, %v1742_v46, %v10332_v27  ;;  %2020 = vst [vmem:[#allocation2 + $0x1c] sm:$0xf] %v1741_v50  ;;  %v10354_v61 = vld [vmem:[%s9732_s14 + $0x2c] sm:$0xf]  ;;  %v9297_v5 = vld [vmem:[%s12165_s1 + $0x278] sm:$0xff]  ;;  %v8447_v11 = vor.u32 %v9210_v56, %v8446_v55 }
  0xd7   : > { %v6133_v10 = vadd.f32 %v6132_v62, %v6063_v4  ;;  %2021 = vst [vmem:[#allocation2 + $0x5c] sm:$0xf] %v1751_v36  ;;  %v7455_v4 = vld [vmem:[%s9732_s14 + $0x28] sm:$0xf]  ;;  %v10360_v62 = vld [vmem:[%s9732_s14 + $0x2c] sm:$0xf]  ;;  %v1245_v15 = vsel %vm9797_vm7, %v1240_v2, %v1244_v58  ;;  %6665 = vmatpush.bf16.msra.mxu1 %v9297_v5 }
  0xd8   : > { %6102 = vmatmul.bf16.gmra.mxu0 %v8383_v43  ;;  %v6267_v21 = vpop.f32.mrf.mxu3  ;;  %v8448_v43 = vld [vmem:[#allocation2 + $0x5c0] sm:$0xf0]  ;;  %v1580_v9 = vrot.slane %v7455_v4, 5  ;;  %v1583_v17 = vrot.slane %v10360_v62, 5  ;;  %1494 = vst [vmem:[#allocation2 + $0x94] sm:$0xf] %v1245_v15 }
  0xd9   : > { %6171 = vmatmul.bf16.gmra.mxu1 %v8387_v34  ;;  %v10329_v26 = vadd.f32 %v6267_v21, %v6199_v3  ;;  %v8454_v34 = vld [vmem:[#allocation2 + $0x588] sm:$0xf]  ;;  %v1252_v3 = vshll.u32 %v10354_v61, 16  ;;  %v8451_v19 = vor.u32 %v9202_v33, %v8448_v43  ;;  %v1256_v36 = vshrl.u32 %v10354_v61, 16  ;;  %v9036_v2 = vld [vmem:[#allocation2 + $0x4c] sm:$0xf0] }
  0xda   : > { %6240 = vmatmul.bf16.gmra.mxu2 %v8391_v63  ;;  %v1248_v63 = vrot.slane %v1246_v39, 4  ;;  %v8455_v20 = vor.u32 %v9211_v60, %v8454_v34  ;;  %v1582_v32 = vrot.slane %v1580_v9, 4  ;;  %v1581_v29 = vsel %vm9774_vm6, %v1579_v8, %v1580_v9  ;;  %v7760_v4 = vld [vmem:[#allocation2 + $0x50] sm:$0xf0]  ;;  %v7766_v8 = vld [vmem:[#allocation2 + $0x18] sm:$0xf] }
  0xdb   : > { %v10374_v16 = vrot.slane %v1252_v3, 5  ;;  %1674 = vst [vmem:[#allocation2 + $0x98] sm:$0xf] %v1581_v29  ;;  %v1262_v43 = vshll.u32 %v7429_v37, 16  ;;  %v9028_v3 = vld [vmem:[#allocation2 + $0x14] sm:$0xf] }
  0xdc   : > { %v1249_v6 = vor.u32 %v1248_v63, %v1244_v58  ;;  %v1584_v46 = vsel %vm9774_vm6, %v1582_v32, %v1583_v17  ;;  %v1258_v63 = vrot.slane %v1256_v36, 4  ;;  %v7430_v5 = vld [vmem:[%s9732_s14 + $0x34] sm:$0x1] }
  0xdd   : > { %v6201_v44 = vpop.f32.mrf.mxu2  ;;  %v6065_v25 = vpop.f32.mrf.mxu0  ;;  %6309 = vmatmul.bf16.gmra.mxu3 %v8395_v22  ;;  %v9203_v22 = vld [vmem:[#allocation2 + $0x58c] sm:$0xf]  ;;  %1675 = vst [vmem:[#allocation2 + $0xd8] sm:$0xf] %v1584_v46  ;;  %v1272_v15 = vshll.u32 %v7430_v5, 16  ;;  %v9288_v29 = vld [vmem:[%s12165_s1 + $0x230] sm:$0xff] }
  0xde   : > { %v6202_v48 = vadd.f32 %v6201_v44, %v6133_v10  ;;  %v6134_v28 = vpop.f32.mrf.mxu1  ;;  %v7488_v10 = vld [vmem:[%s9732_s14 + $0x2c] sm:$0xf]  ;;  %v1250_v21 = vrot.slane %v1249_v6, 4  ;;  %v8459_v56 = vor.u32 %v9203_v22, %v8456_v42  ;;  %v7489_v6 = vld [vmem:[%s9732_s14 + $0x30] sm:$0xf]  ;;  %v1259_v9 = vor.u32 %v1258_v63, %v10374_v16  ;;  %6597 = vmatpush.bf16.msra.mxu0 %v9288_v29 }
  0xdf   : > { %v6135_v52 = vadd.f32 %v6134_v28, %v6065_v25  ;;  %v1764_v39 = vshrl.u32 %v7488_v10, 16  ;;  %v1759_v25 = vrot.slane %v1757_v35, 6  ;;  %v1767_v28 = vshll.u32 %v7488_v10, 16  ;;  %v7405_v46 = vld [vmem:[%s9732_s14 + $0x30] sm:$0xf] }
  0xe0   : > { %v6270_v1 = vpop.f32.mrf.mxu3  ;;  %v1255_v44 = vsel %vm9797_vm7, %v1250_v21, %v10374_v16  ;;  %v1264_v10 = vrot.slane %v1262_v43, 5  ;;  %v1260_v21 = vrot.slane %v1259_v9, 4  ;;  %v9304_v16 = vld [vmem:[%s12165_s1 + $0x2b0] sm:$0xff]  ;;  %v1274_v35 = vrot.slane %v1272_v15, 5  ;;  %1165 = vst [vmem:[#allocation2 + $0x150] sm:$0xf] %v7405_v46 }
  0xe1   : > { %v10362_v54 = vadd.f32 %v6270_v1, %v6202_v48  ;;  %1495 = vst [vmem:[#allocation2 + $0xd4] sm:$0xf] %v1255_v44  ;;  %v1752_v48 = vrot.slane %v10332_v27, 4  ;;  %v1766_v50 = vrot.slane %v1764_v39, 5  ;;  %v1760_v51 = vor.u32 %v1759_v25, %v1756_v31  ;;  %v7758_v1 = vld [vmem:[#allocation2 + $0x10] sm:$0xf]  ;;  %6735 = vmatpush.bf16.msra.mxu2 %v9304_v16 }
  0xe2   : > { %v9312_v31 = vld [vmem:[%s12165_s1 + $0x2f0] sm:$0xff]  ;;  %v7763_v42 = vor.u32 %v9028_v3, %v7760_v4  ;;  %v7404_v44 = vld [vmem:[%s9732_s14 + $0x2c] sm:$0xf]  ;;  %v1265_v39 = vsel %vm9797_vm7, %v1260_v21, %v1264_v10  ;;  %v7767_v25 = vor.u32 %v9037_v13, %v7766_v8  ;;  %v1777_v37 = vshll.u32 %v7489_v6, 16  ;;  %v7768_v43 = vld [vmem:[#allocation2 + $0x58] sm:$0xf0] }
  0xe3   : > { %v1761_v27 = vsel %vm9830_vm8, %v1752_v48, %v1760_v51  ;;  %v1762_v57 = vrot.slane %v1760_v51, 4  ;;  %1164 = vst [vmem:[#allocation2 + $0x110] sm:$0xf] %v7404_v44  ;;  %6804 = vmatpush.bf16.msra.mxu3 %v9312_v31  ;;  %v9296_v4 = vld [vmem:[%s12165_s1 + $0x270] sm:$0xff]  ;;  %v10441_v29 = vld [vmem:[%s9732_s14 + $0x40] sm:$0xf] }
  0xe4   : > { %2022 = vst [vmem:[#allocation2 + $0x9c] sm:$0xf] %v1761_v27  ;;  %6666 = vmatpush.bf16.msra.mxu1 %v9296_v4  ;;  %v9044_v16 = vld [vmem:[#allocation2 + $0x94] sm:$0xf]  ;;  %v7491_v31 = vld [vmem:[%s9732_s14 + $0x38] sm:$0xe] }
  0xe5   : > { %v6203_v18 = vpop.f32.mrf.mxu2  ;;  %v6068_v23 = vpop.f32.mrf.mxu0  ;;  %1496 = vst [vmem:[#allocation2 + $0x114] sm:$0xf] %v1265_v39  ;;  %v1296_v44 = vshll.u32 %v10441_v29, 16  ;;  %v7459_v46 = vld [vmem:[%s9732_s14 + $0x38] sm:$0xe] }
  0xe6   : > { %v6204_v59 = vadd.f32 %v6203_v18, %v6135_v52  ;;  %v6137_v24 = vpop.f32.mrf.mxu1  ;;  %v1769_v52 = vrot.slane %v1767_v28, 6  ;;  %v7458_v18 = vld [vmem:[%s9732_s14 + $0x34] sm:$0x1] }
  0xe7   : > { %v6138_v40 = vadd.f32 %v6137_v24, %v6068_v23  ;;  %v7490_v23 = vld [vmem:[%s9732_s14 + $0x34] sm:$0x3]  ;;  %v1774_v24 = vshrl.u32 %v7489_v6, 16  ;;  %v1589_v62 = vrot.slane %v7458_v18, 5  ;;  %v7432_v6 = vld [vmem:[%s9732_s14 + $0x3c] sm:$0xf] }
  0xe8   : > { %6107 = vmatmul.bf16.gmra.mxu0 %v8447_v11  ;;  %v6272_v41 = vpop.f32.mrf.mxu3  ;;  %v10394_v33 = vor.u32 %v1769_v52, %v1766_v50  ;;  %v1268_v11 = vrot.slane %v1266_v49, 4  ;;  %v1784_v27 = vshrl.u32 %v7490_v23, 16  ;;  %v1286_v13 = vshll.u32 %v7432_v6, 16 }
  0xe9   : > { %6176 = vmatmul.bf16.gmra.mxu1 %v8451_v19  ;;  %v10388_v55 = vadd.f32 %v6272_v41, %v6204_v59  ;;  %v1586_v19 = vrot.slane %v7457_v12, 5  ;;  %v1585_v59 = vrot.slane %v1583_v17, 4  ;;  %v7759_v17 = vor.u32 %v9036_v2, %v7758_v1 }
  0xea   : > { %6245 = vmatmul.bf16.gmra.mxu2 %v8455_v20  ;;  %v1771_v61 = vsel %vm9830_vm8, %v1762_v57, %v10394_v33  ;;  %v1269_v32 = vor.u32 %v1268_v11, %v1264_v10  ;;  %v1776_v36 = vrot.slane %v1774_v24, 5  ;;  %v1290_v15 = vshrl.u32 %v7432_v6, 16  ;;  %v9052_v24 = vld [vmem:[#allocation2 + $0xcc] sm:$0xf0] }
  0xeb   : > { %2023 = vst [vmem:[#allocation2 + $0xdc] sm:$0xf] %v1771_v61  ;;  %v1587_v50 = vsel %vm9774_vm6, %v1585_v59, %v1586_v19  ;;  %v1786_v61 = vrot.slane %v1784_v27, 5 }
  0xec   : > { %v1270_v28 = vrot.slane %v1269_v32, 4  ;;  %1676 = vst [vmem:[#allocation2 + $0x118] sm:$0xf] %v1587_v50  ;;  %v10448_v50 = vld [vmem:[%s9732_s14 + $0x40] sm:$0xf] }
  0xed   : > { %v6206_v34 = vpop.f32.mrf.mxu2  ;;  %v6070_v58 = vpop.f32.mrf.mxu0  ;;  %6314 = vmatmul.bf16.gmra.mxu3 %v8459_v56  ;;  %v9029_v56 = vld [vmem:[#allocation2 + $0x1c] sm:$0xf]  ;;  %v1596_v27 = vrot.slane %v10448_v50, 5 }
  0xee   : > { %v6207_v45 = vadd.f32 %v6206_v34, %v6138_v40  ;;  %v6139_v60 = vpop.f32.mrf.mxu1  ;;  %v1588_v40 = vrot.slane %v1586_v19, 4  ;;  %v1275_v34 = vsel %vm9797_vm7, %v1270_v28, %v1274_v35  ;;  %v7771_v3 = vor.u32 %v9029_v56, %v7768_v43  ;;  %v7824_v35 = vld [vmem:[#allocation2 + $0xd0] sm:$0xf0]  ;;  %v7460_v28 = vld [vmem:[%s9732_s14 + $0x3c] sm:$0xf] }
  0xef   : > { %v6140_v0 = vadd.f32 %v6139_v60, %v6070_v58  ;;  %1497 = vst [vmem:[#allocation2 + $0x154] sm:$0xf] %v1275_v34  ;;  %v1772_v58 = vrot.slane %v10394_v33, 4  ;;  %v1779_v60 = vrot.slane %v1777_v37, 6  ;;  %v7431_v33 = vld [vmem:[%s9732_s14 + $0x38] sm:$0xf]  ;;  %v7827_v43 = vor.u32 %v9044_v16, %v7824_v35 }
  0xf0   : > { %v6275_v20 = vpop.f32.mrf.mxu3  ;;  %v1590_v49 = vsel %vm9774_vm6, %v1588_v40, %v1589_v62  ;;  %v1277_v10 = vshrl.u32 %v7431_v33, 16  ;;  %v1280_v11 = vshll.u32 %v7431_v33, 16  ;;  %v1288_v62 = vrot.slane %v1286_v13, 5  ;;  %v9053_v56 = vld [vmem:[#allocation2 + $0xd4] sm:$0xf0] }
  0xf1   : > { %v10407_v22 = vadd.f32 %v6275_v20, %v6207_v45  ;;  %v1787_v45 = vshll.u32 %v7490_v23, 16  ;;  %1677 = vst [vmem:[#allocation2 + $0x158] sm:$0xf] %v1590_v49  ;;  %v1780_v1 = vor.u32 %v1779_v60, %v1776_v36  ;;  %v7822_v23 = vld [vmem:[#allocation2 + $0x90] sm:$0xf]  ;;  %v10452_v36 = vrot.slane %v1296_v44, 5 }
  0xf2   : > { %v1279_v32 = vrot.slane %v1277_v10, 4  ;;  %v1282_v40 = vrot.slane %v1280_v11, 5  ;;  %v1593_v37 = vrot.slane %v7460_v28, 5  ;;  %v7406_v34 = vld [vmem:[%s9732_s14 + $0x38] sm:$0xf]  ;;  %v1300_v35 = vshrl.u32 %v10441_v29, 16 }
  0xf3   : > { %v1789_v63 = vrot.slane %v1787_v45, 6  ;;  %v1781_v8 = vsel %vm9830_vm8, %v1772_v58, %v1780_v1  ;;  %v1782_v9 = vrot.slane %v1780_v1, 4  ;;  %v7407_v49 = vld [vmem:[%s9732_s14 + $0x3c] sm:$0xf]  ;;  %1166 = vst [vmem:[#allocation2 + $0x190] sm:$0xf] %v7406_v34 }
  0xf4   : > { %2024 = vst [vmem:[#allocation2 + $0x11c] sm:$0xf] %v1781_v8  ;;  %v7492_v45 = vld [vmem:[%s9732_s14 + $0x3c] sm:$0xf]  ;;  %v7493_v33 = vld [vmem:[%s9732_s14 + $0x40] sm:$0xf] }
  0xf5   : > { %v6208_v48 = vpop.f32.mrf.mxu2  ;;  %v6073_v51 = vpop.f32.mrf.mxu0  ;;  %v1790_v5 = vor.u32 %v1789_v63, %v1786_v61  ;;  %1167 = vst [vmem:[#allocation2 + $0x1d0] sm:$0xf] %v7407_v49  ;;  %v9045_v8 = vld [vmem:[#allocation2 + $0x9c] sm:$0xf] }
  0xf6   : > { %v6209_v41 = vadd.f32 %v6208_v48, %v6140_v0  ;;  %v6142_v52 = vpop.f32.mrf.mxu1  ;;  %v1283_v48 = vor.u32 %v1282_v40, %v1279_v32  ;;  %v10482_v34 = vld [vmem:[#allocation2 + $0x150] sm:$0xf0] }
  0xf7   : > { %v6143_v57 = vadd.f32 %v6142_v52, %v6073_v51  ;;  %v1791_v21 = vsel %vm9830_vm8, %v1782_v9, %v1790_v5  ;;  %v1793_v51 = vshrl.u32 %v7491_v31, 16  ;;  %v7832_v9 = vld [vmem:[#allocation2 + $0xd8] sm:$0xf0] }
  0xf8   : > { %6328 = vmatmul.bf16.vlgmr.msrb.gmra.mxu0 %v7759_v17  ;;  %v6277_v0 = vpop.f32.mrf.mxu3  ;;  %2025 = vst [vmem:[#allocation2 + $0x15c] sm:$0xf] %v1791_v21  ;;  %v1292_v17 = vrot.slane %v1290_v15, 4  ;;  %v1284_v60 = vrot.slane %v1283_v48, 4  ;;  %v1796_v15 = vshll.u32 %v7491_v31, 16  ;;  %v1815_v21 = vshll.u32 %v7493_v33, 16 }
  0xf9   : > { %6397 = vmatmul.bf16.vlgmr.msrb.gmra.mxu1 %v7763_v42  ;;  %v10429_v2 = vadd.f32 %v6277_v0, %v6209_v41  ;;  %v7830_v42 = vld [vmem:[#allocation2 + $0x98] sm:$0xf]  ;;  %v7481_v41 = vrot.slane %v7459_v46, 9  ;;  %v1595_v0 = vrot.slane %v1593_v37, 4  ;;  %v1795_v13 = vrot.slane %v1793_v51, 5 }
  0xfa   : > { %6466 = vmatmul.bf16.vlgmr.msrb.gmra.mxu2 %v7767_v25  ;;  %v1293_v25 = vor.u32 %v1292_v17, %v1288_v62  ;;  %v7831_v5 = vor.u32 %v9053_v56, %v7830_v42  ;;  %v1289_v10 = vsel %vm9797_vm7, %v1284_v60, %v1288_v62  ;;  %v7434_v62 = vld [vmem:[%s9732_s14 + $0x44] sm:$0xf]  ;;  %v1817_v42 = vrot.slane %v1815_v21, 6  ;;  %v10476_v51 = vld [vmem:[#allocation2 + $0x14c] sm:$0xf0] }
  0xfb   : > { %v1594_v63 = vsel %vm9774_vm6, %v7481_v41, %v1593_v37  ;;  %1498 = vst [vmem:[#allocation2 + $0x194] sm:$0xf] %v1289_v10  ;;  %v1306_v44 = vshll.u32 %v7434_v62, 16  ;;  %v10474_v41 = vld [vmem:[#allocation2 + $0x110] sm:$0xf]  ;;  %v1310_v29 = vshrl.u32 %v7434_v62, 16 }
  0xfc   : > { %v1294_v61 = vrot.slane %v1293_v25, 4  ;;  %1678 = vst [vmem:[#allocation2 + $0x198] sm:$0xf] %v1594_v63  ;;  %v1302_v60 = vrot.slane %v1300_v35, 4  ;;  %v10492_v63 = vld [vmem:[#allocation2 + $0x154] sm:$0xf0]  ;;  %v7887_v10 = vor.u32 %v10476_v51, %v10474_v41 }
  0xfd   : > { %v6211_v12 = vpop.f32.mrf.mxu2  ;;  %v6075_v19 = vpop.f32.mrf.mxu0  ;;  %6535 = vmatmul.bf16.vlgmr.msrb.gmra.mxu3 %v7771_v3  ;;  %v7495_v21 = vld [vmem:[%s9732_s14 + $0x48] sm:$0xf] }
  0xfe   : > { %v6212_v18 = vadd.f32 %v6211_v12, %v6143_v57  ;;  %v6144_v20 = vpop.f32.mrf.mxu1  ;;  %v7823_v57 = vor.u32 %v9052_v24, %v7822_v23  ;;  %v1299_v11 = vsel %vm9797_vm7, %v1294_v61, %v10452_v36  ;;  %v1597_v12 = vsel %vm9774_vm6, %v1595_v0, %v1596_v27  ;;  %v10490_v61 = vld [vmem:[#allocation2 + $0x118] sm:$0xf] }
  0xff   : > { %v6145_v59 = vadd.f32 %v6144_v20, %v6075_v19  ;;  %1499 = vst [vmem:[#allocation2 + $0x1d4] sm:$0xf] %v1299_v11  ;;  %v1805_v19 = vshll.u32 %v7492_v45, 16  ;;  %v1812_v20 = vshrl.u32 %v7493_v33, 16  ;;  %v1798_v23 = vrot.slane %v1796_v15, 6 }
 0x100   : > { %v6280_v39 = vpop.f32.mrf.mxu3  ;;  %1679 = vst [vmem:[#allocation2 + $0x1d8] sm:$0xf] %v1597_v12  ;;  %v1303_v33 = vor.u32 %v1302_v60, %v10452_v36  ;;  %v1312_v11 = vrot.slane %v1310_v29, 4  ;;  %v9295_v36 = vld [vmem:[%s12165_s1 + $0x268] sm:$0xff]  ;;  %v7895_v62 = vor.u32 %v10492_v63, %v10490_v61  ;;  %v7896_v51 = vld [vmem:[#allocation2 + $0x158] sm:$0xf0] }
 0x101   : > { %v10450_v52 = vadd.f32 %v6280_v39, %v6212_v18  ;;  %v1802_v18 = vshrl.u32 %v7492_v45, 16  ;;  %v1807_v40 = vrot.slane %v1805_v19, 6  ;;  %v1814_v31 = vrot.slane %v1812_v20, 5  ;;  %v9303_v45 = vld [vmem:[%s12165_s1 + $0x2a8] sm:$0xff]  ;;  %6667 = vmatpush.bf16.msra.mxu1 %v9295_v36 }
 0x102   : > { %v1799_v17 = vor.u32 %v1798_v23, %v1795_v13  ;;  %6736 = vmatpush.bf16.msra.mxu2 %v9303_v45  ;;  %v10512_v13 = vld [vmem:[%s9732_s14 + $0x48] sm:$0xf]  ;;  %v1598_v19 = vrot.slane %v1596_v27, 4  ;;  %v7409_v23 = vld [vmem:[%s9732_s14 + $0x44] sm:$0xf]  ;;  %v1832_v29 = vshrl.u32 %v7495_v21, 16 }
 0x103   : > { %v1804_v24 = vrot.slane %v1802_v18, 5  ;;  %v10478_v37 = vor.u32 %v1817_v42, %v1814_v31  ;;  %v1304_v18 = vrot.slane %v1303_v33, 4  ;;  %1169 = vst [vmem:[#allocation2 + $0x250] sm:$0xf] %v7409_v23  ;;  %v7958_v23 = vld [vmem:[#allocation2 + $0x198] sm:$0xf] }
 0x104   : > { %v1800_v56 = vrot.slane %v1799_v17, 4 }
 0x105   : > { %v6213_v58 = vpop.f32.mrf.mxu2  ;;  %v6078_v3 = vpop.f32.mrf.mxu0  ;;  %v1808_v39 = vor.u32 %v1807_v40, %v1804_v24  ;;  %v1602_v40 = vrot.slane %v10512_v13, 5 }
 0x106   : > { %v6214_v1 = vadd.f32 %v6213_v58, %v6145_v59  ;;  %v6147_v4 = vpop.f32.mrf.mxu1  ;;  %v7835_v59 = vor.u32 %v9045_v8, %v7832_v9  ;;  %v9287_v58 = vld [vmem:[%s12165_s1 + $0x228] sm:$0xff]  ;;  %v7494_v8 = vld [vmem:[%s9732_s14 + $0x44] sm:$0xf] }
 0x107   : > { %v6148_v6 = vadd.f32 %v6147_v4, %v6078_v3  ;;  %v1810_v49 = vrot.slane %v1808_v39, 4  ;;  %v1809_v0 = vsel %vm9830_vm8, %v1800_v56, %v1808_v39  ;;  %v10500_v3 = vld [vmem:[%s9732_s14 + $0x48] sm:$0xf]  ;;  %v1308_v4 = vrot.slane %v1306_v44, 5  ;;  %6598 = vmatpush.bf16.msra.mxu0 %v9287_v58  ;;  %v9061_v39 = vld [vmem:[#allocation2 + $0x11c] sm:$0xf] }
 0x108   : > { %6333 = vmatmul.bf16.gmra.mxu0 %v7823_v57  ;;  %v6282_v32 = vpop.f32.mrf.mxu3  ;;  %2026 = vst [vmem:[#allocation2 + $0x19c] sm:$0xf] %v1809_v0  ;;  %v1316_v12 = vshll.u32 %v10500_v3, 16  ;;  %v1834_v58 = vrot.slane %v1832_v29, 5  ;;  %v1604_v29 = vrot.slane %v1602_v40, 4 }
 0x109   : > { %6402 = vmatmul.bf16.gmra.mxu1 %v7827_v43  ;;  %v10470_v16 = vadd.f32 %v6282_v32, %v6214_v1  ;;  %v10480_v43 = vld [vmem:[#allocation2 + $0x114] sm:$0xf]  ;;  %v9311_v1 = vld [vmem:[%s12165_s1 + $0x2e8] sm:$0xff]  ;;  %v1313_v24 = vor.u32 %v1312_v11, %v1308_v4  ;;  %v1309_v50 = vsel %vm9797_vm7, %v1304_v18, %v1308_v4  ;;  %v1320_v4 = vshrl.u32 %v10500_v3, 16 }
 0x10a   : > { %6471 = vmatmul.bf16.gmra.mxu2 %v7831_v5  ;;  %v1819_v5 = vsel %vm9830_vm8, %v1810_v49, %v10478_v37  ;;  %6805 = vmatpush.bf16.msra.mxu3 %v9311_v1  ;;  %v7891_v32 = vor.u32 %v10480_v43, %v10482_v34  ;;  %v10526_v35 = vrot.slane %v1316_v12, 5  ;;  %1500 = vst [vmem:[#allocation2 + $0x214] sm:$0xf] %v1309_v50  ;;  %v1835_v43 = vshll.u32 %v7495_v21, 16  ;;  %v9084_v21 = vld [vmem:[#allocation2 + $0x1cc] sm:$0xf0] }
 0x10b   : > { %2027 = vst [vmem:[#allocation2 + $0x1dc] sm:$0xf] %v1819_v5  ;;  %v1820_v34 = vrot.slane %v10478_v37, 4  ;;  %v7899_v1 = vor.u32 %v9061_v39, %v7896_v51  ;;  %v7436_v37 = vld [vmem:[%s9732_s14 + $0x4c] sm:$0xf]  ;;  %v1322_v18 = vrot.slane %v1320_v4, 4 }
 0x10c   : > { %v1837_v60 = vrot.slane %v1835_v43, 6  ;;  %v9286_v51 = vld [vmem:[%s12165_s1 + $0x220] sm:$0xff] }
 0x10d   : > { %v6216_v46 = vpop.f32.mrf.mxu2  ;;  %v6080_v25 = vpop.f32.mrf.mxu0  ;;  %6540 = vmatmul.bf16.gmra.mxu3 %v7835_v59  ;;  %v7408_v59 = vld [vmem:[%s9732_s14 + $0x40] sm:$0xf]  ;;  %6599 = vmatpush.bf16.msra.mxu0 %v9286_v51 }
 0x10e   : > { %v6217_v48 = vadd.f32 %v6216_v46, %v6148_v6  ;;  %v6149_v28 = vpop.f32.mrf.mxu1  ;;  %v7462_v6 = vld [vmem:[%s9732_s14 + $0x44] sm:$0xf]  ;;  %1168 = vst [vmem:[#allocation2 + $0x210] sm:$0xf] %v7408_v59  ;;  %v10546_v5 = vor.u32 %v1837_v60, %v1834_v58  ;;  %v9076_v59 = vld [vmem:[#allocation2 + $0x194] sm:$0xf] }
 0x10f   : > { %v6150_v57 = vadd.f32 %v6149_v28, %v6080_v25  ;;  %v1599_v20 = vrot.slane %v7462_v6, 5  ;;  %v1822_v25 = vshrl.u32 %v7494_v8, 16  ;;  %v1825_v28 = vshll.u32 %v7494_v8, 16 }
 0x110   : > { %v6285_v9 = vpop.f32.mrf.mxu3  ;;  %v1326_v8 = vshll.u32 %v7436_v37, 16 }
 0x111   : > { %v10514_v15 = vadd.f32 %v6285_v9, %v6217_v48  ;;  %v1600_v27 = vsel %vm9774_vm6, %v1598_v19, %v1599_v20  ;;  %v1601_v17 = vrot.slane %v1599_v20, 4  ;;  %v1314_v48 = vrot.slane %v1313_v24, 4  ;;  %v7950_v20 = vld [vmem:[#allocation2 + $0x190] sm:$0xf] }
 0x112   : > { %1680 = vst [vmem:[#allocation2 + $0x218] sm:$0xf] %v1600_v27  ;;  %v1824_v49 = vrot.slane %v1822_v25, 5  ;;  %v1827_v45 = vrot.slane %v1825_v28, 6  ;;  %v1330_v9 = vshrl.u32 %v7436_v37, 16  ;;  %v1323_v24 = vor.u32 %v1322_v18, %v10526_v35 }
 0x113   : > { %v1603_v56 = vsel %vm9774_vm6, %v1601_v17, %v1602_v40  ;;  %v7952_v27 = vld [vmem:[#allocation2 + $0x1d0] sm:$0xf0]  ;;  %v7464_v17 = vld [vmem:[%s9732_s14 + $0x4c] sm:$0xf]  ;;  %v7497_v37 = vld [vmem:[%s9732_s14 + $0x50] sm:$0x3] }
 0x114   : > { %1681 = vst [vmem:[#allocation2 + $0x258] sm:$0xf] %v1603_v56  ;;  %v1828_v63 = vor.u32 %v1827_v45, %v1824_v49  ;;  %v1324_v39 = vrot.slane %v1323_v24, 4  ;;  %v7496_v28 = vld [vmem:[%s9732_s14 + $0x4c] sm:$0xf]  ;;  %v9310_v56 = vld [vmem:[%s12165_s1 + $0x2e0] sm:$0xff] }
 0x115   : > { %v6218_v31 = vpop.f32.mrf.mxu2  ;;  %v6083_v44 = vpop.f32.mrf.mxu0  ;;  %v1605_v43 = vrot.slane %v7464_v17, 5  ;;  %v7410_v49 = vld [vmem:[%s9732_s14 + $0x48] sm:$0xf]  ;;  %v7411_v45 = vld [vmem:[%s9732_s14 + $0x4c] sm:$0xf]  ;;  %6806 = vmatpush.bf16.msra.mxu3 %v9310_v56  ;;  %v1840_v18 = vrot.slane %v10546_v5, 4 }
 0x116   : > { %v6219_v42 = vadd.f32 %v6218_v31, %v6150_v57  ;;  %v6152_v46 = vpop.f32.mrf.mxu1  ;;  %v1319_v57 = vsel %vm9797_vm7, %v1314_v48, %v10526_v35  ;;  %v1829_v33 = vsel %vm9830_vm8, %v1820_v34, %v1828_v63  ;;  %v1830_v6 = vrot.slane %v1828_v63, 4  ;;  %v9302_v35 = vld [vmem:[%s12165_s1 + $0x2a0] sm:$0xff]  ;;  %1170 = vst [vmem:[#allocation2 + $0x290] sm:$0xf] %v7410_v49  ;;  %v7439_v17 = vld [vmem:[%s9732_s14 + $0x58] sm:$0xf] }
 0x117   : > { %v6153_v41 = vadd.f32 %v6152_v46, %v6083_v44  ;;  %1501 = vst [vmem:[#allocation2 + $0x254] sm:$0xf] %v1319_v57  ;;  %v1328_v31 = vrot.slane %v1326_v8, 5  ;;  %v9085_v46 = vld [vmem:[#allocation2 + $0x1d4] sm:$0xf0]  ;;  %v7951_v34 = vor.u32 %v9084_v21, %v7950_v20  ;;  %6737 = vmatpush.bf16.msra.mxu2 %v9302_v35  ;;  %v1607_v4 = vrot.slane %v1605_v43, 4 }
 0x118   : > { %6338 = vmatmul.bf16.gmra.mxu0 %v7887_v10  ;;  %v6287_v61 = vpop.f32.mrf.mxu3  ;;  %2028 = vst [vmem:[#allocation2 + $0x21c] sm:$0xf] %v1829_v33  ;;  %v1839_v3 = vsel %vm9830_vm8, %v1830_v6, %v10546_v5  ;;  %v7959_v63 = vor.u32 %v9085_v46, %v7958_v23  ;;  %v9077_v6 = vld [vmem:[#allocation2 + $0x19c] sm:$0xf]  ;;  %v1606_v8 = vsel %vm9774_vm6, %v1604_v29, %v1605_v43  ;;  %v1852_v21 = vshrl.u32 %v7497_v37, 16  ;;  %v9294_v5 = vld [vmem:[%s12165_s1 + $0x260] sm:$0xff] }
 0x119   : > { %6407 = vmatmul.bf16.gmra.mxu1 %v7891_v32  ;;  %v10543_v0 = vadd.f32 %v6287_v61, %v6219_v42  ;;  %2029 = vst [vmem:[#allocation2 + $0x25c] sm:$0xf] %v1839_v3  ;;  %v7437_v32 = vld [vmem:[%s9732_s14 + $0x50] sm:$0x1]  ;;  %v1329_v58 = vsel %vm9797_vm7, %v1324_v39, %v1328_v31  ;;  %v7955_v61 = vor.u32 %v9076_v59, %v7952_v27  ;;  %v7438_v27 = vld [vmem:[%s9732_s14 + $0x54] sm:$0xf] }
 0x11a   : > { %6476 = vmatmul.bf16.gmra.mxu2 %v7895_v62  ;;  %v1332_v62 = vrot.slane %v1330_v9, 4  ;;  %v1336_v50 = vshll.u32 %v7437_v32, 16  ;;  %v7465_v42 = vld [vmem:[%s9732_s14 + $0x50] sm:$0x1]  ;;  %1171 = vst [vmem:[#allocation2 + $0x2d0] sm:$0xf] %v7411_v45  ;;  %6668 = vmatpush.bf16.msra.mxu1 %v9294_v5 }
 0x11b   : > { %v1608_v57 = vrot.slane %v7465_v42, 5  ;;  %v1842_v9 = vshrl.u32 %v7496_v28, 16  ;;  %1502 = vst [vmem:[#allocation2 + $0x294] sm:$0xf] %v1329_v58  ;;  %v1855_v32 = vshll.u32 %v7497_v37, 16  ;;  %v1854_v24 = vrot.slane %v1852_v21, 5 }
 0x11c   : > { %v1333_v48 = vor.u32 %v1332_v62, %v1328_v31  ;;  %v1338_v25 = vrot.slane %v1336_v50, 5  ;;  %1682 = vst [vmem:[#allocation2 + $0x298] sm:$0xf] %v1606_v8  ;;  %v1341_v39 = vshrl.u32 %v7438_v27, 16  ;;  %v8014_v49 = vld [vmem:[#allocation2 + $0x210] sm:$0xf] }
 0x11d   : > { %v6221_v10 = vpop.f32.mrf.mxu2  ;;  %v6085_v12 = vpop.f32.mrf.mxu0  ;;  %6545 = vmatmul.bf16.gmra.mxu3 %v7899_v1  ;;  %v1609_v3 = vsel %vm9774_vm6, %v1607_v4, %v1608_v57  ;;  %v1857_v31 = vrot.slane %v1855_v32, 6  ;;  %v7498_v57 = vld [vmem:[%s9732_s14 + $0x54] sm:$0xe]  ;;  %v9100_v45 = vld [vmem:[#allocation2 + $0x24c] sm:$0xf0]  ;;  %v1354_v37 = vshrl.u32 %v7439_v17, 16 }
 0x11e   : > { %v6222_v11 = vadd.f32 %v6221_v10, %v6153_v41  ;;  %v6154_v36 = vpop.f32.mrf.mxu1  ;;  %v1334_v1 = vrot.slane %v1333_v48, 4  ;;  %v1845_v10 = vshll.u32 %v7496_v28, 16  ;;  %1683 = vst [vmem:[#allocation2 + $0x2d8] sm:$0xf] %v1609_v3  ;;  %v1350_v28 = vshll.u32 %v7439_v17, 16 }
 0x11f   : > { %v6155_v19 = vadd.f32 %v6154_v36, %v6085_v12  ;;  %v7960_v12 = vld [vmem:[#allocation2 + $0x1d8] sm:$0xf0]  ;;  %v1858_v46 = vor.u32 %v1857_v31, %v1854_v24  ;;  %v1343_v43 = vrot.slane %v1341_v39, 4  ;;  %v9092_v58 = vld [vmem:[#allocation2 + $0x214] sm:$0xf]  ;;  %v8015_v21 = vor.u32 %v9100_v45, %v8014_v49 }
 0x120   : > { %v6290_v44 = vpop.f32.mrf.mxu3  ;;  %v1339_v36 = vsel %vm9797_vm7, %v1334_v1, %v1338_v25  ;;  %v1847_v20 = vrot.slane %v1845_v10, 6  ;;  %v7963_v50 = vor.u32 %v9077_v6, %v7960_v12  ;;  %v1344_v25 = vshll.u32 %v7438_v27, 16  ;;  %v10603_v12 = vld [vmem:[%s9732_s14 + $0x5c] sm:$0xf] }
 0x121   : > { %v10559_v41 = vadd.f32 %v6290_v44, %v6222_v11  ;;  %1503 = vst [vmem:[#allocation2 + $0x2d4] sm:$0xf] %v1339_v36  ;;  %v1352_v4 = vrot.slane %v1350_v28, 5  ;;  %v1861_v6 = vshrl.u32 %v7498_v57, 16  ;;  %v1356_v10 = vrot.slane %v1354_v37, 4 }
 0x122   : > { %v1346_v1 = vrot.slane %v1344_v25, 5 }
 0x123   : > { %v1357_v24 = vor.u32 %v1356_v10, %v1352_v4  ;;  %v1863_v28 = vrot.slane %v1861_v6, 5 }
 0x125   : > { %v6223_v60 = vpop.f32.mrf.mxu2  ;;  %v6088_v33 = vpop.f32.mrf.mxu0  ;;  %v1358_v25 = vrot.slane %v1357_v24, 4 }
 0x126   : > { %v6224_v13 = vadd.f32 %v6223_v60, %v6155_v19  ;;  %v6157_v40 = vpop.f32.mrf.mxu1  ;;  %v1844_v19 = vrot.slane %v1842_v9, 5  ;;  %v10597_v60 = vld [vmem:[%s9732_s14 + $0x5c] sm:$0xf]  ;;  %v1347_v9 = vor.u32 %v1346_v1, %v1343_v43 }
 0x127   : > { %v6158_v11 = vadd.f32 %v6157_v40, %v6088_v33  ;;  %v1360_v33 = vshll.u32 %v10597_v60, 16  ;;  %v7466_v40 = vld [vmem:[%s9732_s14 + $0x54] sm:$0xe]  ;;  %v1364_v10 = vshrl.u32 %v10597_v60, 16  ;;  %v9116_v60 = vld [vmem:[#allocation2 + $0x2cc] sm:$0xf0] }
 0x128   : > { %6343 = vmatmul.bf16.gmra.mxu0 %v7951_v34  ;;  %v6292_v59 = vpop.f32.mrf.mxu3  ;;  %v1848_v23 = vor.u32 %v1847_v20, %v1844_v19  ;;  %v7482_v36 = vrot.slane %v7466_v40, 9  ;;  %v1615_v19 = vrot.slane %v10603_v12, 5  ;;  %v7499_v20 = vld [vmem:[%s9732_s14 + $0x58] sm:$0xf]  ;;  %v1348_v27 = vrot.slane %v1347_v9, 4 }
 0x129   : > { %6412 = vmatmul.bf16.gmra.mxu1 %v7955_v61  ;;  %v10584_v62 = vadd.f32 %v6292_v59, %v6224_v13  ;;  %v8016_v61 = vld [vmem:[#allocation2 + $0x250] sm:$0xf0]  ;;  %v9101_v13 = vld [vmem:[#allocation2 + $0x254] sm:$0xf0]  ;;  %v10611_v31 = vrot.slane %v1360_v33, 5 }
 0x12a   : > { %6481 = vmatmul.bf16.gmra.mxu2 %v7959_v63  ;;  %v1849_v42 = vsel %vm9830_vm8, %v1840_v18, %v1848_v23  ;;  %v1850_v44 = vrot.slane %v1848_v23, 4  ;;  %v8022_v63 = vld [vmem:[#allocation2 + $0x218] sm:$0xf]  ;;  %v8019_v32 = vor.u32 %v9092_v58, %v8016_v61  ;;  %v7412_v59 = vld [vmem:[%s9732_s14 + $0x54] sm:$0xf]  ;;  %v1353_v43 = vsel %vm9797_vm7, %v1348_v27, %v1352_v4 }
 0x12b   : > { %2030 = vst [vmem:[#allocation2 + $0x29c] sm:$0xf] %v1849_v42  ;;  %v7413_v23 = vld [vmem:[%s9732_s14 + $0x58] sm:$0xf]  ;;  %v8023_v5 = vor.u32 %v9101_v13, %v8022_v63  ;;  %v1870_v58 = vshrl.u32 %v7499_v20, 16 }
 0x12c   : > { %v1859_v29 = vsel %vm9830_vm8, %v1850_v44, %v1858_v46  ;;  %1172 = vst [vmem:[#allocation2 + $0x310] sm:$0xf] %v7412_v59  ;;  %v7500_v44 = vld [vmem:[%s9732_s14 + $0x5c] sm:$0xf]  ;;  %v7441_v9 = vld [vmem:[%s9732_s14 + $0x60] sm:$0xf] }
 0x12d   : > { %v6226_v48 = vpop.f32.mrf.mxu2  ;;  %v6090_v51 = vpop.f32.mrf.mxu0  ;;  %6550 = vmatmul.bf16.gmra.mxu3 %v7963_v50  ;;  %2031 = vst [vmem:[#allocation2 + $0x2dc] sm:$0xf] %v1859_v29  ;;  %v8024_v29 = vld [vmem:[#allocation2 + $0x258] sm:$0xf0]  ;;  %v1880_v61 = vshrl.u32 %v7500_v44, 16  ;;  %v1883_v63 = vshll.u32 %v7500_v44, 16 }
 0x12e   : > { %v6227_v35 = vadd.f32 %v6226_v48, %v6158_v11  ;;  %v6159_v56 = vpop.f32.mrf.mxu1  ;;  %v7467_v11 = vld [vmem:[%s9732_s14 + $0x58] sm:$0xf]  ;;  %1173 = vst [vmem:[#allocation2 + $0x350] sm:$0xf] %v7413_v23  ;;  %v1872_v37 = vrot.slane %v1870_v58, 5 }
 0x12f   : > { %v6160_v34 = vadd.f32 %v6159_v56, %v6090_v51  ;;  %v1612_v18 = vrot.slane %v7467_v11, 5  ;;  %v9093_v56 = vld [vmem:[#allocation2 + $0x21c] sm:$0xf]  ;;  %1504 = vst [vmem:[#allocation2 + $0x314] sm:$0xf] %v1353_v43  ;;  %v1882_v6 = vrot.slane %v1880_v61, 5 }
 0x130   : > { %v6295_v8 = vpop.f32.mrf.mxu3  ;;  %v8027_v40 = vor.u32 %v9093_v56, %v8024_v29  ;;  %v8080_v44 = vld [vmem:[#allocation2 + $0x2d0] sm:$0xf0]  ;;  %v1366_v56 = vrot.slane %v1364_v10, 4  ;;  %v10655_v61 = vld [vmem:[%s9732_s14 + $0x64] sm:$0xf] }
 0x131   : > { %v10605_v3 = vadd.f32 %v6295_v8, %v6227_v35  ;;  %v1613_v17 = vsel %vm9774_vm6, %v7482_v36, %v1612_v18  ;;  %v1614_v42 = vrot.slane %v1612_v18, 4  ;;  %v1864_v35 = vshll.u32 %v7498_v57, 16  ;;  %v7415_v10 = vld [vmem:[%s9732_s14 + $0x60] sm:$0xf] }
 0x132   : > { %1684 = vst [vmem:[#allocation2 + $0x318] sm:$0xf] %v1613_v17  ;;  %v1873_v57 = vshll.u32 %v7499_v20, 16  ;;  %v1885_v8 = vrot.slane %v1883_v63, 6  ;;  %v10633_v17 = vld [vmem:[#allocation2 + $0x290] sm:$0xf] }
 0x133   : > { %v1616_v49 = vsel %vm9774_vm6, %v1614_v42, %v1615_v19  ;;  %v1866_v45 = vrot.slane %v1864_v35, 6  ;;  %v9108_v42 = vld [vmem:[#allocation2 + $0x294] sm:$0xf]  ;;  %v9309_v35 = vld [vmem:[%s12165_s1 + $0x2d8] sm:$0xff]  ;;  %v1617_v63 = vrot.slane %v1615_v19, 4 }
 0x134   : > { %1685 = vst [vmem:[#allocation2 + $0x358] sm:$0xf] %v1616_v49  ;;  %v1875_v13 = vrot.slane %v1873_v57, 6  ;;  %v10629_v20 = vor.u32 %v1885_v8, %v1882_v6  ;;  %v7501_v49 = vld [vmem:[%s9732_s14 + $0x60] sm:$0xf]  ;;  %6807 = vmatpush.bf16.msra.mxu3 %v9309_v35  ;;  %v8083_v8 = vor.u32 %v9108_v42, %v8080_v44 }
 0x135   : > { %v6228_v50 = vpop.f32.mrf.mxu2  ;;  %v6093_v39 = vpop.f32.mrf.mxu0  ;;  %v1867_v4 = vor.u32 %v1866_v45, %v1863_v28  ;;  %v1367_v45 = vor.u32 %v1366_v56, %v10611_v31  ;;  %v7469_v57 = vld [vmem:[%s9732_s14 + $0x60] sm:$0xf]  ;;  %v7502_v6 = vld [vmem:[%s9732_s14 + $0x64] sm:$0xf]  ;;  %1175 = vst [vmem:[#allocation2 + $0x3d0] sm:$0xf] %v7415_v10 }
 0x136   : > { %v6229_v46 = vadd.f32 %v6228_v50, %v6160_v34  ;;  %v6162_v48 = vpop.f32.mrf.mxu1  ;;  %v1363_v34 = vsel %vm9797_vm7, %v1358_v25, %v10611_v31  ;;  %v1876_v36 = vor.u32 %v1875_v13, %v1872_v37  ;;  %v9117_v25 = vld [vmem:[#allocation2 + $0x2d4] sm:$0xf0]  ;;  %v1618_v13 = vrot.slane %v7469_v57, 5  ;;  %v8088_v44 = vld [vmem:[#allocation2 + $0x2d8] sm:$0xf0] }
 0x137   : > { %v6163_v51 = vadd.f32 %v6162_v48, %v6093_v39  ;;  %1505 = vst [vmem:[#allocation2 + $0x354] sm:$0xf] %v1363_v34  ;;  %v1868_v11 = vrot.slane %v1867_v4, 4  ;;  %v9285_v39 = vld [vmem:[%s12165_s1 + $0x218] sm:$0xff]  ;;  %v8079_v31 = vor.u32 %v9116_v60, %v10633_v17  ;;  %v1890_v17 = vshrl.u32 %v7501_v49, 16 }
 0x138   : > { %6348 = vmatmul.bf16.gmra.mxu0 %v8015_v21  ;;  %v6297_v1 = vpop.f32.mrf.mxu3  ;;  %v1370_v21 = vshll.u32 %v7441_v9, 16  ;;  %v8086_v48 = vld [vmem:[#allocation2 + $0x298] sm:$0xf]  ;;  %v1893_v60 = vshll.u32 %v7501_v49, 16  ;;  %v1903_v56 = vshll.u32 %v7502_v6, 16 }
 0x139   : > { %6417 = vmatmul.bf16.gmra.mxu1 %v8019_v32  ;;  %v10625_v33 = vadd.f32 %v6297_v1, %v6229_v46  ;;  %v1374_v32 = vshrl.u32 %v7441_v9, 16  ;;  %v1877_v50 = vsel %vm9830_vm8, %v1868_v11, %v1876_v36  ;;  %v9301_v46 = vld [vmem:[%s12165_s1 + $0x298] sm:$0xff]  ;;  %6600 = vmatpush.bf16.msra.mxu0 %v9285_v39  ;;  %v1368_v11 = vrot.slane %v1367_v45, 4 }
 0x13a   : > { %6486 = vmatmul.bf16.gmra.mxu2 %v8023_v5  ;;  %v1878_v5 = vrot.slane %v1876_v36, 4  ;;  %2032 = vst [vmem:[#allocation2 + $0x31c] sm:$0xf] %v1877_v50  ;;  %v1372_v29 = vrot.slane %v1370_v21, 5  ;;  %v9293_v4 = vld [vmem:[%s12165_s1 + $0x258] sm:$0xff]  ;;  %v8087_v19 = vor.u32 %v9117_v25, %v8086_v48  ;;  %v1619_v21 = vsel %vm9774_vm6, %v1617_v63, %v1618_v13 }
 0x13b   : > { %6738 = vmatpush.bf16.msra.mxu2 %v9301_v46  ;;  %v1376_v43 = vrot.slane %v1374_v32, 4  ;;  %v7414_v9 = vld [vmem:[%s9732_s14 + $0x5c] sm:$0xf]  ;;  %6669 = vmatpush.bf16.msra.mxu1 %v9293_v4  ;;  %v1620_v32 = vrot.slane %v1618_v13, 4  ;;  %v1900_v39 = vshrl.u32 %v7502_v6, 16  ;;  %v1888_v48 = vrot.slane %v10629_v20, 4 }
 0x13c   : > { %v1887_v28 = vsel %vm9830_vm8, %v1878_v5, %v10629_v20  ;;  %1174 = vst [vmem:[#allocation2 + $0x390] sm:$0xf] %v7414_v9  ;;  %v9109_v50 = vld [vmem:[#allocation2 + $0x29c] sm:$0xf]  ;;  %v1373_v5 = vsel %vm9797_vm7, %v1368_v11, %v1372_v29  ;;  %v1892_v25 = vrot.slane %v1890_v17, 5 }
 0x13d   : > { %v6231_v18 = vpop.f32.mrf.mxu2  ;;  %v6095_v23 = vpop.f32.mrf.mxu0  ;;  %6555 = vmatmul.bf16.gmra.mxu3 %v8027_v40  ;;  %2033 = vst [vmem:[#allocation2 + $0x35c] sm:$0xf] %v1887_v28  ;;  %v1377_v37 = vor.u32 %v1376_v43, %v1372_v29  ;;  %v1621_v40 = vrot.slane %v10655_v61, 5  ;;  %v1895_v28 = vrot.slane %v1893_v60, 6  ;;  %v1902_v35 = vrot.slane %v1900_v39, 5 }
 0x13e   : > { %v6232_v59 = vadd.f32 %v6231_v18, %v6163_v51  ;;  %v6164_v24 = vpop.f32.mrf.mxu1  ;;  %v10648_v51 = vld [vmem:[%s9732_s14 + $0x64] sm:$0xf]  ;;  %1506 = vst [vmem:[#allocation2 + $0x394] sm:$0xf] %v1373_v5  ;;  %v7443_v20 = vld [vmem:[%s9732_s14 + $0x68] sm:$0xf] }
 0x13f   : > { %v6165_v27 = vadd.f32 %v6164_v24, %v6095_v23  ;;  %v1380_v58 = vshll.u32 %v10648_v51, 16  ;;  %v1378_v18 = vrot.slane %v1377_v37, 4  ;;  %1686 = vst [vmem:[#allocation2 + $0x398] sm:$0xf] %v1619_v21  ;;  %v1896_v43 = vor.u32 %v1895_v28, %v1892_v25  ;;  %v9124_v21 = vld [vmem:[#allocation2 + $0x314] sm:$0xf] }
 0x140   : > { %v6300_v34 = vpop.f32.mrf.mxu3  ;;  %v1384_v45 = vshrl.u32 %v10648_v51, 16  ;;  %v1390_v4 = vshll.u32 %v7443_v20, 16  ;;  %v1394_v37 = vshrl.u32 %v7443_v20, 16  ;;  %v9133_v5 = vld [vmem:[#allocation2 + $0x354] sm:$0xf0]  ;;  %v1623_v28 = vrot.slane %v1621_v40, 4 }
 0x141   : > { %v10659_v1 = vadd.f32 %v6300_v34, %v6232_v59  ;;  %v10669_v36 = vrot.slane %v1380_v58, 5  ;;  %v8091_v34 = vor.u32 %v9109_v50, %v8088_v44  ;;  %v1905_v58 = vrot.slane %v1903_v56, 6  ;;  %v7471_v44 = vld [vmem:[%s9732_s14 + $0x68] sm:$0xf] }
 0x142   : > { %v1897_v57 = vsel %vm9830_vm8, %v1888_v48, %v1896_v43  ;;  %v1898_v63 = vrot.slane %v1896_v43, 4  ;;  %v1386_v10 = vrot.slane %v1384_v45, 4  ;;  %v1392_v11 = vrot.slane %v1390_v4, 5  ;;  %v9284_v43 = vld [vmem:[%s12165_s1 + $0x210] sm:$0xff]  ;;  %v7417_v4 = vld [vmem:[%s9732_s14 + $0x68] sm:$0xf] }
 0x143   : > { %v1383_v46 = vsel %vm9797_vm7, %v1378_v18, %v10669_v36  ;;  %v10689_v6 = vor.u32 %v1905_v58, %v1902_v35  ;;  %2034 = vst [vmem:[#allocation2 + $0x39c] sm:$0xf] %v1897_v57  ;;  %v9132_v18 = vld [vmem:[#allocation2 + $0x34c] sm:$0xf0]  ;;  %v1396_v50 = vrot.slane %v1394_v37, 4  ;;  %v1624_v58 = vrot.slane %v7471_v44, 5  ;;  %6601 = vmatpush.bf16.msra.mxu0 %v9284_v43 }
 0x144   : > { %1507 = vst [vmem:[#allocation2 + $0x3d4] sm:$0xf] %v1383_v46  ;;  %v1387_v17 = vor.u32 %v1386_v10, %v10669_v36  ;;  %v7472_v46 = vld [vmem:[%s9732_s14 + $0x6c] sm:$0x1]  ;;  %v9300_v36 = vld [vmem:[%s12165_s1 + $0x290] sm:$0xff] }
 0x145   : > { %v6233_v12 = vpop.f32.mrf.mxu2  ;;  %v6098_v23 = vpop.f32.mrf.mxu0  ;;  %v7504_v35 = vld [vmem:[%s9732_s14 + $0x6c] sm:$0x3]  ;;  %v1627_v61 = vrot.slane %v7472_v46, 5  ;;  %6739 = vmatpush.bf16.msra.mxu2 %v9300_v36  ;;  %v1908_v10 = vrot.slane %v10689_v6, 4  ;;  %1177 = vst [vmem:[#allocation2 + $0x450] sm:$0xf] %v7417_v4 }
 0x146   : > { %v6234_v59 = vadd.f32 %v6233_v12, %v6165_v27  ;;  %v6167_v24 = vpop.f32.mrf.mxu1  ;;  %v1622_v27 = vsel %vm9774_vm6, %v1620_v32, %v1621_v40  ;;  %v7503_v12 = vld [vmem:[%s9732_s14 + $0x68] sm:$0xf]  ;;  %v8144_v32 = vld [vmem:[#allocation2 + $0x350] sm:$0xf0]  ;;  %v1388_v48 = vrot.slane %v1387_v17, 4 }
 0x147   : > { %v6168_v42 = vadd.f32 %v6167_v24, %v6098_v23  ;;  %1687 = vst [vmem:[#allocation2 + $0x3d8] sm:$0xf] %v1622_v27  ;;  %v1907_v23 = vsel %vm9830_vm8, %v1898_v63, %v10689_v6  ;;  %v7444_v24 = vld [vmem:[%s9732_s14 + $0x6c] sm:$0x1]  ;;  %v1910_v27 = vshrl.u32 %v7503_v12, 16  ;;  %v1913_v56 = vshll.u32 %v7503_v12, 16 }
 0x148   : > { %6353 = vmatmul.bf16.gmra.mxu0 %v8079_v31  ;;  %v6302_v29 = vpop.f32.mrf.mxu3  ;;  %2035 = vst [vmem:[#allocation2 + $0x3dc] sm:$0xf] %v1907_v23  ;;  %v1400_v60 = vshll.u32 %v7444_v24, 16  ;;  %v8147_v20 = vor.u32 %v9124_v21, %v8144_v32  ;;  %v7416_v63 = vld [vmem:[%s9732_s14 + $0x64] sm:$0xf]  ;;  %v1393_v37 = vsel %vm9797_vm7, %v1388_v48, %v1392_v11  ;;  %v1920_v32 = vshrl.u32 %v7504_v35, 16 }
 0x149   : > { %6422 = vmatmul.bf16.gmra.mxu1 %v8083_v8  ;;  %v10683_v49 = vadd.f32 %v6302_v29, %v6234_v59  ;;  %v8150_v59 = vld [vmem:[#allocation2 + $0x318] sm:$0xf]  ;;  %1176 = vst [vmem:[#allocation2 + $0x410] sm:$0xf] %v7416_v63  ;;  %v1912_v21 = vrot.slane %v1910_v27, 5 }
 0x14a   : > { %6491 = vmatmul.bf16.gmra.mxu2 %v8087_v19  ;;  %v8142_v19 = vld [vmem:[#allocation2 + $0x310] sm:$0xf]  ;;  %v1402_v25 = vrot.slane %v1400_v60, 5  ;;  %v8151_v57 = vor.u32 %v9133_v5, %v8150_v59  ;;  %v9125_v23 = vld [vmem:[#allocation2 + $0x31c] sm:$0xf]  ;;  %v1922_v6 = vrot.slane %v1920_v32, 5 }
 0x14b   : > { %v8143_v40 = vor.u32 %v9132_v18, %v8142_v19  ;;  %1508 = vst [vmem:[#allocation2 + $0x414] sm:$0xf] %v1393_v37  ;;  %v8152_v5 = vld [vmem:[#allocation2 + $0x358] sm:$0xf0]  ;;  %v8206_v4 = vld [vmem:[#allocation2 + $0x390] sm:$0xf] }
 0x14c   : > { %v8155_v27 = vor.u32 %v9125_v23, %v8152_v5  ;;  %v9148_v37 = vld [vmem:[#allocation2 + $0x3cc] sm:$0xf0]  ;;  %v10743_v23 = vld [vmem:[%s9732_s14 + $0x78] sm:$0xf] }
 0x14d   : > { %v6236_v13 = vpop.f32.mrf.mxu2  ;;  %v6100_v8 = vpop.f32.mrf.mxu0  ;;  %6560 = vmatmul.bf16.gmra.mxu3 %v8091_v34  ;;  %v9308_v34 = vld [vmem:[%s12165_s1 + $0x2d0] sm:$0xff] }
 0x14e   : > { %v6237_v31 = vadd.f32 %v6236_v13, %v6168_v42  ;;  %v6169_v9 = vpop.f32.mrf.mxu1  ;;  %v1397_v42 = vor.u32 %v1396_v50, %v1392_v11  ;;  %6808 = vmatpush.bf16.msra.mxu3 %v9308_v34  ;;  %v1915_v11 = vrot.slane %v1913_v56, 6  ;;  %v1923_v50 = vshll.u32 %v7504_v35, 16 }
 0x14f   : > { %v6170_v51 = vadd.f32 %v6169_v9, %v6100_v8  ;;  %v1625_v8 = vsel %vm9774_vm6, %v1623_v28, %v1624_v58  ;;  %v1626_v9 = vrot.slane %v1624_v58, 4  ;;  %v7446_v28 = vld [vmem:[%s9732_s14 + $0x74] sm:$0xf] }
 0x150   : > { %v6305_v39 = vpop.f32.mrf.mxu3  ;;  %v1398_v45 = vrot.slane %v1397_v42, 4  ;;  %v1916_v17 = vor.u32 %v1915_v11, %v1912_v21  ;;  %1688 = vst [vmem:[#allocation2 + $0x418] sm:$0xf] %v1625_v8  ;;  %v1414_v34 = vshll.u32 %v7446_v28, 16  ;;  %v7474_v21 = vld [vmem:[%s9732_s14 + $0x74] sm:$0xf] }
 0x151   : > { %v10702_v29 = vadd.f32 %v6305_v39, %v6237_v31  ;;  %v1628_v24 = vsel %vm9774_vm6, %v1626_v9, %v1627_v61  ;;  %v9292_v39 = vld [vmem:[%s12165_s1 + $0x250] sm:$0xff]  ;;  %v8214_v11 = vld [vmem:[#allocation2 + $0x398] sm:$0xf] }
 0x152   : > { %v1403_v31 = vsel %vm9797_vm7, %v1398_v45, %v1402_v25  ;;  %1689 = vst [vmem:[#allocation2 + $0x458] sm:$0xf] %v1628_v24  ;;  %v1917_v42 = vsel %vm9830_vm8, %v1908_v10, %v1916_v17  ;;  %v1918_v44 = vrot.slane %v1916_v17, 4  ;;  %v7445_v25 = vld [vmem:[%s9732_s14 + $0x70] sm:$0xf]  ;;  %6670 = vmatpush.bf16.msra.mxu1 %v9292_v39  ;;  %v1418_v45 = vshrl.u32 %v7446_v28, 16 }
 0x153   : > { %1509 = vst [vmem:[#allocation2 + $0x454] sm:$0xf] %v1403_v31  ;;  %v1405_v35 = vshrl.u32 %v7445_v25, 16  ;;  %v1408_v56 = vshll.u32 %v7445_v25, 16  ;;  %v10736_v31 = vld [vmem:[%s9732_s14 + $0x78] sm:$0xf] }
 0x154   : > { %2036 = vst [vmem:[#allocation2 + $0x41c] sm:$0xf] %v1917_v42  ;;  %v1416_v8 = vrot.slane %v1414_v34, 5  ;;  %v1420_v9 = vrot.slane %v1418_v45, 4  ;;  %v7505_v10 = vld [vmem:[%s9732_s14 + $0x70] sm:$0xe] }
 0x155   : > { %v6238_v13 = vpop.f32.mrf.mxu2  ;;  %v6103_v19 = vpop.f32.mrf.mxu0  ;;  %v7506_v39 = vld [vmem:[%s9732_s14 + $0x74] sm:$0xf]  ;;  %v7418_v28 = vld [vmem:[%s9732_s14 + $0x70] sm:$0xf] }
 0x156   : > { %v6239_v12 = vadd.f32 %v6238_v13, %v6170_v51  ;;  %v6172_v18 = vpop.f32.mrf.mxu1  ;;  %v1925_v51 = vrot.slane %v1923_v50, 6  ;;  %v9140_v13 = vld [vmem:[#allocation2 + $0x394] sm:$0xf]  ;;  %v1421_v32 = vor.u32 %v1420_v9, %v1416_v8  ;;  %v9149_v50 = vld [vmem:[#allocation2 + $0x3d4] sm:$0xf0] }
 0x157   : > { %v6173_v59 = vadd.f32 %v6172_v18, %v6103_v19  ;;  %v1424_v18 = vshll.u32 %v10736_v31, 16  ;;  %v8215_v34 = vor.u32 %v9149_v50, %v8214_v11  ;;  %1178 = vst [vmem:[#allocation2 + $0x490] sm:$0xf] %v7418_v28 }
 0x158   : > { %6358 = vmatmul.bf16.gmra.mxu0 %v8143_v40  ;;  %v6307_v60 = vpop.f32.mrf.mxu3  ;;  %v1926_v48 = vor.u32 %v1925_v51, %v1922_v6  ;;  %v1929_v51 = vshrl.u32 %v7505_v10, 16  ;;  %v1422_v42 = vrot.slane %v1421_v32, 4 }
 0x159   : > { %6427 = vmatmul.bf16.gmra.mxu1 %v8147_v20  ;;  %v10726_v46 = vadd.f32 %v6307_v60, %v6239_v12  ;;  %v1407_v20 = vrot.slane %v1405_v35, 4  ;;  %v8208_v12 = vld [vmem:[#allocation2 + $0x3d0] sm:$0xf0]  ;;  %v10745_v17 = vrot.slane %v1424_v18, 5  ;;  %v1941_v18 = vshll.u32 %v7506_v39, 16 }
 0x15a   : > { %6496 = vmatmul.bf16.gmra.mxu2 %v8151_v57  ;;  %v1927_v43 = vsel %vm9830_vm8, %v1918_v44, %v1926_v48  ;;  %v1410_v57 = vrot.slane %v1408_v56, 5  ;;  %v1631_v44 = vrot.slane %v7474_v21, 5  ;;  %v8207_v48 = vor.u32 %v9148_v37, %v8206_v4  ;;  %v7419_v35 = vld [vmem:[%s9732_s14 + $0x74] sm:$0xf]  ;;  %v9141_v4 = vld [vmem:[#allocation2 + $0x39c] sm:$0xf] }
 0x15b   : > { %2037 = vst [vmem:[#allocation2 + $0x45c] sm:$0xf] %v1927_v43  ;;  %v8211_v25 = vor.u32 %v9140_v13, %v8208_v12  ;;  %v1427_v45 = vsel %vm9797_vm7, %v1422_v42, %v10745_v17  ;;  %v1931_v37 = vrot.slane %v1929_v51, 5  ;;  %v1932_v13 = vshll.u32 %v7505_v10, 16  ;;  %v8216_v12 = vld [vmem:[#allocation2 + $0x3d8] sm:$0xf0] }
 0x15c   : > { %v1411_v19 = vor.u32 %v1410_v57, %v1407_v20  ;;  %1179 = vst [vmem:[#allocation2 + $0x4d0] sm:$0xf] %v7419_v35  ;;  %v1943_v10 = vrot.slane %v1941_v18, 6  ;;  %v8219_v51 = vor.u32 %v9141_v4, %v8216_v12  ;;  %v1428_v42 = vshrl.u32 %v10736_v31, 16  ;;  %v10778_v4 = vld [vmem:[#allocation2 + $0x414] sm:$0xf] }
 0x15d   : > { %v6241_v36 = vpop.f32.mrf.mxu2  ;;  %v6105_v61 = vpop.f32.mrf.mxu0  ;;  %6565 = vmatmul.bf16.gmra.mxu3 %v8155_v27  ;;  %v1634_v27 = vrot.slane %v10743_v23, 5  ;;  %1511 = vst [vmem:[#allocation2 + $0x4d4] sm:$0xf] %v1427_v45  ;;  %v1934_v11 = vrot.slane %v1932_v13, 6  ;;  %v8278_v12 = vld [vmem:[#allocation2 + $0x418] sm:$0xf] }
 0x15e   : > { %v6242_v58 = vadd.f32 %v6241_v36, %v6173_v59  ;;  %v6174_v40 = vpop.f32.mrf.mxu1  ;;  %v7473_v59 = vld [vmem:[%s9732_s14 + $0x70] sm:$0xe]  ;;  %v1412_v5 = vrot.slane %v1411_v19, 4  ;;  %v7507_v36 = vld [vmem:[%s9732_s14 + $0x78] sm:$0xf] }
 0x15f   : > { %v6175_v63 = vadd.f32 %v6174_v40, %v6105_v61  ;;  %v7483_v6 = vrot.slane %v7473_v59, 9  ;;  %v1633_v61 = vrot.slane %v1631_v44, 4  ;;  %v1948_v21 = vshrl.u32 %v7507_v36, 16 }
 0x160   : > { %v6310_v24 = vpop.f32.mrf.mxu3  ;;  %v1417_v56 = vsel %vm9797_vm7, %v1412_v5, %v1416_v8  ;;  %v1938_v8 = vshrl.u32 %v7506_v39, 16  ;;  %v1951_v32 = vshll.u32 %v7507_v36, 16  ;;  %v1935_v50 = vor.u32 %v1934_v11, %v1931_v37  ;;  %v7448_v39 = vld [vmem:[%s9732_s14 + $0x7c] sm:$0xf]  ;;  %v8272_v37 = vld [vmem:[#allocation2 + $0x450] sm:$0xf0] }
 0x161   : > { %v10747_v60 = vadd.f32 %v6310_v24, %v6242_v58  ;;  %v1632_v58 = vsel %vm9774_vm6, %v7483_v6, %v1631_v44  ;;  %1510 = vst [vmem:[#allocation2 + $0x494] sm:$0xf] %v1417_v56  ;;  %v1635_v19 = vsel %vm9774_vm6, %v1633_v61, %v1634_v27  ;;  %v1950_v59 = vrot.slane %v1948_v21, 5  ;;  %v10771_v56 = vld [vmem:[#allocation2 + $0x410] sm:$0xf] }
 0x162   : > { %1690 = vst [vmem:[#allocation2 + $0x498] sm:$0xf] %v1632_v58  ;;  %v1953_v5 = vrot.slane %v1951_v32, 6  ;;  %v1936_v28 = vrot.slane %v1935_v50, 4  ;;  %v10773_v61 = vld [vmem:[#allocation2 + $0x44c] sm:$0xf0] }
 0x163   : > { %1691 = vst [vmem:[#allocation2 + $0x4d8] sm:$0xf] %v1635_v19  ;;  %v9307_v19 = vld [vmem:[%s12165_s1 + $0x2c8] sm:$0xff]  ;;  %v9165_v11 = vld [vmem:[#allocation2 + $0x454] sm:$0xf0] }
 0x164   : > { %v10769_v35 = vor.u32 %v1953_v5, %v1950_v59  ;;  %6809 = vmatpush.bf16.msra.mxu3 %v9307_v19 }
 0x165   : > { %v6243_v43 = vpop.f32.mrf.mxu2  ;;  %v6108_v20 = vpop.f32.mrf.mxu0 }
 0x166   : > { %v6244_v40 = vadd.f32 %v6243_v43, %v6175_v63  ;;  %v6177_v57 = vpop.f32.mrf.mxu1  ;;  %v1940_v63 = vrot.slane %v1938_v8, 5  ;;  %v1438_v43 = vshrl.u32 %v7448_v39, 16  ;;  %v9299_v8 = vld [vmem:[%s12165_s1 + $0x288] sm:$0xff] }
 0x167   : > { %v6178_v9 = vadd.f32 %v6177_v57, %v6108_v20  ;;  %v7508_v20 = vld [vmem:[%s9732_s14 + $0x7c] sm:$0xf]  ;;  %6740 = vmatpush.bf16.msra.mxu2 %v9299_v8 }
 0x168   : > { %6363 = vmatmul.bf16.gmra.mxu0 %v8207_v48  ;;  %v6312_v24 = vpop.f32.mrf.mxu3  ;;  %v1944_v44 = vor.u32 %v1943_v10, %v1940_v63  ;;  %v1434_v48 = vshll.u32 %v7448_v39, 16  ;;  %v10794_v63 = vld [vmem:[%s9732_s14 + $0x80] sm:$0xf]  ;;  %v1440_v32 = vrot.slane %v1438_v43, 4  ;;  %v1958_v10 = vshrl.u32 %v7508_v20, 16 }
 0x169   : > { %6432 = vmatmul.bf16.gmra.mxu1 %v8211_v25  ;;  %v10765_v6 = vadd.f32 %v6312_v24, %v6244_v40  ;;  %v1430_v40 = vrot.slane %v1428_v42, 4  ;;  %v8271_v24 = vor.u32 %v10773_v61, %v10771_v56  ;;  %v1444_v5 = vshll.u32 %v10794_v63, 16  ;;  %v7421_v43 = vld [vmem:[%s9732_s14 + $0x7c] sm:$0xf] }
 0x16a   : > { %6501 = vmatmul.bf16.gmra.mxu2 %v8215_v34  ;;  %v1946_v36 = vrot.slane %v1944_v44, 4  ;;  %v1945_v31 = vsel %vm9830_vm8, %v1936_v28, %v1944_v44  ;;  %v1436_v21 = vrot.slane %v1434_v48, 5  ;;  %v9291_v44 = vld [vmem:[%s12165_s1 + $0x248] sm:$0xff]  ;;  %v1636_v28 = vrot.slane %v1634_v27, 4  ;;  %1181 = vst [vmem:[#allocation2 + $0x550] sm:$0xf] %v7421_v43 }
 0x16b   : > { %2038 = vst [vmem:[#allocation2 + $0x49c] sm:$0xf] %v1945_v31  ;;  %v1431_v18 = vor.u32 %v1430_v40, %v10745_v17  ;;  %v7476_v17 = vld [vmem:[%s9732_s14 + $0x7c] sm:$0xf]  ;;  %v8275_v56 = vor.u32 %v10778_v4, %v8272_v37  ;;  %v8279_v31 = vor.u32 %v9165_v11, %v8278_v12  ;;  %6671 = vmatpush.bf16.msra.mxu1 %v9291_v44  ;;  %v1960_v27 = vrot.slane %v1958_v10, 5 }
 0x16c   : > { %v1955_v13 = vsel %vm9830_vm8, %v1946_v36, %v10769_v35  ;;  %v1441_v39 = vor.u32 %v1440_v32, %v1436_v21  ;;  %v1637_v48 = vrot.slane %v7476_v17, 5  ;;  %v7420_v36 = vld [vmem:[%s9732_s14 + $0x78] sm:$0xf]  ;;  %v9157_v4 = vld [vmem:[#allocation2 + $0x41c] sm:$0xf]  ;;  %v1961_v19 = vshll.u32 %v7508_v20, 16 }
 0x16d   : > { %v6246_v25 = vpop.f32.mrf.mxu2  ;;  %v6110_v45 = vpop.f32.mrf.mxu0  ;;  %6570 = vmatmul.bf16.gmra.mxu3 %v8219_v51  ;;  %2039 = vst [vmem:[#allocation2 + $0x4dc] sm:$0xf] %v1955_v13  ;;  %v1432_v50 = vrot.slane %v1431_v18, 4  ;;  %v10801_v51 = vld [vmem:[%s9732_s14 + $0x80] sm:$0xf]  ;;  %v1956_v10 = vrot.slane %v10769_v35, 4 }
 0x16e   : > { %v6247_v34 = vadd.f32 %v6246_v25, %v6178_v9  ;;  %v6179_v58 = vpop.f32.mrf.mxu1  ;;  %v9283_v9 = vld [vmem:[%s12165_s1 + $0x208] sm:$0xff]  ;;  %v7509_v25 = vld [vmem:[%s9732_s14 + $0x80] sm:$0xf]  ;;  %1180 = vst [vmem:[#allocation2 + $0x510] sm:$0xf] %v7420_v36  ;;  %v1442_v40 = vrot.slane %v1441_v39, 4  ;;  %v1638_v37 = vsel %vm9774_vm6, %v1636_v28, %v1637_v48 }
 0x16f   : > { %v6180_v57 = vadd.f32 %v6179_v58, %v6110_v45  ;;  %6602 = vmatpush.bf16.msra.mxu0 %v9283_v9  ;;  %v1437_v45 = vsel %vm9797_vm7, %v1432_v50, %v1436_v21  ;;  %v10816_v58 = vrot.slane %v1444_v5, 5  ;;  %v1639_v23 = vrot.slane %v1637_v48, 4  ;;  %v8280_v32 = vld [vmem:[#allocation2 + $0x458] sm:$0xf0]  ;;  %1692 = vst [vmem:[#allocation2 + $0x518] sm:$0xf] %v1638_v37 }
 0x170   : > { %v6315_v59 = vpop.f32.mrf.mxu3  ;;  %v1968_v18 = vshrl.u32 %v7509_v25, 16  ;;  %1512 = vst [vmem:[#allocation2 + $0x514] sm:$0xf] %v1437_v45  ;;  %v1971_v11 = vshll.u32 %v7509_v25, 16  ;;  %v1963_v20 = vrot.slane %v1961_v19, 6  ;;  %v8283_v39 = vor.u32 %v9157_v4, %v8280_v32 }
 0x171   : > { %v10803_v42 = vadd.f32 %v6315_v59, %v6247_v34  ;;  %v1640_v34 = vrot.slane %v10801_v51, 5  ;;  %v1447_v12 = vsel %vm9797_vm7, %v1442_v40, %v10816_v58  ;;  %v1448_v28 = vshrl.u32 %v10794_v63, 16  ;;  %v7450_v35 = vld [vmem:[%s9732_s14 + $0x84] sm:$0xf]  ;;  %v8336_v4 = vld [vmem:[#allocation2 + $0x4d0] sm:$0xf0] }
 0x172   : > { %1513 = vst [vmem:[#allocation2 + $0x554] sm:$0xf] %v1447_v12  ;;  %v1970_v59 = vrot.slane %v1968_v18, 5  ;;  %v1964_v17 = vor.u32 %v1963_v20, %v1960_v27  ;;  %v1458_v36 = vshrl.u32 %v7450_v35, 16  ;;  %v8334_v27 = vld [vmem:[#allocation2 + $0x490] sm:$0xf] }
 0x173   : > { %v1450_v40 = vrot.slane %v1448_v28, 4  ;;  %v8342_v37 = vld [vmem:[#allocation2 + $0x498] sm:$0xf]  ;;  %v7478_v32 = vld [vmem:[%s9732_s14 + $0x84] sm:$0xf] }
 0x174   : > { %v1965_v25 = vsel %vm9830_vm8, %v1956_v10, %v1964_v17  ;;  %v7479_v10 = vld [vmem:[%s9732_s14 + $0x88] sm:$0x1]  ;;  %v9282_v28 = vld [vmem:[%s12165_s1 + $0x200] sm:$0xff] }
 0x175   : > { %v6248_v61 = vpop.f32.mrf.mxu2  ;;  %v6329_v8 = vpop.f32.mrf.mxu0  ;;  %2040 = vst [vmem:[#allocation2 + $0x51c] sm:$0xf] %v1965_v25  ;;  %v1451_v19 = vor.u32 %v1450_v40, %v10816_v58  ;;  %v9298_v58 = vld [vmem:[%s12165_s1 + $0x280] sm:$0xff]  ;;  %v1646_v51 = vrot.slane %v7479_v10, 5  ;;  %6603 = vmatpush.bf16.msra.mxu0 %v9282_v28  ;;  %v7539_v28 = vld [vmem:[%s9732_s14 + $0x3c] sm:$0xf] }
 0x176   : > { %v6249_v13 = vadd.f32 %v6248_v61, %v6180_v57  ;;  %v6398_v9 = vpop.f32.mrf.mxu1  ;;  %v6330_v21 = vadd.f32 %v6329_v8, %v10266_v47  ;;  %v1641_v57 = vsel %vm9774_vm6, %v1639_v23, %v1640_v34  ;;  %v1973_v47 = vrot.slane %v1971_v11, 6  ;;  %v7451_v8 = vld [vmem:[%s9732_s14 + $0x88] sm:$0x1]  ;;  %6741 = vmatpush.bf16.msra.mxu2 %v9298_v58  ;;  %v7538_v58 = vld [vmem:[%s9732_s14 + $0x38] sm:$0xf] }
 0x177   : > { %1693 = vst [vmem:[#allocation2 + $0x558] sm:$0xf] %v1641_v57  ;;  %v9181_v57 = vld [vmem:[#allocation2 + $0x4d4] sm:$0xf0]  ;;  %v1464_v11 = vshll.u32 %v7451_v8, 16 }
 0x178   : > { %v6399_v50 = vadd.f32 %v6398_v9, %v6330_v21  ;;  %6368 = vmatmul.bf16.gmra.mxu0 %v8271_v24  ;;  %v6317_v5 = vpop.f32.mrf.mxu3  ;;  %v10833_v48 = vor.u32 %v1973_v47, %v1970_v59  ;;  %v1966_v24 = vrot.slane %v1964_v17, 4  ;;  %v9172_v9 = vld [vmem:[#allocation2 + $0x494] sm:$0xf]  ;;  %v1460_v21 = vrot.slane %v1458_v36, 4  ;;  %v7511_v17 = vld [vmem:[%s9732_s14 + $0x88] sm:$0x3] }
 0x179   : > { %6437 = vmatmul.bf16.gmra.mxu1 %v8275_v56  ;;  %v10830_v44 = vadd.f32 %v6317_v5, %v6249_v13  ;;  %v1454_v56 = vshll.u32 %v7450_v35, 16  ;;  %v9180_v13 = vld [vmem:[#allocation2 + $0x4cc] sm:$0xf0]  ;;  %v1452_v59 = vrot.slane %v1451_v19, 4  ;;  %v1642_v47 = vrot.slane %v1640_v34, 4  ;;  %v9306_v35 = vld [vmem:[%s12165_s1 + $0x2c0] sm:$0xff] }
 0x17a   : > { %6506 = vmatmul.bf16.gmra.mxu2 %v8279_v31  ;;  %v1975_v63 = vsel %vm9830_vm8, %v1966_v24, %v10833_v48  ;;  %v7510_v5 = vld [vmem:[%s9732_s14 + $0x84] sm:$0xf]  ;;  %v1466_v25 = vrot.slane %v1464_v11, 5  ;;  %v8335_v34 = vor.u32 %v9180_v13, %v8334_v27  ;;  %6810 = vmatpush.bf16.msra.mxu3 %v9306_v35 }
 0x17b   : > { %2041 = vst [vmem:[#allocation2 + $0x55c] sm:$0xf] %v1975_v63  ;;  %v1456_v18 = vrot.slane %v1454_v56, 5  ;;  %v7422_v56 = vld [vmem:[%s9732_s14 + $0x80] sm:$0xf]  ;;  %v1978_v40 = vshrl.u32 %v7510_v5, 16 }
 0x17c   : > { %v7423_v36 = vld [vmem:[%s9732_s14 + $0x84] sm:$0xf]  ;;  %1182 = vst [vmem:[#allocation2 + $0x590] sm:$0xf] %v7422_v56  ;;  %v1981_v13 = vshll.u32 %v7510_v5, 16  ;;  %v2134_v56 = vshll.u32 %v7539_v28, 16 }
 0x17d   : > { %v6467_v43 = vpop.f32.mrf.mxu2  ;;  %v6331_v61 = vpop.f32.mrf.mxu0  ;;  %6575 = vmatmul.bf16.gmra.mxu3 %v8283_v39  ;;  %1183 = vst [vmem:[#allocation2 + $0x5d0] sm:$0xf] %v7423_v36 }
 0x17e   : > { %v6468_v45 = vadd.f32 %v6467_v43, %v6399_v50  ;;  %v6400_v31 = vpop.f32.mrf.mxu1  ;;  %v6332_v23 = vadd.f32 %v6331_v61, %v10290_v7  ;;  %v1643_v7 = vrot.slane %v7478_v32, 5  ;;  %v1461_v50 = vor.u32 %v1460_v21, %v1456_v18  ;;  %v9173_v21 = vld [vmem:[#allocation2 + $0x49c] sm:$0xf] }
 0x17f   : > { %v1457_v43 = vsel %vm9797_vm7, %v1452_v59, %v1456_v18  ;;  %v8339_v61 = vor.u32 %v9172_v9, %v8336_v4  ;;  %v1988_v32 = vshrl.u32 %v7511_v17, 16  ;;  %v8344_v9 = vld [vmem:[#allocation2 + $0x4d8] sm:$0xf0]  ;;  %v1983_v11 = vrot.slane %v1981_v13, 6  ;;  %v8406_v13 = vld [vmem:[#allocation2 + $0x518] sm:$0xf] }
 0x180   : > { %v6401_v12 = vadd.f32 %v6400_v31, %v6332_v23  ;;  %v6536_v20 = vpop.f32.mrf.mxu3  ;;  %v1645_v24 = vrot.slane %v1643_v7, 4  ;;  %v8343_v31 = vor.u32 %v9181_v57, %v8342_v37  ;;  %v1462_v63 = vrot.slane %v1461_v50, 4  ;;  %1514 = vst [vmem:[#allocation2 + $0x594] sm:$0xf] %v1457_v43 }
 0x181   : > { %v10850_v39 = vadd.f32 %v6536_v20, %v6468_v45  ;;  %v1644_v27 = vsel %vm9774_vm6, %v1642_v47, %v1643_v7  ;;  %v1976_v57 = vrot.slane %v10833_v48, 4  ;;  %v1990_v10 = vrot.slane %v1988_v32, 5  ;;  %v9290_v48 = vld [vmem:[%s12165_s1 + $0x240] sm:$0xff] }
 0x182   : > { %v1467_v4 = vsel %vm9797_vm7, %v1462_v63, %v1466_v25  ;;  %v1647_v37 = vsel %vm9774_vm6, %v1645_v24, %v1646_v51  ;;  %v1991_v7 = vshll.u32 %v7511_v17, 16  ;;  %1694 = vst [vmem:[#allocation2 + $0x598] sm:$0xf] %v1644_v27  ;;  %v8347_v5 = vor.u32 %v9173_v21, %v8344_v9  ;;  %6672 = vmatpush.bf16.msra.mxu1 %v9290_v48  ;;  %v7598_v63 = vld [vmem:[%s9732_s14 + $0x38] sm:$0xe] }
 0x183   : > { %1515 = vst [vmem:[#allocation2 + $0x5d4] sm:$0xf] %v1467_v4  ;;  %v2125_v24 = vshrl.u32 %v7538_v58, 16  ;;  %v8400_v21 = vld [vmem:[#allocation2 + $0x550] sm:$0xf0]  ;;  %v2138_v9 = vshrl.u32 %v7539_v28, 16 }
 0x184   : > { %1695 = vst [vmem:[#allocation2 + $0x5d8] sm:$0xf] %v1647_v37  ;;  %v1993_v50 = vrot.slane %v1991_v7, 6  ;;  %v10887_v27 = vld [vmem:[%s9732_s14 + $0x40] sm:$0xf] }
 0x185   : > { %v6469_v45 = vpop.f32.mrf.mxu2  ;;  %v6334_v8 = vpop.f32.mrf.mxu0  ;;  %v9197_v37 = vld [vmem:[#allocation2 + $0x554] sm:$0xf0]  ;;  %v2140_v7 = vrot.slane %v2138_v9, 4  ;;  %v9189_v9 = vld [vmem:[#allocation2 + $0x51c] sm:$0xf] }
 0x186   : > { %v6470_v23 = vadd.f32 %v6469_v45, %v6401_v12  ;;  %v6403_v19 = vpop.f32.mrf.mxu1  ;;  %v6335_v18 = vadd.f32 %v6334_v8, %v10311_v30  ;;  %v1980_v12 = vrot.slane %v1978_v40, 5  ;;  %v1994_v25 = vor.u32 %v1993_v50, %v1990_v10  ;;  %v9196_v8 = vld [vmem:[#allocation2 + $0x54c] sm:$0xf0] }
 0x188   : > { %v6404_v20 = vadd.f32 %v6403_v19, %v6335_v18  ;;  %6373 = vmatmul.bf16.gmra.mxu0 %v8335_v34  ;;  %v6538_v30 = vpop.f32.mrf.mxu3  ;;  %v1984_v59 = vor.u32 %v1983_v11, %v1980_v12  ;;  %v2128_v34 = vshll.u32 %v7538_v58, 16  ;;  %v9188_v19 = vld [vmem:[#allocation2 + $0x514] sm:$0xf]  ;;  %v2136_v18 = vrot.slane %v2134_v56, 5  ;;  %v7599_v58 = vld [vmem:[%s9732_s14 + $0x3c] sm:$0xf] }
 0x189   : > { %6442 = vmatmul.bf16.gmra.mxu1 %v8339_v61  ;;  %v10873_v47 = vadd.f32 %v6538_v30, %v6470_v23  ;;  %v8398_v23 = vld [vmem:[#allocation2 + $0x510] sm:$0xf]  ;;  %v2144_v12 = vshll.u32 %v10887_v27, 16  ;;  %v10893_v30 = vld [vmem:[%s9732_s14 + $0x40] sm:$0xf]  ;;  %v8407_v56 = vor.u32 %v9197_v37, %v8406_v13 }
 0x18a   : > { %6511 = vmatmul.bf16.gmra.mxu2 %v8343_v31  ;;  %v1985_v17 = vsel %vm9830_vm8, %v1976_v57, %v1984_v59  ;;  %v1986_v35 = vrot.slane %v1984_v59, 4  ;;  %v2127_v31 = vrot.slane %v2125_v24, 4  ;;  %v2130_v32 = vrot.slane %v2128_v34, 5 }
 0x18b   : > { %2042 = vst [vmem:[#allocation2 + $0x59c] sm:$0xf] %v1985_v17  ;;  %v2637_v57 = vshrl.u32 %v7598_v63, 16  ;;  %v2489_v48 = vrot.slane %v10893_v30, 5  ;;  %v8399_v28 = vor.u32 %v9196_v8, %v8398_v23  ;;  %v8403_v17 = vor.u32 %v9188_v19, %v8400_v21  ;;  %v7517_v30 = vld [vmem:[%s9732_s14 + $0x44] sm:$0xf] }
 0x18c   : > { %v1995_v61 = vsel %vm9830_vm8, %v1986_v35, %v1994_v25  ;;  %v2131_v10 = vor.u32 %v2130_v32, %v2127_v31  ;;  %v7514_v35 = vld [vmem:[%s9732_s14 + $0x38] sm:$0xf]  ;;  %v7515_v25 = vld [vmem:[%s9732_s14 + $0x3c] sm:$0xf]  ;;  %v2141_v24 = vor.u32 %v2140_v7, %v2136_v18  ;;  %v2640_v19 = vshll.u32 %v7598_v63, 16 }
 0x18d   : > { %v6472_v51 = vpop.f32.mrf.mxu2  ;;  %v6336_v43 = vpop.f32.mrf.mxu0  ;;  %6580 = vmatmul.bf16.gmra.mxu3 %v8347_v5  ;;  %2043 = vst [vmem:[#allocation2 + $0x5dc] sm:$0xf] %v1995_v61  ;;  %v7600_v61 = vld [vmem:[%s9732_s14 + $0x40] sm:$0xf]  ;;  %v2639_v8 = vrot.slane %v2637_v57, 5  ;;  %v2646_v63 = vshrl.u32 %v7599_v58, 16 }
 0x18e   : > { %v6473_v36 = vadd.f32 %v6472_v51, %v6404_v20  ;;  %v6405_v45 = vpop.f32.mrf.mxu1  ;;  %v6337_v40 = vadd.f32 %v6336_v43, %v10329_v26  ;;  %v7566_v26 = vld [vmem:[%s9732_s14 + $0x38] sm:$0xe]  ;;  %v7567_v20 = vld [vmem:[%s9732_s14 + $0x3c] sm:$0xf]  ;;  %v10901_v51 = vrot.slane %v2144_v12, 5  ;;  %v2132_v43 = vrot.slane %v2131_v10, 4 }
 0x18f   : > { %v7594_v59 = vrot.slane %v7566_v26, 9  ;;  %v2486_v5 = vrot.slane %v7567_v20, 5  ;;  %2072 = vst [vmem:[#allocation2 + $0x20] sm:$0xf] %v7514_v35  ;;  %v2142_v23 = vrot.slane %v2141_v24, 4  ;;  %v2642_v26 = vrot.slane %v2640_v19, 6 }
 0x190   : > { %v6406_v4 = vadd.f32 %v6405_v45, %v6337_v40  ;;  %v6541_v11 = vpop.f32.mrf.mxu3  ;;  %2073 = vst [vmem:[#allocation2 + $0x60] sm:$0xf] %v7515_v25  ;;  %v8408_v12 = vld [vmem:[#allocation2 + $0x558] sm:$0xf0]  ;;  %v2137_v13 = vsel %vm9797_vm7, %v2132_v43, %v2136_v18  ;;  %v2649_v57 = vshll.u32 %v7599_v58, 16  ;;  %v2656_v18 = vshrl.u32 %v7600_v61, 16 }
 0x191   : > { %v10895_v50 = vadd.f32 %v6541_v11, %v6473_v36  ;;  %v2487_v36 = vsel %vm9774_vm6, %v7594_v59, %v2486_v5  ;;  %v2488_v45 = vrot.slane %v2486_v5, 4  ;;  %2404 = vst [vmem:[#allocation2 + $0x24] sm:$0xf] %v2137_v13  ;;  %v2659_v11 = vshll.u32 %v7600_v61, 16  ;;  %v7541_v58 = vld [vmem:[%s9732_s14 + $0x44] sm:$0xf] }
 0x192   : > { %2584 = vst [vmem:[#allocation2 + $0x28] sm:$0xf] %v2487_v36  ;;  %v2643_v7 = vor.u32 %v2642_v26, %v2639_v8  ;;  %v2648_v20 = vrot.slane %v2646_v63, 5  ;;  %v2651_v59 = vrot.slane %v2649_v57, 6  ;;  %v8411_v35 = vor.u32 %v9189_v9, %v8408_v12  ;;  %v10925_v8 = vld [vmem:[%s9732_s14 + $0x44] sm:$0xf] }
 0x193   : > { %v2490_v37 = vsel %vm9774_vm6, %v2488_v45, %v2489_v48  ;;  %v2658_v25 = vrot.slane %v2656_v18, 5  ;;  %v2661_v24 = vrot.slane %v2659_v11, 6  ;;  %v2154_v45 = vshll.u32 %v7541_v58, 16  ;;  %v10932_v9 = vld [vmem:[#allocation2 + $0x594] sm:$0xf]  ;;  %v9337_v13 = vld [vmem:[%s12165_s1 + $0x3b8] sm:$0xff] }
 0x194   : > { %2585 = vst [vmem:[#allocation2 + $0x68] sm:$0xf] %v2490_v37  ;;  %v2652_v43 = vor.u32 %v2651_v59, %v2648_v20  ;;  %v10934_v12 = vld [vmem:[#allocation2 + $0x5d0] sm:$0xf0]  ;;  %v9321_v37 = vld [vmem:[%s12165_s1 + $0x338] sm:$0xff]  ;;  %7010 = vmatpush.bf16.msrb.mxu2 %v9337_v13 }
 0x195   : > { %v6474_v34 = vpop.f32.mrf.mxu2  ;;  %v6339_v40 = vpop.f32.mrf.mxu0  ;;  %v10920_v36 = vor.u32 %v2661_v24, %v2658_v25  ;;  %v9345_v63 = vld [vmem:[%s12165_s1 + $0x3f8] sm:$0xff]  ;;  %v10951_v57 = vld [vmem:[%s9732_s14 + $0x48] sm:$0xf]  ;;  %6872 = vmatpush.bf16.msrb.mxu0 %v9321_v37  ;;  %v2156_v11 = vrot.slane %v2154_v45, 5  ;;  %v7569_v25 = vld [vmem:[%s9732_s14 + $0x44] sm:$0xf] }
 0x196   : > { %v6475_v31 = vadd.f32 %v6474_v34, %v6406_v4  ;;  %v6408_v32 = vpop.f32.mrf.mxu1  ;;  %v6340_v21 = vadd.f32 %v6339_v40, %v10362_v54  ;;  %v2147_v4 = vsel %vm9797_vm7, %v2142_v23, %v10901_v51  ;;  %v2644_v34 = vrot.slane %v2643_v7, 4  ;;  %7079 = vmatpush.bf16.msrb.mxu3 %v9345_v63  ;;  %v10958_v24 = vld [vmem:[%s9732_s14 + $0x48] sm:$0xf]  ;;  %v9205_v63 = vld [vmem:[#allocation2 + $0x59c] sm:$0xf] }
 0x197   : > { %2405 = vst [vmem:[#allocation2 + $0x64] sm:$0xf] %v2147_v4  ;;  %v2654_v23 = vrot.slane %v2652_v43, 4  ;;  %v10942_v4 = vld [vmem:[#allocation2 + $0x598] sm:$0xf]  ;;  %v2666_v7 = vshrl.u32 %v10925_v8, 16 }
 0x198   : > { %v6409_v54 = vadd.f32 %v6408_v32, %v6340_v21  ;;  %6378 = vmatmul.bf16.gmra.mxu0 %v8399_v28  ;;  %v6543_v10 = vpop.f32.mrf.mxu3  ;;  %v2148_v28 = vshrl.u32 %v10887_v27, 16  ;;  %v10928_v21 = vld [vmem:[#allocation2 + $0x590] sm:$0xf]  ;;  %v2495_v45 = vrot.slane %v10958_v24, 5  ;;  %2075 = vst [vmem:[#allocation2 + $0xe0] sm:$0xf] %v7517_v30 }
 0x199   : > { %6447 = vmatmul.bf16.gmra.mxu1 %v8403_v17  ;;  %v10916_v5 = vadd.f32 %v6543_v10, %v6475_v31  ;;  %v2653_v31 = vsel %vm9830_vm8, %v2644_v34, %v2652_v43  ;;  %v10930_v27 = vld [vmem:[#allocation2 + $0x5cc] sm:$0xf0]  ;;  %v2663_v26 = vsel %vm9830_vm8, %v2654_v23, %v10920_v36  ;;  %v9329_v43 = vld [vmem:[%s12165_s1 + $0x378] sm:$0xff] }
 0x19a   : > { %6516 = vmatmul.bf16.gmra.mxu2 %v8407_v56  ;;  %v2158_v56 = vshrl.u32 %v7541_v58, 16  ;;  %2932 = vst [vmem:[#allocation2 + $0x2c] sm:$0xf] %v2653_v31  ;;  %v2491_v58 = vrot.slane %v2489_v48, 4  ;;  %6941 = vmatpush.bf16.msrb.mxu1 %v9329_v43 }
 0x19b   : > { %2933 = vst [vmem:[#allocation2 + $0x6c] sm:$0xf] %v2663_v26 }
 0x19c   : > { %v2160_v10 = vrot.slane %v2158_v56, 4  ;;  %v7602_v56 = vld [vmem:[%s9732_s14 + $0x48] sm:$0xf] }
 0x19d   : > { %v6477_v17 = vpop.f32.mrf.mxu2  ;;  %v6341_v40 = vpop.f32.mrf.mxu0  ;;  %6585 = vmatmul.bf16.gmra.mxu3 %v8411_v35  ;;  %v2164_v35 = vshll.u32 %v10951_v57, 16 }
 0x19e   : > { %v6478_v61 = vadd.f32 %v6477_v17, %v6409_v54  ;;  %v6410_v32 = vpop.f32.mrf.mxu1  ;;  %v6342_v19 = vadd.f32 %v6341_v40, %v10388_v55  ;;  %v9213_v55 = vld [vmem:[#allocation2 + $0x5d4] sm:$0xf0]  ;;  %v2150_v54 = vrot.slane %v2148_v28, 4  ;;  %v2161_v28 = vor.u32 %v2160_v10, %v2156_v11 }
 0x19f   : > { %v2492_v17 = vrot.slane %v7569_v25, 5  ;;  %v8467_v40 = vor.u32 %v10932_v9, %v10934_v12  ;;  %v8471_v23 = vor.u32 %v9213_v55, %v10942_v4  ;;  %v2668_v12 = vrot.slane %v2666_v7, 5  ;;  %v8472_v55 = vld [vmem:[#allocation2 + $0x5d8] sm:$0xf0] }
 0x1a0   : > { %v6411_v18 = vadd.f32 %v6410_v32, %v6342_v19  ;;  %v6546_v20 = vpop.f32.mrf.mxu3  ;;  %v2151_v59 = vor.u32 %v2150_v54, %v10901_v51  ;;  %v8463_v51 = vor.u32 %v10930_v27, %v10928_v21  ;;  %v7516_v32 = vld [vmem:[%s9732_s14 + $0x40] sm:$0xf]  ;;  %v2162_v19 = vrot.slane %v2161_v28, 4 }
 0x1a1   : > { %v10962_v34 = vadd.f32 %v6546_v20, %v6478_v61  ;;  %v10975_v61 = vrot.slane %v2164_v35, 5  ;;  %2074 = vst [vmem:[#allocation2 + $0xa0] sm:$0xf] %v7516_v32  ;;  %v2493_v13 = vsel %vm9774_vm6, %v2491_v58, %v2492_v17  ;;  %v2494_v37 = vrot.slane %v2492_v17, 4  ;;  %v7543_v32 = vld [vmem:[%s9732_s14 + $0x4c] sm:$0xf] }
 0x1a2   : > { %v2152_v48 = vrot.slane %v2151_v59, 4  ;;  %v2669_v54 = vshll.u32 %v10925_v8, 16  ;;  %v2676_v20 = vshrl.u32 %v7602_v56, 16  ;;  %v2679_v8 = vshll.u32 %v7602_v56, 16  ;;  %2586 = vst [vmem:[#allocation2 + $0xa8] sm:$0xf] %v2493_v13 }
 0x1a3   : > { %v2167_v10 = vsel %vm9797_vm7, %v2162_v19, %v10975_v61  ;;  %v8475_v28 = vor.u32 %v9205_v63, %v8472_v55  ;;  %v2168_v17 = vshrl.u32 %v10951_v57, 16  ;;  %v7544_v63 = vld [vmem:[%s9732_s14 + $0x50] sm:$0x1] }
 0x1a4   : > { %v2157_v9 = vsel %vm9797_vm7, %v2152_v48, %v2156_v11  ;;  %2407 = vst [vmem:[#allocation2 + $0xe4] sm:$0xf] %v2167_v10  ;;  %v2664_v11 = vrot.slane %v10920_v36, 4  ;;  %v2671_v7 = vrot.slane %v2669_v54, 6  ;;  %v2681_v58 = vrot.slane %v2679_v8, 6 }
 0x1a5   : > { %v6479_v31 = vpop.f32.mrf.mxu2  ;;  %v6344_v21 = vpop.f32.mrf.mxu0  ;;  %2406 = vst [vmem:[#allocation2 + $0xa4] sm:$0xf] %v2157_v9  ;;  %v2178_v48 = vshrl.u32 %v7543_v32, 16  ;;  %v2170_v13 = vrot.slane %v2168_v17, 4  ;;  %v7603_v9 = vld [vmem:[%s9732_s14 + $0x4c] sm:$0xf] }
 0x1a6   : > { %v6480_v26 = vadd.f32 %v6479_v31, %v6411_v18  ;;  %v6413_v27 = vpop.f32.mrf.mxu1  ;;  %v6345_v4 = vadd.f32 %v6344_v21, %v10407_v22  ;;  %v2496_v18 = vsel %vm9774_vm6, %v2494_v37, %v2495_v45  ;;  %v2678_v22 = vrot.slane %v2676_v20, 5  ;;  %v9038_v21 = vld [vmem:[#allocation2 + $0x5c] sm:$0xf0]  ;;  %v7782_v54 = vld [vmem:[#allocation2 + $0x28] sm:$0xf] }
 0x1a7   : > { %2587 = vst [vmem:[#allocation2 + $0xe8] sm:$0xf] %v2496_v18  ;;  %v2672_v25 = vor.u32 %v2671_v7, %v2668_v12  ;;  %v7776_v12 = vld [vmem:[#allocation2 + $0x60] sm:$0xf0]  ;;  %v2180_v10 = vrot.slane %v2178_v48, 4  ;;  %v2184_v7 = vshll.u32 %v7544_v63, 16 }
 0x1a8   : > { %v6414_v59 = vadd.f32 %v6413_v27, %v6345_v4  ;;  %6383 = vmatmul.bf16.gmra.mxu0 %v8463_v51  ;;  %v6548_v35 = vpop.f32.mrf.mxu3  ;;  %v10998_v30 = vor.u32 %v2681_v58, %v2678_v22  ;;  %v2174_v51 = vshll.u32 %v7543_v32, 16  ;;  %v9030_v27 = vld [vmem:[#allocation2 + $0x24] sm:$0xf]  ;;  %v2171_v4 = vor.u32 %v2170_v13, %v10975_v61  ;;  %v7571_v18 = vld [vmem:[%s9732_s14 + $0x4c] sm:$0xf]  ;;  %v9336_v61 = vld [vmem:[%s12165_s1 + $0x3b0] sm:$0xff] }
 0x1a9   : > { %6452 = vmatmul.bf16.gmra.mxu1 %v8467_v40  ;;  %v10992_v43 = vadd.f32 %v6548_v35, %v6480_v26  ;;  %v2673_v36 = vsel %vm9830_vm8, %v2664_v11, %v2672_v25  ;;  %v2674_v56 = vrot.slane %v2672_v25, 4  ;;  %v7774_v26 = vld [vmem:[#allocation2 + $0x20] sm:$0xf]  ;;  %v9039_v11 = vld [vmem:[#allocation2 + $0x64] sm:$0xf0]  ;;  %v2497_v25 = vrot.slane %v2495_v45, 4  ;;  %7011 = vmatpush.bf16.msrb.mxu2 %v9336_v61 }
 0x1aa   : > { %6521 = vmatmul.bf16.gmra.mxu2 %v8471_v23  ;;  %2934 = vst [vmem:[#allocation2 + $0xac] sm:$0xf] %v2673_v36  ;;  %v2176_v55 = vrot.slane %v2174_v51, 5  ;;  %v7572_v8 = vld [vmem:[%s9732_s14 + $0x50] sm:$0x1]  ;;  %v2172_v22 = vrot.slane %v2171_v4, 4  ;;  %v7775_v45 = vor.u32 %v9038_v21, %v7774_v26 }
 0x1ab   : > { %v2683_v57 = vsel %vm9830_vm8, %v2674_v56, %v10998_v30  ;;  %v7604_v58 = vld [vmem:[%s9732_s14 + $0x50] sm:$0x3]  ;;  %v2186_v56 = vrot.slane %v2184_v7, 5  ;;  %v2501_v24 = vrot.slane %v7572_v8, 5  ;;  %v7518_v48 = vld [vmem:[%s9732_s14 + $0x48] sm:$0xf] }
 0x1ac   : > { %2935 = vst [vmem:[#allocation2 + $0xec] sm:$0xf] %v2683_v57  ;;  %v2181_v35 = vor.u32 %v2180_v10, %v2176_v55  ;;  %v9320_v32 = vld [vmem:[%s12165_s1 + $0x330] sm:$0xff]  ;;  %v7783_v57 = vor.u32 %v9039_v11, %v7782_v54  ;;  %v2689_v21 = vshll.u32 %v7603_v9, 16  ;;  %v2699_v7 = vshll.u32 %v7604_v58, 16 }
 0x1ad   : > { %v6482_v40 = vpop.f32.mrf.mxu2  ;;  %v6346_v23 = vpop.f32.mrf.mxu0  ;;  %6590 = vmatmul.bf16.gmra.mxu3 %v8475_v28  ;;  %v2686_v28 = vshrl.u32 %v7603_v9, 16  ;;  %v9344_v36 = vld [vmem:[%s12165_s1 + $0x3f0] sm:$0xff]  ;;  %6873 = vmatpush.bf16.msrb.mxu0 %v9320_v32  ;;  %2076 = vst [vmem:[#allocation2 + $0x120] sm:$0xf] %v7518_v48  ;;  %v7546_v61 = vld [vmem:[%s9732_s14 + $0x58] sm:$0xf] }
 0x1ae   : > { %v6483_v31 = vadd.f32 %v6482_v40, %v6414_v59  ;;  %v6415_v19 = vpop.f32.mrf.mxu1  ;;  %v6347_v37 = vadd.f32 %v6346_v23, %v10429_v2  ;;  %v2498_v2 = vrot.slane %v7571_v18, 5  ;;  %v7779_v40 = vor.u32 %v9030_v27, %v7776_v12  ;;  %v9031_v18 = vld [vmem:[#allocation2 + $0x2c] sm:$0xf]  ;;  %7080 = vmatpush.bf16.msrb.mxu3 %v9344_v36 }
 0x1af   : > { %v2177_v23 = vsel %vm9797_vm7, %v2172_v22, %v2176_v55  ;;  %v2182_v13 = vrot.slane %v2181_v35, 4  ;;  %v2688_v26 = vrot.slane %v2686_v28, 5  ;;  %v2696_v27 = vshrl.u32 %v7604_v58, 16  ;;  %v7784_v55 = vld [vmem:[#allocation2 + $0x68] sm:$0xf0] }
 0x1b0   : > { %v6416_v20 = vadd.f32 %v6415_v19, %v6347_v37  ;;  %v6551_v59 = vpop.f32.mrf.mxu3  ;;  %v2500_v51 = vrot.slane %v2498_v2, 4  ;;  %v2499_v37 = vsel %vm9774_vm6, %v2497_v25, %v2498_v2  ;;  %2408 = vst [vmem:[#allocation2 + $0x124] sm:$0xf] %v2177_v23  ;;  %v2691_v8 = vrot.slane %v2689_v21, 6  ;;  %v7545_v28 = vld [vmem:[%s9732_s14 + $0x54] sm:$0xf] }
 0x1b1   : > { %v11012_v17 = vadd.f32 %v6551_v59, %v6483_v31  ;;  %v7519_v31 = vld [vmem:[%s9732_s14 + $0x4c] sm:$0xf]  ;;  %v2187_v54 = vsel %vm9797_vm7, %v2182_v13, %v2186_v56  ;;  %v2698_v2 = vrot.slane %v2696_v27, 5  ;;  %2588 = vst [vmem:[#allocation2 + $0x128] sm:$0xf] %v2499_v37  ;;  %v7787_v25 = vor.u32 %v9031_v18, %v7784_v55 }
 0x1b2   : > { %2077 = vst [vmem:[#allocation2 + $0x160] sm:$0xf] %v7519_v31  ;;  %v2502_v11 = vsel %vm9774_vm6, %v2500_v51, %v2501_v24  ;;  %v2692_v22 = vor.u32 %v2691_v8, %v2688_v26  ;;  %v2189_v56 = vshrl.u32 %v7545_v28, 16  ;;  %v2192_v51 = vshll.u32 %v7545_v28, 16  ;;  %v7838_v37 = vld [vmem:[#allocation2 + $0xa0] sm:$0xf] }
 0x1b3   : > { %2409 = vst [vmem:[#allocation2 + $0x164] sm:$0xf] %v2187_v54  ;;  %v7605_v18 = vld [vmem:[%s9732_s14 + $0x54] sm:$0xe]  ;;  %v7840_v26 = vld [vmem:[#allocation2 + $0xe0] sm:$0xf0] }
 0x1b4   : > { %2589 = vst [vmem:[#allocation2 + $0x168] sm:$0xf] %v2502_v11  ;;  %v2694_v36 = vrot.slane %v2692_v22, 4  ;;  %v2194_v21 = vrot.slane %v2192_v51, 5  ;;  %v7846_v54 = vld [vmem:[#allocation2 + $0xa8] sm:$0xf] }
 0x1b5   : > { %v6484_v19 = vpop.f32.mrf.mxu2  ;;  %v6349_v4 = vpop.f32.mrf.mxu0  ;;  %v7606_v51 = vld [vmem:[%s9732_s14 + $0x58] sm:$0xf] }
 0x1b6   : > { %v6485_v63 = vadd.f32 %v6484_v19, %v6416_v20  ;;  %v6418_v10 = vpop.f32.mrf.mxu1  ;;  %v6350_v12 = vadd.f32 %v6349_v4, %v10450_v52  ;;  %v2684_v20 = vrot.slane %v10998_v30, 4  ;;  %v2701_v52 = vrot.slane %v2699_v7, 6  ;;  %v9328_v30 = vld [vmem:[%s12165_s1 + $0x370] sm:$0xff]  ;;  %v9046_v4 = vld [vmem:[#allocation2 + $0xa4] sm:$0xf] }
 0x1b7   : > { %6942 = vmatpush.bf16.msrb.mxu1 %v9328_v30  ;;  %v7573_v7 = vld [vmem:[%s9732_s14 + $0x54] sm:$0xe] }
 0x1b8   : > { %v6419_v9 = vadd.f32 %v6418_v10, %v6350_v12  ;;  %6604 = vmatmul.bf16.vlgmr.msra.gmra.mxu0 %v7775_v45  ;;  %v6553_v59 = vpop.f32.mrf.mxu3  ;;  %v2702_v58 = vor.u32 %v2701_v52, %v2698_v2  ;;  %v2693_v32 = vsel %vm9830_vm8, %v2684_v20, %v2692_v22  ;;  %v2198_v45 = vshll.u32 %v7546_v61, 16  ;;  %v11048_v10 = vld [vmem:[%s9732_s14 + $0x5c] sm:$0xf]  ;;  %v7574_v2 = vld [vmem:[%s9732_s14 + $0x58] sm:$0xf] }
 0x1b9   : > { %6673 = vmatmul.bf16.vlgmr.msra.gmra.mxu1 %v7779_v40  ;;  %v11035_v35 = vadd.f32 %v6553_v59, %v6485_v63  ;;  %2936 = vst [vmem:[#allocation2 + $0x12c] sm:$0xf] %v2693_v32  ;;  %v2202_v40 = vshrl.u32 %v7546_v61, 16  ;;  %v9054_v63 = vld [vmem:[#allocation2 + $0xdc] sm:$0xf0]  ;;  %v2208_v11 = vshll.u32 %v11048_v10, 16  ;;  %v7843_v32 = vor.u32 %v9046_v4, %v7840_v26 }
 0x1ba   : > { %6742 = vmatmul.bf16.vlgmr.msra.gmra.mxu2 %v7783_v57  ;;  %v2703_v19 = vsel %vm9830_vm8, %v2694_v36, %v2702_v58  ;;  %v2191_v57 = vrot.slane %v2189_v56, 4  ;;  %v2200_v27 = vrot.slane %v2198_v45, 5  ;;  %v7595_v52 = vrot.slane %v7573_v7, 9  ;;  %v7520_v36 = vld [vmem:[%s9732_s14 + $0x54] sm:$0xf] }
 0x1bb   : > { %2937 = vst [vmem:[#allocation2 + $0x16c] sm:$0xf] %v2703_v19  ;;  %v2204_v12 = vrot.slane %v2202_v40, 4  ;;  %v2705_v59 = vshrl.u32 %v7605_v18, 16  ;;  %v11059_v30 = vrot.slane %v2208_v11, 5  ;;  %v2505_v58 = vrot.slane %v7574_v2, 5 }
 0x1bc   : > { %v2195_v20 = vor.u32 %v2194_v21, %v2191_v57  ;;  %v7839_v61 = vor.u32 %v9054_v63, %v7838_v37  ;;  %v7521_v56 = vld [vmem:[%s9732_s14 + $0x58] sm:$0xf]  ;;  %2078 = vst [vmem:[#allocation2 + $0x1a0] sm:$0xf] %v7520_v36  ;;  %v7607_v21 = vld [vmem:[%s9732_s14 + $0x5c] sm:$0xf] }
 0x1bd   : > { %v6487_v24 = vpop.f32.mrf.mxu2  ;;  %v6351_v31 = vpop.f32.mrf.mxu0  ;;  %6811 = vmatmul.bf16.vlgmr.msra.gmra.mxu3 %v7787_v25  ;;  %v2205_v8 = vor.u32 %v2204_v12, %v2200_v27  ;;  %v9055_v25 = vld [vmem:[#allocation2 + $0xe4] sm:$0xf0]  ;;  %2079 = vst [vmem:[#allocation2 + $0x1e0] sm:$0xf] %v7521_v56  ;;  %v9047_v63 = vld [vmem:[#allocation2 + $0xac] sm:$0xf] }
 0x1be   : > { %v6488_v48 = vadd.f32 %v6487_v24, %v6419_v9  ;;  %v6420_v23 = vpop.f32.mrf.mxu1  ;;  %v6352_v13 = vadd.f32 %v6351_v31, %v10470_v16  ;;  %v11055_v9 = vld [vmem:[%s9732_s14 + $0x5c] sm:$0xf]  ;;  %v2196_v45 = vrot.slane %v2195_v20, 4  ;;  %v2507_v31 = vrot.slane %v2505_v58, 4  ;;  %v7848_v4 = vld [vmem:[#allocation2 + $0xe8] sm:$0xf0] }
 0x1bf   : > { %v2508_v28 = vrot.slane %v11055_v9, 5  ;;  %v2206_v40 = vrot.slane %v2205_v8, 4  ;;  %v2708_v11 = vshll.u32 %v7605_v18, 16  ;;  %v2714_v7 = vshrl.u32 %v7606_v51, 16  ;;  %v7548_v56 = vld [vmem:[%s9732_s14 + $0x60] sm:$0xf] }
 0x1c0   : > { %v6421_v55 = vadd.f32 %v6420_v23, %v6352_v13  ;;  %v6556_v16 = vpop.f32.mrf.mxu3  ;;  %v7847_v13 = vor.u32 %v9055_v25, %v7846_v54  ;;  %v2201_v26 = vsel %vm9797_vm7, %v2196_v45, %v2200_v27  ;;  %v2707_v54 = vrot.slane %v2705_v59, 5 }
 0x1c1   : > { %v11057_v22 = vadd.f32 %v6556_v16, %v6488_v48  ;;  %v2506_v48 = vsel %vm9774_vm6, %v7595_v52, %v2505_v58  ;;  %v2211_v12 = vsel %vm9797_vm7, %v2206_v40, %v11059_v30  ;;  %2410 = vst [vmem:[#allocation2 + $0x1a4] sm:$0xf] %v2201_v26  ;;  %v2717_v27 = vshll.u32 %v7606_v51, 16  ;;  %v9335_v26 = vld [vmem:[%s12165_s1 + $0x3a8] sm:$0xff] }
 0x1c2   : > { %2590 = vst [vmem:[#allocation2 + $0x1a8] sm:$0xf] %v2506_v48  ;;  %v2724_v16 = vshrl.u32 %v7607_v21, 16  ;;  %v2727_v20 = vshll.u32 %v7607_v21, 16  ;;  %v7851_v2 = vor.u32 %v9047_v63, %v7848_v4  ;;  %v2710_v52 = vrot.slane %v2708_v11, 6  ;;  %7012 = vmatpush.bf16.msrb.mxu2 %v9335_v26 }
 0x1c3   : > { %2411 = vst [vmem:[#allocation2 + $0x1e4] sm:$0xf] %v2211_v12  ;;  %v2716_v25 = vrot.slane %v2714_v7, 5  ;;  %v2212_v59 = vshrl.u32 %v11048_v10, 16  ;;  %v2719_v18 = vrot.slane %v2717_v27, 6  ;;  %v2222_v10 = vshrl.u32 %v7548_v56, 16 }
 0x1c4   : > { %v2726_v36 = vrot.slane %v2724_v16, 5  ;;  %v11091_v63 = vld [vmem:[#allocation2 + $0x160] sm:$0xf0]  ;;  %v9319_v12 = vld [vmem:[%s12165_s1 + $0x328] sm:$0xff] }
 0x1c5   : > { %v6489_v24 = vpop.f32.mrf.mxu2  ;;  %v6354_v19 = vpop.f32.mrf.mxu0  ;;  %v2720_v51 = vor.u32 %v2719_v18, %v2716_v25  ;;  %v11101_v11 = vld [vmem:[#allocation2 + $0x164] sm:$0xf0]  ;;  %6874 = vmatpush.bf16.msrb.mxu0 %v9319_v12  ;;  %v2224_v18 = vrot.slane %v2222_v10, 4 }
 0x1c6   : > { %v6490_v23 = vadd.f32 %v6489_v24, %v6421_v55  ;;  %v6423_v57 = vpop.f32.mrf.mxu1  ;;  %v6355_v37 = vadd.f32 %v6354_v19, %v10514_v15  ;;  %v2509_v55 = vsel %vm9774_vm6, %v2507_v31, %v2508_v28  ;;  %v2729_v24 = vrot.slane %v2727_v20, 6  ;;  %v11082_v19 = vld [vmem:[#allocation2 + $0x120] sm:$0xf]  ;;  %v9343_v7 = vld [vmem:[%s12165_s1 + $0x3e8] sm:$0xff] }
 0x1c7   : > { %2591 = vst [vmem:[#allocation2 + $0x1e8] sm:$0xf] %v2509_v55  ;;  %v2722_v4 = vrot.slane %v2720_v51, 4  ;;  %v2214_v55 = vrot.slane %v2212_v59, 4  ;;  %7081 = vmatpush.bf16.msrb.mxu3 %v9343_v7 }
 0x1c8   : > { %v6424_v15 = vadd.f32 %v6423_v57, %v6355_v37  ;;  %6609 = vmatmul.bf16.gmra.mxu0 %v7839_v61  ;;  %v6558_v8 = vpop.f32.mrf.mxu3  ;;  %v2711_v61 = vor.u32 %v2710_v52, %v2707_v54  ;;  %v11084_v57 = vld [vmem:[#allocation2 + $0x15c] sm:$0xf0]  ;;  %v11089_v37 = vld [vmem:[#allocation2 + $0x124] sm:$0xf]  ;;  %v11099_v54 = vld [vmem:[#allocation2 + $0x128] sm:$0xf] }
 0x1c9   : > { %6678 = vmatmul.bf16.gmra.mxu1 %v7843_v32  ;;  %v11078_v58 = vadd.f32 %v6558_v8, %v6490_v23  ;;  %v2218_v32 = vshll.u32 %v7548_v56, 16  ;;  %v7576_v8 = vld [vmem:[%s9732_s14 + $0x60] sm:$0xf]  ;;  %v7903_v25 = vor.u32 %v11084_v57, %v11082_v19  ;;  %v2215_v59 = vor.u32 %v2214_v55, %v11059_v30  ;;  %v11121_v56 = vld [vmem:[%s9732_s14 + $0x64] sm:$0xf] }
 0x1ca   : > { %6747 = vmatmul.bf16.gmra.mxu2 %v7847_v13  ;;  %v2712_v23 = vrot.slane %v2711_v61, 4  ;;  %v11086_v13 = vor.u32 %v2729_v24, %v2726_v36  ;;  %v9327_v24 = vld [vmem:[%s12165_s1 + $0x368] sm:$0xff]  ;;  %v7907_v30 = vor.u32 %v11089_v37, %v11091_v63  ;;  %v7523_v19 = vld [vmem:[%s9732_s14 + $0x60] sm:$0xf] }
 0x1cb   : > { %v2220_v27 = vrot.slane %v2218_v32, 5  ;;  %v2510_v32 = vrot.slane %v2508_v28, 4  ;;  %v2216_v57 = vrot.slane %v2215_v59, 4  ;;  %6943 = vmatpush.bf16.msrb.mxu1 %v9327_v24  ;;  %v9063_v63 = vld [vmem:[#allocation2 + $0x12c] sm:$0xf] }
 0x1cc   : > { %v2731_v20 = vsel %vm9830_vm8, %v2722_v4, %v11086_v13  ;;  %2081 = vst [vmem:[#allocation2 + $0x260] sm:$0xf] %v7523_v19 }
 0x1cd   : > { %v6492_v45 = vpop.f32.mrf.mxu2  ;;  %v6356_v48 = vpop.f32.mrf.mxu0  ;;  %6816 = vmatmul.bf16.gmra.mxu3 %v7851_v2  ;;  %v7608_v2 = vld [vmem:[%s9732_s14 + $0x60] sm:$0xf]  ;;  %2939 = vst [vmem:[#allocation2 + $0x1ec] sm:$0xf] %v2731_v20  ;;  %v2221_v55 = vsel %vm9797_vm7, %v2216_v57, %v2220_v27  ;;  %v7550_v57 = vld [vmem:[%s9732_s14 + $0x68] sm:$0xf] }
 0x1ce   : > { %v6493_v40 = vadd.f32 %v6492_v45, %v6424_v15  ;;  %v6425_v31 = vpop.f32.mrf.mxu1  ;;  %v6357_v21 = vadd.f32 %v6356_v48, %v10543_v0  ;;  %v2721_v0 = vsel %vm9830_vm8, %v2712_v23, %v2720_v51  ;;  %v11109_v15 = vld [vmem:[%s9732_s14 + $0x64] sm:$0xf]  ;;  %v2511_v45 = vrot.slane %v7576_v8, 5  ;;  %2412 = vst [vmem:[#allocation2 + $0x224] sm:$0xf] %v2221_v55 }
 0x1cf   : > { %2938 = vst [vmem:[#allocation2 + $0x1ac] sm:$0xf] %v2721_v0  ;;  %v2228_v36 = vshll.u32 %v11109_v15, 16  ;;  %v2514_v51 = vrot.slane %v11121_v56, 5  ;;  %v7609_v48 = vld [vmem:[%s9732_s14 + $0x64] sm:$0xf]  ;;  %v2225_v23 = vor.u32 %v2224_v18, %v2220_v27 }
 0x1d0   : > { %v6426_v16 = vadd.f32 %v6425_v31, %v6357_v21  ;;  %v6561_v52 = vpop.f32.mrf.mxu3  ;;  %v7522_v31 = vld [vmem:[%s9732_s14 + $0x5c] sm:$0xf]  ;;  %v7911_v21 = vor.u32 %v11101_v11, %v11099_v54  ;;  %v2512_v9 = vsel %vm9774_vm6, %v2510_v32, %v2511_v45  ;;  %v2513_v28 = vrot.slane %v2511_v45, 4  ;;  %v7912_v54 = vld [vmem:[#allocation2 + $0x168] sm:$0xf0] }
 0x1d1   : > { %v11123_v61 = vadd.f32 %v6561_v52, %v6493_v40  ;;  %v11136_v40 = vrot.slane %v2228_v36, 5  ;;  %2080 = vst [vmem:[#allocation2 + $0x220] sm:$0xf] %v7522_v31  ;;  %v2734_v4 = vshrl.u32 %v7608_v2, 16  ;;  %v2226_v0 = vrot.slane %v2225_v23, 4 }
 0x1d2   : > { %v2737_v7 = vshll.u32 %v7608_v2, 16  ;;  %v2515_v11 = vsel %vm9774_vm6, %v2513_v28, %v2514_v51  ;;  %2592 = vst [vmem:[#allocation2 + $0x228] sm:$0xf] %v2512_v9  ;;  %v2732_v27 = vrot.slane %v11086_v13, 4  ;;  %v2747_v59 = vshll.u32 %v7609_v48, 16 }
 0x1d3   : > { %v2736_v8 = vrot.slane %v2734_v4, 5  ;;  %v2231_v52 = vsel %vm9797_vm7, %v2226_v0, %v11136_v40  ;;  %2593 = vst [vmem:[#allocation2 + $0x268] sm:$0xf] %v2515_v11  ;;  %v7915_v31 = vor.u32 %v9063_v63, %v7912_v54  ;;  %v2232_v19 = vshrl.u32 %v11109_v15, 16  ;;  %v7551_v63 = vld [vmem:[%s9732_s14 + $0x6c] sm:$0x1] }
 0x1d4   : > { %v2739_v2 = vrot.slane %v2737_v7, 6  ;;  %2413 = vst [vmem:[#allocation2 + $0x264] sm:$0xf] %v2231_v52  ;;  %v2749_v32 = vrot.slane %v2747_v59, 6  ;;  %v7610_v55 = vld [vmem:[%s9732_s14 + $0x68] sm:$0xf] }
 0x1d5   : > { %v6494_v10 = vpop.f32.mrf.mxu2  ;;  %v6359_v12 = vpop.f32.mrf.mxu0  ;;  %v2234_v4 = vrot.slane %v2232_v19, 4  ;;  %v9078_v0 = vld [vmem:[#allocation2 + $0x1a4] sm:$0xf]  ;;  %v7974_v7 = vld [vmem:[#allocation2 + $0x1a8] sm:$0xf] }
 0x1d6   : > { %v6495_v26 = vadd.f32 %v6494_v10, %v6426_v16  ;;  %v6428_v37 = vpop.f32.mrf.mxu1  ;;  %v6360_v20 = vadd.f32 %v6359_v12, %v10559_v41  ;;  %v2744_v16 = vshrl.u32 %v7609_v48, 16  ;;  %v2740_v24 = vor.u32 %v2739_v2, %v2736_v8  ;;  %v7966_v12 = vld [vmem:[#allocation2 + $0x1a0] sm:$0xf]  ;;  %v7968_v52 = vld [vmem:[#allocation2 + $0x1e0] sm:$0xf0] }
 0x1d7   : > { %v2242_v10 = vshrl.u32 %v7550_v57, 16  ;;  %v2248_v8 = vshll.u32 %v7551_v63, 16  ;;  %v7579_v2 = vld [vmem:[%s9732_s14 + $0x6c] sm:$0x1]  ;;  %v9342_v19 = vld [vmem:[%s12165_s1 + $0x3e0] sm:$0xff] }
 0x1d8   : > { %v6429_v41 = vadd.f32 %v6428_v37, %v6360_v20  ;;  %6614 = vmatmul.bf16.gmra.mxu0 %v7903_v25  ;;  %v2746_v18 = vrot.slane %v2744_v16, 5  ;;  %v6563_v36 = vpop.f32.mrf.mxu3  ;;  %v2741_v13 = vsel %vm9830_vm8, %v2732_v27, %v2740_v24  ;;  %v2742_v48 = vrot.slane %v2740_v24, 4  ;;  %v9086_v37 = vld [vmem:[#allocation2 + $0x1dc] sm:$0xf0]  ;;  %v7578_v27 = vld [vmem:[%s9732_s14 + $0x68] sm:$0xf]  ;;  %7082 = vmatpush.bf16.msrb.mxu3 %v9342_v19 }
 0x1d9   : > { %6683 = vmatmul.bf16.gmra.mxu1 %v7907_v30  ;;  %v11153_v45 = vadd.f32 %v6563_v36, %v6495_v26  ;;  %v2238_v30 = vshll.u32 %v7550_v57, 16  ;;  %2940 = vst [vmem:[#allocation2 + $0x22c] sm:$0xf] %v2741_v13  ;;  %v2235_v20 = vor.u32 %v2234_v4, %v11136_v40  ;;  %v2244_v11 = vrot.slane %v2242_v10, 4  ;;  %v9334_v40 = vld [vmem:[%s12165_s1 + $0x3a0] sm:$0xff] }
 0x1da   : > { %6752 = vmatmul.bf16.gmra.mxu2 %v7911_v21  ;;  %v11159_v25 = vor.u32 %v2749_v32, %v2746_v18  ;;  %v2250_v36 = vrot.slane %v2248_v8, 5  ;;  %v2754_v24 = vshrl.u32 %v7610_v55, 16  ;;  %v2516_v57 = vrot.slane %v2514_v51, 4  ;;  %v7525_v10 = vld [vmem:[%s9732_s14 + $0x68] sm:$0xf] }
 0x1db   : > { %v2240_v54 = vrot.slane %v2238_v30, 5  ;;  %v2517_v13 = vrot.slane %v7578_v27, 5  ;;  %v7967_v30 = vor.u32 %v9086_v37, %v7966_v12  ;;  %7013 = vmatpush.bf16.msrb.mxu2 %v9334_v40  ;;  %v7611_v63 = vld [vmem:[%s9732_s14 + $0x6c] sm:$0x3]  ;;  %2083 = vst [vmem:[#allocation2 + $0x2e0] sm:$0xf] %v7525_v10 }
 0x1dc   : > { %v2751_v15 = vsel %vm9830_vm8, %v2742_v48, %v11159_v25  ;;  %v2520_v48 = vrot.slane %v7579_v2, 5  ;;  %v2756_v37 = vrot.slane %v2754_v24, 5  ;;  %v2764_v2 = vshrl.u32 %v7611_v63, 16  ;;  %v7552_v40 = vld [vmem:[%s9732_s14 + $0x70] sm:$0xf] }
 0x1dd   : > { %v6497_v23 = vpop.f32.mrf.mxu2  ;;  %v6361_v9 = vpop.f32.mrf.mxu0  ;;  %6821 = vmatmul.bf16.gmra.mxu3 %v7915_v31  ;;  %2941 = vst [vmem:[#allocation2 + $0x26c] sm:$0xf] %v2751_v15  ;;  %v2245_v18 = vor.u32 %v2244_v11, %v2240_v54  ;;  %v9318_v31 = vld [vmem:[%s12165_s1 + $0x320] sm:$0xff]  ;;  %v2518_v12 = vsel %vm9774_vm6, %v2516_v57, %v2517_v13  ;;  %v2757_v11 = vshll.u32 %v7610_v55, 16 }
 0x1de   : > { %v6498_v21 = vadd.f32 %v6497_v23, %v6429_v41  ;;  %v6430_v28 = vpop.f32.mrf.mxu1  ;;  %v6362_v26 = vadd.f32 %v6361_v9, %v10584_v62  ;;  %v9087_v62 = vld [vmem:[#allocation2 + $0x1e4] sm:$0xf0]  ;;  %v2236_v41 = vrot.slane %v2235_v20, 4  ;;  %v7524_v23 = vld [vmem:[%s9732_s14 + $0x64] sm:$0xf]  ;;  %6875 = vmatpush.bf16.msrb.mxu0 %v9318_v31 }
 0x1df   : > { %v7975_v15 = vor.u32 %v9087_v62, %v7974_v7  ;;  %2082 = vst [vmem:[#allocation2 + $0x2a0] sm:$0xf] %v7524_v23  ;;  %v2246_v4 = vrot.slane %v2245_v18, 4  ;;  %v7976_v7 = vld [vmem:[#allocation2 + $0x1e8] sm:$0xf0]  ;;  %v2759_v27 = vrot.slane %v2757_v11, 6 }
 0x1e0   : > { %v6431_v16 = vadd.f32 %v6430_v28, %v6362_v26  ;;  %v6566_v59 = vpop.f32.mrf.mxu3  ;;  %v7971_v28 = vor.u32 %v9078_v0, %v7968_v52  ;;  %v2519_v26 = vrot.slane %v2517_v13, 4  ;;  %v9079_v0 = vld [vmem:[#allocation2 + $0x1ac] sm:$0xf]  ;;  %v2752_v52 = vrot.slane %v11159_v25, 4  ;;  %2594 = vst [vmem:[#allocation2 + $0x2a8] sm:$0xf] %v2518_v12 }
 0x1e1   : > { %v11170_v32 = vadd.f32 %v6566_v59, %v6498_v21  ;;  %v2241_v21 = vsel %vm9797_vm7, %v2236_v41, %v2240_v54  ;;  %v2251_v8 = vsel %vm9797_vm7, %v2246_v4, %v2250_v36  ;;  %v2767_v59 = vshll.u32 %v7611_v63, 16  ;;  %v9326_v25 = vld [vmem:[%s12165_s1 + $0x360] sm:$0xff]  ;;  %v7553_v31 = vld [vmem:[%s9732_s14 + $0x74] sm:$0xf]  ;;  %v11210_v12 = vld [vmem:[%s9732_s14 + $0x78] sm:$0xf] }
 0x1e2   : > { %2414 = vst [vmem:[#allocation2 + $0x2a4] sm:$0xf] %v2241_v21  ;;  %v2760_v62 = vor.u32 %v2759_v27, %v2756_v37  ;;  %v2766_v41 = vrot.slane %v2764_v2, 5  ;;  %v7979_v24 = vor.u32 %v9079_v0, %v7976_v7  ;;  %6944 = vmatpush.bf16.msrb.mxu1 %v9326_v25  ;;  %v2256_v23 = vshll.u32 %v7552_v40, 16  ;;  %v8032_v37 = vld [vmem:[#allocation2 + $0x260] sm:$0xf0] }
 0x1e3   : > { %2415 = vst [vmem:[#allocation2 + $0x2e4] sm:$0xf] %v2251_v8  ;;  %v2769_v18 = vrot.slane %v2767_v59, 6  ;;  %v2262_v10 = vshll.u32 %v7553_v31, 16  ;;  %v8038_v11 = vld [vmem:[#allocation2 + $0x228] sm:$0xf] }
 0x1e4   : > { %v2761_v19 = vsel %vm9830_vm8, %v2752_v52, %v2760_v62  ;;  %v2762_v57 = vrot.slane %v2760_v62, 4  ;;  %v2266_v7 = vshrl.u32 %v7553_v31, 16  ;;  %v2272_v52 = vshll.u32 %v11210_v12, 16  ;;  %v11216_v62 = vld [vmem:[%s9732_s14 + $0x78] sm:$0xf] }
 0x1e5   : > { %v6499_v9 = vpop.f32.mrf.mxu2  ;;  %v6364_v20 = vpop.f32.mrf.mxu0  ;;  %v2770_v13 = vor.u32 %v2769_v18, %v2766_v41  ;;  %2942 = vst [vmem:[#allocation2 + $0x2ac] sm:$0xf] %v2761_v19  ;;  %v2264_v0 = vrot.slane %v2262_v10, 5  ;;  %v2527_v25 = vrot.slane %v11216_v62, 5  ;;  %v7529_v62 = vld [vmem:[%s9732_s14 + $0x7c] sm:$0xf] }
 0x1e6   : > { %v6500_v56 = vadd.f32 %v6499_v9, %v6431_v16  ;;  %v6433_v51 = vpop.f32.mrf.mxu1  ;;  %v6365_v54 = vadd.f32 %v6364_v20, %v10605_v3  ;;  %v2521_v16 = vsel %vm9774_vm6, %v2519_v26, %v2520_v48  ;;  %v2253_v48 = vshrl.u32 %v7552_v40, 16  ;;  %v7612_v26 = vld [vmem:[%s9732_s14 + $0x70] sm:$0xe]  ;;  %v9102_v20 = vld [vmem:[#allocation2 + $0x25c] sm:$0xf0] }
 0x1e7   : > { %2595 = vst [vmem:[#allocation2 + $0x2e8] sm:$0xf] %v2521_v16  ;;  %v9103_v16 = vld [vmem:[#allocation2 + $0x264] sm:$0xf0]  ;;  %v2773_v27 = vshrl.u32 %v7612_v26, 16 }
 0x1e8   : > { %v6434_v55 = vadd.f32 %v6433_v51, %v6365_v54  ;;  %6619 = vmatmul.bf16.gmra.mxu0 %v7967_v30  ;;  %v6568_v3 = vpop.f32.mrf.mxu3  ;;  %v2255_v4 = vrot.slane %v2253_v48, 4  ;;  %v9094_v51 = vld [vmem:[#allocation2 + $0x224] sm:$0xf]  ;;  %v2258_v54 = vrot.slane %v2256_v23, 5  ;;  %v7613_v40 = vld [vmem:[%s9732_s14 + $0x74] sm:$0xf]  ;;  %v8039_v10 = vor.u32 %v9103_v16, %v8038_v11 }
 0x1e9   : > { %6688 = vmatmul.bf16.gmra.mxu1 %v7971_v28  ;;  %v11196_v36 = vadd.f32 %v6568_v3, %v6500_v56  ;;  %v8030_v56 = vld [vmem:[#allocation2 + $0x220] sm:$0xf]  ;;  %v7581_v3 = vld [vmem:[%s9732_s14 + $0x74] sm:$0xf]  ;;  %v8035_v19 = vor.u32 %v9094_v51, %v8032_v37  ;;  %v2776_v51 = vshll.u32 %v7612_v26, 16  ;;  %v2782_v26 = vshrl.u32 %v7613_v40, 16 }
 0x1ea   : > { %6757 = vmatmul.bf16.gmra.mxu2 %v7975_v15  ;;  %v2771_v15 = vsel %vm9830_vm8, %v2762_v57, %v2770_v13  ;;  %v2259_v59 = vor.u32 %v2258_v54, %v2255_v4  ;;  %v8031_v31 = vor.u32 %v9102_v20, %v8030_v56  ;;  %v7526_v57 = vld [vmem:[%s9732_s14 + $0x70] sm:$0xf]  ;;  %v7527_v13 = vld [vmem:[%s9732_s14 + $0x74] sm:$0xf]  ;;  %v2775_v20 = vrot.slane %v2773_v27, 5 }
 0x1eb   : > { %2943 = vst [vmem:[#allocation2 + $0x2ec] sm:$0xf] %v2771_v15  ;;  %v7614_v15 = vld [vmem:[%s9732_s14 + $0x78] sm:$0xf]  ;;  %v2785_v27 = vshll.u32 %v7613_v40, 16  ;;  %v2276_v40 = vshrl.u32 %v11210_v12, 16 }
 0x1ec   : > { %2084 = vst [vmem:[#allocation2 + $0x320] sm:$0xf] %v7526_v57  ;;  %v11250_v12 = vld [vmem:[#allocation2 + $0x2dc] sm:$0xf0] }
 0x1ed   : > { %v6502_v30 = vpop.f32.mrf.mxu2  ;;  %v6366_v9 = vpop.f32.mrf.mxu0  ;;  %6826 = vmatmul.bf16.gmra.mxu3 %v7979_v24  ;;  %v2524_v24 = vrot.slane %v7581_v3, 5  ;;  %2085 = vst [vmem:[#allocation2 + $0x360] sm:$0xf] %v7527_v13  ;;  %v2784_v3 = vrot.slane %v2782_v26, 5  ;;  %v11273_v26 = vld [vmem:[%s9732_s14 + $0x80] sm:$0xf] }
 0x1ee   : > { %v6503_v21 = vadd.f32 %v6502_v30, %v6434_v55  ;;  %v6435_v28 = vpop.f32.mrf.mxu1  ;;  %v6367_v63 = vadd.f32 %v6366_v9, %v10625_v33  ;;  %v7580_v33 = vld [vmem:[%s9732_s14 + $0x70] sm:$0xe]  ;;  %v2268_v55 = vrot.slane %v2266_v7, 4  ;;  %v11224_v30 = vrot.slane %v2272_v52, 5  ;;  %v9095_v7 = vld [vmem:[#allocation2 + $0x22c] sm:$0xf] }
 0x1ef   : > { %v7596_v41 = vrot.slane %v7580_v33, 9  ;;  %v2260_v9 = vrot.slane %v2259_v59, 4  ;;  %v8040_v52 = vld [vmem:[#allocation2 + $0x268] sm:$0xf0]  ;;  %v2778_v33 = vrot.slane %v2776_v51, 6 }
 0x1f0   : > { %v6436_v8 = vadd.f32 %v6435_v28, %v6367_v63  ;;  %v6571_v2 = vpop.f32.mrf.mxu3  ;;  %v2269_v48 = vor.u32 %v2268_v55, %v2264_v0  ;;  %v2526_v28 = vrot.slane %v2524_v24, 4  ;;  %v8043_v57 = vor.u32 %v9095_v7, %v8040_v52  ;;  %v11248_v51 = vld [vmem:[#allocation2 + $0x2a0] sm:$0xf]  ;;  %v11254_v7 = vld [vmem:[#allocation2 + $0x2e0] sm:$0xf0]  ;;  %v9333_v52 = vld [vmem:[%s12165_s1 + $0x398] sm:$0xff] }
 0x1f1   : > { %v11218_v18 = vadd.f32 %v6571_v2, %v6503_v21  ;;  %v2525_v21 = vsel %vm9774_vm6, %v7596_v41, %v2524_v24  ;;  %v2265_v11 = vsel %vm9797_vm7, %v2260_v9, %v2264_v0  ;;  %v2792_v0 = vshrl.u32 %v7614_v15, 16  ;;  %7014 = vmatpush.bf16.msrb.mxu2 %v9333_v52  ;;  %2087 = vst [vmem:[#allocation2 + $0x3e0] sm:$0xf] %v7529_v62 }
 0x1f2   : > { %v2270_v56 = vrot.slane %v2269_v48, 4  ;;  %v2528_v16 = vsel %vm9774_vm6, %v2526_v28, %v2527_v25  ;;  %2596 = vst [vmem:[#allocation2 + $0x328] sm:$0xf] %v2525_v21  ;;  %v2795_v2 = vshll.u32 %v7614_v15, 16  ;;  %v2779_v55 = vor.u32 %v2778_v33, %v2775_v20  ;;  %v9341_v33 = vld [vmem:[%s12165_s1 + $0x3d8] sm:$0xff] }
 0x1f3   : > { %2416 = vst [vmem:[#allocation2 + $0x324] sm:$0xf] %v2265_v11  ;;  %v2787_v41 = vrot.slane %v2785_v27, 6  ;;  %v2794_v13 = vrot.slane %v2792_v0, 5  ;;  %v9317_v11 = vld [vmem:[%s12165_s1 + $0x318] sm:$0xff]  ;;  %v2278_v27 = vrot.slane %v2276_v40, 4  ;;  %7083 = vmatpush.bf16.msrb.mxu3 %v9341_v33 }
 0x1f4   : > { %2597 = vst [vmem:[#allocation2 + $0x368] sm:$0xf] %v2528_v16  ;;  %v2797_v48 = vrot.slane %v2795_v2, 6  ;;  %v2780_v9 = vrot.slane %v2779_v55, 4  ;;  %v11262_v16 = vld [vmem:[#allocation2 + $0x2a8] sm:$0xf]  ;;  %6876 = vmatpush.bf16.msrb.mxu0 %v9317_v11 }
 0x1f5   : > { %v6504_v23 = vpop.f32.mrf.mxu2  ;;  %v6369_v63 = vpop.f32.mrf.mxu0  ;;  %v9325_v40 = vld [vmem:[%s12165_s1 + $0x358] sm:$0xff] }
 0x1f6   : > { %v6505_v4 = vadd.f32 %v6504_v23, %v6436_v8  ;;  %v6438_v54 = vpop.f32.mrf.mxu1  ;;  %v6370_v37 = vadd.f32 %v6369_v63, %v10659_v1  ;;  %v2275_v8 = vsel %vm9797_vm7, %v2270_v56, %v11224_v30  ;;  %v7555_v23 = vld [vmem:[%s9732_s14 + $0x7c] sm:$0xf]  ;;  %v11243_v21 = vor.u32 %v2797_v48, %v2794_v13  ;;  %v11280_v13 = vld [vmem:[%s9732_s14 + $0x80] sm:$0xf]  ;;  %6945 = vmatpush.bf16.msrb.mxu1 %v9325_v40 }
 0x1f7   : > { %2417 = vst [vmem:[#allocation2 + $0x364] sm:$0xf] %v2275_v8  ;;  %v2282_v28 = vshll.u32 %v7555_v23, 16  ;;  %v2286_v15 = vshrl.u32 %v7555_v23, 16  ;;  %v2529_v48 = vrot.slane %v2527_v25, 4 }
 0x1f8   : > { %v6439_v1 = vadd.f32 %v6438_v54, %v6370_v37  ;;  %6624 = vmatmul.bf16.gmra.mxu0 %v8031_v31  ;;  %v6573_v59 = vpop.f32.mrf.mxu3  ;;  %v2788_v31 = vor.u32 %v2787_v41, %v2784_v3  ;;  %v11252_v37 = vld [vmem:[#allocation2 + $0x2a4] sm:$0xf]  ;;  %v2279_v3 = vor.u32 %v2278_v27, %v11224_v30  ;;  %v2292_v41 = vshll.u32 %v11273_v26, 16 }
 0x1f9   : > { %6693 = vmatmul.bf16.gmra.mxu1 %v8035_v19  ;;  %v11239_v24 = vadd.f32 %v6573_v59, %v6505_v4  ;;  %v2284_v0 = vrot.slane %v2282_v28, 5  ;;  %v2288_v2 = vrot.slane %v2286_v15, 4  ;;  %v7615_v59 = vld [vmem:[%s9732_s14 + $0x7c] sm:$0xf]  ;;  %v7616_v28 = vld [vmem:[%s9732_s14 + $0x80] sm:$0xf]  ;;  %v8095_v30 = vor.u32 %v11250_v12, %v11248_v51 }
 0x1fa   : > { %6762 = vmatmul.bf16.gmra.mxu2 %v8039_v10  ;;  %v2789_v4 = vsel %vm9830_vm8, %v2780_v9, %v2788_v31  ;;  %v2790_v56 = vrot.slane %v2788_v31, 4  ;;  %v8099_v15 = vor.u32 %v11252_v37, %v11254_v7  ;;  %v2280_v25 = vrot.slane %v2279_v3, 4  ;;  %v9111_v37 = vld [vmem:[#allocation2 + $0x2ac] sm:$0xf] }
 0x1fb   : > { %2944 = vst [vmem:[#allocation2 + $0x32c] sm:$0xf] %v2789_v4  ;;  %v2289_v9 = vor.u32 %v2288_v2, %v2284_v0  ;;  %v2805_v33 = vshll.u32 %v7615_v59, 16  ;;  %v2812_v2 = vshrl.u32 %v7616_v28, 16 }
 0x1fc   : > { %v2799_v8 = vsel %vm9830_vm8, %v2790_v56, %v11243_v21  ;;  %v2285_v7 = vsel %vm9797_vm7, %v2280_v25, %v2284_v0 }
 0x1fd   : > { %v6507_v19 = vpop.f32.mrf.mxu2  ;;  %v6371_v63 = vpop.f32.mrf.mxu0  ;;  %6831 = vmatmul.bf16.gmra.mxu3 %v8043_v57  ;;  %2945 = vst [vmem:[#allocation2 + $0x36c] sm:$0xf] %v2799_v8  ;;  %v7583_v57 = vld [vmem:[%s9732_s14 + $0x7c] sm:$0xf]  ;;  %v2290_v56 = vrot.slane %v2289_v9, 4  ;;  %v2802_v8 = vshrl.u32 %v7615_v59, 16 }
 0x1fe   : > { %v6508_v10 = vadd.f32 %v6507_v19, %v6439_v1  ;;  %v6440_v54 = vpop.f32.mrf.mxu1  ;;  %v6372_v20 = vadd.f32 %v6371_v63, %v10683_v49  ;;  %v11264_v49 = vld [vmem:[#allocation2 + $0x2e4] sm:$0xf0]  ;;  %v2530_v31 = vrot.slane %v7583_v57, 5  ;;  %v2533_v19 = vrot.slane %v11280_v13, 5  ;;  %v7528_v63 = vld [vmem:[%s9732_s14 + $0x78] sm:$0xf] }
 0x1ff   : > { %v8103_v4 = vor.u32 %v11264_v49, %v11262_v16  ;;  %2086 = vst [vmem:[#allocation2 + $0x3a0] sm:$0xf] %v7528_v63  ;;  %v8104_v16 = vld [vmem:[#allocation2 + $0x2e8] sm:$0xf0]  ;;  %v2804_v0 = vrot.slane %v2802_v8, 5  ;;  %v2807_v59 = vrot.slane %v2805_v33, 6 }
 0x200   : > { %v6441_v1 = vadd.f32 %v6440_v54, %v6372_v20  ;;  %v6576_v55 = vpop.f32.mrf.mxu3  ;;  %v2531_v20 = vsel %vm9774_vm6, %v2529_v48, %v2530_v31  ;;  %v2532_v52 = vrot.slane %v2530_v31, 4  ;;  %2418 = vst [vmem:[#allocation2 + $0x3a4] sm:$0xf] %v2285_v7  ;;  %v8107_v9 = vor.u32 %v9111_v37, %v8104_v16  ;;  %v7557_v63 = vld [vmem:[%s9732_s14 + $0x84] sm:$0xf] }
 0x201   : > { %v11284_v23 = vadd.f32 %v6576_v55, %v6508_v10  ;;  %v11297_v10 = vrot.slane %v2292_v41, 5  ;;  %v2800_v55 = vrot.slane %v11243_v21, 4  ;;  %2598 = vst [vmem:[#allocation2 + $0x3a8] sm:$0xf] %v2531_v20  ;;  %v2815_v41 = vshll.u32 %v7616_v28, 16 }
 0x202   : > { %v2808_v48 = vor.u32 %v2807_v59, %v2804_v0  ;;  %v2296_v31 = vshrl.u32 %v11273_v26, 16  ;;  %v2306_v25 = vshrl.u32 %v7557_v63, 16  ;;  %v9134_v37 = vld [vmem:[#allocation2 + $0x35c] sm:$0xf0]  ;;  %v9126_v7 = vld [vmem:[#allocation2 + $0x324] sm:$0xf] }
 0x203   : > { %v2295_v49 = vsel %vm9797_vm7, %v2290_v56, %v11297_v10  ;;  %v2817_v21 = vrot.slane %v2815_v41, 6  ;;  %v8160_v8 = vld [vmem:[#allocation2 + $0x360] sm:$0xf0]  ;;  %v11324_v33 = vld [vmem:[#allocation2 + $0x328] sm:$0xf] }
 0x204   : > { %2419 = vst [vmem:[#allocation2 + $0x3e4] sm:$0xf] %v2295_v49  ;;  %v2809_v62 = vsel %vm9830_vm8, %v2800_v55, %v2808_v48  ;;  %v7558_v16 = vld [vmem:[%s9732_s14 + $0x88] sm:$0x1]  ;;  %v2308_v49 = vrot.slane %v2306_v25, 4 }
 0x205   : > { %v6509_v54 = vpop.f32.mrf.mxu2  ;;  %v6374_v12 = vpop.f32.mrf.mxu0  ;;  %2946 = vst [vmem:[#allocation2 + $0x3ac] sm:$0xf] %v2809_v62  ;;  %v2312_v55 = vshll.u32 %v7558_v16, 16  ;;  %v7585_v59 = vld [vmem:[%s9732_s14 + $0x84] sm:$0xf]  ;;  %v9316_v62 = vld [vmem:[%s12165_s1 + $0x310] sm:$0xff] }
 0x206   : > { %v6510_v51 = vadd.f32 %v6509_v54, %v6441_v1  ;;  %v6443_v11 = vpop.f32.mrf.mxu1  ;;  %v6375_v27 = vadd.f32 %v6374_v12, %v10702_v29  ;;  %v2534_v1 = vsel %vm9774_vm6, %v2532_v52, %v2533_v19  ;;  %v2814_v29 = vrot.slane %v2812_v2, 5  ;;  %v7617_v12 = vld [vmem:[%s9732_s14 + $0x84] sm:$0xf]  ;;  %6877 = vmatpush.bf16.msrb.mxu0 %v9316_v62  ;;  %v7560_v62 = vld [vmem:[%s9732_s14 + $0x90] sm:$0xf] }
 0x207   : > { %2599 = vst [vmem:[#allocation2 + $0x3e8] sm:$0xf] %v2534_v1  ;;  %v2298_v52 = vrot.slane %v2296_v31, 4  ;;  %v9135_v1 = vld [vmem:[#allocation2 + $0x364] sm:$0xf0]  ;;  %v2536_v25 = vrot.slane %v7585_v59, 5 }
 0x208   : > { %v6444_v3 = vadd.f32 %v6443_v11, %v6375_v27  ;;  %6629 = vmatmul.bf16.gmra.mxu0 %v8095_v30  ;;  %v6578_v57 = vpop.f32.mrf.mxu3  ;;  %v2810_v30 = vrot.slane %v2808_v48, 4  ;;  %v11320_v28 = vor.u32 %v2817_v21, %v2814_v29  ;;  %v8158_v11 = vld [vmem:[#allocation2 + $0x320] sm:$0xf]  ;;  %v2822_v29 = vshrl.u32 %v7617_v12, 16  ;;  %v7618_v31 = vld [vmem:[%s9732_s14 + $0x88] sm:$0x3] }
 0x209   : > { %6698 = vmatmul.bf16.gmra.mxu1 %v8099_v15  ;;  %v11314_v40 = vadd.f32 %v6578_v57, %v6510_v51  ;;  %v2302_v15 = vshll.u32 %v7557_v63, 16  ;;  %v2299_v2 = vor.u32 %v2298_v52, %v11297_v10  ;;  %v2314_v48 = vrot.slane %v2312_v55, 5  ;;  %v9332_v10 = vld [vmem:[%s12165_s1 + $0x390] sm:$0xff]  ;;  %v8168_v59 = vld [vmem:[#allocation2 + $0x368] sm:$0xf0] }
 0x20a   : > { %6767 = vmatmul.bf16.gmra.mxu2 %v8103_v4  ;;  %v2819_v27 = vsel %vm9830_vm8, %v2810_v30, %v11320_v28  ;;  %v2825_v21 = vshll.u32 %v7617_v12, 16  ;;  %v9340_v30 = vld [vmem:[%s12165_s1 + $0x3d0] sm:$0xff]  ;;  %v2538_v16 = vrot.slane %v2536_v25, 4 }
 0x20b   : > { %v2304_v51 = vrot.slane %v2302_v15, 5  ;;  %2947 = vst [vmem:[#allocation2 + $0x3ec] sm:$0xf] %v2819_v27  ;;  %v2300_v57 = vrot.slane %v2299_v2, 4  ;;  %7015 = vmatpush.bf16.msrb.mxu2 %v9332_v10  ;;  %7084 = vmatpush.bf16.msrb.mxu3 %v9340_v30  ;;  %v9127_v2 = vld [vmem:[#allocation2 + $0x32c] sm:$0xf] }
 0x20c   : > { %v7559_v10 = vld [vmem:[%s9732_s14 + $0x8c] sm:$0xf] }
 0x20d   : > { %v6512_v54 = vpop.f32.mrf.mxu2  ;;  %v6376_v56 = vpop.f32.mrf.mxu0  ;;  %6836 = vmatmul.bf16.gmra.mxu3 %v8107_v9  ;;  %v2309_v0 = vor.u32 %v2308_v49, %v2304_v51  ;;  %v2535_v9 = vrot.slane %v2533_v19, 4  ;;  %v8159_v19 = vor.u32 %v9134_v37, %v8158_v11  ;;  %v2305_v52 = vsel %vm9797_vm7, %v2300_v57, %v2304_v51 }
 0x20e   : > { %v6513_v4 = vadd.f32 %v6512_v54, %v6444_v3  ;;  %v6445_v20 = vpop.f32.mrf.mxu1  ;;  %v6377_v26 = vadd.f32 %v6376_v56, %v10726_v46  ;;  %v7586_v3 = vld [vmem:[%s9732_s14 + $0x88] sm:$0x1]  ;;  %v8163_v54 = vor.u32 %v9126_v7, %v8160_v8  ;;  %v7530_v56 = vld [vmem:[%s9732_s14 + $0x80] sm:$0xf]  ;;  %v2820_v11 = vrot.slane %v11320_v28, 4 }
 0x20f   : > { %v2310_v15 = vrot.slane %v2309_v0, 4  ;;  %v2539_v13 = vrot.slane %v7586_v3, 5  ;;  %2088 = vst [vmem:[#allocation2 + $0x420] sm:$0xf] %v7530_v56  ;;  %v2537_v27 = vsel %vm9774_vm6, %v2535_v9, %v2536_v25  ;;  %v2827_v51 = vrot.slane %v2825_v21, 6 }
 0x210   : > { %v6446_v46 = vadd.f32 %v6445_v20, %v6377_v26  ;;  %v6581_v41 = vpop.f32.mrf.mxu3  ;;  %v7531_v20 = vld [vmem:[%s9732_s14 + $0x84] sm:$0xf]  ;;  %v2832_v49 = vshrl.u32 %v7618_v31, 16  ;;  %2420 = vst [vmem:[#allocation2 + $0x424] sm:$0xf] %v2305_v52  ;;  %v2835_v0 = vshll.u32 %v7618_v31, 16  ;;  %v8171_v9 = vor.u32 %v9127_v2, %v8168_v59 }
 0x211   : > { %v11336_v63 = vadd.f32 %v6581_v41, %v6513_v4  ;;  %v8167_v4 = vor.u32 %v9135_v1, %v11324_v33  ;;  %v2315_v26 = vsel %vm9797_vm7, %v2310_v15, %v2314_v48  ;;  %2089 = vst [vmem:[#allocation2 + $0x460] sm:$0xf] %v7531_v20  ;;  %v2824_v33 = vrot.slane %v2822_v29, 5  ;;  %v9324_v31 = vld [vmem:[%s12165_s1 + $0x350] sm:$0xff] }
 0x212   : > { %v2540_v55 = vsel %vm9774_vm6, %v2538_v16, %v2539_v13  ;;  %2421 = vst [vmem:[#allocation2 + $0x464] sm:$0xf] %v2315_v26  ;;  %v2834_v28 = vrot.slane %v2832_v49, 5  ;;  %v2837_v29 = vrot.slane %v2835_v0, 6  ;;  %v2317_v30 = vshrl.u32 %v7559_v10, 16  ;;  %6946 = vmatpush.bf16.msrb.mxu1 %v9324_v31 }
 0x213   : > { %v2828_v3 = vor.u32 %v2827_v51, %v2824_v33  ;;  %2600 = vst [vmem:[#allocation2 + $0x428] sm:$0xf] %v2537_v27  ;;  %v2320_v15 = vshll.u32 %v7559_v10, 16  ;;  %v8222_v27 = vld [vmem:[#allocation2 + $0x3a0] sm:$0xf] }
 0x214   : > { %2601 = vst [vmem:[#allocation2 + $0x468] sm:$0xf] %v2540_v55  ;;  %v2838_v21 = vor.u32 %v2837_v29, %v2834_v28  ;;  %v2319_v52 = vrot.slane %v2317_v30, 4  ;;  %v9150_v16 = vld [vmem:[#allocation2 + $0x3dc] sm:$0xf0] }
 0x215   : > { %v6514_v12 = vpop.f32.mrf.mxu2  ;;  %v6379_v7 = vpop.f32.mrf.mxu0  ;;  %v2830_v57 = vrot.slane %v2828_v3, 4  ;;  %v7619_v33 = vld [vmem:[%s9732_s14 + $0x8c] sm:$0xe]  ;;  %v8224_v51 = vld [vmem:[#allocation2 + $0x3e0] sm:$0xf0]  ;;  %v8223_v30 = vor.u32 %v9150_v16, %v8222_v27 }
 0x216   : > { %v6515_v37 = vadd.f32 %v6514_v12, %v6446_v46  ;;  %v6448_v8 = vpop.f32.mrf.mxu1  ;;  %v6380_v1 = vadd.f32 %v6379_v7, %v10747_v60  ;;  %v2829_v60 = vsel %vm9830_vm8, %v2820_v11, %v2828_v3  ;;  %v2322_v12 = vrot.slane %v2320_v15, 5  ;;  %v9142_v11 = vld [vmem:[#allocation2 + $0x3a4] sm:$0xf]  ;;  %v7588_v2 = vld [vmem:[%s9732_s14 + $0x90] sm:$0xf] }
 0x217   : > { %2948 = vst [vmem:[#allocation2 + $0x42c] sm:$0xf] %v2829_v60  ;;  %v2839_v13 = vsel %vm9830_vm8, %v2830_v57, %v2838_v21  ;;  %v8230_v0 = vld [vmem:[#allocation2 + $0x3a8] sm:$0xf]  ;;  %v11380_v3 = vld [vmem:[%s9732_s14 + $0x94] sm:$0xf]  ;;  %v8227_v15 = vor.u32 %v9142_v11, %v8224_v51 }
 0x218   : > { %v6449_v46 = vadd.f32 %v6448_v8, %v6380_v1  ;;  %6634 = vmatmul.bf16.gmra.mxu0 %v8159_v19  ;;  %v6583_v41 = vpop.f32.mrf.mxu3  ;;  %v2326_v19 = vshll.u32 %v7560_v62, 16  ;;  %2949 = vst [vmem:[#allocation2 + $0x46c] sm:$0xf] %v2839_v13  ;;  %v2323_v49 = vor.u32 %v2322_v12, %v2319_v52  ;;  %v2841_v57 = vshrl.u32 %v7619_v33, 16  ;;  %v7533_v13 = vld [vmem:[%s9732_s14 + $0x90] sm:$0xf] }
 0x219   : > { %6703 = vmatmul.bf16.gmra.mxu1 %v8163_v54  ;;  %v11362_v48 = vadd.f32 %v6583_v41, %v6515_v37  ;;  %v2330_v54 = vshrl.u32 %v7560_v62, 16  ;;  %v11373_v37 = vld [vmem:[%s9732_s14 + $0x94] sm:$0xf]  ;;  %v2543_v21 = vrot.slane %v7588_v2, 5  ;;  %v2546_v10 = vrot.slane %v11380_v3, 5 }
 0x21a   : > { %6772 = vmatmul.bf16.gmra.mxu2 %v8167_v4  ;;  %v2328_v7 = vrot.slane %v2326_v19, 5  ;;  %v2336_v1 = vshll.u32 %v11373_v37, 16  ;;  %v2324_v29 = vrot.slane %v2323_v49, 4  ;;  %v7620_v62 = vld [vmem:[%s9732_s14 + $0x90] sm:$0xf]  ;;  %v2844_v51 = vshll.u32 %v7619_v33, 16 }
 0x21b   : > { %v2332_v8 = vrot.slane %v2330_v54, 4  ;;  %v7621_v54 = vld [vmem:[%s9732_s14 + $0x94] sm:$0xf]  ;;  %v2545_v12 = vrot.slane %v2543_v21, 4  ;;  %v9143_v11 = vld [vmem:[#allocation2 + $0x3ac] sm:$0xf] }
 0x21c   : > { %v11382_v41 = vrot.slane %v2336_v1, 5  ;;  %v2329_v19 = vsel %vm9797_vm7, %v2324_v29, %v2328_v7  ;;  %2091 = vst [vmem:[#allocation2 + $0x4e0] sm:$0xf] %v7533_v13  ;;  %v8232_v1 = vld [vmem:[#allocation2 + $0x3e8] sm:$0xf0] }
 0x21d   : > { %v6517_v25 = vpop.f32.mrf.mxu2  ;;  %v6381_v56 = vpop.f32.mrf.mxu0  ;;  %6841 = vmatmul.bf16.gmra.mxu3 %v8171_v9  ;;  %v2333_v59 = vor.u32 %v2332_v8, %v2328_v7  ;;  %v2843_v8 = vrot.slane %v2841_v57, 5  ;;  %v2850_v7 = vshrl.u32 %v7620_v62, 16  ;;  %2422 = vst [vmem:[#allocation2 + $0x4a4] sm:$0xf] %v2329_v19  ;;  %v2547_v2 = vsel %vm9774_vm6, %v2545_v12, %v2546_v10  ;;  %v7562_v13 = vld [vmem:[%s9732_s14 + $0x98] sm:$0xf] }
 0x21e   : > { %v6518_v4 = vadd.f32 %v6517_v25, %v6449_v46  ;;  %v6450_v20 = vpop.f32.mrf.mxu1  ;;  %v6382_v26 = vadd.f32 %v6381_v56, %v10765_v6  ;;  %v7587_v6 = vld [vmem:[%s9732_s14 + $0x8c] sm:$0xe]  ;;  %v9151_v46 = vld [vmem:[#allocation2 + $0x3e4] sm:$0xf0]  ;;  %2603 = vst [vmem:[#allocation2 + $0x4e8] sm:$0xf] %v2547_v2 }
 0x21f   : > { %v7597_v60 = vrot.slane %v7587_v6, 9  ;;  %v2334_v31 = vrot.slane %v2333_v59, 4  ;;  %v7532_v25 = vld [vmem:[%s9732_s14 + $0x8c] sm:$0xf]  ;;  %v2860_v59 = vshrl.u32 %v7621_v54, 16  ;;  %v2852_v6 = vrot.slane %v2850_v7, 5 }
 0x220   : > { %v6451_v55 = vadd.f32 %v6450_v20, %v6382_v26  ;;  %v6586_v28 = vpop.f32.mrf.mxu3  ;;  %v8231_v20 = vor.u32 %v9151_v46, %v8230_v0  ;;  %2090 = vst [vmem:[#allocation2 + $0x4a0] sm:$0xf] %v7532_v25  ;;  %v2853_v0 = vshll.u32 %v7620_v62, 16  ;;  %v2340_v62 = vshrl.u32 %v11373_v37, 16  ;;  %v11421_v7 = vld [vmem:[#allocation2 + $0x460] sm:$0xf0] }
 0x221   : > { %v11384_v9 = vadd.f32 %v6586_v28, %v6518_v4  ;;  %v2339_v4 = vsel %vm9797_vm7, %v2334_v31, %v11382_v41  ;;  %v2544_v52 = vsel %vm9774_vm6, %v7597_v60, %v2543_v21  ;;  %v2863_v28 = vshll.u32 %v7621_v54, 16  ;;  %v9315_v2 = vld [vmem:[%s12165_s1 + $0x308] sm:$0xff] }
 0x222   : > { %2423 = vst [vmem:[#allocation2 + $0x4e4] sm:$0xf] %v2339_v4  ;;  %v2855_v33 = vrot.slane %v2853_v0, 6  ;;  %v8235_v21 = vor.u32 %v9143_v11, %v8232_v1  ;;  %v11416_v11 = vld [vmem:[%s9732_s14 + $0x98] sm:$0xf]  ;;  %v9331_v1 = vld [vmem:[%s12165_s1 + $0x388] sm:$0xff]  ;;  %6878 = vmatpush.bf16.msrb.mxu0 %v9315_v2 }
 0x223   : > { %2602 = vst [vmem:[#allocation2 + $0x4a8] sm:$0xf] %v2544_v52  ;;  %v2865_v57 = vrot.slane %v2863_v28, 6  ;;  %v8294_v0 = vld [vmem:[#allocation2 + $0x428] sm:$0xf]  ;;  %7016 = vmatpush.bf16.msrb.mxu2 %v9331_v1 }
 0x224   : > { %v2856_v25 = vor.u32 %v2855_v33, %v2852_v6  ;;  %v9167_v28 = vld [vmem:[#allocation2 + $0x464] sm:$0xf0] }
 0x225   : > { %v6519_v56 = vpop.f32.mrf.mxu2  ;;  %v6384_v27 = vpop.f32.mrf.mxu0 }
 0x226   : > { %v6520_v26 = vadd.f32 %v6519_v56, %v6451_v55  ;;  %v6453_v16 = vpop.f32.mrf.mxu1  ;;  %v6385_v49 = vadd.f32 %v6384_v27, %v10803_v42  ;;  %v2846_v55 = vrot.slane %v2844_v51, 6  ;;  %v2862_v42 = vrot.slane %v2860_v59, 5  ;;  %v11409_v56 = vld [vmem:[#allocation2 + $0x420] sm:$0xf]  ;;  %v11419_v51 = vld [vmem:[#allocation2 + $0x424] sm:$0xf] }
 0x227   : > { %v2858_v4 = vrot.slane %v2856_v25, 4 }
 0x228   : > { %v6454_v46 = vadd.f32 %v6453_v16, %v6385_v49  ;;  %6639 = vmatmul.bf16.gmra.mxu0 %v8223_v30  ;;  %v6588_v29 = vpop.f32.mrf.mxu3  ;;  %v2847_v60 = vor.u32 %v2846_v55, %v2843_v8  ;;  %v11407_v54 = vor.u32 %v2865_v57, %v2862_v42  ;;  %v2346_v30 = vshll.u32 %v7562_v13, 16 }
 0x229   : > { %6708 = vmatmul.bf16.gmra.mxu1 %v8227_v15  ;;  %v11403_v31 = vadd.f32 %v6588_v29, %v6520_v26  ;;  %v11411_v26 = vld [vmem:[#allocation2 + $0x45c] sm:$0xf0]  ;;  %v2342_v16 = vrot.slane %v2340_v62, 4  ;;  %v2870_v42 = vshrl.u32 %v11416_v11, 16  ;;  %v11445_v62 = vld [vmem:[%s9732_s14 + $0x9c] sm:$0xf] }
 0x22a   : > { %6777 = vmatmul.bf16.gmra.mxu2 %v8231_v20  ;;  %v2848_v19 = vrot.slane %v2847_v60, 4  ;;  %v2350_v20 = vshrl.u32 %v7562_v13, 16  ;;  %v2867_v49 = vsel %vm9830_vm8, %v2858_v4, %v11407_v54  ;;  %v2348_v55 = vrot.slane %v2346_v30, 5  ;;  %v9323_v13 = vld [vmem:[%s12165_s1 + $0x348] sm:$0xff]  ;;  %v7623_v4 = vld [vmem:[%s9732_s14 + $0x9c] sm:$0xf] }
 0x22b   : > { %2951 = vst [vmem:[#allocation2 + $0x4ec] sm:$0xf] %v2867_v49  ;;  %v2343_v59 = vor.u32 %v2342_v16, %v11382_v41  ;;  %v8287_v60 = vor.u32 %v11411_v26, %v11409_v56  ;;  %v2548_v30 = vrot.slane %v2546_v10, 4  ;;  %v8291_v56 = vor.u32 %v11419_v51, %v11421_v7  ;;  %6947 = vmatpush.bf16.msrb.mxu1 %v9323_v13  ;;  %v9159_v51 = vld [vmem:[#allocation2 + $0x42c] sm:$0xf] }
 0x22c   : > { %v2857_v37 = vsel %vm9830_vm8, %v2848_v19, %v2856_v25  ;;  %v2352_v33 = vrot.slane %v2350_v20, 4  ;;  %v7534_v20 = vld [vmem:[%s9732_s14 + $0x94] sm:$0xf]  ;;  %v2552_v26 = vrot.slane %v11445_v62, 5  ;;  %v8295_v16 = vor.u32 %v9167_v28, %v8294_v0 }
 0x22d   : > { %v6522_v15 = vpop.f32.mrf.mxu2  ;;  %v6386_v12 = vpop.f32.mrf.mxu0  ;;  %6846 = vmatmul.bf16.gmra.mxu3 %v8235_v21  ;;  %2950 = vst [vmem:[#allocation2 + $0x4ac] sm:$0xf] %v2857_v37  ;;  %v2344_v57 = vrot.slane %v2343_v59, 4  ;;  %v7590_v21 = vld [vmem:[%s9732_s14 + $0x98] sm:$0xf]  ;;  %v2880_v59 = vshrl.u32 %v7623_v4, 16 }
 0x22e   : > { %v6523_v52 = vadd.f32 %v6522_v15, %v6454_v46  ;;  %v6455_v27 = vpop.f32.mrf.mxu1  ;;  %v6387_v8 = vadd.f32 %v6386_v12, %v10830_v44  ;;  %v9339_v44 = vld [vmem:[%s12165_s1 + $0x3c8] sm:$0xff]  ;;  %v11437_v46 = vld [vmem:[%s9732_s14 + $0x9c] sm:$0xf]  ;;  %v2353_v19 = vor.u32 %v2352_v33, %v2348_v55  ;;  %v2549_v15 = vrot.slane %v7590_v21, 5  ;;  %v7535_v12 = vld [vmem:[%s9732_s14 + $0x98] sm:$0xf] }
 0x22f   : > { %7085 = vmatpush.bf16.msrb.mxu3 %v9339_v44  ;;  %v2356_v41 = vshll.u32 %v11437_v46, 16  ;;  %2092 = vst [vmem:[#allocation2 + $0x520] sm:$0xf] %v7534_v20  ;;  %v2873_v44 = vshll.u32 %v11416_v11, 16  ;;  %v8296_v33 = vld [vmem:[#allocation2 + $0x468] sm:$0xf0] }
 0x230   : > { %v6456_v6 = vadd.f32 %v6455_v27, %v6387_v8  ;;  %v6591_v29 = vpop.f32.mrf.mxu3  ;;  %v2349_v27 = vsel %vm9797_vm7, %v2344_v57, %v2348_v55  ;;  %v2354_v3 = vrot.slane %v2353_v19, 4  ;;  %v2551_v10 = vrot.slane %v2549_v15, 4  ;;  %2093 = vst [vmem:[#allocation2 + $0x560] sm:$0xf] %v7535_v12 }
 0x231   : > { %v11447_v25 = vadd.f32 %v6591_v29, %v6523_v52  ;;  %v11461_v52 = vrot.slane %v2356_v41, 5  ;;  %v2872_v8 = vrot.slane %v2870_v42, 5  ;;  %v2550_v7 = vsel %vm9774_vm6, %v2548_v30, %v2549_v15  ;;  %2424 = vst [vmem:[#allocation2 + $0x524] sm:$0xf] %v2349_v27 }
 0x232   : > { %v2883_v28 = vshll.u32 %v7623_v4, 16  ;;  %v2868_v42 = vrot.slane %v11407_v54, 4  ;;  %v2875_v11 = vrot.slane %v2873_v44, 6  ;;  %v2882_v29 = vrot.slane %v2880_v59, 5  ;;  %2604 = vst [vmem:[#allocation2 + $0x528] sm:$0xf] %v2550_v7 }
 0x233   : > { %v2359_v0 = vsel %vm9797_vm7, %v2354_v3, %v11461_v52  ;;  %v8299_v19 = vor.u32 %v9159_v51, %v8296_v33  ;;  %v2360_v30 = vshrl.u32 %v11437_v46, 16  ;;  %v7564_v54 = vld [vmem:[%s9732_s14 + $0xa0] sm:$0xf]  ;;  %v8352_v51 = vld [vmem:[#allocation2 + $0x4e0] sm:$0xf0] }
 0x234   : > { %2425 = vst [vmem:[#allocation2 + $0x564] sm:$0xf] %v2359_v0  ;;  %v2876_v21 = vor.u32 %v2875_v11, %v2872_v8  ;;  %v2370_v20 = vshrl.u32 %v7564_v54, 16  ;;  %v8350_v8 = vld [vmem:[#allocation2 + $0x4a0] sm:$0xf] }
 0x235   : > { %v6524_v37 = vpop.f32.mrf.mxu2  ;;  %v6605_v1 = vpop.f32.mrf.mxu0  ;;  %v2362_v3 = vrot.slane %v2360_v30, 4  ;;  %v8358_v7 = vld [vmem:[#allocation2 + $0x4a8] sm:$0xf]  ;;  %v7592_v33 = vld [vmem:[%s9732_s14 + $0xa0] sm:$0xf] }
 0x236   : > { %v6525_v49 = vadd.f32 %v6524_v37, %v6456_v6  ;;  %v6674_v2 = vpop.f32.mrf.mxu1  ;;  %v6606_v55 = vadd.f32 %v6605_v1, %v10850_v39  ;;  %v2553_v6 = vsel %vm9774_vm6, %v2551_v10, %v2552_v26  ;;  %v2885_v39 = vrot.slane %v2883_v28, 6  ;;  %v7565_v1 = vld [vmem:[%s9732_s14 + $0xa4] sm:$0x1] }
 0x237   : > { %2605 = vst [vmem:[#allocation2 + $0x568] sm:$0xf] %v2553_v6  ;;  %v2877_v4 = vsel %vm9830_vm8, %v2868_v42, %v2876_v21  ;;  %v2363_v44 = vor.u32 %v2362_v3, %v11461_v52  ;;  %v9183_v6 = vld [vmem:[#allocation2 + $0x4e4] sm:$0xf0]  ;;  %v2376_v28 = vshll.u32 %v7565_v1, 16  ;;  %v9330_v52 = vld [vmem:[%s12165_s1 + $0x380] sm:$0xff] }
 0x238   : > { %v6675_v57 = vadd.f32 %v6674_v2, %v6606_v55  ;;  %6644 = vmatmul.bf16.gmra.mxu0 %v8287_v60  ;;  %v6593_v41 = vpop.f32.mrf.mxu3  ;;  %v11479_v15 = vor.u32 %v2885_v39, %v2882_v29  ;;  %v2878_v60 = vrot.slane %v2876_v21, 4  ;;  %2952 = vst [vmem:[#allocation2 + $0x52c] sm:$0xf] %v2877_v4  ;;  %v9174_v2 = vld [vmem:[#allocation2 + $0x4a4] sm:$0xf]  ;;  %v2372_v55 = vrot.slane %v2370_v20, 4  ;;  %7017 = vmatpush.bf16.msrb.mxu2 %v9330_v52 }
 0x239   : > { %6713 = vmatmul.bf16.gmra.mxu1 %v8291_v56  ;;  %v11476_v13 = vadd.f32 %v6593_v41, %v6525_v49  ;;  %v2366_v56 = vshll.u32 %v7564_v54, 16  ;;  %v9182_v49 = vld [vmem:[#allocation2 + $0x4dc] sm:$0xf0]  ;;  %v7593_v42 = vld [vmem:[%s9732_s14 + $0xa4] sm:$0x1]  ;;  %v2364_v29 = vrot.slane %v2363_v44, 4 }
 0x23a   : > { %6782 = vmatmul.bf16.gmra.mxu2 %v8295_v16  ;;  %v2887_v46 = vsel %vm9830_vm8, %v2878_v60, %v11479_v15  ;;  %v2554_v39 = vrot.slane %v2552_v26, 4  ;;  %v7624_v41 = vld [vmem:[%s9732_s14 + $0xa0] sm:$0xf]  ;;  %v7625_v21 = vld [vmem:[%s9732_s14 + $0xa4] sm:$0x3]  ;;  %v2378_v4 = vrot.slane %v2376_v28, 5  ;;  %v8351_v26 = vor.u32 %v9182_v49, %v8350_v8 }
 0x23b   : > { %2953 = vst [vmem:[#allocation2 + $0x56c] sm:$0xf] %v2887_v46  ;;  %v2368_v59 = vrot.slane %v2366_v56, 5  ;;  %v9314_v30 = vld [vmem:[%s12165_s1 + $0x300] sm:$0xff]  ;;  %v2558_v62 = vrot.slane %v7593_v42, 5  ;;  %v2890_v3 = vshrl.u32 %v7624_v41, 16 }
 0x23c   : > { %v9338_v54 = vld [vmem:[%s12165_s1 + $0x3c0] sm:$0xff]  ;;  %v7536_v56 = vld [vmem:[%s9732_s14 + $0x9c] sm:$0xf]  ;;  %6879 = vmatpush.bf16.msrb.mxu0 %v9314_v30  ;;  %v2893_v49 = vshll.u32 %v7624_v41, 16  ;;  %v7652_v52 = vld [vmem:[%s9732_s14 + $0x54] sm:$0xf] }
 0x23d   : > { %v6743_v12 = vpop.f32.mrf.mxu2  ;;  %v6607_v37 = vpop.f32.mrf.mxu0  ;;  %6851 = vmatmul.bf16.gmra.mxu3 %v8299_v19  ;;  %v7537_v20 = vld [vmem:[%s9732_s14 + $0xa0] sm:$0xf]  ;;  %2094 = vst [vmem:[#allocation2 + $0x5a0] sm:$0xf] %v7536_v56  ;;  %v7653_v30 = vld [vmem:[%s9732_s14 + $0x58] sm:$0xf] }
 0x23e   : > { %v6744_v27 = vadd.f32 %v6743_v12, %v6675_v57  ;;  %v6676_v16 = vpop.f32.mrf.mxu1  ;;  %v6608_v10 = vadd.f32 %v6607_v37, %v10873_v47  ;;  %v2555_v47 = vrot.slane %v7592_v33, 5  ;;  %v2373_v57 = vor.u32 %v2372_v55, %v2368_v59  ;;  %v9175_v55 = vld [vmem:[#allocation2 + $0x4ac] sm:$0xf]  ;;  %7086 = vmatpush.bf16.msrb.mxu3 %v9338_v54  ;;  %2095 = vst [vmem:[#allocation2 + $0x5e0] sm:$0xf] %v7537_v20 }
 0x23f   : > { %v2369_v12 = vsel %vm9797_vm7, %v2364_v29, %v2368_v59  ;;  %v8355_v37 = vor.u32 %v9174_v2, %v8352_v51  ;;  %v2900_v33 = vshrl.u32 %v7625_v21, 16  ;;  %v8360_v2 = vld [vmem:[#allocation2 + $0x4e8] sm:$0xf0]  ;;  %v2895_v28 = vrot.slane %v2893_v49, 6  ;;  %v8422_v49 = vld [vmem:[#allocation2 + $0x528] sm:$0xf] }
 0x240   : > { %v6677_v0 = vadd.f32 %v6676_v16, %v6608_v10  ;;  %v6812_v11 = vpop.f32.mrf.mxu3  ;;  %v2557_v60 = vrot.slane %v2555_v47, 4  ;;  %v8359_v16 = vor.u32 %v9183_v6, %v8358_v7  ;;  %v2374_v46 = vrot.slane %v2373_v57, 4  ;;  %2426 = vst [vmem:[#allocation2 + $0x5a4] sm:$0xf] %v2369_v12 }
 0x241   : > { %v11496_v19 = vadd.f32 %v6812_v11, %v6744_v27  ;;  %v2556_v8 = vsel %vm9774_vm6, %v2554_v39, %v2555_v47  ;;  %v2888_v6 = vrot.slane %v11479_v15, 4  ;;  %v2902_v42 = vrot.slane %v2900_v33, 5  ;;  %v9322_v15 = vld [vmem:[%s12165_s1 + $0x340] sm:$0xff] }
 0x242   : > { %v2379_v51 = vsel %vm9797_vm7, %v2374_v46, %v2378_v4  ;;  %v2559_v7 = vsel %vm9774_vm6, %v2557_v60, %v2558_v62  ;;  %v2903_v47 = vshll.u32 %v7625_v21, 16  ;;  %2606 = vst [vmem:[#allocation2 + $0x5a8] sm:$0xf] %v2556_v8  ;;  %v8363_v41 = vor.u32 %v9175_v55, %v8360_v2  ;;  %6948 = vmatpush.bf16.msrb.mxu1 %v9322_v15  ;;  %v7712_v46 = vld [vmem:[%s9732_s14 + $0x54] sm:$0xe] }
 0x243   : > { %2427 = vst [vmem:[#allocation2 + $0x5e4] sm:$0xf] %v2379_v51  ;;  %v3037_v60 = vshrl.u32 %v7652_v52, 16  ;;  %v3046_v56 = vshll.u32 %v7653_v30, 16  ;;  %v8416_v55 = vld [vmem:[#allocation2 + $0x560] sm:$0xf0] }
 0x244   : > { %2607 = vst [vmem:[#allocation2 + $0x5e8] sm:$0xf] %v2559_v7  ;;  %v2905_v57 = vrot.slane %v2903_v47, 6  ;;  %v11533_v8 = vld [vmem:[%s9732_s14 + $0x5c] sm:$0xf]  ;;  %v3050_v2 = vshrl.u32 %v7653_v30, 16 }
 0x245   : > { %v6745_v27 = vpop.f32.mrf.mxu2  ;;  %v6610_v1 = vpop.f32.mrf.mxu0  ;;  %v9199_v7 = vld [vmem:[#allocation2 + $0x564] sm:$0xf0] }
 0x246   : > { %v6746_v10 = vadd.f32 %v6745_v27, %v6677_v0  ;;  %v6679_v44 = vpop.f32.mrf.mxu1  ;;  %v6611_v59 = vadd.f32 %v6610_v1, %v10895_v50  ;;  %v2892_v0 = vrot.slane %v2890_v3, 5  ;;  %v2906_v4 = vor.u32 %v2905_v57, %v2902_v42  ;;  %v9198_v1 = vld [vmem:[#allocation2 + $0x55c] sm:$0xf0] }
 0x247   : > { %v3052_v47 = vrot.slane %v3050_v2, 4  ;;  %v9191_v2 = vld [vmem:[#allocation2 + $0x52c] sm:$0xf] }
 0x248   : > { %v6680_v11 = vadd.f32 %v6679_v44, %v6611_v59  ;;  %6649 = vmatmul.bf16.gmra.mxu0 %v8351_v26  ;;  %v6814_v50 = vpop.f32.mrf.mxu3  ;;  %v2896_v29 = vor.u32 %v2895_v28, %v2892_v0  ;;  %v3040_v26 = vshll.u32 %v7652_v52, 16  ;;  %v9190_v44 = vld [vmem:[#allocation2 + $0x524] sm:$0xf]  ;;  %v3048_v59 = vrot.slane %v3046_v56, 5  ;;  %v7713_v52 = vld [vmem:[%s9732_s14 + $0x58] sm:$0xf] }
 0x249   : > { %6718 = vmatmul.bf16.gmra.mxu1 %v8355_v37  ;;  %v11519_v39 = vadd.f32 %v6814_v50, %v6746_v10  ;;  %v8414_v10 = vld [vmem:[#allocation2 + $0x520] sm:$0xf]  ;;  %v3056_v0 = vshll.u32 %v11533_v8, 16  ;;  %v11539_v50 = vld [vmem:[%s9732_s14 + $0x5c] sm:$0xf]  ;;  %v8423_v56 = vor.u32 %v9199_v7, %v8422_v49 }
 0x24a   : > { %6787 = vmatmul.bf16.gmra.mxu2 %v8359_v16  ;;  %v2897_v21 = vsel %vm9830_vm8, %v2888_v6, %v2896_v29  ;;  %v2898_v54 = vrot.slane %v2896_v29, 4  ;;  %v3039_v16 = vrot.slane %v3037_v60, 4  ;;  %v3042_v33 = vrot.slane %v3040_v26, 5 }
 0x24b   : > { %2954 = vst [vmem:[#allocation2 + $0x5ac] sm:$0xf] %v2897_v21  ;;  %v3549_v6 = vshrl.u32 %v7712_v46, 16  ;;  %v3401_v15 = vrot.slane %v11539_v50, 5  ;;  %v8415_v30 = vor.u32 %v9198_v1, %v8414_v10  ;;  %v8419_v21 = vor.u32 %v9190_v44, %v8416_v55 }
 0x24c   : > { %v2907_v37 = vsel %vm9830_vm8, %v2898_v54, %v2906_v4  ;;  %v3043_v42 = vor.u32 %v3042_v33, %v3039_v16  ;;  %v7628_v54 = vld [vmem:[%s9732_s14 + $0x54] sm:$0xf]  ;;  %v7629_v4 = vld [vmem:[%s9732_s14 + $0x58] sm:$0xf]  ;;  %v3053_v60 = vor.u32 %v3052_v47, %v3048_v59  ;;  %v3552_v44 = vshll.u32 %v7712_v46, 16 }
 0x24d   : > { %v6748_v62 = vpop.f32.mrf.mxu2  ;;  %v6612_v12 = vpop.f32.mrf.mxu0  ;;  %6856 = vmatmul.bf16.gmra.mxu3 %v8363_v41  ;;  %2955 = vst [vmem:[#allocation2 + $0x5ec] sm:$0xf] %v2907_v37  ;;  %v7714_v37 = vld [vmem:[%s9732_s14 + $0x5c] sm:$0xf]  ;;  %v3551_v1 = vrot.slane %v3549_v6, 5  ;;  %v3558_v46 = vshrl.u32 %v7713_v52, 16 }
 0x24e   : > { %v6749_v20 = vadd.f32 %v6748_v62, %v6680_v11  ;;  %v6681_v27 = vpop.f32.mrf.mxu1  ;;  %v6613_v3 = vadd.f32 %v6612_v12, %v10916_v5  ;;  %v7680_v5 = vld [vmem:[%s9732_s14 + $0x54] sm:$0xe]  ;;  %v7681_v11 = vld [vmem:[%s9732_s14 + $0x58] sm:$0xf]  ;;  %v11547_v62 = vrot.slane %v3056_v0, 5  ;;  %v3044_v12 = vrot.slane %v3043_v42, 4 }
 0x24f   : > { %v7708_v29 = vrot.slane %v7680_v5, 9  ;;  %v3398_v41 = vrot.slane %v7681_v11, 5  ;;  %2984 = vst [vmem:[#allocation2 + $0x30] sm:$0xf] %v7628_v54  ;;  %v3054_v10 = vrot.slane %v3053_v60, 4  ;;  %v3554_v5 = vrot.slane %v3552_v44, 6 }
 0x250   : > { %v6682_v51 = vadd.f32 %v6681_v27, %v6613_v3  ;;  %v6817_v28 = vpop.f32.mrf.mxu3  ;;  %2985 = vst [vmem:[#allocation2 + $0x70] sm:$0xf] %v7629_v4  ;;  %v8424_v0 = vld [vmem:[#allocation2 + $0x568] sm:$0xf0]  ;;  %v3049_v49 = vsel %vm9797_vm7, %v3044_v12, %v3048_v59  ;;  %v3561_v6 = vshll.u32 %v7713_v52, 16  ;;  %v3568_v59 = vshrl.u32 %v7714_v37, 16 }
 0x251   : > { %v11541_v57 = vadd.f32 %v6817_v28, %v6749_v20  ;;  %v3399_v20 = vsel %vm9774_vm6, %v7708_v29, %v3398_v41  ;;  %v3400_v27 = vrot.slane %v3398_v41, 4  ;;  %3316 = vst [vmem:[#allocation2 + $0x34] sm:$0xf] %v3049_v49  ;;  %v3571_v28 = vshll.u32 %v7714_v37, 16  ;;  %v7655_v52 = vld [vmem:[%s9732_s14 + $0x60] sm:$0xf] }
 0x252   : > { %3496 = vst [vmem:[#allocation2 + $0x38] sm:$0xf] %v3399_v20  ;;  %v3555_v47 = vor.u32 %v3554_v5, %v3551_v1  ;;  %v3560_v11 = vrot.slane %v3558_v46, 5  ;;  %v3563_v29 = vrot.slane %v3561_v6, 6  ;;  %v8427_v54 = vor.u32 %v9191_v2, %v8424_v0  ;;  %v9214_v1 = vld [vmem:[#allocation2 + $0x5dc] sm:$0xf0] }
 0x253   : > { %v3402_v7 = vsel %vm9774_vm6, %v3400_v27, %v3401_v15  ;;  %v3570_v4 = vrot.slane %v3568_v59, 5  ;;  %v3573_v60 = vrot.slane %v3571_v28, 6  ;;  %v3066_v20 = vshll.u32 %v7655_v52, 16  ;;  %v9206_v0 = vld [vmem:[#allocation2 + $0x5a4] sm:$0xf] }
 0x254   : > { %3497 = vst [vmem:[#allocation2 + $0x78] sm:$0xf] %v3402_v7  ;;  %v3564_v12 = vor.u32 %v3563_v29, %v3560_v11  ;;  %v3070_v37 = vshrl.u32 %v7655_v52, 16  ;;  %v8480_v49 = vld [vmem:[#allocation2 + $0x5e0] sm:$0xf0] }
 0x255   : > { %v6750_v26 = vpop.f32.mrf.mxu2  ;;  %v6615_v3 = vpop.f32.mrf.mxu0  ;;  %v11576_v7 = vld [vmem:[%s9732_s14 + $0x64] sm:$0xf]  ;;  %v3068_v6 = vrot.slane %v3066_v20, 5 }
 0x256   : > { %v6751_v16 = vadd.f32 %v6750_v26, %v6682_v51  ;;  %v6684_v33 = vpop.f32.mrf.mxu1  ;;  %v6616_v55 = vadd.f32 %v6615_v3, %v10962_v34  ;;  %v3059_v51 = vsel %vm9797_vm7, %v3054_v10, %v11547_v62  ;;  %v11566_v26 = vld [vmem:[%s9732_s14 + $0x60] sm:$0xf] }
 0x257   : > { %3317 = vst [vmem:[#allocation2 + $0x74] sm:$0xf] %v3059_v51  ;;  %v8478_v10 = vld [vmem:[#allocation2 + $0x5a0] sm:$0xf]  ;;  %v3578_v2 = vshrl.u32 %v11566_v26, 16 }
 0x258   : > { %v6685_v34 = vadd.f32 %v6684_v33, %v6616_v55  ;;  %6654 = vmatmul.bf16.gmra.mxu0 %v8415_v30  ;;  %v6819_v42 = vpop.f32.mrf.mxu3  ;;  %v3556_v30 = vrot.slane %v3555_v47, 4  ;;  %v3566_v55 = vrot.slane %v3564_v12, 4  ;;  %v8486_v51 = vld [vmem:[#allocation2 + $0x5a8] sm:$0xf]  ;;  %v8479_v28 = vor.u32 %v9214_v1, %v8478_v10 }
 0x259   : > { %6723 = vmatmul.bf16.gmra.mxu1 %v8419_v21  ;;  %v11562_v41 = vadd.f32 %v6819_v42, %v6751_v16  ;;  %v3060_v21 = vshrl.u32 %v11533_v8, 16  ;;  %v9215_v42 = vld [vmem:[#allocation2 + $0x5e4] sm:$0xf0]  ;;  %v3580_v52 = vrot.slane %v3578_v2, 5 }
 0x25a   : > { %6792 = vmatmul.bf16.gmra.mxu2 %v8423_v56  ;;  %v11569_v56 = vor.u32 %v3573_v60, %v3570_v4  ;;  %v3565_v44 = vsel %vm9830_vm8, %v3556_v30, %v3564_v12  ;;  %v11585_v4 = vld [vmem:[%s9732_s14 + $0x64] sm:$0xf]  ;;  %v3403_v60 = vrot.slane %v3401_v15, 4 }
 0x25b   : > { %3844 = vst [vmem:[#allocation2 + $0x3c] sm:$0xf] %v3565_v44  ;;  %v3062_v46 = vrot.slane %v3060_v21, 4  ;;  %v3407_v20 = vrot.slane %v11585_v4, 5 }
 0x25c   : > { %v3575_v5 = vsel %vm9830_vm8, %v3566_v55, %v11569_v56  ;;  %v3581_v55 = vshll.u32 %v11566_v26, 16 }
 0x25d   : > { %v6753_v27 = vpop.f32.mrf.mxu2  ;;  %v6617_v33 = vpop.f32.mrf.mxu0  ;;  %6861 = vmatmul.bf16.gmra.mxu3 %v8427_v54  ;;  %3845 = vst [vmem:[#allocation2 + $0x7c] sm:$0xf] %v3575_v5  ;;  %v3063_v11 = vor.u32 %v3062_v46, %v11547_v62  ;;  %v7683_v54 = vld [vmem:[%s9732_s14 + $0x60] sm:$0xf]  ;;  %v9207_v46 = vld [vmem:[#allocation2 + $0x5ac] sm:$0xf] }
 0x25e   : > { %v6754_v3 = vadd.f32 %v6753_v27, %v6685_v34  ;;  %v6686_v16 = vpop.f32.mrf.mxu1  ;;  %v6618_v8 = vadd.f32 %v6617_v33, %v10992_v43  ;;  %v3072_v34 = vrot.slane %v3070_v37, 4  ;;  %v3076_v43 = vshll.u32 %v11576_v7, 16  ;;  %v7716_v27 = vld [vmem:[%s9732_s14 + $0x64] sm:$0xf]  ;;  %v7631_v62 = vld [vmem:[%s9732_s14 + $0x60] sm:$0xf] }
 0x25f   : > { %v3404_v21 = vrot.slane %v7683_v54, 5  ;;  %v8483_v37 = vor.u32 %v9206_v0, %v8480_v49  ;;  %v8487_v33 = vor.u32 %v9215_v42, %v8486_v51  ;;  %v3064_v10 = vrot.slane %v3063_v11, 4  ;;  %2987 = vst [vmem:[#allocation2 + $0xf0] sm:$0xf] %v7631_v62  ;;  %v8488_v42 = vld [vmem:[#allocation2 + $0x5e8] sm:$0xf0] }
 0x260   : > { %v6687_v59 = vadd.f32 %v6686_v16, %v6618_v8  ;;  %v6822_v47 = vpop.f32.mrf.mxu3  ;;  %v3073_v29 = vor.u32 %v3072_v34, %v3068_v6  ;;  %v11591_v12 = vrot.slane %v3076_v43, 5  ;;  %v7630_v16 = vld [vmem:[%s9732_s14 + $0x5c] sm:$0xf]  ;;  %v3588_v51 = vshrl.u32 %v7716_v27, 16 }
 0x261   : > { %v11589_v30 = vadd.f32 %v6822_v47, %v6754_v3  ;;  %2986 = vst [vmem:[#allocation2 + $0xb0] sm:$0xf] %v7630_v16  ;;  %v3405_v50 = vsel %vm9774_vm6, %v3403_v60, %v3404_v21  ;;  %v3406_v15 = vrot.slane %v3404_v21, 4  ;;  %v3576_v3 = vrot.slane %v11569_v56, 4  ;;  %v7657_v16 = vld [vmem:[%s9732_s14 + $0x68] sm:$0xf] }
 0x262   : > { %v3074_v1 = vrot.slane %v3073_v29, 4  ;;  %v3069_v0 = vsel %vm9797_vm7, %v3064_v10, %v3068_v6  ;;  %v3583_v56 = vrot.slane %v3581_v55, 6  ;;  %v3590_v43 = vrot.slane %v3588_v51, 5  ;;  %3498 = vst [vmem:[#allocation2 + $0xb8] sm:$0xf] %v3405_v50 }
 0x263   : > { %3318 = vst [vmem:[#allocation2 + $0xb4] sm:$0xf] %v3069_v0  ;;  %v3408_v26 = vsel %vm9774_vm6, %v3406_v15, %v3407_v20  ;;  %v3080_v60 = vshrl.u32 %v11576_v7, 16  ;;  %v7790_v50 = vld [vmem:[#allocation2 + $0x30] sm:$0xf] }
 0x264   : > { %v3079_v49 = vsel %vm9797_vm7, %v3074_v1, %v11591_v12  ;;  %v3584_v47 = vor.u32 %v3583_v56, %v3580_v52  ;;  %3499 = vst [vmem:[#allocation2 + $0xf8] sm:$0xf] %v3408_v26  ;;  %v3090_v52 = vshrl.u32 %v7657_v16, 16  ;;  %v9040_v15 = vld [vmem:[#allocation2 + $0x6c] sm:$0xf0] }
 0x265   : > { %v6755_v44 = vpop.f32.mrf.mxu2  ;;  %v6620_v8 = vpop.f32.mrf.mxu0  ;;  %3319 = vst [vmem:[#allocation2 + $0xf4] sm:$0xf] %v3079_v49  ;;  %v7658_v0 = vld [vmem:[%s9732_s14 + $0x6c] sm:$0x1] }
 0x266   : > { %v6756_v2 = vadd.f32 %v6755_v44, %v6687_v59  ;;  %v6689_v5 = vpop.f32.mrf.mxu1  ;;  %v6621_v34 = vadd.f32 %v6620_v8, %v11012_v17  ;;  %v3591_v59 = vshll.u32 %v7716_v27, 16  ;;  %v8491_v17 = vor.u32 %v9207_v46, %v8488_v42  ;;  %v7792_v8 = vld [vmem:[#allocation2 + $0x70] sm:$0xf0]  ;;  %v9041_v46 = vld [vmem:[#allocation2 + $0x74] sm:$0xf0] }
 0x267   : > { %v3585_v21 = vsel %vm9830_vm8, %v3576_v3, %v3584_v47  ;;  %v3586_v27 = vrot.slane %v3584_v47, 4  ;;  %v3082_v3 = vrot.slane %v3080_v60, 4  ;;  %v7685_v42 = vld [vmem:[%s9732_s14 + $0x68] sm:$0xf]  ;;  %v3409_v60 = vrot.slane %v3407_v20, 4 }
 0x268   : > { %v6690_v6 = vadd.f32 %v6689_v5, %v6621_v34  ;;  %6659 = vmatmul.bf16.gmra.mxu0 %v8479_v28  ;;  %v6824_v11 = vpop.f32.mrf.mxu3  ;;  %v3593_v29 = vrot.slane %v3591_v59, 6  ;;  %3846 = vst [vmem:[#allocation2 + $0xbc] sm:$0xf] %v3585_v21  ;;  %v3086_v28 = vshll.u32 %v7657_v16, 16  ;;  %v7798_v5 = vld [vmem:[#allocation2 + $0x38] sm:$0xf] }
 0x269   : > { %6728 = vmatmul.bf16.gmra.mxu1 %v8483_v37  ;;  %v11611_v54 = vadd.f32 %v6824_v11, %v6756_v2  ;;  %v9032_v2 = vld [vmem:[#allocation2 + $0x34] sm:$0xf]  ;;  %v3083_v49 = vor.u32 %v3082_v3, %v11591_v12  ;;  %v3092_v34 = vrot.slane %v3090_v52, 4  ;;  %v3096_v59 = vshll.u32 %v7658_v0, 16  ;;  %v7718_v21 = vld [vmem:[%s9732_s14 + $0x6c] sm:$0x3] }
 0x26a   : > { %6797 = vmatmul.bf16.gmra.mxu2 %v8487_v33  ;;  %v11617_v62 = vor.u32 %v3593_v29, %v3590_v43  ;;  %v7717_v33 = vld [vmem:[%s9732_s14 + $0x68] sm:$0xf]  ;;  %v3088_v51 = vrot.slane %v3086_v28, 5  ;;  %v7686_v43 = vld [vmem:[%s9732_s14 + $0x6c] sm:$0x1]  ;;  %v7791_v11 = vor.u32 %v9040_v15, %v7790_v50  ;;  %v7795_v52 = vor.u32 %v9032_v2, %v7792_v8 }
 0x26b   : > { %v3598_v26 = vshrl.u32 %v7717_v33, 16  ;;  %v3413_v28 = vrot.slane %v7686_v43, 5  ;;  %v3608_v3 = vshrl.u32 %v7718_v21, 16 }
 0x26c   : > { %v3595_v7 = vsel %vm9830_vm8, %v3586_v27, %v11617_v62  ;;  %v3093_v29 = vor.u32 %v3092_v34, %v3088_v51  ;;  %v3098_v27 = vrot.slane %v3096_v59, 5  ;;  %v3596_v15 = vrot.slane %v11617_v62, 4 }
 0x26d   : > { %v6758_v37 = vpop.f32.mrf.mxu2  ;;  %v6622_v1 = vpop.f32.mrf.mxu0  ;;  %6866 = vmatmul.bf16.gmra.mxu3 %v8491_v17  ;;  %3847 = vst [vmem:[#allocation2 + $0xfc] sm:$0xf] %v3595_v7  ;;  %v3084_v17 = vrot.slane %v3083_v49, 4  ;;  %v3600_v4 = vrot.slane %v3598_v26, 5  ;;  %v9033_v49 = vld [vmem:[#allocation2 + $0x3c] sm:$0xf] }
 0x26e   : > { %v6759_v10 = vadd.f32 %v6758_v37, %v6690_v6  ;;  %v6691_v44 = vpop.f32.mrf.mxu1  ;;  %v6623_v55 = vadd.f32 %v6622_v1, %v11035_v35  ;;  %v3410_v6 = vrot.slane %v7685_v42, 5  ;;  %v3601_v35 = vshll.u32 %v7717_v33, 16  ;;  %v7632_v1 = vld [vmem:[%s9732_s14 + $0x64] sm:$0xf]  ;;  %v7800_v42 = vld [vmem:[#allocation2 + $0x78] sm:$0xf0] }
 0x26f   : > { %v7799_v37 = vor.u32 %v9041_v46, %v7798_v5  ;;  %v3089_v33 = vsel %vm9797_vm7, %v3084_v17, %v3088_v51  ;;  %v3094_v7 = vrot.slane %v3093_v29, 4  ;;  %2988 = vst [vmem:[#allocation2 + $0x130] sm:$0xf] %v7632_v1  ;;  %v3611_v5 = vshll.u32 %v7718_v21, 16  ;;  %v7659_v17 = vld [vmem:[%s9732_s14 + $0x70] sm:$0xf] }
 0x270   : > { %v6692_v56 = vadd.f32 %v6691_v44, %v6623_v55  ;;  %v6827_v47 = vpop.f32.mrf.mxu3  ;;  %v3412_v16 = vrot.slane %v3410_v6, 4  ;;  %v7633_v44 = vld [vmem:[%s9732_s14 + $0x68] sm:$0xf]  ;;  %v3603_v20 = vrot.slane %v3601_v35, 6  ;;  %v3411_v8 = vsel %vm9774_vm6, %v3409_v60, %v3410_v6  ;;  %3320 = vst [vmem:[#allocation2 + $0x134] sm:$0xf] %v3089_v33 }
 0x271   : > { %v11631_v12 = vadd.f32 %v6827_v47, %v6759_v10  ;;  %2989 = vst [vmem:[#allocation2 + $0x170] sm:$0xf] %v7633_v44  ;;  %v3099_v2 = vsel %vm9797_vm7, %v3094_v7, %v3098_v27  ;;  %v3610_v34 = vrot.slane %v3608_v3, 5  ;;  %v3613_v26 = vrot.slane %v3611_v5, 6  ;;  %v7660_v29 = vld [vmem:[%s9732_s14 + $0x74] sm:$0xf] }
 0x272   : > { %v3414_v62 = vsel %vm9774_vm6, %v3412_v16, %v3413_v28  ;;  %v3604_v51 = vor.u32 %v3603_v20, %v3600_v4  ;;  %3321 = vst [vmem:[#allocation2 + $0x174] sm:$0xf] %v3099_v2  ;;  %v7803_v47 = vor.u32 %v9033_v49, %v7800_v42  ;;  %v3104_v21 = vshll.u32 %v7659_v17, 16  ;;  %v9048_v4 = vld [vmem:[#allocation2 + $0xb4] sm:$0xf] }
 0x273   : > { %3500 = vst [vmem:[#allocation2 + $0x138] sm:$0xf] %v3411_v8  ;;  %v3614_v6 = vor.u32 %v3613_v26, %v3610_v34  ;;  %v3110_v27 = vshll.u32 %v7660_v29, 16  ;;  %v3114_v28 = vshrl.u32 %v7660_v29, 16  ;;  %v11655_v20 = vld [vmem:[%s9732_s14 + $0x78] sm:$0xf] }
 0x274   : > { %v3605_v59 = vsel %vm9830_vm8, %v3596_v15, %v3604_v51  ;;  %3501 = vst [vmem:[#allocation2 + $0x178] sm:$0xf] %v3414_v62  ;;  %v3106_v33 = vrot.slane %v3104_v21, 5  ;;  %v9056_v15 = vld [vmem:[#allocation2 + $0xec] sm:$0xf0]  ;;  %v3120_v8 = vshll.u32 %v11655_v20, 16 }
 0x275   : > { %v6760_v50 = vpop.f32.mrf.mxu2  ;;  %v6625_v55 = vpop.f32.mrf.mxu0  ;;  %3848 = vst [vmem:[#allocation2 + $0x13c] sm:$0xf] %v3605_v59  ;;  %v3112_v3 = vrot.slane %v3110_v27, 5  ;;  %v7688_v5 = vld [vmem:[%s9732_s14 + $0x74] sm:$0xf] }
 0x276   : > { %v6761_v10 = vadd.f32 %v6760_v50, %v6692_v56  ;;  %v6694_v0 = vpop.f32.mrf.mxu1  ;;  %v6626_v46 = vadd.f32 %v6625_v55, %v11057_v22  ;;  %v3606_v22 = vrot.slane %v3604_v51, 4  ;;  %v7854_v50 = vld [vmem:[#allocation2 + $0xb0] sm:$0xf]  ;;  %v7862_v49 = vld [vmem:[#allocation2 + $0xb8] sm:$0xf] }
 0x277   : > { %v7719_v55 = vld [vmem:[%s9732_s14 + $0x70] sm:$0xe]  ;;  %v11662_v51 = vld [vmem:[%s9732_s14 + $0x78] sm:$0xf]  ;;  %v7720_v29 = vld [vmem:[%s9732_s14 + $0x74] sm:$0xf] }
 0x278   : > { %v6695_v56 = vadd.f32 %v6694_v0, %v6626_v46  ;;  %6880 = vmatmul.bf16.vlgmr.msrb.gmra.mxu0 %v7791_v11  ;;  %v6829_v43 = vpop.f32.mrf.mxu3  ;;  %v3615_v60 = vsel %vm9830_vm8, %v3606_v22, %v3614_v6  ;;  %v3101_v11 = vshrl.u32 %v7659_v17, 16  ;;  %v7856_v0 = vld [vmem:[#allocation2 + $0xf0] sm:$0xf0]  ;;  %v9057_v42 = vld [vmem:[#allocation2 + $0xf4] sm:$0xf0]  ;;  %v3617_v22 = vshrl.u32 %v7719_v55, 16 }
 0x279   : > { %6949 = vmatmul.bf16.vlgmr.msrb.gmra.mxu1 %v7795_v52  ;;  %v11647_v35 = vadd.f32 %v6829_v43, %v6761_v10  ;;  %3849 = vst [vmem:[#allocation2 + $0x17c] sm:$0xf] %v3615_v60  ;;  %v3116_v10 = vrot.slane %v3114_v28, 4  ;;  %v3420_v17 = vrot.slane %v11662_v51, 5  ;;  %v7855_v60 = vor.u32 %v9056_v15, %v7854_v50  ;;  %v7634_v21 = vld [vmem:[%s9732_s14 + $0x70] sm:$0xf] }
 0x27a   : > { %7018 = vmatmul.bf16.vlgmr.msrb.gmra.mxu2 %v7799_v37  ;;  %v3103_v44 = vrot.slane %v3101_v11, 4  ;;  %v7859_v11 = vor.u32 %v9048_v4, %v7856_v0  ;;  %v7635_v27 = vld [vmem:[%s9732_s14 + $0x74] sm:$0xf]  ;;  %2990 = vst [vmem:[#allocation2 + $0x1b0] sm:$0xf] %v7634_v21  ;;  %v3620_v0 = vshll.u32 %v7719_v55, 16 }
 0x27b   : > { %v3117_v62 = vor.u32 %v3116_v10, %v3112_v3  ;;  %v9049_v4 = vld [vmem:[#allocation2 + $0xbc] sm:$0xf]  ;;  %2991 = vst [vmem:[#allocation2 + $0x1f0] sm:$0xf] %v7635_v27  ;;  %v3619_v10 = vrot.slane %v3617_v22, 5 }
 0x27c   : > { %v3107_v2 = vor.u32 %v3106_v33, %v3103_v44  ;;  %v7721_v33 = vld [vmem:[%s9732_s14 + $0x78] sm:$0xf]  ;;  %v7662_v27 = vld [vmem:[%s9732_s14 + $0x7c] sm:$0xf] }
 0x27d   : > { %v6763_v16 = vpop.f32.mrf.mxu2  ;;  %v6627_v37 = vpop.f32.mrf.mxu0  ;;  %7087 = vmatmul.bf16.vlgmr.msrb.gmra.mxu3 %v7803_v47  ;;  %v3118_v6 = vrot.slane %v3117_v62, 4  ;;  %v3417_v47 = vrot.slane %v7688_v5, 5  ;;  %v3636_v62 = vshrl.u32 %v7721_v33, 16 }
 0x27e   : > { %v6764_v52 = vadd.f32 %v6763_v16, %v6695_v56  ;;  %v6696_v1 = vpop.f32.mrf.mxu1  ;;  %v6628_v7 = vadd.f32 %v6627_v37, %v11078_v58  ;;  %v7687_v58 = vld [vmem:[%s9732_s14 + $0x70] sm:$0xe]  ;;  %v3108_v26 = vrot.slane %v3107_v2, 4  ;;  %v11664_v56 = vrot.slane %v3120_v8, 5  ;;  %v7864_v8 = vld [vmem:[#allocation2 + $0xf8] sm:$0xf0] }
 0x27f   : > { %v7709_v59 = vrot.slane %v7687_v58, 9  ;;  %v7863_v37 = vor.u32 %v9057_v42, %v7862_v49  ;;  %v3419_v44 = vrot.slane %v3417_v47, 4  ;;  %v3629_v49 = vshll.u32 %v7720_v29, 16 }
 0x280   : > { %v6697_v46 = vadd.f32 %v6696_v1, %v6628_v7  ;;  %v6832_v34 = vpop.f32.mrf.mxu3  ;;  %v3113_v16 = vsel %vm9797_vm7, %v3108_v26, %v3112_v3  ;;  %v3626_v3 = vshrl.u32 %v7720_v29, 16  ;;  %v3124_v29 = vshrl.u32 %v11655_v20, 16  ;;  %v7920_v20 = vld [vmem:[#allocation2 + $0x170] sm:$0xf0] }
 0x281   : > { %v11666_v43 = vadd.f32 %v6832_v34, %v6764_v52  ;;  %v3123_v52 = vsel %vm9797_vm7, %v3118_v6, %v11664_v56  ;;  %v3418_v1 = vsel %vm9774_vm6, %v7709_v59, %v3417_v47  ;;  %3322 = vst [vmem:[#allocation2 + $0x1b4] sm:$0xf] %v3113_v16  ;;  %v3421_v5 = vsel %vm9774_vm6, %v3419_v44, %v3420_v17  ;;  %v11689_v16 = vld [vmem:[#allocation2 + $0x130] sm:$0xf] }
 0x282   : > { %3323 = vst [vmem:[#allocation2 + $0x1f4] sm:$0xf] %v3123_v52  ;;  %v3628_v58 = vrot.slane %v3626_v3, 5  ;;  %v3639_v34 = vshll.u32 %v7721_v33, 16  ;;  %v3631_v55 = vrot.slane %v3629_v49, 6  ;;  %v7867_v47 = vor.u32 %v9049_v4, %v7864_v8 }
 0x283   : > { %3502 = vst [vmem:[#allocation2 + $0x1b8] sm:$0xf] %v3418_v1  ;;  %v3134_v52 = vshrl.u32 %v7662_v27, 16  ;;  %v7722_v33 = vld [vmem:[%s9732_s14 + $0x7c] sm:$0xf] }
 0x284   : > { %3503 = vst [vmem:[#allocation2 + $0x1f8] sm:$0xf] %v3421_v5  ;;  %v3641_v22 = vrot.slane %v3639_v34, 6  ;;  %v3632_v21 = vor.u32 %v3631_v55, %v3628_v58  ;;  %v9064_v4 = vld [vmem:[#allocation2 + $0x134] sm:$0xf]  ;;  %v3646_v58 = vshrl.u32 %v7722_v33, 16 }
 0x285   : > { %v6765_v28 = vpop.f32.mrf.mxu2  ;;  %v6630_v50 = vpop.f32.mrf.mxu0  ;;  %v11703_v5 = vld [vmem:[%s9732_s14 + $0x80] sm:$0xf] }
 0x286   : > { %v6766_v7 = vadd.f32 %v6765_v28, %v6697_v46  ;;  %v6699_v15 = vpop.f32.mrf.mxu1  ;;  %v6631_v2 = vadd.f32 %v6630_v50, %v11123_v61  ;;  %v3622_v46 = vrot.slane %v3620_v0, 6  ;;  %v3638_v61 = vrot.slane %v3636_v62, 5 }
 0x287   : > { %v3130_v28 = vshll.u32 %v7662_v27, 16  ;;  %v3634_v44 = vrot.slane %v3632_v21, 4  ;;  %v3126_v0 = vrot.slane %v3124_v29, 4  ;;  %v3140_v55 = vshll.u32 %v11703_v5, 16  ;;  %v11711_v29 = vld [vmem:[%s9732_s14 + $0x80] sm:$0xf] }
 0x288   : > { %v6700_v42 = vadd.f32 %v6699_v15, %v6631_v2  ;;  %6885 = vmatmul.bf16.gmra.mxu0 %v7855_v60  ;;  %v6834_v26 = vpop.f32.mrf.mxu3  ;;  %v3623_v59 = vor.u32 %v3622_v46, %v3619_v10  ;;  %v7926_v2 = vld [vmem:[#allocation2 + $0x138] sm:$0xf]  ;;  %v3136_v46 = vrot.slane %v3134_v52, 4 }
 0x289   : > { %6954 = vmatmul.bf16.gmra.mxu1 %v7859_v11  ;;  %v11685_v6 = vadd.f32 %v6834_v26, %v6766_v7  ;;  %v11691_v11 = vor.u32 %v3641_v22, %v3638_v61  ;;  %v3127_v49 = vor.u32 %v3126_v0, %v11664_v56  ;;  %v3132_v62 = vrot.slane %v3130_v28, 5  ;;  %v7690_v61 = vld [vmem:[%s9732_s14 + $0x7c] sm:$0xf] }
 0x28a   : > { %7023 = vmatmul.bf16.gmra.mxu2 %v7863_v37  ;;  %v3624_v60 = vrot.slane %v3623_v59, 4  ;;  %v11693_v37 = vld [vmem:[#allocation2 + $0x16c] sm:$0xf0]  ;;  %v7923_v59 = vor.u32 %v9064_v4, %v7920_v20  ;;  %v3422_v56 = vrot.slane %v3420_v17, 4  ;;  %v3426_v28 = vrot.slane %v11711_v29, 5 }
 0x28b   : > { %v3643_v8 = vsel %vm9830_vm8, %v3634_v44, %v11691_v11  ;;  %v3128_v22 = vrot.slane %v3127_v49, 4  ;;  %v3644_v17 = vrot.slane %v11691_v11, 4 }
 0x28c   : > { %v3633_v10 = vsel %vm9830_vm8, %v3624_v60, %v3632_v21  ;;  %3851 = vst [vmem:[#allocation2 + $0x1fc] sm:$0xf] %v3643_v8  ;;  %v7723_v21 = vld [vmem:[%s9732_s14 + $0x80] sm:$0xf]  ;;  %v11718_v60 = vrot.slane %v3140_v55, 5 }
 0x28d   : > { %v6768_v1 = vpop.f32.mrf.mxu2  ;;  %v6632_v50 = vpop.f32.mrf.mxu0  ;;  %7092 = vmatmul.bf16.gmra.mxu3 %v7867_v47  ;;  %3850 = vst [vmem:[#allocation2 + $0x1bc] sm:$0xf] %v3633_v10  ;;  %v3137_v47 = vor.u32 %v3136_v46, %v3132_v62  ;;  %v3133_v44 = vsel %vm9797_vm7, %v3128_v22, %v3132_v62  ;;  %v3656_v20 = vshrl.u32 %v7723_v21, 16  ;;  %v9065_v8 = vld [vmem:[#allocation2 + $0x13c] sm:$0xf]  ;;  %v3659_v62 = vshll.u32 %v7723_v21, 16 }
 0x28e   : > { %v6769_v7 = vadd.f32 %v6768_v1, %v6700_v42  ;;  %v6701_v15 = vpop.f32.mrf.mxu1  ;;  %v6633_v3 = vadd.f32 %v6632_v50, %v11153_v45  ;;  %v7919_v45 = vor.u32 %v11693_v37, %v11689_v16  ;;  %v9073_v42 = vld [vmem:[#allocation2 + $0x174] sm:$0xf0]  ;;  %v3423_v16 = vrot.slane %v7690_v61, 5  ;;  %v7637_v37 = vld [vmem:[%s9732_s14 + $0x7c] sm:$0xf] }
 0x28f   : > { %v7927_v52 = vor.u32 %v9073_v42, %v7926_v2  ;;  %v7636_v1 = vld [vmem:[%s9732_s14 + $0x78] sm:$0xf]  ;;  %v3138_v50 = vrot.slane %v3137_v47, 4  ;;  %2993 = vst [vmem:[#allocation2 + $0x270] sm:$0xf] %v7637_v37  ;;  %v3661_v42 = vrot.slane %v3659_v62, 6 }
 0x290   : > { %v6702_v34 = vadd.f32 %v6701_v15, %v6633_v3  ;;  %v6837_v26 = vpop.f32.mrf.mxu3  ;;  %v3648_v15 = vrot.slane %v3646_v58, 5  ;;  %2992 = vst [vmem:[#allocation2 + $0x230] sm:$0xf] %v7636_v1  ;;  %v3425_v51 = vrot.slane %v3423_v16, 4  ;;  %v3424_v49 = vsel %vm9774_vm6, %v3422_v56, %v3423_v16  ;;  %v7928_v58 = vld [vmem:[#allocation2 + $0x178] sm:$0xf0] }
 0x291   : > { %v11716_v27 = vadd.f32 %v6837_v26, %v6769_v7  ;;  %v3649_v7 = vshll.u32 %v7722_v33, 16  ;;  %v3143_v2 = vsel %vm9797_vm7, %v3138_v50, %v11718_v60  ;;  %3324 = vst [vmem:[#allocation2 + $0x234] sm:$0xf] %v3133_v44  ;;  %v3144_v56 = vshrl.u32 %v11703_v5, 16  ;;  %v7664_v1 = vld [vmem:[%s9732_s14 + $0x84] sm:$0xf] }
 0x292   : > { %v3427_v11 = vsel %vm9774_vm6, %v3425_v51, %v3426_v28  ;;  %3325 = vst [vmem:[#allocation2 + $0x274] sm:$0xf] %v3143_v2  ;;  %v3154_v37 = vshrl.u32 %v7664_v1, 16 }
 0x293   : > { %v3651_v33 = vrot.slane %v3649_v7, 6  ;;  %3504 = vst [vmem:[#allocation2 + $0x238] sm:$0xf] %v3424_v49  ;;  %v9080_v49 = vld [vmem:[#allocation2 + $0x1b4] sm:$0xf] }
 0x294   : > { %3505 = vst [vmem:[#allocation2 + $0x278] sm:$0xf] %v3427_v11  ;;  %v3156_v2 = vrot.slane %v3154_v37, 4 }
 0x295   : > { %v6770_v4 = vpop.f32.mrf.mxu2  ;;  %v6635_v0 = vpop.f32.mrf.mxu0  ;;  %v3652_v61 = vor.u32 %v3651_v33, %v3648_v15 }
 0x296   : > { %v6771_v10 = vadd.f32 %v6770_v4, %v6702_v34  ;;  %v6704_v3 = vpop.f32.mrf.mxu1  ;;  %v6636_v46 = vadd.f32 %v6635_v0, %v11170_v32  ;;  %v3658_v34 = vrot.slane %v3656_v20, 5  ;;  %v7931_v32 = vor.u32 %v9065_v8, %v7928_v58  ;;  %v7725_v20 = vld [vmem:[%s9732_s14 + $0x88] sm:$0x3]  ;;  %v7982_v0 = vld [vmem:[#allocation2 + $0x1b0] sm:$0xf] }
 0x297   : > { %v3653_v21 = vsel %vm9830_vm8, %v3644_v17, %v3652_v61  ;;  %v3654_v16 = vrot.slane %v3652_v61, 4  ;;  %v3146_v17 = vrot.slane %v3144_v56, 4  ;;  %v7665_v8 = vld [vmem:[%s9732_s14 + $0x88] sm:$0x1]  ;;  %v7692_v58 = vld [vmem:[%s9732_s14 + $0x84] sm:$0xf] }
 0x298   : > { %v6705_v55 = vadd.f32 %v6704_v3, %v6636_v46  ;;  %6890 = vmatmul.bf16.gmra.mxu0 %v7919_v45  ;;  %v6839_v26 = vpop.f32.mrf.mxu3  ;;  %v11736_v22 = vor.u32 %v3661_v42, %v3658_v34  ;;  %v7724_v45 = vld [vmem:[%s9732_s14 + $0x84] sm:$0xf]  ;;  %3852 = vst [vmem:[#allocation2 + $0x23c] sm:$0xf] %v3653_v21  ;;  %v9088_v3 = vld [vmem:[#allocation2 + $0x1ec] sm:$0xf0] }
 0x299   : > { %6959 = vmatmul.bf16.gmra.mxu1 %v7923_v59  ;;  %v11738_v47 = vadd.f32 %v6839_v26, %v6771_v10  ;;  %v3150_v59 = vshll.u32 %v7664_v1, 16  ;;  %v3666_v50 = vshrl.u32 %v7724_v45, 16  ;;  %v3669_v15 = vshll.u32 %v7724_v45, 16  ;;  %v7984_v42 = vld [vmem:[#allocation2 + $0x1f0] sm:$0xf0] }
 0x29a   : > { %7028 = vmatmul.bf16.gmra.mxu2 %v7927_v52  ;;  %v3663_v44 = vsel %vm9830_vm8, %v3654_v16, %v11736_v22  ;;  %v3147_v62 = vor.u32 %v3146_v17, %v11718_v60  ;;  %v3160_v46 = vshll.u32 %v7665_v8, 16  ;;  %v7693_v61 = vld [vmem:[%s9732_s14 + $0x88] sm:$0x1]  ;;  %v3429_v26 = vrot.slane %v7692_v58, 5  ;;  %v7990_v56 = vld [vmem:[#allocation2 + $0x1b8] sm:$0xf] }
 0x29b   : > { %3853 = vst [vmem:[#allocation2 + $0x27c] sm:$0xf] %v3663_v44  ;;  %v3152_v7 = vrot.slane %v3150_v59, 5  ;;  %v3668_v11 = vrot.slane %v3666_v50, 5  ;;  %v3671_v33 = vrot.slane %v3669_v15, 6  ;;  %v3428_v1 = vrot.slane %v3426_v28, 4 }
 0x29c   : > { %v3148_v21 = vrot.slane %v3147_v62, 4  ;;  %v3162_v16 = vrot.slane %v3160_v46, 5  ;;  %v9089_v45 = vld [vmem:[#allocation2 + $0x1f4] sm:$0xf0]  ;;  %v3431_v37 = vrot.slane %v3429_v26, 4  ;;  %v7983_v44 = vor.u32 %v9088_v3, %v7982_v0 }
 0x29d   : > { %v6773_v52 = vpop.f32.mrf.mxu2  ;;  %v6637_v5 = vpop.f32.mrf.mxu0  ;;  %7097 = vmatmul.bf16.gmra.mxu3 %v7931_v32  ;;  %v3676_v32 = vshrl.u32 %v7725_v20, 16  ;;  %v7638_v50 = vld [vmem:[%s9732_s14 + $0x80] sm:$0xf]  ;;  %v7639_v15 = vld [vmem:[%s9732_s14 + $0x84] sm:$0xf]  ;;  %v3672_v17 = vor.u32 %v3671_v33, %v3668_v11  ;;  %v7987_v8 = vor.u32 %v9080_v49, %v7984_v42  ;;  %v7991_v0 = vor.u32 %v9089_v45, %v7990_v56 }
 0x29e   : > { %v6774_v4 = vadd.f32 %v6773_v52, %v6705_v55  ;;  %v6706_v51 = vpop.f32.mrf.mxu1  ;;  %v6638_v10 = vadd.f32 %v6637_v5, %v11196_v36  ;;  %v3157_v55 = vor.u32 %v3156_v2, %v3152_v7  ;;  %v3432_v52 = vrot.slane %v7693_v61, 5  ;;  %2994 = vst [vmem:[#allocation2 + $0x2b0] sm:$0xf] %v7638_v50  ;;  %v9081_v11 = vld [vmem:[#allocation2 + $0x1bc] sm:$0xf] }
 0x29f   : > { %v3153_v5 = vsel %vm9797_vm7, %v3148_v21, %v3152_v7  ;;  %v3678_v28 = vrot.slane %v3676_v32, 5  ;;  %2995 = vst [vmem:[#allocation2 + $0x2f0] sm:$0xf] %v7639_v15  ;;  %v3430_v3 = vsel %vm9774_vm6, %v3428_v1, %v3429_v26  ;;  %v3674_v49 = vrot.slane %v3672_v17, 4  ;;  %v7992_v33 = vld [vmem:[#allocation2 + $0x1f8] sm:$0xf0] }
 0x2a0   : > { %v6707_v34 = vadd.f32 %v6706_v51, %v6638_v10  ;;  %v6842_v36 = vpop.f32.mrf.mxu3  ;;  %v3158_v59 = vrot.slane %v3157_v55, 4  ;;  %v3664_v51 = vrot.slane %v11736_v22, 4  ;;  %3326 = vst [vmem:[#allocation2 + $0x2b4] sm:$0xf] %v3153_v5  ;;  %v3433_v22 = vsel %vm9774_vm6, %v3431_v37, %v3432_v52  ;;  %v7666_v32 = vld [vmem:[%s9732_s14 + $0x8c] sm:$0xf] }
 0x2a1   : > { %v11756_v60 = vadd.f32 %v6842_v36, %v6774_v4  ;;  %v3679_v4 = vshll.u32 %v7725_v20, 16  ;;  %3506 = vst [vmem:[#allocation2 + $0x2b8] sm:$0xf] %v3430_v3  ;;  %v7995_v61 = vor.u32 %v9081_v11, %v7992_v33  ;;  %v7667_v36 = vld [vmem:[%s9732_s14 + $0x90] sm:$0xf]  ;;  %v3165_v56 = vshrl.u32 %v7666_v32, 16 }
 0x2a2   : > { %v3163_v29 = vsel %vm9797_vm7, %v3158_v59, %v3162_v16  ;;  %v3673_v20 = vsel %vm9830_vm8, %v3664_v51, %v3672_v17  ;;  %3507 = vst [vmem:[#allocation2 + $0x2f8] sm:$0xf] %v3433_v22  ;;  %v3168_v21 = vshll.u32 %v7666_v32, 16  ;;  %v3174_v1 = vshll.u32 %v7667_v36, 16  ;;  %v7726_v15 = vld [vmem:[%s9732_s14 + $0x8c] sm:$0xe] }
 0x2a3   : > { %v3681_v58 = vrot.slane %v3679_v4, 6  ;;  %3327 = vst [vmem:[#allocation2 + $0x2f4] sm:$0xf] %v3163_v29  ;;  %v3178_v45 = vshrl.u32 %v7667_v36, 16  ;;  %v8046_v51 = vld [vmem:[#allocation2 + $0x230] sm:$0xf] }
 0x2a4   : > { %3854 = vst [vmem:[#allocation2 + $0x2bc] sm:$0xf] %v3673_v20  ;;  %v3170_v50 = vrot.slane %v3168_v21, 5  ;;  %v9104_v17 = vld [vmem:[#allocation2 + $0x26c] sm:$0xf0]  ;;  %v3176_v4 = vrot.slane %v3174_v1, 5 }
 0x2a5   : > { %v6775_v10 = vpop.f32.mrf.mxu2  ;;  %v6640_v62 = vpop.f32.mrf.mxu0  ;;  %v3682_v42 = vor.u32 %v3681_v58, %v3678_v28  ;;  %v8054_v29 = vld [vmem:[#allocation2 + $0x238] sm:$0xf]  ;;  %v11781_v28 = vld [vmem:[%s9732_s14 + $0x94] sm:$0xf]  ;;  %v7695_v3 = vld [vmem:[%s9732_s14 + $0x90] sm:$0xf]  ;;  %v8047_v36 = vor.u32 %v9104_v17, %v8046_v51 }
 0x2a6   : > { %v6776_v2 = vadd.f32 %v6775_v10, %v6707_v34  ;;  %v6709_v46 = vpop.f32.mrf.mxu1  ;;  %v6641_v7 = vadd.f32 %v6640_v62, %v11218_v18  ;;  %v9096_v10 = vld [vmem:[#allocation2 + $0x234] sm:$0xf]  ;;  %v9105_v62 = vld [vmem:[#allocation2 + $0x274] sm:$0xf0]  ;;  %v3685_v58 = vshrl.u32 %v7726_v15, 16 }
 0x2a7   : > { %v3683_v26 = vsel %vm9830_vm8, %v3674_v49, %v3682_v42  ;;  %v11787_v49 = vld [vmem:[%s9732_s14 + $0x94] sm:$0xf]  ;;  %v7727_v32 = vld [vmem:[%s9732_s14 + $0x90] sm:$0xf]  ;;  %v8055_v21 = vor.u32 %v9105_v62, %v8054_v29  ;;  %v3688_v29 = vshll.u32 %v7726_v15, 16 }
 0x2a8   : > { %v6710_v34 = vadd.f32 %v6709_v46, %v6641_v7  ;;  %6895 = vmatmul.bf16.gmra.mxu0 %v7983_v44  ;;  %v6844_v18 = vpop.f32.mrf.mxu3  ;;  %3855 = vst [vmem:[#allocation2 + $0x2fc] sm:$0xf] %v3683_v26  ;;  %v3167_v44 = vrot.slane %v3165_v56, 4  ;;  %v3439_v26 = vrot.slane %v11787_v49, 5  ;;  %v7641_v1 = vld [vmem:[%s9732_s14 + $0x90] sm:$0xf] }
 0x2a9   : > { %6964 = vmatmul.bf16.gmra.mxu1 %v7987_v8  ;;  %v11772_v55 = vadd.f32 %v6844_v18, %v6776_v2  ;;  %v8048_v8 = vld [vmem:[#allocation2 + $0x270] sm:$0xf0]  ;;  %v3180_v2 = vrot.slane %v3178_v45, 4  ;;  %2997 = vst [vmem:[#allocation2 + $0x370] sm:$0xf] %v7641_v1 }
 0x2aa   : > { %7033 = vmatmul.bf16.gmra.mxu2 %v7991_v0  ;;  %v3171_v46 = vor.u32 %v3170_v50, %v3167_v44  ;;  %v3184_v0 = vshll.u32 %v11781_v28, 16  ;;  %v8051_v56 = vor.u32 %v9096_v10, %v8048_v8  ;;  %v9097_v8 = vld [vmem:[#allocation2 + $0x23c] sm:$0xf]  ;;  %v7669_v1 = vld [vmem:[%s9732_s14 + $0x98] sm:$0xf] }
 0x2ab   : > { %v3181_v22 = vor.u32 %v3180_v2, %v3176_v4  ;;  %v3694_v2 = vshrl.u32 %v7727_v32, 16 }
 0x2ac   : > { %v3172_v33 = vrot.slane %v3171_v46, 4  ;;  %v11789_v20 = vrot.slane %v3184_v0, 5  ;;  %v8056_v46 = vld [vmem:[#allocation2 + $0x278] sm:$0xf0] }
 0x2ad   : > { %v6778_v16 = vpop.f32.mrf.mxu2  ;;  %v6642_v37 = vpop.f32.mrf.mxu0  ;;  %7102 = vmatmul.bf16.gmra.mxu3 %v7995_v61  ;;  %v3182_v18 = vrot.slane %v3181_v22, 4  ;;  %v3436_v61 = vrot.slane %v7695_v3, 5 }
 0x2ae   : > { %v6779_v59 = vadd.f32 %v6778_v16, %v6710_v34  ;;  %v6711_v52 = vpop.f32.mrf.mxu1  ;;  %v6643_v5 = vadd.f32 %v6642_v37, %v11239_v24  ;;  %v7694_v24 = vld [vmem:[%s9732_s14 + $0x8c] sm:$0xe]  ;;  %v3177_v45 = vsel %vm9797_vm7, %v3172_v33, %v3176_v4  ;;  %v7728_v37 = vld [vmem:[%s9732_s14 + $0x94] sm:$0xf]  ;;  %v3697_v4 = vshll.u32 %v7727_v32, 16 }
 0x2af   : > { %v7710_v34 = vrot.slane %v7694_v24, 9  ;;  %v7640_v16 = vld [vmem:[%s9732_s14 + $0x8c] sm:$0xf]  ;;  %v3438_v50 = vrot.slane %v3436_v61, 4  ;;  %3328 = vst [vmem:[#allocation2 + $0x334] sm:$0xf] %v3177_v45  ;;  %v8059_v32 = vor.u32 %v9097_v8, %v8056_v46 }
 0x2b0   : > { %v6712_v7 = vadd.f32 %v6711_v52, %v6643_v5  ;;  %v6847_v11 = vpop.f32.mrf.mxu3  ;;  %2996 = vst [vmem:[#allocation2 + $0x330] sm:$0xf] %v7640_v16  ;;  %v3687_v5 = vrot.slane %v3685_v58, 5  ;;  %v3704_v3 = vshrl.u32 %v7728_v37, 16  ;;  %v3707_v22 = vshll.u32 %v7728_v37, 16 }
 0x2b1   : > { %v11791_v42 = vadd.f32 %v6847_v11, %v6779_v59  ;;  %v3187_v59 = vsel %vm9797_vm7, %v3182_v18, %v11789_v20  ;;  %v3437_v44 = vsel %vm9774_vm6, %v7710_v34, %v3436_v61  ;;  %v3440_v0 = vsel %vm9774_vm6, %v3438_v50, %v3439_v26  ;;  %v11815_v45 = vld [vmem:[#allocation2 + $0x2b0] sm:$0xf]  ;;  %v7729_v50 = vld [vmem:[%s9732_s14 + $0x98] sm:$0xf]  ;;  %v8112_v8 = vld [vmem:[#allocation2 + $0x2f0] sm:$0xf0] }
 0x2b2   : > { %3329 = vst [vmem:[#allocation2 + $0x374] sm:$0xf] %v3187_v59  ;;  %v3696_v24 = vrot.slane %v3694_v2, 5  ;;  %v3699_v58 = vrot.slane %v3697_v4, 6  ;;  %v3706_v15 = vrot.slane %v3704_v3, 5 }
 0x2b3   : > { %3508 = vst [vmem:[#allocation2 + $0x338] sm:$0xf] %v3437_v44  ;;  %v3198_v44 = vshrl.u32 %v7669_v1, 16  ;;  %v8118_v4 = vld [vmem:[#allocation2 + $0x2b8] sm:$0xf] }
 0x2b4   : > { %3509 = vst [vmem:[#allocation2 + $0x378] sm:$0xf] %v3440_v0  ;;  %v3700_v18 = vor.u32 %v3699_v58, %v3696_v24  ;;  %v11828_v46 = vld [vmem:[%s9732_s14 + $0x9c] sm:$0xf] }
 0x2b5   : > { %v6780_v52 = vpop.f32.mrf.mxu2  ;;  %v6645_v17 = vpop.f32.mrf.mxu0  ;;  %v3200_v58 = vrot.slane %v3198_v44, 4  ;;  %v7643_v44 = vld [vmem:[%s9732_s14 + $0x98] sm:$0xf] }
 0x2b6   : > { %v6781_v51 = vadd.f32 %v6780_v52, %v6712_v7  ;;  %v6714_v10 = vpop.f32.mrf.mxu1  ;;  %v6646_v62 = vadd.f32 %v6645_v17, %v11284_v23  ;;  %v3690_v7 = vrot.slane %v3688_v29, 6  ;;  %v3709_v23 = vrot.slane %v3707_v22, 6  ;;  %2999 = vst [vmem:[#allocation2 + $0x3f0] sm:$0xf] %v7643_v44  ;;  %v7731_v44 = vld [vmem:[%s9732_s14 + $0xa0] sm:$0xf] }
 0x2b7   : > { %v3702_v37 = vrot.slane %v3700_v18, 4  ;;  %v3194_v52 = vshll.u32 %v7669_v1, 16 }
 0x2b8   : > { %v6715_v11 = vadd.f32 %v6714_v10, %v6646_v62  ;;  %6900 = vmatmul.bf16.gmra.mxu0 %v8047_v36  ;;  %v6849_v33 = vpop.f32.mrf.mxu3  ;;  %v3691_v34 = vor.u32 %v3690_v7, %v3687_v5  ;;  %v11812_v16 = vor.u32 %v3709_v23, %v3706_v15  ;;  %v3188_v36 = vshrl.u32 %v11781_v28, 16  ;;  %v9112_v10 = vld [vmem:[#allocation2 + $0x2b4] sm:$0xf]  ;;  %v9121_v62 = vld [vmem:[#allocation2 + $0x2f4] sm:$0xf0] }
 0x2b9   : > { %6969 = vmatmul.bf16.gmra.mxu1 %v8051_v56  ;;  %v11810_v61 = vadd.f32 %v6849_v33, %v6781_v51  ;;  %v3196_v22 = vrot.slane %v3194_v52, 5  ;;  %v3714_v7 = vshrl.u32 %v7729_v50, 16  ;;  %v3717_v15 = vshll.u32 %v7729_v50, 16  ;;  %v7730_v52 = vld [vmem:[%s9732_s14 + $0x9c] sm:$0xf] }
 0x2ba   : > { %7038 = vmatmul.bf16.gmra.mxu2 %v8055_v21  ;;  %v3692_v56 = vrot.slane %v3691_v34, 4  ;;  %v11818_v21 = vld [vmem:[#allocation2 + $0x2ec] sm:$0xf0]  ;;  %v3711_v28 = vsel %vm9830_vm8, %v3702_v37, %v11812_v16  ;;  %v3190_v3 = vrot.slane %v3188_v36, 4  ;;  %v8115_v33 = vor.u32 %v9112_v10, %v8112_v8 }
 0x2bb   : > { %v8111_v0 = vor.u32 %v11818_v21, %v11815_v45  ;;  %3857 = vst [vmem:[#allocation2 + $0x37c] sm:$0xf] %v3711_v28  ;;  %v3201_v36 = vor.u32 %v3200_v58, %v3196_v22  ;;  %v7642_v21 = vld [vmem:[%s9732_s14 + $0x94] sm:$0xf]  ;;  %v3719_v10 = vrot.slane %v3717_v15, 6 }
 0x2bc   : > { %v3701_v29 = vsel %vm9830_vm8, %v3692_v56, %v3700_v18  ;;  %v3191_v34 = vor.u32 %v3190_v3, %v11789_v20  ;;  %v11836_v18 = vld [vmem:[%s9732_s14 + $0x9c] sm:$0xf]  ;;  %2998 = vst [vmem:[#allocation2 + $0x3b0] sm:$0xf] %v7642_v21 }
 0x2bd   : > { %v6783_v59 = vpop.f32.mrf.mxu2  ;;  %v6647_v51 = vpop.f32.mrf.mxu0  ;;  %7107 = vmatmul.bf16.gmra.mxu3 %v8059_v32  ;;  %3856 = vst [vmem:[#allocation2 + $0x33c] sm:$0xf] %v3701_v29  ;;  %v3441_v32 = vrot.slane %v3439_v26, 4  ;;  %v3445_v37 = vrot.slane %v11836_v18, 5  ;;  %v3202_v49 = vrot.slane %v3201_v36, 4  ;;  %v3712_v26 = vrot.slane %v11812_v16, 4 }
 0x2be   : > { %v6784_v5 = vadd.f32 %v6783_v59, %v6715_v11  ;;  %v6716_v17 = vpop.f32.mrf.mxu1  ;;  %v6648_v2 = vadd.f32 %v6647_v51, %v11314_v40  ;;  %v3204_v11 = vshll.u32 %v11828_v46, 16  ;;  %v7697_v40 = vld [vmem:[%s9732_s14 + $0x98] sm:$0xf]  ;;  %v8119_v59 = vor.u32 %v9121_v62, %v8118_v4  ;;  %v9113_v58 = vld [vmem:[#allocation2 + $0x2bc] sm:$0xf] }
 0x2bf   : > { %v3442_v1 = vrot.slane %v7697_v40, 5  ;;  %v3192_v50 = vrot.slane %v3191_v34, 4  ;;  %v3724_v62 = vshrl.u32 %v7730_v52, 16  ;;  %v3208_v36 = vshrl.u32 %v11828_v46, 16 }
 0x2c0   : > { %v6717_v24 = vadd.f32 %v6716_v17, %v6648_v2  ;;  %v6852_v23 = vpop.f32.mrf.mxu3  ;;  %v11842_v56 = vrot.slane %v3204_v11, 5  ;;  %v8120_v11 = vld [vmem:[#allocation2 + $0x2f8] sm:$0xf0] }
 0x2c1   : > { %v11840_v45 = vadd.f32 %v6852_v23, %v6784_v5  ;;  %v3443_v20 = vsel %vm9774_vm6, %v3441_v32, %v3442_v1  ;;  %v3444_v51 = vrot.slane %v3442_v1, 4  ;;  %v3716_v5 = vrot.slane %v3714_v7, 5 }
 0x2c2   : > { %v3197_v2 = vsel %vm9797_vm7, %v3192_v50, %v3196_v22  ;;  %v3207_v16 = vsel %vm9797_vm7, %v3202_v49, %v11842_v56  ;;  %v3726_v40 = vrot.slane %v3724_v62, 5  ;;  %3510 = vst [vmem:[#allocation2 + $0x3b8] sm:$0xf] %v3443_v20  ;;  %v8123_v1 = vor.u32 %v9113_v58, %v8120_v11  ;;  %v9128_v62 = vld [vmem:[#allocation2 + $0x334] sm:$0xf] }
 0x2c3   : > { %v3446_v4 = vsel %vm9774_vm6, %v3444_v51, %v3445_v37  ;;  %3330 = vst [vmem:[#allocation2 + $0x3b4] sm:$0xf] %v3197_v2  ;;  %v3720_v7 = vor.u32 %v3719_v10, %v3716_v5  ;;  %v3734_v20 = vshrl.u32 %v7731_v44, 16  ;;  %v3737_v51 = vshll.u32 %v7731_v44, 16  ;;  %v7732_v10 = vld [vmem:[%s9732_s14 + $0xa4] sm:$0x3] }
 0x2c4   : > { %3331 = vst [vmem:[#allocation2 + $0x3f4] sm:$0xf] %v3207_v16  ;;  %v7672_v2 = vld [vmem:[%s9732_s14 + $0xa4] sm:$0x1]  ;;  %v7699_v16 = vld [vmem:[%s9732_s14 + $0xa0] sm:$0xf] }
 0x2c5   : > { %v6785_v17 = vpop.f32.mrf.mxu2  ;;  %v6650_v29 = vpop.f32.mrf.mxu0  ;;  %v3722_v15 = vrot.slane %v3720_v7, 4  ;;  %3511 = vst [vmem:[#allocation2 + $0x3f8] sm:$0xf] %v3446_v4  ;;  %v3224_v58 = vshll.u32 %v7672_v2, 16 }
 0x2c6   : > { %v6786_v8 = vadd.f32 %v6785_v17, %v6717_v24  ;;  %v6719_v28 = vpop.f32.mrf.mxu1  ;;  %v6651_v3 = vadd.f32 %v6650_v29, %v11336_v63  ;;  %v3727_v24 = vshll.u32 %v7730_v52, 16  ;;  %v3721_v63 = vsel %vm9830_vm8, %v3712_v26, %v3720_v7  ;;  %v8174_v29 = vld [vmem:[#allocation2 + $0x330] sm:$0xf] }
 0x2c7   : > { %3858 = vst [vmem:[#allocation2 + $0x3bc] sm:$0xf] %v3721_v63  ;;  %v3210_v26 = vrot.slane %v3208_v36, 4  ;;  %v3736_v7 = vrot.slane %v3734_v20, 5  ;;  %v7700_v63 = vld [vmem:[%s9732_s14 + $0xa4] sm:$0x1] }
 0x2c8   : > { %v6720_v22 = vadd.f32 %v6719_v28, %v6651_v3  ;;  %6905 = vmatmul.bf16.gmra.mxu0 %v8111_v0  ;;  %v3729_v23 = vrot.slane %v3727_v24, 6  ;;  %v6854_v34 = vpop.f32.mrf.mxu3  ;;  %v7671_v0 = vld [vmem:[%s9732_s14 + $0xa0] sm:$0xf]  ;;  %v9136_v28 = vld [vmem:[#allocation2 + $0x36c] sm:$0xf0]  ;;  %v3739_v24 = vrot.slane %v3737_v51, 6 }
 0x2c9   : > { %6974 = vmatmul.bf16.gmra.mxu1 %v8115_v33  ;;  %v11863_v32 = vadd.f32 %v6854_v34, %v6786_v8  ;;  %v3214_v33 = vshll.u32 %v7671_v0, 16  ;;  %v3218_v21 = vshrl.u32 %v7671_v0, 16  ;;  %v3211_v3 = vor.u32 %v3210_v26, %v11842_v56  ;;  %v8182_v34 = vld [vmem:[#allocation2 + $0x338] sm:$0xf]  ;;  %v7644_v20 = vld [vmem:[%s9732_s14 + $0x9c] sm:$0xf] }
 0x2ca   : > { %7043 = vmatmul.bf16.gmra.mxu2 %v8119_v59  ;;  %v11866_v52 = vor.u32 %v3729_v23, %v3726_v40  ;;  %v8176_v40 = vld [vmem:[#allocation2 + $0x370] sm:$0xf0]  ;;  %v3744_v23 = vshrl.u32 %v7732_v10, 16  ;;  %v3226_v36 = vrot.slane %v3224_v58, 5  ;;  %v3447_v0 = vrot.slane %v3445_v37, 4 }
 0x2cb   : > { %v3216_v5 = vrot.slane %v3214_v33, 5  ;;  %v3220_v4 = vrot.slane %v3218_v21, 4  ;;  %v9137_v33 = vld [vmem:[#allocation2 + $0x374] sm:$0xf0]  ;;  %v7645_v51 = vld [vmem:[%s9732_s14 + $0xa0] sm:$0xf]  ;;  %v3740_v26 = vor.u32 %v3739_v24, %v3736_v7  ;;  %v8179_v2 = vor.u32 %v9128_v62, %v8176_v40 }
 0x2cc   : > { %v3731_v59 = vsel %vm9830_vm8, %v3722_v15, %v11866_v52  ;;  %v3448_v15 = vrot.slane %v7699_v16, 5  ;;  %3000 = vst [vmem:[#allocation2 + $0x430] sm:$0xf] %v7644_v20  ;;  %v3746_v37 = vrot.slane %v3744_v23, 5  ;;  %v9129_v7 = vld [vmem:[#allocation2 + $0x33c] sm:$0xf] }
 0x2cd   : > { %v6788_v50 = vpop.f32.mrf.mxu2  ;;  %v6652_v49 = vpop.f32.mrf.mxu0  ;;  %3859 = vst [vmem:[#allocation2 + $0x3fc] sm:$0xf] %v3731_v59  ;;  %7112 = vmatmul.bf16.gmra.mxu3 %v8123_v1  ;;  %v3212_v1 = vrot.slane %v3211_v3, 4  ;;  %v8175_v59 = vor.u32 %v9136_v28, %v8174_v29  ;;  %v8183_v29 = vor.u32 %v9137_v33, %v8182_v34  ;;  %v3742_v62 = vrot.slane %v3740_v26, 4  ;;  %v8184_v24 = vld [vmem:[#allocation2 + $0x378] sm:$0xf0] }
 0x2ce   : > { %v6789_v17 = vadd.f32 %v6788_v50, %v6720_v22  ;;  %v6721_v46 = vpop.f32.mrf.mxu1  ;;  %v6653_v8 = vadd.f32 %v6652_v49, %v11362_v48  ;;  %v3221_v22 = vor.u32 %v3220_v4, %v3216_v5  ;;  %v3450_v44 = vrot.slane %v3448_v15, 4  ;;  %3001 = vst [vmem:[#allocation2 + $0x470] sm:$0xf] %v7645_v51  ;;  %v7673_v23 = vld [vmem:[%s9732_s14 + $0xa8] sm:$0xf] }
 0x2cf   : > { %v3451_v50 = vrot.slane %v7700_v63, 5  ;;  %v3217_v49 = vsel %vm9797_vm7, %v3212_v1, %v3216_v5  ;;  %v3449_v28 = vsel %vm9774_vm6, %v3447_v0, %v3448_v15  ;;  %v8187_v63 = vor.u32 %v9129_v7, %v8184_v24  ;;  %v9152_v20 = vld [vmem:[#allocation2 + $0x3ec] sm:$0xf0] }
 0x2d0   : > { %v6722_v11 = vadd.f32 %v6721_v46, %v6653_v8  ;;  %v6857_v48 = vpop.f32.mrf.mxu3  ;;  %v3222_v21 = vrot.slane %v3221_v22, 4  ;;  %v3732_v46 = vrot.slane %v11866_v52, 4  ;;  %3332 = vst [vmem:[#allocation2 + $0x434] sm:$0xf] %v3217_v49  ;;  %v3229_v34 = vshrl.u32 %v7673_v23, 16 }
 0x2d1   : > { %v11881_v56 = vadd.f32 %v6857_v48, %v6789_v17  ;;  %v3747_v17 = vshll.u32 %v7732_v10, 16  ;;  %v3452_v52 = vsel %vm9774_vm6, %v3450_v44, %v3451_v50  ;;  %3512 = vst [vmem:[#allocation2 + $0x438] sm:$0xf] %v3449_v28  ;;  %v7674_v48 = vld [vmem:[%s9732_s14 + $0xac] sm:$0xf]  ;;  %v3232_v1 = vshll.u32 %v7673_v23, 16 }
 0x2d2   : > { %v3227_v18 = vsel %vm9797_vm7, %v3222_v21, %v3226_v36  ;;  %v3741_v10 = vsel %vm9830_vm8, %v3732_v46, %v3740_v26  ;;  %3513 = vst [vmem:[#allocation2 + $0x478] sm:$0xf] %v3452_v52  ;;  %v3238_v0 = vshll.u32 %v7674_v48, 16  ;;  %v3242_v33 = vshrl.u32 %v7674_v48, 16  ;;  %v7733_v46 = vld [vmem:[%s9732_s14 + $0xa8] sm:$0xe] }
 0x2d3   : > { %v3749_v16 = vrot.slane %v3747_v17, 6  ;;  %3333 = vst [vmem:[#allocation2 + $0x474] sm:$0xf] %v3227_v18  ;;  %v3231_v51 = vrot.slane %v3229_v34, 4  ;;  %v3234_v49 = vrot.slane %v3232_v1, 5 }
 0x2d4   : > { %3860 = vst [vmem:[#allocation2 + $0x43c] sm:$0xf] %v3741_v10  ;;  %v8246_v18 = vld [vmem:[#allocation2 + $0x3b8] sm:$0xf]  ;;  %v3240_v17 = vrot.slane %v3238_v0, 5 }
 0x2d5   : > { %v6790_v8 = vpop.f32.mrf.mxu2  ;;  %v6655_v3 = vpop.f32.mrf.mxu0  ;;  %v3750_v40 = vor.u32 %v3749_v16, %v3746_v37  ;;  %v11908_v37 = vld [vmem:[%s9732_s14 + $0xb0] sm:$0xf]  ;;  %v7702_v28 = vld [vmem:[%s9732_s14 + $0xac] sm:$0xf]  ;;  %v7646_v1 = vld [vmem:[%s9732_s14 + $0xa8] sm:$0xf] }
 0x2d6   : > { %v6791_v4 = vadd.f32 %v6790_v8, %v6722_v11  ;;  %v6724_v58 = vpop.f32.mrf.mxu1  ;;  %v6656_v5 = vadd.f32 %v6655_v3, %v11384_v9  ;;  %v9144_v8 = vld [vmem:[#allocation2 + $0x3b4] sm:$0xf]  ;;  %v9153_v3 = vld [vmem:[#allocation2 + $0x3f4] sm:$0xf0]  ;;  %v11914_v16 = vld [vmem:[%s9732_s14 + $0xb0] sm:$0xf] }
 0x2d7   : > { %v3751_v15 = vsel %vm9830_vm8, %v3742_v62, %v3750_v40  ;;  %v7701_v62 = vld [vmem:[%s9732_s14 + $0xa8] sm:$0xe]  ;;  %v7734_v23 = vld [vmem:[%s9732_s14 + $0xac] sm:$0xf]  ;;  %v8247_v34 = vor.u32 %v9153_v3, %v8246_v18  ;;  %3002 = vst [vmem:[#allocation2 + $0x4b0] sm:$0xf] %v7646_v1 }
 0x2d8   : > { %v6725_v11 = vadd.f32 %v6724_v58, %v6656_v5  ;;  %6910 = vmatmul.bf16.gmra.mxu0 %v8175_v59  ;;  %v6859_v9 = vpop.f32.mrf.mxu3  ;;  %3861 = vst [vmem:[#allocation2 + $0x47c] sm:$0xf] %v3751_v15  ;;  %v11903_v59 = vld [vmem:[#allocation2 + $0x3b0] sm:$0xf]  ;;  %v3235_v58 = vor.u32 %v3234_v49, %v3231_v51  ;;  %v3455_v15 = vrot.slane %v7702_v28, 5 }
 0x2d9   : > { %6979 = vmatmul.bf16.gmra.mxu1 %v8179_v2  ;;  %v11897_v22 = vadd.f32 %v6859_v9, %v6791_v4  ;;  %v8240_v2 = vld [vmem:[#allocation2 + $0x3f0] sm:$0xf0]  ;;  %v3244_v4 = vrot.slane %v3242_v33, 4  ;;  %v8239_v9 = vor.u32 %v9152_v20, %v11903_v59  ;;  %v3458_v33 = vrot.slane %v11914_v16, 5  ;;  %v7735_v18 = vld [vmem:[%s9732_s14 + $0xb0] sm:$0xf] }
 0x2da   : > { %7048 = vmatmul.bf16.gmra.mxu2 %v8183_v29  ;;  %v3248_v29 = vshll.u32 %v11908_v37, 16  ;;  %v3236_v24 = vrot.slane %v3235_v58, 4  ;;  %v8243_v48 = vor.u32 %v9144_v8, %v8240_v2  ;;  %v3756_v20 = vshll.u32 %v7733_v46, 16  ;;  %v9145_v8 = vld [vmem:[#allocation2 + $0x3bc] sm:$0xf] }
 0x2db   : > { %v3245_v52 = vor.u32 %v3244_v4, %v3240_v17  ;;  %v3765_v4 = vshll.u32 %v7734_v23, 16  ;;  %v8248_v58 = vld [vmem:[#allocation2 + $0x3f8] sm:$0xf0]  ;;  %v3772_v28 = vshrl.u32 %v7735_v18, 16 }
 0x2dc   : > { %v11916_v10 = vrot.slane %v3248_v29, 5  ;;  %v3241_v0 = vsel %vm9797_vm7, %v3236_v24, %v3240_v17  ;;  %v3762_v17 = vshrl.u32 %v7734_v23, 16  ;;  %v3758_v29 = vrot.slane %v3756_v20, 6 }
 0x2dd   : > { %v6793_v36 = vpop.f32.mrf.mxu2  ;;  %v6657_v44 = vpop.f32.mrf.mxu0  ;;  %7117 = vmatmul.bf16.gmra.mxu3 %v8187_v63  ;;  %v3246_v63 = vrot.slane %v3245_v52, 4  ;;  %3334 = vst [vmem:[#allocation2 + $0x4b4] sm:$0xf] %v3241_v0  ;;  %v3767_v52 = vrot.slane %v3765_v4, 6  ;;  %v8251_v23 = vor.u32 %v9145_v8, %v8248_v58  ;;  %v3252_v0 = vshrl.u32 %v11908_v37, 16 }
 0x2de   : > { %v6794_v21 = vadd.f32 %v6793_v36, %v6725_v11  ;;  %v6726_v50 = vpop.f32.mrf.mxu1  ;;  %v6658_v26 = vadd.f32 %v6657_v44, %v11403_v31  ;;  %v3753_v31 = vshrl.u32 %v7733_v46, 16  ;;  %v7711_v11 = vrot.slane %v7701_v62, 9  ;;  %v7647_v36 = vld [vmem:[%s9732_s14 + $0xac] sm:$0xf]  ;;  %v11952_v4 = vld [vmem:[%s9732_s14 + $0xb8] sm:$0xf] }
 0x2df   : > { %3003 = vst [vmem:[#allocation2 + $0x4f0] sm:$0xf] %v7647_v36  ;;  %v3775_v62 = vshll.u32 %v7735_v18, 16  ;;  %v7676_v36 = vld [vmem:[%s9732_s14 + $0xb4] sm:$0xf]  ;;  %v3254_v37 = vrot.slane %v3252_v0, 4 }
 0x2e0   : > { %v6727_v5 = vadd.f32 %v6726_v50, %v6658_v26  ;;  %v6862_v7 = vpop.f32.mrf.mxu3  ;;  %v3457_v50 = vrot.slane %v3455_v15, 4  ;;  %v3755_v59 = vrot.slane %v3753_v31, 5  ;;  %v3456_v2 = vsel %vm9774_vm6, %v7711_v11, %v3455_v15  ;;  %v9168_v18 = vld [vmem:[#allocation2 + $0x46c] sm:$0xf0] }
 0x2e1   : > { %v11918_v40 = vadd.f32 %v6862_v7, %v6794_v21  ;;  %v3251_v21 = vsel %vm9797_vm7, %v3246_v63, %v11916_v10  ;;  %3514 = vst [vmem:[#allocation2 + $0x4b8] sm:$0xf] %v3456_v2  ;;  %v3777_v63 = vrot.slane %v3775_v62, 6  ;;  %v8302_v2 = vld [vmem:[#allocation2 + $0x430] sm:$0xf]  ;;  %v3255_v58 = vor.u32 %v3254_v37, %v11916_v10 }
 0x2e2   : > { %v3459_v46 = vsel %vm9774_vm6, %v3457_v50, %v3458_v33  ;;  %3335 = vst [vmem:[#allocation2 + $0x4f4] sm:$0xf] %v3251_v21  ;;  %v3759_v7 = vor.u32 %v3758_v29, %v3755_v59  ;;  %v3262_v50 = vshrl.u32 %v7676_v36, 16  ;;  %v11958_v62 = vld [vmem:[%s9732_s14 + $0xb8] sm:$0xf]  ;;  %v3460_v10 = vrot.slane %v3458_v33, 4 }
 0x2e3   : > { %3515 = vst [vmem:[#allocation2 + $0x4f8] sm:$0xf] %v3459_v46  ;;  %v3464_v0 = vrot.slane %v11958_v62, 5  ;;  %v12014_v62 = vld [vmem:[%s12166_s2] ss:$0 sm:$0xff] }
 0x2e4   : > { %v3760_v1 = vrot.slane %v3759_v7, 4  ;;  %v3264_v29 = vrot.slane %v3262_v50, 4  ;;  %v7649_v50 = vld [vmem:[%s9732_s14 + $0xb4] sm:$0xf] }
 0x2e5   : > { %v6795_v44 = vpop.f32.mrf.mxu2  ;;  %v6660_v49 = vpop.f32.mrf.mxu0  ;;  %3005 = vst [vmem:[#allocation2 + $0x570] sm:$0xf] %v7649_v50 }
 0x2e6   : > { %v6796_v51 = vadd.f32 %v6795_v44, %v6727_v5  ;;  %v6729_v26 = vpop.f32.mrf.mxu1  ;;  %v6661_v3 = vadd.f32 %v6660_v49, %v11447_v25  ;;  %v3764_v5 = vrot.slane %v3762_v17, 5  ;;  %v3774_v25 = vrot.slane %v3772_v28, 5  ;;  %v9160_v17 = vld [vmem:[#allocation2 + $0x434] sm:$0xf] }
 0x2e7   : > { %v7704_v28 = vld [vmem:[%s9732_s14 + $0xb4] sm:$0xf] }
 0x2e8   : > { %v6730_v31 = vadd.f32 %v6729_v26, %v6661_v3  ;;  %6915 = vmatmul.bf16.gmra.mxu0 %v8239_v9  ;;  %v6864_v24 = vpop.f32.mrf.mxu3  ;;  %v3768_v11 = vor.u32 %v3767_v52, %v3764_v5  ;;  %v11942_v21 = vor.u32 %v3777_v63, %v3774_v25  ;;  %v3258_v9 = vshll.u32 %v7676_v36, 16  ;;  %v7736_v26 = vld [vmem:[%s9732_s14 + $0xb4] sm:$0xf]  ;;  %v8310_v25 = vld [vmem:[#allocation2 + $0x438] sm:$0xf] }
 0x2e9   : > { %6984 = vmatmul.bf16.gmra.mxu1 %v8243_v48  ;;  %v11938_v15 = vadd.f32 %v6864_v24, %v6796_v51  ;;  %v8304_v3 = vld [vmem:[#allocation2 + $0x470] sm:$0xf0]  ;;  %v3268_v52 = vshll.u32 %v11952_v4, 16  ;;  %v9169_v24 = vld [vmem:[#allocation2 + $0x474] sm:$0xf0] }
 0x2ea   : > { %7053 = vmatmul.bf16.gmra.mxu2 %v8247_v34  ;;  %v3770_v44 = vrot.slane %v3768_v11, 4  ;;  %v3769_v34 = vsel %vm9830_vm8, %v3760_v1, %v3768_v11  ;;  %v3260_v46 = vrot.slane %v3258_v9, 5  ;;  %v3256_v11 = vrot.slane %v3255_v58, 4 }
 0x2eb   : > { %3862 = vst [vmem:[#allocation2 + $0x4bc] sm:$0xf] %v3769_v34  ;;  %v11964_v1 = vrot.slane %v3268_v52, 5  ;;  %v8303_v9 = vor.u32 %v9168_v18, %v8302_v2  ;;  %v7648_v34 = vld [vmem:[%s9732_s14 + $0xb0] sm:$0xf]  ;;  %v8311_v37 = vor.u32 %v9169_v24, %v8310_v25 }
 0x2ec   : > { %v3779_v49 = vsel %vm9830_vm8, %v3770_v44, %v11942_v21  ;;  %v3265_v63 = vor.u32 %v3264_v29, %v3260_v46  ;;  %v7737_v44 = vld [vmem:[%s9732_s14 + $0xb8] sm:$0xf]  ;;  %3004 = vst [vmem:[#allocation2 + $0x530] sm:$0xf] %v7648_v34 }
 0x2ed   : > { %v6798_v48 = vpop.f32.mrf.mxu2  ;;  %v6662_v20 = vpop.f32.mrf.mxu0  ;;  %7122 = vmatmul.bf16.gmra.mxu3 %v8251_v23  ;;  %3863 = vst [vmem:[#allocation2 + $0x4fc] sm:$0xf] %v3779_v49  ;;  %v3792_v18 = vshrl.u32 %v7737_v44, 16 }
 0x2ee   : > { %v6799_v59 = vadd.f32 %v6798_v48, %v6730_v31  ;;  %v6731_v51 = vpop.f32.mrf.mxu1  ;;  %v6663_v8 = vadd.f32 %v6662_v20, %v11476_v13  ;;  %v3461_v13 = vrot.slane %v7704_v28, 5  ;;  %v3782_v31 = vshrl.u32 %v7736_v26, 16 }
 0x2ef   : > { %v8307_v48 = vor.u32 %v9160_v17, %v8304_v3  ;;  %v3261_v20 = vsel %vm9797_vm7, %v3256_v11, %v3260_v46  ;;  %v3795_v17 = vshll.u32 %v7737_v44, 16  ;;  %v9161_v3 = vld [vmem:[#allocation2 + $0x43c] sm:$0xf]  ;;  %v3780_v28 = vrot.slane %v11942_v21, 4 }
 0x2f0   : > { %v6732_v5 = vadd.f32 %v6731_v51, %v6663_v8  ;;  %v6867_v7 = vpop.f32.mrf.mxu3  ;;  %v3463_v36 = vrot.slane %v3461_v13, 4  ;;  %v3266_v51 = vrot.slane %v3265_v63, 4  ;;  %v3462_v16 = vsel %vm9774_vm6, %v3460_v10, %v3461_v13  ;;  %3336 = vst [vmem:[#allocation2 + $0x534] sm:$0xf] %v3261_v20  ;;  %v7738_v44 = vld [vmem:[%s9732_s14 + $0xbc] sm:$0xf] }
 0x2f1   : > { %v11962_v23 = vadd.f32 %v6867_v7, %v6799_v59  ;;  %v3784_v33 = vrot.slane %v3782_v31, 5  ;;  %v3785_v59 = vshll.u32 %v7736_v26, 16  ;;  %v3794_v52 = vrot.slane %v3792_v18, 5  ;;  %3516 = vst [vmem:[#allocation2 + $0x538] sm:$0xf] %v3462_v16 }
 0x2f2   : > { %v3271_v2 = vsel %vm9797_vm7, %v3266_v51, %v11964_v1  ;;  %v3465_v46 = vsel %vm9774_vm6, %v3463_v36, %v3464_v0  ;;  %v3797_v13 = vrot.slane %v3795_v17, 6  ;;  %v7678_v36 = vld [vmem:[%s9732_s14 + $0xbc] sm:$0xf]  ;;  %v3802_v20 = vshrl.u32 %v7738_v44, 16  ;;  %v11995_v16 = vld [vmem:[#allocation2 + $0x4b0] sm:$0xf] }
 0x2f3   : > { %v3787_v26 = vrot.slane %v3785_v59, 6  ;;  %3337 = vst [vmem:[#allocation2 + $0x574] sm:$0xf] %v3271_v2  ;;  %v3282_v50 = vshrl.u32 %v7678_v36, 16  ;;  %v7739_v18 = vld [vmem:[%s9732_s14 + $0xc0] sm:$0x3] }
 0x2f4   : > { %3517 = vst [vmem:[#allocation2 + $0x578] sm:$0xf] %v3465_v46  ;;  %v11983_v24 = vor.u32 %v3797_v13, %v3794_v52  ;;  %v8374_v52 = vld [vmem:[#allocation2 + $0x4b8] sm:$0xf] }
 0x2f5   : > { %v6800_v49 = vpop.f32.mrf.mxu2  ;;  %v6881_v58 = vpop.f32.mrf.mxu0  ;;  %v3788_v31 = vor.u32 %v3787_v26, %v3784_v33  ;;  %v9184_v33 = vld [vmem:[#allocation2 + $0x4ec] sm:$0xf0]  ;;  %v3284_v2 = vrot.slane %v3282_v50, 4  ;;  %v3805_v26 = vshll.u32 %v7738_v44, 16  ;;  %v7650_v50 = vld [vmem:[%s9732_s14 + $0xb8] sm:$0xf] }
 0x2f6   : > { %v6801_v8 = vadd.f32 %v6800_v49, %v6732_v5  ;;  %v6950_v29 = vpop.f32.mrf.mxu1  ;;  %v8312_v5 = vld [vmem:[#allocation2 + $0x478] sm:$0xf0]  ;;  %v6882_v25 = vadd.f32 %v6881_v58, %v11496_v19  ;;  %v7679_v58 = vld [vmem:[%s9732_s14 + $0xc0] sm:$0x1]  ;;  %3006 = vst [vmem:[#allocation2 + $0x5b0] sm:$0xf] %v7650_v50 }
 0x2f7   : > { %v8315_v21 = vor.u32 %v9161_v3, %v8312_v5  ;;  %v3789_v63 = vsel %vm9830_vm8, %v3780_v28, %v3788_v31  ;;  %v3790_v10 = vrot.slane %v3788_v31, 4  ;;  %v8368_v3 = vld [vmem:[#allocation2 + $0x4f0] sm:$0xf0]  ;;  %v7706_v28 = vld [vmem:[%s9732_s14 + $0xbc] sm:$0xf] }
 0x2f8   : > { %6920 = vmatmul.bf16.gmra.mxu0 %v8303_v9  ;;  %v6869_v7 = vpop.f32.mrf.mxu3  ;;  %v3272_v9 = vshrl.u32 %v11952_v4, 16  ;;  %3864 = vst [vmem:[#allocation2 + $0x53c] sm:$0xf] %v3789_v63  ;;  %v6951_v51 = vadd.f32 %v6950_v29, %v6882_v25  ;;  %v3288_v29 = vshll.u32 %v7679_v58, 16  ;;  %v7707_v31 = vld [vmem:[%s9732_s14 + $0xc0] sm:$0x1] }
 0x2f9   : > { %6989 = vmatmul.bf16.gmra.mxu1 %v8307_v48  ;;  %v11985_v11 = vadd.f32 %v6869_v7, %v6801_v8  ;;  %v3278_v48 = vshll.u32 %v7678_v36, 16  ;;  %v3799_v19 = vsel %vm9830_vm8, %v3790_v10, %v11983_v24  ;;  %v9176_v8 = vld [vmem:[#allocation2 + $0x4b4] sm:$0xf]  ;;  %v3467_v7 = vrot.slane %v7706_v28, 5  ;;  %v9185_v63 = vld [vmem:[#allocation2 + $0x4f4] sm:$0xf0] }
 0x2fa   : > { %7058 = vmatmul.bf16.gmra.mxu2 %v8311_v37  ;;  %3865 = vst [vmem:[#allocation2 + $0x57c] sm:$0xf] %v3799_v19  ;;  %v3274_v4 = vrot.slane %v3272_v9, 4  ;;  %v3804_v25 = vrot.slane %v3802_v20, 5  ;;  %v3290_v36 = vrot.slane %v3288_v29, 5  ;;  %v3466_v9 = vrot.slane %v3464_v0, 4 }
 0x2fb   : > { %v3280_v59 = vrot.slane %v3278_v48, 5  ;;  %v8367_v48 = vor.u32 %v9184_v33, %v11995_v16  ;;  %v8371_v19 = vor.u32 %v9176_v8, %v8368_v3  ;;  %v3800_v20 = vrot.slane %v11983_v24, 4  ;;  %v9177_v28 = vld [vmem:[#allocation2 + $0x4bc] sm:$0xf]  ;;  %v8430_v50 = vld [vmem:[#allocation2 + $0x530] sm:$0xf] }
 0x2fc   : > { %v3275_v46 = vor.u32 %v3274_v4, %v11964_v1  ;;  %v3812_v1 = vshrl.u32 %v7739_v18, 16  ;;  %v3807_v4 = vrot.slane %v3805_v26, 6  ;;  %v8375_v33 = vor.u32 %v9185_v63, %v8374_v52  ;;  %v8376_v26 = vld [vmem:[#allocation2 + $0x4f8] sm:$0xf0] }
 0x2fd   : > { %v7019_v34 = vpop.f32.mrf.mxu2  ;;  %v6883_v49 = vpop.f32.mrf.mxu0  ;;  %7127 = vmatmul.bf16.gmra.mxu3 %v8315_v21  ;;  %v3285_v13 = vor.u32 %v3284_v2, %v3280_v59  ;;  %v3468_v24 = vsel %vm9774_vm6, %v3466_v9, %v3467_v7 }
 0x2fe   : > { %v6952_v37 = vpop.f32.mrf.mxu1  ;;  %v7020_v17 = vadd.f32 %v7019_v34, %v6951_v51  ;;  %v6884_v5 = vadd.f32 %v6883_v49, %v11519_v39  ;;  %v3276_v10 = vrot.slane %v3275_v46, 4  ;;  %v3469_v34 = vrot.slane %v3467_v7, 4  ;;  %v7651_v51 = vld [vmem:[%s9732_s14 + $0xbc] sm:$0xf]  ;;  %3518 = vst [vmem:[#allocation2 + $0x5b8] sm:$0xf] %v3468_v24 }
 0x2ff   : > { %v3286_v44 = vrot.slane %v3285_v13, 4  ;;  %v3470_v39 = vrot.slane %v7707_v31, 5  ;;  %3007 = vst [vmem:[#allocation2 + $0x5f0] sm:$0xf] %v7651_v51  ;;  %v3815_v46 = vshll.u32 %v7739_v18, 16  ;;  %s9512_s14 = scalar_lea.hbm %s9511_s6, 96 }
 0x300   : > { %v7088_v21 = vpop.f32.mrf.mxu3  ;;  %v3281_v49 = vsel %vm9797_vm7, %v3276_v10, %v3280_v59  ;;  %v6953_v0 = vadd.f32 %v6952_v37, %v6884_v5  ;;  %v3808_v59 = vor.u32 %v3807_v4, %v3804_v25  ;;  %v12028_v18 = vld [vmem:[%s12167_s3] ss:$0 sm:$0xff]  ;;  %v8432_v4 = vld [vmem:[#allocation2 + $0x570] sm:$0xf0]  ;;  %p9513_p13 = scmp.ne.s32.totalorder %s9511_s6, %s9512_s14  ;;  %p9518_p4 = scmp.lt.s32.totalorder %s9516_s12, %s9512_s14 }
 0x301   : > { %v7089_v58 = vadd.f32 %v7088_v21, %v7020_v17  ;;  %v3291_v8 = vsel %vm9797_vm7, %v3286_v44, %v3290_v36  ;;  %v3814_v17 = vrot.slane %v3812_v1, 5  ;;  %3338 = vst [vmem:[#allocation2 + $0x5b4] sm:$0xf] %v3281_v49  ;;  %v3471_v37 = vsel %vm9774_vm6, %v3469_v34, %v3470_v39  ;;  %v9200_v49 = vld [vmem:[#allocation2 + $0x56c] sm:$0xf0] }
 0x302   : > { %3339 = vst [vmem:[#allocation2 + $0x5f4] sm:$0xf] %v3291_v8  ;;  %v3809_v53 = vsel %vm9830_vm8, %v3800_v20, %v3808_v59  ;;  %v3810_v5 = vrot.slane %v3808_v59, 4  ;;  %v3817_v52 = vrot.slane %v3815_v46, 6  ;;  %v8379_v21 = vor.u32 %v9177_v28, %v8376_v26  ;;  %v9192_v20 = vld [vmem:[#allocation2 + $0x534] sm:$0xf]  ;;  %p9514_p0 = pnand %p9513_p13, %p9670_p3  ;;  %p9519_p5 = por %p9518_p4, %p9517_p2 }
 0x303   : > { %v7152_v13 = vmul.f32 %v12014_v62, %v7089_v58  ;;  %3519 = vst [vmem:[#allocation2 + $0x5f8] sm:$0xf] %v3471_v37  ;;  %v8435_v24 = vor.u32 %v9192_v20, %v8432_v4  ;;  %v8440_v28 = vld [vmem:[#allocation2 + $0x578] sm:$0xf0] }
 0x304   : > { %v3818_v31 = vor.u32 %v3817_v52, %v3814_v17  ;;  %3866 = vst [vmem:[#allocation2 + $0x5bc] sm:$0xf] %v3809_v53  ;;  %p9515_p1 = pneg %p9514_p0 }
 0x305   : > { %v7021_v16 = vpop.f32.mrf.mxu2  ;;  %v6886_v2 = vpop.f32.mrf.mxu0  ;;  %v7180_v10 = vadd.f32 %v12028_v18, %v7152_v13 }
 0x306   : > { %v6955_v3 = vpop.f32.mrf.mxu1  ;;  %v7022_v29 = vadd.f32 %v7021_v16, %v6953_v0  ;;  %v6887_v25 = vadd.f32 %v6886_v2, %v11541_v57  ;;  %v3819_v63 = vsel %vm9830_vm8, %v3810_v5, %v3818_v31  ;;  %v8438_v0 = vld [vmem:[#allocation2 + $0x538] sm:$0xf]  ;;  %p9520_p6 = pnand %p9519_p5, %p9515_p1 }
 0x307   : > { %3867 = vst [vmem:[#allocation2 + $0x5fc] sm:$0xf] %v3819_v63  ;;  %v7204_v57 = vmax.f32 %v7180_v10, 0.0  ;;  %v9201_v16 = vld [vmem:[#allocation2 + $0x574] sm:$0xf0] }
 0x308   : > { %6925 = vmatmul.bf16.gmra.mxu0 %v8367_v48  ;;  %v7090_v38 = vpop.f32.mrf.mxu3  ;;  %v6956_v34 = vadd.f32 %v6955_v3, %v6887_v25  ;;  %v8431_v3 = vor.u32 %v9200_v49, %v8430_v50 }
 0x309   : > { %6994 = vmatmul.bf16.gmra.mxu1 %v8371_v19  ;;  %v7091_v7 = vadd.f32 %v7090_v38, %v7022_v29  ;;  %v9193_v29 = vld [vmem:[#allocation2 + $0x53c] sm:$0xf] }
 0x30a   : > { %7063 = vmatmul.bf16.gmra.mxu2 %v8375_v33  ;;  %v8443_v52 = vor.u32 %v9193_v29, %v8440_v28 }
 0x30b   : > { %v7153_v36 = vmul.f32 %v12014_v62, %v7091_v7 }
 0x30d   : > { %v7024_v9 = vpop.f32.mrf.mxu2  ;;  %v6888_v1 = vpop.f32.mrf.mxu0  ;;  %v7181_v44 = vadd.f32 %v12028_v18, %v7153_v36  ;;  %7132 = vmatmul.bf16.gmra.mxu3 %v8379_v21 }
 0x30e   : > { %v6957_v48 = vpop.f32.mrf.mxu1  ;;  %v7025_v19 = vadd.f32 %v7024_v9, %v6956_v34  ;;  %v6889_v14 = vadd.f32 %v6888_v1, %v11562_v41  ;;  %v8439_v41 = vor.u32 %v9201_v16, %v8438_v0  ;;  %v9208_v34 = vld [vmem:[#allocation2 + $0x5b4] sm:$0xf] }
 0x30f   : > { %v7205_v39 = vmax.f32 %v7181_v44, 0.0  ;;  %v9216_v44 = vld [vmem:[#allocation2 + $0x5ec] sm:$0xf0] }
 0x310   : > { %v7093_v51 = vpop.f32.mrf.mxu3  ;;  %v6958_v8 = vadd.f32 %v6957_v48, %v6889_v14  ;;  %v8494_v48 = vld [vmem:[#allocation2 + $0x5b0] sm:$0xf]  ;;  %v9217_v14 = vld [vmem:[#allocation2 + $0x5f4] sm:$0xf0] }
 0x311   : > { %v9349_v58 = vpack.c.bf16 %v7205_v39, %v7204_v57  ;;  %v7094_v33 = vadd.f32 %v7093_v51, %v7025_v19  ;;  %v8496_v57 = vld [vmem:[#allocation2 + $0x5f0] sm:$0xf0]  ;;  %v8502_v19 = vld [vmem:[#allocation2 + $0x5b8] sm:$0xf]  ;;  %v8495_v20 = vor.u32 %v9216_v44, %v8494_v48 }
 0x312   : > { %v8499_v4 = vor.u32 %v9208_v34, %v8496_v57  ;;  %v8503_v16 = vor.u32 %v9217_v14, %v8502_v19 }
 0x313   : > { %9350 = vst [vmem:[%s12040_s24] sm:$0xff] %v9349_v58   ;;  %v7154_v37 = vmul.f32 %v12014_v62, %v7094_v33 }
 0x315   : > { %v7026_v2 = vpop.f32.mrf.mxu2  ;;  %v6891_v59 = vpop.f32.mrf.mxu0  ;;  %v7182_v13 = vadd.f32 %v12028_v18, %v7154_v37 }
 0x316   : > { %v6960_v17 = vpop.f32.mrf.mxu1  ;;  %v7027_v46 = vadd.f32 %v7026_v2, %v6958_v8  ;;  %v6892_v5 = vadd.f32 %v6891_v59, %v11589_v30  ;;  %v9209_v8 = vld [vmem:[#allocation2 + $0x5bc] sm:$0xf] }
 0x317   : > { %v7206_v10 = vmax.f32 %v7182_v13, 0.0 }
 0x318   : > { %6930 = vmatmul.bf16.gmra.mxu0 %v8431_v3  ;;  %v7095_v26 = vpop.f32.mrf.mxu3  ;;  %v6961_v63 = vadd.f32 %v6960_v17, %v6892_v5 }
 0x319   : > { %6999 = vmatmul.bf16.gmra.mxu1 %v8435_v24  ;;  %v7096_v53 = vadd.f32 %v7095_v26, %v7027_v46 }
 0x31a   : > { %7068 = vmatmul.bf16.gmra.mxu2 %v8439_v41 }
 0x31b   : > { %v7155_v38 = vmul.f32 %v12014_v62, %v7096_v53 }
 0x31d   : > { %v7029_v31 = vpop.f32.mrf.mxu2  ;;  %v6893_v7 = vpop.f32.mrf.mxu0  ;;  %v7183_v21 = vadd.f32 %v12028_v18, %v7155_v38  ;;  %7137 = vmatmul.bf16.gmra.mxu3 %v8443_v52 }
 0x31e   : > { %v6962_v25 = vpop.f32.mrf.mxu1  ;;  %v7030_v9 = vadd.f32 %v7029_v31, %v6961_v63  ;;  %v6894_v1 = vadd.f32 %v6893_v7, %v11611_v54  ;;  %v8504_v54 = vld [vmem:[#allocation2 + $0x5f8] sm:$0xf0] }
 0x31f   : > { %v7207_v36 = vmax.f32 %v7183_v21, 0.0  ;;  %v8507_v17 = vor.u32 %v9209_v8, %v8504_v54 }
 0x320   : > { %v7098_v30 = vpop.f32.mrf.mxu3  ;;  %v6963_v51 = vadd.f32 %v6962_v25, %v6894_v1 }
 0x321   : > { %v9354_v39 = vpack.c.bf16 %v7207_v36, %v7206_v10  ;;  %v7099_v50 = vadd.f32 %v7098_v30, %v7030_v9 }
 0x323   : > { %9406 = vst [vmem:[%s12040_s24 + $0x8] sm:$0xff] %v9354_v39   ;;  %v7156_v2 = vmul.f32 %v12014_v62, %v7099_v50 }
 0x325   : > { %v7031_v49 = vpop.f32.mrf.mxu2  ;;  %v6896_v58 = vpop.f32.mrf.mxu0  ;;  %v7184_v41 = vadd.f32 %v12028_v18, %v7156_v2 }
 0x326   : > { %v6965_v0 = vpop.f32.mrf.mxu1  ;;  %v7032_v33 = vadd.f32 %v7031_v49, %v6963_v51  ;;  %v6897_v59 = vadd.f32 %v6896_v58, %v11631_v12 }
 0x327   : > { %v7208_v5 = vmax.f32 %v7184_v41, 0.0 }
 0x328   : > { %6935 = vmatmul.bf16.gmra.mxu0 %v8495_v20  ;;  %v7100_v3 = vpop.f32.mrf.mxu3  ;;  %v6966_v53 = vadd.f32 %v6965_v0, %v6897_v59 }
 0x329   : > { %7004 = vmatmul.bf16.gmra.mxu1 %v8499_v4  ;;  %v7101_v24 = vadd.f32 %v7100_v3, %v7032_v33 }
 0x32a   : > { %7073 = vmatmul.bf16.gmra.mxu2 %v8503_v16 }
 0x32b   : > { %v7157_v46 = vmul.f32 %v12014_v62, %v7101_v24 }
 0x32d   : > { %v7034_v29 = vpop.f32.mrf.mxu2  ;;  %v6898_v28 = vpop.f32.mrf.mxu0  ;;  %v7185_v26 = vadd.f32 %v12028_v18, %v7157_v46  ;;  %7142 = vmatmul.bf16.gmra.mxu3 %v8507_v17 }
 0x32e   : > { %v6967_v37 = vpop.f32.mrf.mxu1  ;;  %v7035_v13 = vadd.f32 %v7034_v29, %v6966_v53  ;;  %v6899_v38 = vadd.f32 %v6898_v28, %v11647_v35 }
 0x32f   : > { %v7209_v52 = vmax.f32 %v7185_v26, 0.0 }
 0x330   : > { %v7103_v31 = vpop.f32.mrf.mxu3  ;;  %v6968_v25 = vadd.f32 %v6967_v37, %v6899_v38 }
 0x331   : > { %v9359_v12 = vpack.c.bf16 %v7209_v52, %v7208_v5  ;;  %v7104_v7 = vadd.f32 %v7103_v31, %v7035_v13 }
 0x333   : > { %9407 = vst [vmem:[%s12040_s24 + $0x10] sm:$0xff] %v9359_v12   ;;  %v7158_v9 = vmul.f32 %v12014_v62, %v7104_v7 }
 0x335   : > { %v7036_v21 = vpop.f32.mrf.mxu2  ;;  %v6901_v63 = vpop.f32.mrf.mxu0  ;;  %v7186_v44 = vadd.f32 %v12028_v18, %v7158_v9 }
 0x336   : > { %v6970_v10 = vpop.f32.mrf.mxu1  ;;  %v7037_v36 = vadd.f32 %v7036_v21, %v6968_v25  ;;  %v6902_v30 = vadd.f32 %v6901_v63, %v11666_v43 }
 0x337   : > { %v7210_v50 = vmax.f32 %v7186_v44, 0.0 }
 0x338   : > { %v7105_v1 = vpop.f32.mrf.mxu3  ;;  %v6971_v14 = vadd.f32 %v6970_v10, %v6902_v30 }
 0x339   : > { %v7106_v48 = vadd.f32 %v7105_v1, %v7037_v36 }
 0x33b   : > { %v7159_v35 = vmul.f32 %v12014_v62, %v7106_v48 }
 0x33d   : > { %v7039_v34 = vpop.f32.mrf.mxu2  ;;  %v6903_v57 = vpop.f32.mrf.mxu0  ;;  %v7187_v19 = vadd.f32 %v12028_v18, %v7159_v35 }
 0x33e   : > { %v6972_v39 = vpop.f32.mrf.mxu1  ;;  %v7040_v49 = vadd.f32 %v7039_v34, %v6971_v14  ;;  %v6904_v20 = vadd.f32 %v6903_v57, %v11685_v6 }
 0x33f   : > { %v7211_v51 = vmax.f32 %v7187_v19, 0.0 }
 0x340   : > { %v7108_v4 = vpop.f32.mrf.mxu3  ;;  %v6973_v43 = vadd.f32 %v6972_v39, %v6904_v20 }
 0x341   : > { %v9364_v58 = vpack.c.bf16 %v7211_v51, %v7210_v50  ;;  %v7109_v0 = vadd.f32 %v7108_v4, %v7040_v49 }
 0x343   : > { %9408 = vst [vmem:[%s12040_s24 + $0x18] sm:$0xff] %v9364_v58   ;;  %v7160_v2 = vmul.f32 %v12014_v62, %v7109_v0 }
 0x345   : > { %v7041_v16 = vpop.f32.mrf.mxu2  ;;  %v6906_v33 = vpop.f32.mrf.mxu0  ;;  %v7188_v17 = vadd.f32 %v12028_v18, %v7160_v2 }
 0x346   : > { %v6975_v8 = vpop.f32.mrf.mxu1  ;;  %v7042_v54 = vadd.f32 %v7041_v16, %v6973_v43  ;;  %v6907_v59 = vadd.f32 %v6906_v33, %v11716_v27 }
 0x347   : > { %v7212_v26 = vmax.f32 %v7188_v17, 0.0 }
 0x348   : > { %v7110_v3 = vpop.f32.mrf.mxu3  ;;  %v6976_v37 = vadd.f32 %v6975_v8, %v6907_v59 }
 0x349   : > { %v7111_v24 = vadd.f32 %v7110_v3, %v7042_v54 }
 0x34b   : > { %v7161_v6 = vmul.f32 %v12014_v62, %v7111_v24 }
 0x34d   : > { %v7044_v41 = vpop.f32.mrf.mxu2  ;;  %v6908_v46 = vpop.f32.mrf.mxu0  ;;  %v7189_v28 = vadd.f32 %v12028_v18, %v7161_v6 }
 0x34e   : > { %v6977_v29 = vpop.f32.mrf.mxu1  ;;  %v7045_v5 = vadd.f32 %v7044_v41, %v6976_v37  ;;  %v6909_v52 = vadd.f32 %v6908_v46, %v11738_v47 }
 0x34f   : > { %v7213_v53 = vmax.f32 %v7189_v28, 0.0 }
 0x350   : > { %v7113_v13 = vpop.f32.mrf.mxu3  ;;  %v6978_v27 = vadd.f32 %v6977_v29, %v6909_v52 }
 0x351   : > { %v9369_v38 = vpack.c.bf16 %v7213_v53, %v7212_v26  ;;  %v7114_v31 = vadd.f32 %v7113_v13, %v7045_v5 }
 0x353   : > { %9409 = vst [vmem:[%s12040_s24 + $0x20] sm:$0xff] %v9369_v38   ;;  %v7162_v63 = vmul.f32 %v12014_v62, %v7114_v31 }
 0x355   : > { %v7046_v12 = vpop.f32.mrf.mxu2  ;;  %v6911_v7 = vpop.f32.mrf.mxu0  ;;  %v7190_v1 = vadd.f32 %v12028_v18, %v7162_v63 }
 0x356   : > { %v6980_v25 = vpop.f32.mrf.mxu1  ;;  %v7047_v21 = vadd.f32 %v7046_v12, %v6978_v27  ;;  %v6912_v9 = vadd.f32 %v6911_v7, %v11756_v60 }
 0x357   : > { %v7214_v57 = vmax.f32 %v7190_v1, 0.0 }
 0x358   : > { %v7115_v10 = vpop.f32.mrf.mxu3  ;;  %v6981_v34 = vadd.f32 %v6980_v25, %v6912_v9 }
 0x359   : > { %v7116_v36 = vadd.f32 %v7115_v10, %v7047_v21 }
 0x35b   : > { %v7163_v47 = vmul.f32 %v12014_v62, %v7116_v36 }
 0x35d   : > { %v7049_v48 = vpop.f32.mrf.mxu2  ;;  %v6913_v30 = vpop.f32.mrf.mxu0  ;;  %v7191_v35 = vadd.f32 %v12028_v18, %v7163_v47 }
 0x35e   : > { %v6982_v44 = vpop.f32.mrf.mxu1  ;;  %v7050_v19 = vadd.f32 %v7049_v48, %v6981_v34  ;;  %v6914_v14 = vadd.f32 %v6913_v30, %v11772_v55 }
 0x35f   : > { %v7215_v39 = vmax.f32 %v7191_v35, 0.0 }
 0x360   : > { %v7118_v50 = vpop.f32.mrf.mxu3  ;;  %v6983_v60 = vadd.f32 %v6982_v44, %v6914_v14 }
 0x361   : > { %v9374_v51 = vpack.c.bf16 %v7215_v39, %v7214_v57  ;;  %v7119_v49 = vadd.f32 %v7118_v50, %v7050_v19 }
 0x363   : > { %9410 = vst [vmem:[%s12040_s24 + $0x28] sm:$0xff] %v9374_v51   ;;  %v7164_v43 = vmul.f32 %v12014_v62, %v7119_v49 }
 0x365   : > { %v7051_v20 = vpop.f32.mrf.mxu2  ;;  %v6916_v4 = vpop.f32.mrf.mxu0  ;;  %v7192_v54 = vadd.f32 %v12028_v18, %v7164_v43 }
 0x366   : > { %v6985_v58 = vpop.f32.mrf.mxu1  ;;  %v7052_v0 = vadd.f32 %v7051_v20, %v6983_v60  ;;  %v6917_v8 = vadd.f32 %v6916_v4, %v11791_v42 }
 0x367   : > { %v7216_v6 = vmax.f32 %v7192_v54, 0.0 }
 0x368   : > { %v7120_v16 = vpop.f32.mrf.mxu3  ;;  %v6986_v17 = vadd.f32 %v6985_v58, %v6917_v8 }
 0x369   : > { %v7121_v33 = vadd.f32 %v7120_v16, %v7052_v0 }
 0x36b   : > { %v7165_v55 = vmul.f32 %v12014_v62, %v7121_v33 }
 0x36d   : > { %v7054_v2 = vpop.f32.mrf.mxu2  ;;  %v6918_v3 = vpop.f32.mrf.mxu0  ;;  %v7193_v59 = vadd.f32 %v12028_v18, %v7165_v55 }
 0x36e   : > { %v6987_v24 = vpop.f32.mrf.mxu1  ;;  %v7055_v46 = vadd.f32 %v7054_v2, %v6986_v17  ;;  %v6919_v29 = vadd.f32 %v6918_v3, %v11810_v61 }
 0x36f   : > { %v7217_v41 = vmax.f32 %v7193_v59, 0.0 }
 0x370   : > { %v7123_v28 = vpop.f32.mrf.mxu3  ;;  %v6988_v42 = vadd.f32 %v6987_v24, %v6919_v29 }
 0x371   : > { %v9379_v37 = vpack.c.bf16 %v7217_v41, %v7216_v6  ;;  %v7124_v26 = vadd.f32 %v7123_v28, %v7055_v46 }
 0x373   : > { %9411 = vst [vmem:[%s12040_s24 + $0x30] sm:$0xff] %v9379_v37   ;;  %v7166_v38 = vmul.f32 %v12014_v62, %v7124_v26 }
 0x375   : > { %v7056_v53 = vpop.f32.mrf.mxu2  ;;  %v6921_v5 = vpop.f32.mrf.mxu0  ;;  %v7194_v7 = vadd.f32 %v12028_v18, %v7166_v38 }
 0x376   : > { %v6990_v52 = vpop.f32.mrf.mxu1  ;;  %v7057_v13 = vadd.f32 %v7056_v53, %v6988_v42  ;;  %v6922_v12 = vadd.f32 %v6921_v5, %v11840_v45 }
 0x377   : > { %v7218_v9 = vmax.f32 %v7194_v7, 0.0 }
 0x378   : > { %v7125_v31 = vpop.f32.mrf.mxu3  ;;  %v6991_v36 = vadd.f32 %v6990_v52, %v6922_v12 }
 0x379   : > { %v7126_v27 = vadd.f32 %v7125_v31, %v7057_v13 }
 0x37b   : > { %v7167_v61 = vmul.f32 %v12014_v62, %v7126_v27 }
 0x37d   : > { %v7059_v25 = vpop.f32.mrf.mxu2  ;;  %v6923_v21 = vpop.f32.mrf.mxu0  ;;  %v7195_v10 = vadd.f32 %v12028_v18, %v7167_v61 }
 0x37e   : > { %v6992_v63 = vpop.f32.mrf.mxu1  ;;  %v7060_v47 = vadd.f32 %v7059_v25, %v6991_v36  ;;  %v6924_v48 = vadd.f32 %v6923_v21, %v11863_v32 }
 0x37f   : > { %v7219_v1 = vmax.f32 %v7195_v10, 0.0 }
 0x380   : > { %v7128_v30 = vpop.f32.mrf.mxu3  ;;  %v6993_v45 = vadd.f32 %v6992_v63, %v6924_v48 }
 0x381   : > { %v9384_v44 = vpack.c.bf16 %v7219_v1, %v7218_v9  ;;  %v7129_v35 = vadd.f32 %v7128_v30, %v7060_v47 }
 0x383   : > { %9412 = vst [vmem:[%s12040_s24 + $0x38] sm:$0xff] %v9384_v44   ;;  %v7168_v14 = vmul.f32 %v12014_v62, %v7129_v35 }
 0x385   : > { %v7061_v34 = vpop.f32.mrf.mxu2  ;;  %v6926_v57 = vpop.f32.mrf.mxu0  ;;  %v7196_v60 = vadd.f32 %v12028_v18, %v7168_v14 }
 0x386   : > { %v6995_v39 = vpop.f32.mrf.mxu1  ;;  %v7062_v19 = vadd.f32 %v7061_v34, %v6993_v45  ;;  %v6927_v49 = vadd.f32 %v6926_v57, %v11881_v56 }
 0x387   : > { %v7220_v16 = vmax.f32 %v7196_v60, 0.0 }
 0x388   : > { %v7130_v50 = vpop.f32.mrf.mxu3  ;;  %v6996_v43 = vadd.f32 %v6995_v39, %v6927_v49 }
 0x389   : > { %v7131_v51 = vadd.f32 %v7130_v50, %v7062_v19 }
 0x38b   : > { %v7169_v32 = vmul.f32 %v12014_v62, %v7131_v51 }
 0x38d   : > { %v7064_v20 = vpop.f32.mrf.mxu2  ;;  %v6928_v4 = vpop.f32.mrf.mxu0  ;;  %v7197_v0 = vadd.f32 %v12028_v18, %v7169_v32 }
 0x38e   : > { %v6997_v58 = vpop.f32.mrf.mxu1  ;;  %v7065_v8 = vadd.f32 %v7064_v20, %v6996_v43  ;;  %v6929_v54 = vadd.f32 %v6928_v4, %v11897_v22 }
 0x38f   : > { %v7221_v33 = vmax.f32 %v7197_v0, 0.0 }
 0x390   : > { %v7133_v55 = vpop.f32.mrf.mxu3  ;;  %v6998_v56 = vadd.f32 %v6997_v58, %v6929_v54 }
 0x391   : > { %v9389_v2 = vpack.c.bf16 %v7221_v33, %v7220_v16  ;;  %v7134_v3 = vadd.f32 %v7133_v55, %v7065_v8 }
 0x393   : > { %9413 = vst [vmem:[%s12040_s24 + $0x40] sm:$0xff] %v9389_v2   ;;  %v7170_v41 = vmul.f32 %v12014_v62, %v7134_v3 }
 0x395   : > { %v7066_v24 = vpop.f32.mrf.mxu2  ;;  %v6931_v59 = vpop.f32.mrf.mxu0  ;;  %v7198_v37 = vadd.f32 %v12028_v18, %v7170_v41 }
 0x396   : > { %v7000_v17 = vpop.f32.mrf.mxu1  ;;  %v7067_v6 = vadd.f32 %v7066_v24, %v6998_v56  ;;  %v6932_v28 = vadd.f32 %v6931_v59, %v11918_v40 }
 0x397   : > { %v7222_v13 = vmax.f32 %v7198_v37, 0.0 }
 0x398   : > { %v7135_v46 = vpop.f32.mrf.mxu3  ;;  %v7001_v5 = vadd.f32 %v7000_v17, %v6932_v28 }
 0x399   : > { %v7136_v29 = vadd.f32 %v7135_v46, %v7067_v6 }
 0x39b   : > { %v7171_v22 = vmul.f32 %v12014_v62, %v7136_v29 }
 0x39d   : > { %v7069_v26 = vpop.f32.mrf.mxu2  ;;  %v6933_v42 = vpop.f32.mrf.mxu0  ;;  %v7199_v53 = vadd.f32 %v12028_v18, %v7171_v22 }
 0x39e   : > { %v7002_v52 = vpop.f32.mrf.mxu1  ;;  %v7070_v31 = vadd.f32 %v7069_v26, %v7001_v5  ;;  %v6934_v27 = vadd.f32 %v6933_v42, %v11938_v15 }
 0x39f   : > { %v7223_v38 = vmax.f32 %v7199_v53, 0.0 }
 0x3a0   : > { %v7138_v12 = vpop.f32.mrf.mxu3  ;;  %v7003_v40 = vadd.f32 %v7002_v52, %v6934_v27 }
 0x3a1   : > { %v9394_v7 = vpack.c.bf16 %v7223_v38, %v7222_v13  ;;  %v7139_v61 = vadd.f32 %v7138_v12, %v7070_v31 }
 0x3a3   : > { %9414 = vst [vmem:[%s12040_s24 + $0x48] sm:$0xff] %v9394_v7   ;;  %v7172_v10 = vmul.f32 %v12014_v62, %v7139_v61 }
 0x3a5   : > { %v7071_v25 = vpop.f32.mrf.mxu2  ;;  %v6936_v21 = vpop.f32.mrf.mxu0  ;;  %v7200_v15 = vadd.f32 %v12028_v18, %v7172_v10 }
 0x3a6   : > { %v7072_v63 = vadd.f32 %v7071_v25, %v7003_v40  ;;  %v7005_v9 = vpop.f32.mrf.mxu1  ;;  %v6937_v47 = vadd.f32 %v6936_v21, %v11962_v23 }
 0x3a7   : > { %v7224_v34 = vmax.f32 %v7200_v15, 0.0 }
 0x3a8   : > { %v7140_v36 = vpop.f32.mrf.mxu3  ;;  %v7006_v45 = vadd.f32 %v7005_v9, %v6937_v47 }
 0x3a9   : > { %v7141_v1 = vadd.f32 %v7140_v36, %v7072_v63 }
 0x3ab   : > { %v7173_v48 = vmul.f32 %v12014_v62, %v7141_v1 }
 0x3ad   : > { %v7074_v30 = vpop.f32.mrf.mxu2  ;;  %v6938_v44 = vpop.f32.mrf.mxu0  ;;  %v7201_v35 = vadd.f32 %v12028_v18, %v7173_v48 }
 0x3ae   : > { %v7075_v39 = vadd.f32 %v7074_v30, %v7006_v45  ;;  %v6939_v19 = vadd.f32 %v6938_v44, %v11985_v11  ;;  %v7007_v23 = vpop.f32.mrf.mxu1 }
 0x3af   : > { %v7225_v57 = vmax.f32 %v7201_v35, 0.0 }
 0x3b0   : > { %v7143_v14 = vpop.f32.mrf.mxu3  ;;  %v7008_v49 = vadd.f32 %v7007_v23, %v6939_v19 }
 0x3b1   : > { %v9399_v50 = vpack.c.bf16 %v7225_v57, %v7224_v34  ;;  %v7144_v51 = vadd.f32 %v7143_v14, %v7075_v39 }
 0x3b3   : > { %9415 = vst [vmem:[%s12040_s24 + $0x50] sm:$0xff] %v9399_v50   ;;  %v7174_v20 = vmul.f32 %v12014_v62, %v7144_v51 }
 0x3b5   : > { %v7076_v60 = vpop.f32.mrf.mxu2  ;;  %v7202_v11 = vadd.f32 %v12028_v18, %v7174_v20 }
 0x3b6   : > { %v7077_v32 = vadd.f32 %v7076_v60, %v7008_v49 }
 0x3b7   : > { %v7226_v16 = vmax.f32 %v7202_v11, 0.0 }
 0x3b8   : > { %v7145_v4 = vpop.f32.mrf.mxu3 }
 0x3b9   : > { %v7146_v58 = vadd.f32 %v7145_v4, %v7077_v32 }
 0x3bb   : > { %v7175_v0 = vmul.f32 %v12014_v62, %v7146_v58 }
 0x3bd   : > { %v7203_v43 = vadd.f32 %v12028_v18, %v7175_v0 }
 0x3bf   : > { %v7227_v33 = vmax.f32 %v7203_v43, 0.0 }
 0x3c1   : > { %v9404_v8 = vpack.c.bf16 %v7227_v33, %v7226_v16 }
 0x3c3   : > { %9416 = vst [vmem:[%s12040_s24 + $0x58] sm:$0xff] %v9404_v8  }
 0x3c4   : > { %9523 = shalt.err (!%p9520_p6)
}
 0x3c5   : > { %s9592_s23 = smov 64   ;;  %s9593_s24 = smov 4  }
 0x3c6   : > { %9421 = dma.vmem_to_hbm [thread:$0]  (%p9670_p3), %s7293_s8, 1536, %s7295_s9, %s7277_s10, %s9592_s23, %s9592_s23, %s9593_s24  }
 0x3c7 PF: > { %p9427_p7 = scmp.ge.s32.totalorder %s9590_s22, 2  ;;  %s7309_s30 = sand.u32 1, %s9562_s15  }
 0x3c8   : > { %s7310_s18 = scalar_lea.sflag [#allocation4], %s7309_s30 }
 0x3c9   : > { %p9424_p9 = pnand %p9427_p7, %p9679_p8 }
 0x3cb   : > { %p9425_p10 = pneg %p9424_p9 }
 0x3cd   : > { %9557 = dma.done.wait (%p9425_p10), %s7310_s18, 1536  }
 0x3ce   : > { %9559 = vsyncadd (%p9425_p10), %s7310_s18, 4294965760  ;;  %s17_s22 = sadd.s32 1, %s9590_s22   ;;  %s12179_s28 = sld [smem:[#allocation6_spill]] }
 0x3cf   : > { %p14_p11 = scmp.ge.s32.totalorder %s17_s22, 26   ;;  %s12180_s15 = smov %s9566_s16 }
 0x3d0   : > { %s12181_s16 = smov %s9570_s17  ;;  %s12182_s17 = smov %s9688_s7 }
 0x3d1   : > { %s12183_s18 = smov %s9582_s20  ;;  %s12184_s19 = smov %s9586_s21 }
 0x3d2   : > { %s12185_s20 = smov %s12188_s25  ;;  %16 = sbr.rel (!%p14_p11) target bundleno = 5 (0x5), region = 75 }
 0x3d4   : > { %s12186_s21 = smov %s12179_s28 }
 0x3d7   :  { %7316 = vsyncpa [#allocation4], 1 }
 0x3d8   :  { %7318 = vsyncpa [#allocation4 + $0x1], 1 }

</bundles_post_ra>
